<compile_context>
chip_gen: v6e
topology: v6e:2x2x1
jax: 0.10.0
libtpu: 0.0.40
codegen_flags: <defaults>
</compile_context>

<pallas_src>
import functools

import jax
import jax.numpy as jnp
from jax.experimental import pallas as pl
from jax.experimental.pallas import tpu as pltpu


# ----------------------------------------------------------------------------
# Fused Conv2d (stride 1, SAME) + bias + activation, single stacked-K matmul
# ----------------------------------------------------------------------------
def _conv_kernel(x_ref, w_ref, b_ref, o_ref, slab_ref, *,
                 kh, kw, wp, lout, cp, act, alpha):
    # Build the stacked contraction slab in VMEM: block t = di*kw+dj holds the
    # tap window at static offset di*Wp+dj.  Pure ld/st copies (no VALU work);
    # sublane offsets t*cp are multiples of 16, so bf16 stores stay aligned.
    for di in range(kh):
        for dj in range(kw):
            t = di * kw + dj
            s = di * wp + dj
            slab_ref[t * cp:(t + 1) * cp, :] = x_ref[:, s:s + lout]
    # Single MXU matmul, K = kh*kw*Cp; cross-tap reduction stays in the MXU.
    y = jnp.dot(w_ref[...], slab_ref[...], preferred_element_type=jnp.float32)
    y = y + b_ref[...]                                  # fused bias (Cout, 1)
    # Activation in f32 (v5e has no bf16 VPU/EUP); cast only at the store.
    if act == "prelu":
        y = jnp.maximum(y, 0.0) + alpha * jnp.minimum(y, 0.0)
    elif act == "lrelu":
        y = jnp.where(y > 0, y, alpha * y)
    elif act == "relu":
        y = jnp.maximum(y, 0.0)
    elif act == "tanh":
        y = jnp.tanh(y)
    o_ref[...] = y.astype(o_ref.dtype)                  # lane-dense (Cout, Lout)


def conv2d_same(x, w, b, *, act="linear", alpha=0.25, kh=3, kw=3,
                out_dtype=jnp.bfloat16):
    """x: (N,Cin,H,W); w: (Cout,kh,kw,Cin) f32; b: (Cout,) f32."""
    N, Cin, H, W = x.shape
    Cout = b.shape[0]
    ph, pw = kh // 2, kw // 2
    Wp = W + 2 * pw
    Cp = ((Cin + 15) // 16) * 16            # bf16 sublane-packing alignment
    halo = 2 * ph * Wp + 2 * pw

    # Zero-pad spatially and flatten.  With the padded-width output layout
    # every tap is a contiguous window at offset di*Wp+dj -> no wrap masks.
    xp = jnp.pad(x, ((0, 0), (0, 0), (ph, ph), (pw, pw)))
    xf = xp.reshape(N, Cin, (H + 2 * ph) * Wp)
    xf = jnp.pad(xf, ((0, 0), (0, 0), (0, 2 * pw)))      # (N, Cin, S)
    S = xf.shape[-1]                                     # per-image slot

    batch_merged = (H * Wp) < 128
    if batch_merged:
        # Tiny layer: lay the whole batch along the lane axis -> one grid
        # step, lane-dense output (last dim N*S >= 128, no masked stores).
        xf = xf.transpose(1, 0, 2).reshape(1, Cin, N * S)
        lout = N * S
    else:
        lout = H * Wp
    lin = lout + halo
    xf = jnp.pad(xf, ((0, 0), (0, Cp - Cin), (0, lin - xf.shape[-1])))
    xf = xf.astype(jnp.bfloat16)
    G = xf.shape[0]

    # Weights: contraction dim last, K index = (di*kw+dj)*Cp + c.
    wk = jnp.pad(w, ((0, 0), (0, 0), (0, 0), (0, Cp - Cin)))
    wk = wk.reshape(Cout, kh * kw * Cp).astype(jnp.bfloat16)
    bb = b.reshape(Cout, 1).astype(jnp.float32)

    kernel = functools.partial(_conv_kernel, kh=kh, kw=kw, wp=Wp, lout=lout,
                               cp=Cp, act=act, alpha=alpha)
    out = pl.pallas_call(
        kernel,
        out_shape=jax.ShapeDtypeStruct((G, Cout, lout), out_dtype),
        grid=(G,),
        in_specs=[
            pl.BlockSpec((None, Cp, lin), lambda n: (n, 0, 0)),
            pl.BlockSpec((Cout, kh * kw * Cp), lambda n: (0, 0)),
            pl.BlockSpec((Cout, 1), lambda n: (0, 0)),
        ],
        out_specs=pl.BlockSpec((None, Cout, lout), lambda n: (n, 0, 0)),
        scratch_shapes=[pltpu.VMEM((kh * kw * Cp, lout), jnp.bfloat16)],
        compiler_params=pltpu.CompilerParams(
            dimension_semantics=("parallel",),
            vmem_limit_bytes=32 * 1024 * 1024),
    )(xf, wk, bb)

    # Drop the 2*pw junk columns per row (padded-width layout) in XLA.
    if batch_merged:
        out = out.reshape(Cout, N, S)[:, :, :H * Wp]
        out = out.reshape(Cout, N, H, Wp)[..., :W].transpose(1, 0, 2, 3)
    else:
        out = out.reshape(N, Cout, H, Wp)[..., :W]
    return out


# ----------------------------------------------------------------------------
# Discriminator head: (N, D) . (D,) as a VPU multiply + reduce (no MXU)
# ----------------------------------------------------------------------------
def _fc_kernel(x_ref, w_ref, b_ref, o_ref):
    prod = x_ref[...] * w_ref[...]                           # (N, D) VPU
    o_ref[...] = jnp.sum(prod, axis=-1, keepdims=True) + b_ref[0, 0]


def linear_vpu(x, w, b):
    """x: (N, D) f32, w: (D,) f32, b: (1,) f32 -> (N, 1) f32 logits."""
    N, D = x.shape
    return pl.pallas_call(
        _fc_kernel,
        out_shape=jax.ShapeDtypeStruct((N, 1), jnp.float32),
        in_specs=[
            pl.BlockSpec(memory_space=pltpu.MemorySpace.VMEM),
            pl.BlockSpec(memory_space=pltpu.MemorySpace.VMEM),
            pl.BlockSpec(memory_space=pltpu.MemorySpace.SMEM),
        ],
        out_specs=pl.BlockSpec(memory_space=pltpu.MemorySpace.VMEM),
    )(x, w.reshape(1, D), b.reshape(1, 1))


# ----------------------------------------------------------------------------
# SRGAN loss: adaptive-grid MSE reduction + fused BCE-with-logits epilogue
# ----------------------------------------------------------------------------
def _loss_kernel(hr_r_ref, hr_f_ref, ft_r_ref, ft_f_ref, pf_ref, pr_ref,
                 g_ref, d_ref, acc_ref, *, inv_img, inv_vgg, inv_pred):
    i = pl.program_id(0)

    @pl.when(i == 0)
    def _():
        acc_ref[...] = jnp.zeros_like(acc_ref)

    dh = hr_r_ref[...] - hr_f_ref[...]
    df = ft_r_ref[...] - ft_f_ref[...]
    # Per-lane partial sums on the VPU; cross-lane reduce only in the epilogue.
    acc_ref[0:1, :] += jnp.sum(dh * dh, axis=0, keepdims=True)
    acc_ref[1:2, :] += jnp.sum(df * df, axis=0, keepdims=True)

    @pl.when(i == pl.num_programs(0) - 1)
    def _():
        def bce_sum(x, t):
            # stable BCE-with-logits: max(x,0) - x*t + log1p(exp(-|x|))
            return jnp.sum(jnp.maximum(x, 0.0) - x * t
                           + jnp.log1p(jnp.exp(-jnp.abs(x))))
        # Reference convention: adv_loss(x, is_real) uses target = 0 if
        # is_real else 1 ("torch.zeros_like if is_real else ones_like"), so
        # both the g and d fake-pred terms use target=1 and coincide
        # (detach only affects gradients; forward values are identical).
        adv_fake = bce_sum(pf_ref[...], 1.0) * inv_pred   # is_real=False
        adv_real = bce_sum(pr_ref[...], 0.0) * inv_pred   # is_real=True
        img_l = jnp.sum(acc_ref[0:1, :]) * inv_img
        vgg_l = jnp.sum(acc_ref[1:2, :]) * inv_vgg
        g_ref[0, 0] = 0.001 * adv_fake + 0.006 * vgg_l + img_l
        d_ref[0, 0] = 0.5 * (adv_real + adv_fake)


def _flatten_pad_rows(x, n_blocks):
    """Flatten to (rows, 128) f32, rows padded to a multiple of 8*n_blocks."""
    v = x.reshape(-1).astype(jnp.float32)
    rows = pl.cdiv(v.shape[0], 128)
    rows_p = pl.cdiv(rows, 8 * n_blocks) * 8 * n_blocks
    v = jnp.pad(v, (0, rows_p * 128 - v.shape[0]))    # zero pad: diff == 0
    return v.reshape(rows_p, 128)


def srgan_loss(hr_real, hr_fake, feat_real, feat_fake, pred_fake, pred_real):
    rows_hr = pl.cdiv(hr_real.size, 128)
    rows_ft = pl.cdiv(feat_real.size, 128)
    # Adaptive grid: a single step at demo size; ~2048-row blocks otherwise.
    n_blocks = max(1, pl.cdiv(max(rows_hr, rows_ft), 2048))

    hr_r = _flatten_pad_rows(hr_real, n_blocks)
    hr_f = _flatten_pad_rows(hr_fake, n_blocks)
    ft_r = _flatten_pad_rows(feat_real, n_blocks)
    ft_f = _flatten_pad_rows(feat_fake, n_blocks)
    pf = pred_fake.reshape(-1, 1).astype(jnp.float32)
    pr = pred_real.reshape(-1, 1).astype(jnp.float32)
    bh = hr_r.shape[0] // n_blocks
    bf = ft_r.shape[0] // n_blocks
    Np = pf.shape[0]

    kernel = functools.partial(
        _loss_kernel,
        inv_img=1.0 / hr_real.size, inv_vgg=1.0 / feat_real.size,
        inv_pred=1.0 / pred_fake.size)
    g_loss, d_loss = pl.pallas_call(
        kernel,
        out_shape=(jax.ShapeDtypeStruct((1, 1), jnp.float32),
                   jax.ShapeDtypeStruct((1, 1), jnp.float32)),
        grid=(n_blocks,),
        in_specs=[
            pl.BlockSpec((bh, 128), lambda i: (i, 0)),
            pl.BlockSpec((bh, 128), lambda i: (i, 0)),
            pl.BlockSpec((bf, 128), lambda i: (i, 0)),
            pl.BlockSpec((bf, 128), lambda i: (i, 0)),
            pl.BlockSpec((Np, 1), lambda i: (0, 0)),
            pl.BlockSpec((Np, 1), lambda i: (0, 0)),
        ],
        out_specs=(pl.BlockSpec((1, 1), lambda i: (0, 0),
                                memory_space=pltpu.MemorySpace.SMEM),
                   pl.BlockSpec((1, 1), lambda i: (0, 0),
                                memory_space=pltpu.MemorySpace.SMEM)),
        scratch_shapes=[pltpu.VMEM((2, 128), jnp.float32)],
        compiler_params=pltpu.CompilerParams(
            dimension_semantics=("arbitrary",),
            vmem_limit_bytes=32 * 1024 * 1024),
    )(hr_r, hr_f, ft_r, ft_f, pf, pr)
    return g_loss[0, 0], d_loss[0, 0]


# ----------------------------------------------------------------------------
# Synthetic (deterministically initialized) generator / discriminator / "VGG"
# ----------------------------------------------------------------------------
BASE_CH = 8          # base_channels (64 in the paper; shrunk for the demo)
N_RES = 2            # n_res_blocks (16 in the paper; shrunk for the demo)
N_PS = 2             # n_ps_blocks -> total 4x upscale
VGG_CH = 16
KSZ = 3


def _conv_params(key, cin, cout, k=KSZ, scale=0.05):
    kw_, kb_ = jax.random.split(key)
    w = jax.random.normal(kw_, (cout, k, k, cin), jnp.float32) * scale
    b = jax.random.normal(kb_, (cout,), jnp.float32) * 0.01
    return w, b


def init_params(key):
    keys = iter(jax.random.split(key, 64))
    p = {}
    p['g_in'] = _conv_params(next(keys), 3, BASE_CH)
    for i in range(N_RES):
        p[f'g_res{i}_a'] = _conv_params(next(keys), BASE_CH, BASE_CH)
        p[f'g_res{i}_b'] = _conv_params(next(keys), BASE_CH, BASE_CH)
    p['g_res_out'] = _conv_params(next(keys), BASE_CH, BASE_CH)
    for i in range(N_PS):
        p[f'g_ps{i}'] = _conv_params(next(keys), BASE_CH, 4 * BASE_CH)
    p['g_out'] = _conv_params(next(keys), BASE_CH, 3)
    p['d_conv'] = _conv_params(next(keys), 3, BASE_CH)
    kfc, kfb = jax.random.split(next(keys))
    p['d_fc_w'] = jax.random.normal(kfc, (BASE_CH * 32 * 32,),
                                    jnp.float32) * 0.01
    p['d_fc_b'] = jax.random.normal(kfb, (1,), jnp.float32) * 0.01
    p['v1'] = _conv_params(next(keys), 3, VGG_CH)
    p['v2'] = _conv_params(next(keys), VGG_CH, VGG_CH)
    return p


def pixel_shuffle(x, r):
    """NCHW pixel shuffle: (N, C*r*r, H, W) -> (N, C, H*r, W*r)."""
    N, C, H, W = x.shape
    Co = C // (r * r)
    x = x.reshape(N, Co, r, r, H, W)
    x = x.transpose(0, 1, 4, 2, 5, 3)
    return x.reshape(N, Co, H * r, W * r)


def generator_forward(p, lr):
    # Intermediate activations are bf16 (conv epilogue casts at the store).
    x_res = conv2d_same(lr, *p['g_in'], act='prelu')            # in_layer
    h = x_res
    for i in range(N_RES):                                      # residual blocks
        r = conv2d_same(h, *p[f'g_res{i}_a'], act='prelu')
        r = conv2d_same(r, *p[f'g_res{i}_b'], act='linear')     # BN(eval)=id
        h = h + r
    h = conv2d_same(h, *p['g_res_out'], act='linear')           # trailing conv
    x = x_res + h                                               # long skip
    for i in range(N_PS):
        # PReLU with a single shared alpha commutes with PixelShuffle (a pure
        # permutation), so it is fused into the conv epilogue; values are
        # identical to conv -> PS -> PReLU.
        x = conv2d_same(x, *p[f'g_ps{i}'], act='prelu')
        x = pixel_shuffle(x, 2)
    x = conv2d_same(x, *p['g_out'], act='tanh',
                    out_dtype=jnp.float32)                      # out_layer+tanh
    return x


def discriminator_forward(p, x):
    h = conv2d_same(x, *p['d_conv'], act='lrelu', alpha=0.2,
                    out_dtype=jnp.float32)
    flat = h.reshape(x.shape[0], -1)
    return linear_vpu(flat, p['d_fc_w'], p['d_fc_b'])           # (N, 1) logits


def vgg_features(p, x):
    h = conv2d_same(x, *p['v1'], act='relu')
    h = conv2d_same(h, *p['v2'], act='relu', out_dtype=jnp.float32)
    return h


# ----------------------------------------------------------------------------
# Loss.forward(generator, discriminator, hr_real, lr_real)
# ----------------------------------------------------------------------------
@jax.jit
def loss_forward(params, hr_real, lr_real):
    hr_fake = generator_forward(params, lr_real)
    # .detach() only changes gradient flow; forward values are identical, so a
    # single discriminator pass on hr_fake serves both the g and d adv terms.
    fake_preds = discriminator_forward(params, hr_fake)
    real_preds = discriminator_forward(params, hr_real)
    feat_real = vgg_features(params, hr_real)
    feat_fake = vgg_features(params, hr_fake)
    g_loss, d_loss = srgan_loss(hr_real, hr_fake, feat_real, feat_fake,
                                fake_preds, real_preds)
    return g_loss, d_loss, hr_fake


if __name__ == "__main__":
    key = jax.random.PRNGKey(0)
    k_p, k_lr, k_hr = jax.random.split(key, 3)
    params = init_params(k_p)

    # lr_real: (2, 3, 8, 8) NCHW ; hr_real: (2, 3, 32, 32) NCHW (4x upscale)
    lr_real = jnp.tanh(jax.random.normal(k_lr, (2, 3, 8, 8), jnp.float32))
    hr_real = jnp.tanh(jax.random.normal(k_hr, (2, 3, 32, 32), jnp.float32))

    g_loss, d_loss, hr_fake = loss_forward(params, hr_real, lr_real)
    jax.block_until_ready((g_loss, d_loss, hr_fake))
    assert hr_fake.shape == hr_real.shape
    assert g_loss.shape == () and d_loss.shape == ()
    assert bool(jnp.isfinite(g_loss)) and bool(jnp.isfinite(d_loss))
    print("KERNEL_OK")
</pallas_src>

<mosaic_0001>
module attributes {stable_mosaic.version = 11 : i64} {
  func.func @_conv_kernel(%arg0: i32, %arg1: memref<1x16x226xbf16, #tpu.memory_space<vmem>>, %arg2: memref<8x144xbf16, #tpu.memory_space<vmem>>, %arg3: memref<8x1xf32, #tpu.memory_space<vmem>>, %arg4: memref<1x8x204xbf16, #tpu.memory_space<vmem>>, %arg5: memref<144x204xbf16, #tpu.memory_space<vmem>>) attributes {dimension_semantics = [#tpu.dimension_semantics<parallel>], iteration_bounds = array<i64: 1>, scalar_prefetch = 0 : i64, scratch_operands = 1 : i64, tpu.core_type = #tpu.core_type<tc>, window_params = [{transform_indices = @transform_0, window_bounds = array<i64: 1, 16, 226>}, {pipeline_mode = #tpu.pipeline_mode<synchronous>, transform_indices = @transform_1, window_bounds = array<i64: 8, 144>}, {pipeline_mode = #tpu.pipeline_mode<synchronous>, transform_indices = @transform_2, window_bounds = array<i64: 8, 1>}, {transform_indices = @transform_3, window_bounds = array<i64: 1, 8, 204>}]} {
    %c0 = arith.constant 0 : index
    %c0_0 = arith.constant 0 : index
    %c0_1 = arith.constant 0 : index
    %0 = vector.load %arg1[%c0, %c0_0, %c0_1] : memref<1x16x226xbf16, #tpu.memory_space<vmem>>, vector<1x16x204xbf16>
    %1 = vector.shape_cast %0 : vector<1x16x204xbf16> to vector<16x204xbf16>
    %c0_2 = arith.constant 0 : index
    %c0_3 = arith.constant 0 : index
    %2 = vector.load %arg5[%c0_2, %c0_3] : memref<144x204xbf16, #tpu.memory_space<vmem>>, vector<16x204xbf16>
    tpu.vector_store %arg5[%c0_2, %c0_3], %1 {strides = array<i32>} : memref<144x204xbf16, #tpu.memory_space<vmem>>, vector<16x204xbf16>,
    %c0_4 = arith.constant 0 : index
    %c0_5 = arith.constant 0 : index
    %c1 = arith.constant 1 : index
    %3 = vector.load %arg1[%c0_4, %c0_5, %c1] : memref<1x16x226xbf16, #tpu.memory_space<vmem>>, vector<1x16x204xbf16>
    %4 = vector.shape_cast %3 : vector<1x16x204xbf16> to vector<16x204xbf16>
    %c16 = arith.constant 16 : index
    %c0_6 = arith.constant 0 : index
    %5 = vector.load %arg5[%c16, %c0_6] : memref<144x204xbf16, #tpu.memory_space<vmem>>, vector<16x204xbf16>
    tpu.vector_store %arg5[%c16, %c0_6], %4 {strides = array<i32>} : memref<144x204xbf16, #tpu.memory_space<vmem>>, vector<16x204xbf16>,
    %c0_7 = arith.constant 0 : index
    %c0_8 = arith.constant 0 : index
    %c2 = arith.constant 2 : index
    %6 = vector.load %arg1[%c0_7, %c0_8, %c2] : memref<1x16x226xbf16, #tpu.memory_space<vmem>>, vector<1x16x204xbf16>
    %7 = vector.shape_cast %6 : vector<1x16x204xbf16> to vector<16x204xbf16>
    %c32 = arith.constant 32 : index
    %c0_9 = arith.constant 0 : index
    %8 = vector.load %arg5[%c32, %c0_9] : memref<144x204xbf16, #tpu.memory_space<vmem>>, vector<16x204xbf16>
    tpu.vector_store %arg5[%c32, %c0_9], %7 {strides = array<i32>} : memref<144x204xbf16, #tpu.memory_space<vmem>>, vector<16x204xbf16>,
    %c0_10 = arith.constant 0 : index
    %c0_11 = arith.constant 0 : index
    %c10 = arith.constant 10 : index
    %9 = vector.load %arg1[%c0_10, %c0_11, %c10] : memref<1x16x226xbf16, #tpu.memory_space<vmem>>, vector<1x16x204xbf16>
    %10 = vector.shape_cast %9 : vector<1x16x204xbf16> to vector<16x204xbf16>
    %c48 = arith.constant 48 : index
    %c0_12 = arith.constant 0 : index
    %11 = vector.load %arg5[%c48, %c0_12] : memref<144x204xbf16, #tpu.memory_space<vmem>>, vector<16x204xbf16>
    tpu.vector_store %arg5[%c48, %c0_12], %10 {strides = array<i32>} : memref<144x204xbf16, #tpu.memory_space<vmem>>, vector<16x204xbf16>,
    %c0_13 = arith.constant 0 : index
    %c0_14 = arith.constant 0 : index
    %c11 = arith.constant 11 : index
    %12 = vector.load %arg1[%c0_13, %c0_14, %c11] : memref<1x16x226xbf16, #tpu.memory_space<vmem>>, vector<1x16x204xbf16>
    %13 = vector.shape_cast %12 : vector<1x16x204xbf16> to vector<16x204xbf16>
    %c64 = arith.constant 64 : index
    %c0_15 = arith.constant 0 : index
    %14 = vector.load %arg5[%c64, %c0_15] : memref<144x204xbf16, #tpu.memory_space<vmem>>, vector<16x204xbf16>
    tpu.vector_store %arg5[%c64, %c0_15], %13 {strides = array<i32>} : memref<144x204xbf16, #tpu.memory_space<vmem>>, vector<16x204xbf16>,
    %c0_16 = arith.constant 0 : index
    %c0_17 = arith.constant 0 : index
    %c12 = arith.constant 12 : index
    %15 = vector.load %arg1[%c0_16, %c0_17, %c12] : memref<1x16x226xbf16, #tpu.memory_space<vmem>>, vector<1x16x204xbf16>
    %16 = vector.shape_cast %15 : vector<1x16x204xbf16> to vector<16x204xbf16>
    %c80 = arith.constant 80 : index
    %c0_18 = arith.constant 0 : index
    %17 = vector.load %arg5[%c80, %c0_18] : memref<144x204xbf16, #tpu.memory_space<vmem>>, vector<16x204xbf16>
    tpu.vector_store %arg5[%c80, %c0_18], %16 {strides = array<i32>} : memref<144x204xbf16, #tpu.memory_space<vmem>>, vector<16x204xbf16>,
    %c0_19 = arith.constant 0 : index
    %c0_20 = arith.constant 0 : index
    %c20 = arith.constant 20 : index
    %18 = vector.load %arg1[%c0_19, %c0_20, %c20] : memref<1x16x226xbf16, #tpu.memory_space<vmem>>, vector<1x16x204xbf16>
    %19 = vector.shape_cast %18 : vector<1x16x204xbf16> to vector<16x204xbf16>
    %c96 = arith.constant 96 : index
    %c0_21 = arith.constant 0 : index
    %20 = vector.load %arg5[%c96, %c0_21] : memref<144x204xbf16, #tpu.memory_space<vmem>>, vector<16x204xbf16>
    tpu.vector_store %arg5[%c96, %c0_21], %19 {strides = array<i32>} : memref<144x204xbf16, #tpu.memory_space<vmem>>, vector<16x204xbf16>,
    %c0_22 = arith.constant 0 : index
    %c0_23 = arith.constant 0 : index
    %c21 = arith.constant 21 : index
    %21 = vector.load %arg1[%c0_22, %c0_23, %c21] : memref<1x16x226xbf16, #tpu.memory_space<vmem>>, vector<1x16x204xbf16>
    %22 = vector.shape_cast %21 : vector<1x16x204xbf16> to vector<16x204xbf16>
    %c112 = arith.constant 112 : index
    %c0_24 = arith.constant 0 : index
    %23 = vector.load %arg5[%c112, %c0_24] : memref<144x204xbf16, #tpu.memory_space<vmem>>, vector<16x204xbf16>
    tpu.vector_store %arg5[%c112, %c0_24], %22 {strides = array<i32>} : memref<144x204xbf16, #tpu.memory_space<vmem>>, vector<16x204xbf16>,
    %c0_25 = arith.constant 0 : index
    %c0_26 = arith.constant 0 : index
    %c22 = arith.constant 22 : index
    %24 = vector.load %arg1[%c0_25, %c0_26, %c22] : memref<1x16x226xbf16, #tpu.memory_space<vmem>>, vector<1x16x204xbf16>
    %25 = vector.shape_cast %24 : vector<1x16x204xbf16> to vector<16x204xbf16>
    %c128 = arith.constant 128 : index
    %c0_27 = arith.constant 0 : index
    %26 = vector.load %arg5[%c128, %c0_27] : memref<144x204xbf16, #tpu.memory_space<vmem>>, vector<16x204xbf16>
    tpu.vector_store %arg5[%c128, %c0_27], %25 {strides = array<i32>} : memref<144x204xbf16, #tpu.memory_space<vmem>>, vector<16x204xbf16>,
    %c0_28 = arith.constant 0 : index
    %c0_29 = arith.constant 0 : index
    %27 = vector.load %arg2[%c0_28, %c0_29] : memref<8x144xbf16, #tpu.memory_space<vmem>>, vector<8x144xbf16>
    %c0_30 = arith.constant 0 : index
    %c0_31 = arith.constant 0 : index
    %28 = vector.load %arg5[%c0_30, %c0_31] : memref<144x204xbf16, #tpu.memory_space<vmem>>, vector<144x204xbf16>
    %cst = arith.constant dense<0.000000e+00> : vector<8x204xf32>
    %29 = tpu.matmul %27, %28, %cst {dimension_numbers = #tpu.dot_dimension_numbers<[1], [0], [0], [1], [0, 0, 1, 1], [], []>} : vector<8x144xbf16>, vector<144x204xbf16>, vector<8x204xf32> -> vector<8x204xf32>
    %c0_32 = arith.constant 0 : index
    %c0_33 = arith.constant 0 : index
    %30 = vector.load %arg3[%c0_32, %c0_33] : memref<8x1xf32, #tpu.memory_space<vmem>>, vector<8x1xf32>
    %31 = vector.broadcast %30 : vector<8x1xf32> to vector<8x204xf32>
    %32 = arith.addf %29, %31 : vector<8x204xf32>
    %cst_34 = arith.constant 0.000000e+00 : f32
    %33 = vector.broadcast %cst_34 : f32 to vector<8x204xf32>
    %34 = arith.maximumf %32, %33 : vector<8x204xf32>
    %cst_35 = arith.constant 0.000000e+00 : f32
    %35 = vector.broadcast %cst_35 : f32 to vector<8x204xf32>
    %36 = arith.minimumf %32, %35 : vector<8x204xf32>
    %cst_36 = arith.constant 2.500000e-01 : f32
    %37 = vector.broadcast %cst_36 : f32 to vector<8x204xf32>
    %38 = arith.mulf %37, %36 : vector<8x204xf32>
    %39 = arith.addf %34, %38 : vector<8x204xf32>
    %40 = arith.truncf %39 : vector<8x204xf32> to vector<8x204xbf16>
    %c0_37 = arith.constant 0 : index
    %c0_38 = arith.constant 0 : index
    %c0_39 = arith.constant 0 : index
    %41 = vector.load %arg4[%c0_37, %c0_38, %c0_39] : memref<1x8x204xbf16, #tpu.memory_space<vmem>>, vector<1x8x204xbf16>
    %42 = vector.shape_cast %41 : vector<1x8x204xbf16> to vector<8x204xbf16>
    %43 = vector.shape_cast %40 : vector<8x204xbf16> to vector<1x8x204xbf16>
    tpu.vector_store %arg4[%c0_37, %c0_38, %c0_39], %43 {strides = array<i32>} : memref<1x8x204xbf16, #tpu.memory_space<vmem>>, vector<1x8x204xbf16>,
    return
  }
  func.func @transform_0(%arg0: i32) -> (i32, i32, i32) {
    %c0_i32 = arith.constant 0 : i32
    %c0_i32_0 = arith.constant 0 : i32
    %c0_i32_1 = arith.constant 0 : i32
    return %arg0, %c0_i32, %c0_i32_0 : i32, i32, i32
  }
  func.func @transform_1(%arg0: i32) -> (i32, i32) {
    %c0_i32 = arith.constant 0 : i32
    %c0_i32_0 = arith.constant 0 : i32
    %c0_i32_1 = arith.constant 0 : i32
    return %c0_i32, %c0_i32_0 : i32, i32
  }
  func.func @transform_2(%arg0: i32) -> (i32, i32) {
    %c0_i32 = arith.constant 0 : i32
    %c0_i32_0 = arith.constant 0 : i32
    %c0_i32_1 = arith.constant 0 : i32
    return %c0_i32, %c0_i32_0 : i32, i32
  }
  func.func @transform_3(%arg0: i32) -> (i32, i32, i32) {
    %c0_i32 = arith.constant 0 : i32
    %c0_i32_0 = arith.constant 0 : i32
    %c0_i32_1 = arith.constant 0 : i32
    return %arg0, %c0_i32, %c0_i32_0 : i32, i32, i32
  }
}

module attributes {stable_mosaic.version = 11 : i64} {
  func.func @_conv_kernel(%arg0: i32, %arg1: memref<1x16x226xbf16, #tpu.memory_space<vmem>>, %arg2: memref<8x144xbf16, #tpu.memory_space<vmem>>, %arg3: memref<8x1xf32, #tpu.memory_space<vmem>>, %arg4: memref<1x8x204xbf16, #tpu.memory_space<vmem>>, %arg5: memref<144x204xbf16, #tpu.memory_space<vmem>>) attributes {dimension_semantics = [#tpu.dimension_semantics<parallel>], iteration_bounds = array<i64: 1>, scalar_prefetch = 0 : i64, scratch_operands = 1 : i64, tpu.core_type = #tpu.core_type<tc>, window_params = [{transform_indices = @transform_0, window_bounds = array<i64: 1, 16, 226>}, {pipeline_mode = #tpu.pipeline_mode<synchronous>, transform_indices = @transform_1, window_bounds = array<i64: 8, 144>}, {pipeline_mode = #tpu.pipeline_mode<synchronous>, transform_indices = @transform_2, window_bounds = array<i64: 8, 1>}, {transform_indices = @transform_3, window_bounds = array<i64: 1, 8, 204>}]} {
    %c0 = arith.constant 0 : index
    %c0_0 = arith.constant 0 : index
    %c0_1 = arith.constant 0 : index
    %0 = vector.load %arg1[%c0, %c0_0, %c0_1] : memref<1x16x226xbf16, #tpu.memory_space<vmem>>, vector<1x16x204xbf16>
    %1 = vector.shape_cast %0 : vector<1x16x204xbf16> to vector<16x204xbf16>
    %c0_2 = arith.constant 0 : index
    %c0_3 = arith.constant 0 : index
    %2 = vector.load %arg5[%c0_2, %c0_3] : memref<144x204xbf16, #tpu.memory_space<vmem>>, vector<16x204xbf16>
    tpu.vector_store %arg5[%c0_2, %c0_3], %1 {strides = array<i32>} : memref<144x204xbf16, #tpu.memory_space<vmem>>, vector<16x204xbf16>,
    %c0_4 = arith.constant 0 : index
    %c0_5 = arith.constant 0 : index
    %c1 = arith.constant 1 : index
    %3 = vector.load %arg1[%c0_4, %c0_5, %c1] : memref<1x16x226xbf16, #tpu.memory_space<vmem>>, vector<1x16x204xbf16>
    %4 = vector.shape_cast %3 : vector<1x16x204xbf16> to vector<16x204xbf16>
    %c16 = arith.constant 16 : index
    %c0_6 = arith.constant 0 : index
    %5 = vector.load %arg5[%c16, %c0_6] : memref<144x204xbf16, #tpu.memory_space<vmem>>, vector<16x204xbf16>
    tpu.vector_store %arg5[%c16, %c0_6], %4 {strides = array<i32>} : memref<144x204xbf16, #tpu.memory_space<vmem>>, vector<16x204xbf16>,
    %c0_7 = arith.constant 0 : index
    %c0_8 = arith.constant 0 : index
    %c2 = arith.constant 2 : index
    %6 = vector.load %arg1[%c0_7, %c0_8, %c2] : memref<1x16x226xbf16, #tpu.memory_space<vmem>>, vector<1x16x204xbf16>
    %7 = vector.shape_cast %6 : vector<1x16x204xbf16> to vector<16x204xbf16>
    %c32 = arith.constant 32 : index
    %c0_9 = arith.constant 0 : index
    %8 = vector.load %arg5[%c32, %c0_9] : memref<144x204xbf16, #tpu.memory_space<vmem>>, vector<16x204xbf16>
    tpu.vector_store %arg5[%c32, %c0_9], %7 {strides = array<i32>} : memref<144x204xbf16, #tpu.memory_space<vmem>>, vector<16x204xbf16>,
    %c0_10 = arith.constant 0 : index
    %c0_11 = arith.constant 0 : index
    %c10 = arith.constant 10 : index
    %9 = vector.load %arg1[%c0_10, %c0_11, %c10] : memref<1x16x226xbf16, #tpu.memory_space<vmem>>, vector<1x16x204xbf16>
    %10 = vector.shape_cast %9 : vector<1x16x204xbf16> to vector<16x204xbf16>
    %c48 = arith.constant 48 : index
    %c0_12 = arith.constant 0 : index
    %11 = vector.load %arg5[%c48, %c0_12] : memref<144x204xbf16, #tpu.memory_space<vmem>>, vector<16x204xbf16>
    tpu.vector_store %arg5[%c48, %c0_12], %10 {strides = array<i32>} : memref<144x204xbf16, #tpu.memory_space<vmem>>, vector<16x204xbf16>,
    %c0_13 = arith.constant 0 : index
    %c0_14 = arith.constant 0 : index
    %c11 = arith.constant 11 : index
    %12 = vector.load %arg1[%c0_13, %c0_14, %c11] : memref<1x16x226xbf16, #tpu.memory_space<vmem>>, vector<1x16x204xbf16>
    %13 = vector.shape_cast %12 : vector<1x16x204xbf16> to vector<16x204xbf16>
    %c64 = arith.constant 64 : index
    %c0_15 = arith.constant 0 : index
    %14 = vector.load %arg5[%c64, %c0_15] : memref<144x204xbf16, #tpu.memory_space<vmem>>, vector<16x204xbf16>
    tpu.vector_store %arg5[%c64, %c0_15], %13 {strides = array<i32>} : memref<144x204xbf16, #tpu.memory_space<vmem>>, vector<16x204xbf16>,
    %c0_16 = arith.constant 0 : index
    %c0_17 = arith.constant 0 : index
    %c12 = arith.constant 12 : index
    %15 = vector.load %arg1[%c0_16, %c0_17, %c12] : memref<1x16x226xbf16, #tpu.memory_space<vmem>>, vector<1x16x204xbf16>
    %16 = vector.shape_cast %15 : vector<1x16x204xbf16> to vector<16x204xbf16>
    %c80 = arith.constant 80 : index
    %c0_18 = arith.constant 0 : index
    %17 = vector.load %arg5[%c80, %c0_18] : memref<144x204xbf16, #tpu.memory_space<vmem>>, vector<16x204xbf16>
    tpu.vector_store %arg5[%c80, %c0_18], %16 {strides = array<i32>} : memref<144x204xbf16, #tpu.memory_space<vmem>>, vector<16x204xbf16>,
    %c0_19 = arith.constant 0 : index
    %c0_20 = arith.constant 0 : index
    %c20 = arith.constant 20 : index
    %18 = vector.load %arg1[%c0_19, %c0_20, %c20] : memref<1x16x226xbf16, #tpu.memory_space<vmem>>, vector<1x16x204xbf16>
    %19 = vector.shape_cast %18 : vector<1x16x204xbf16> to vector<16x204xbf16>
    %c96 = arith.constant 96 : index
    %c0_21 = arith.constant 0 : index
    %20 = vector.load %arg5[%c96, %c0_21] : memref<144x204xbf16, #tpu.memory_space<vmem>>, vector<16x204xbf16>
    tpu.vector_store %arg5[%c96, %c0_21], %19 {strides = array<i32>} : memref<144x204xbf16, #tpu.memory_space<vmem>>, vector<16x204xbf16>,
    %c0_22 = arith.constant 0 : index
    %c0_23 = arith.constant 0 : index
    %c21 = arith.constant 21 : index
    %21 = vector.load %arg1[%c0_22, %c0_23, %c21] : memref<1x16x226xbf16, #tpu.memory_space<vmem>>, vector<1x16x204xbf16>
    %22 = vector.shape_cast %21 : vector<1x16x204xbf16> to vector<16x204xbf16>
    %c112 = arith.constant 112 : index
    %c0_24 = arith.constant 0 : index
    %23 = vector.load %arg5[%c112, %c0_24] : memref<144x204xbf16, #tpu.memory_space<vmem>>, vector<16x204xbf16>
    tpu.vector_store %arg5[%c112, %c0_24], %22 {strides = array<i32>} : memref<144x204xbf16, #tpu.memory_space<vmem>>, vector<16x204xbf16>,
    %c0_25 = arith.constant 0 : index
    %c0_26 = arith.constant 0 : index
    %c22 = arith.constant 22 : index
    %24 = vector.load %arg1[%c0_25, %c0_26, %c22] : memref<1x16x226xbf16, #tpu.memory_space<vmem>>, vector<1x16x204xbf16>
    %25 = vector.shape_cast %24 : vector<1x16x204xbf16> to vector<16x204xbf16>
    %c128 = arith.constant 128 : index
    %c0_27 = arith.constant 0 : index
    %26 = vector.load %arg5[%c128, %c0_27] : memref<144x204xbf16, #tpu.memory_space<vmem>>, vector<16x204xbf16>
    tpu.vector_store %arg5[%c128, %c0_27], %25 {strides = array<i32>} : memref<144x204xbf16, #tpu.memory_space<vmem>>, vector<16x204xbf16>,
    %c0_28 = arith.constant 0 : index
    %c0_29 = arith.constant 0 : index
    %27 = vector.load %arg2[%c0_28, %c0_29] : memref<8x144xbf16, #tpu.memory_space<vmem>>, vector<8x144xbf16>
    %c0_30 = arith.constant 0 : index
    %c0_31 = arith.constant 0 : index
    %28 = vector.load %arg5[%c0_30, %c0_31] : memref<144x204xbf16, #tpu.memory_space<vmem>>, vector<144x204xbf16>
    %cst = arith.constant dense<0.000000e+00> : vector<8x204xf32>
    %29 = tpu.matmul %27, %28, %cst {dimension_numbers = #tpu.dot_dimension_numbers<[1], [0], [0], [1], [0, 0, 1, 1], [], []>} : vector<8x144xbf16>, vector<144x204xbf16>, vector<8x204xf32> -> vector<8x204xf32>
    %c0_32 = arith.constant 0 : index
    %c0_33 = arith.constant 0 : index
    %30 = vector.load %arg3[%c0_32, %c0_33] : memref<8x1xf32, #tpu.memory_space<vmem>>, vector<8x1xf32>
    %31 = vector.broadcast %30 : vector<8x1xf32> to vector<8x204xf32>
    %32 = arith.addf %29, %31 : vector<8x204xf32>
    %33 = arith.truncf %32 : vector<8x204xf32> to vector<8x204xbf16>
    %c0_34 = arith.constant 0 : index
    %c0_35 = arith.constant 0 : index
    %c0_36 = arith.constant 0 : index
    %34 = vector.load %arg4[%c0_34, %c0_35, %c0_36] : memref<1x8x204xbf16, #tpu.memory_space<vmem>>, vector<1x8x204xbf16>
    %35 = vector.shape_cast %34 : vector<1x8x204xbf16> to vector<8x204xbf16>
    %36 = vector.shape_cast %33 : vector<8x204xbf16> to vector<1x8x204xbf16>
    tpu.vector_store %arg4[%c0_34, %c0_35, %c0_36], %36 {strides = array<i32>} : memref<1x8x204xbf16, #tpu.memory_space<vmem>>, vector<1x8x204xbf16>,
    return
  }
  func.func @transform_0(%arg0: i32) -> (i32, i32, i32) {
    %c0_i32 = arith.constant 0 : i32
    %c0_i32_0 = arith.constant 0 : i32
    %c0_i32_1 = arith.constant 0 : i32
    return %arg0, %c0_i32, %c0_i32_0 : i32, i32, i32
  }
  func.func @transform_1(%arg0: i32) -> (i32, i32) {
    %c0_i32 = arith.constant 0 : i32
    %c0_i32_0 = arith.constant 0 : i32
    %c0_i32_1 = arith.constant 0 : i32
    return %c0_i32, %c0_i32_0 : i32, i32
  }
  func.func @transform_2(%arg0: i32) -> (i32, i32) {
    %c0_i32 = arith.constant 0 : i32
    %c0_i32_0 = arith.constant 0 : i32
    %c0_i32_1 = arith.constant 0 : i32
    return %c0_i32, %c0_i32_0 : i32, i32
  }
  func.func @transform_3(%arg0: i32) -> (i32, i32, i32) {
    %c0_i32 = arith.constant 0 : i32
    %c0_i32_0 = arith.constant 0 : i32
    %c0_i32_1 = arith.constant 0 : i32
    return %arg0, %c0_i32, %c0_i32_0 : i32, i32, i32
  }
}

module attributes {stable_mosaic.version = 11 : i64} {
  func.func @_conv_kernel(%arg0: i32, %arg1: memref<1x16x226xbf16, #tpu.memory_space<vmem>>, %arg2: memref<32x144xbf16, #tpu.memory_space<vmem>>, %arg3: memref<32x1xf32, #tpu.memory_space<vmem>>, %arg4: memref<1x32x204xbf16, #tpu.memory_space<vmem>>, %arg5: memref<144x204xbf16, #tpu.memory_space<vmem>>) attributes {dimension_semantics = [#tpu.dimension_semantics<parallel>], iteration_bounds = array<i64: 1>, scalar_prefetch = 0 : i64, scratch_operands = 1 : i64, tpu.core_type = #tpu.core_type<tc>, window_params = [{transform_indices = @transform_0, window_bounds = array<i64: 1, 16, 226>}, {pipeline_mode = #tpu.pipeline_mode<synchronous>, transform_indices = @transform_1, window_bounds = array<i64: 32, 144>}, {pipeline_mode = #tpu.pipeline_mode<synchronous>, transform_indices = @transform_2, window_bounds = array<i64: 32, 1>}, {transform_indices = @transform_3, window_bounds = array<i64: 1, 32, 204>}]} {
    %c0 = arith.constant 0 : index
    %c0_0 = arith.constant 0 : index
    %c0_1 = arith.constant 0 : index
    %0 = vector.load %arg1[%c0, %c0_0, %c0_1] : memref<1x16x226xbf16, #tpu.memory_space<vmem>>, vector<1x16x204xbf16>
    %1 = vector.shape_cast %0 : vector<1x16x204xbf16> to vector<16x204xbf16>
    %c0_2 = arith.constant 0 : index
    %c0_3 = arith.constant 0 : index
    %2 = vector.load %arg5[%c0_2, %c0_3] : memref<144x204xbf16, #tpu.memory_space<vmem>>, vector<16x204xbf16>
    tpu.vector_store %arg5[%c0_2, %c0_3], %1 {strides = array<i32>} : memref<144x204xbf16, #tpu.memory_space<vmem>>, vector<16x204xbf16>,
    %c0_4 = arith.constant 0 : index
    %c0_5 = arith.constant 0 : index
    %c1 = arith.constant 1 : index
    %3 = vector.load %arg1[%c0_4, %c0_5, %c1] : memref<1x16x226xbf16, #tpu.memory_space<vmem>>, vector<1x16x204xbf16>
    %4 = vector.shape_cast %3 : vector<1x16x204xbf16> to vector<16x204xbf16>
    %c16 = arith.constant 16 : index
    %c0_6 = arith.constant 0 : index
    %5 = vector.load %arg5[%c16, %c0_6] : memref<144x204xbf16, #tpu.memory_space<vmem>>, vector<16x204xbf16>
    tpu.vector_store %arg5[%c16, %c0_6], %4 {strides = array<i32>} : memref<144x204xbf16, #tpu.memory_space<vmem>>, vector<16x204xbf16>,
    %c0_7 = arith.constant 0 : index
    %c0_8 = arith.constant 0 : index
    %c2 = arith.constant 2 : index
    %6 = vector.load %arg1[%c0_7, %c0_8, %c2] : memref<1x16x226xbf16, #tpu.memory_space<vmem>>, vector<1x16x204xbf16>
    %7 = vector.shape_cast %6 : vector<1x16x204xbf16> to vector<16x204xbf16>
    %c32 = arith.constant 32 : index
    %c0_9 = arith.constant 0 : index
    %8 = vector.load %arg5[%c32, %c0_9] : memref<144x204xbf16, #tpu.memory_space<vmem>>, vector<16x204xbf16>
    tpu.vector_store %arg5[%c32, %c0_9], %7 {strides = array<i32>} : memref<144x204xbf16, #tpu.memory_space<vmem>>, vector<16x204xbf16>,
    %c0_10 = arith.constant 0 : index
    %c0_11 = arith.constant 0 : index
    %c10 = arith.constant 10 : index
    %9 = vector.load %arg1[%c0_10, %c0_11, %c10] : memref<1x16x226xbf16, #tpu.memory_space<vmem>>, vector<1x16x204xbf16>
    %10 = vector.shape_cast %9 : vector<1x16x204xbf16> to vector<16x204xbf16>
    %c48 = arith.constant 48 : index
    %c0_12 = arith.constant 0 : index
    %11 = vector.load %arg5[%c48, %c0_12] : memref<144x204xbf16, #tpu.memory_space<vmem>>, vector<16x204xbf16>
    tpu.vector_store %arg5[%c48, %c0_12], %10 {strides = array<i32>} : memref<144x204xbf16, #tpu.memory_space<vmem>>, vector<16x204xbf16>,
    %c0_13 = arith.constant 0 : index
    %c0_14 = arith.constant 0 : index
    %c11 = arith.constant 11 : index
    %12 = vector.load %arg1[%c0_13, %c0_14, %c11] : memref<1x16x226xbf16, #tpu.memory_space<vmem>>, vector<1x16x204xbf16>
    %13 = vector.shape_cast %12 : vector<1x16x204xbf16> to vector<16x204xbf16>
    %c64 = arith.constant 64 : index
    %c0_15 = arith.constant 0 : index
    %14 = vector.load %arg5[%c64, %c0_15] : memref<144x204xbf16, #tpu.memory_space<vmem>>, vector<16x204xbf16>
    tpu.vector_store %arg5[%c64, %c0_15], %13 {strides = array<i32>} : memref<144x204xbf16, #tpu.memory_space<vmem>>, vector<16x204xbf16>,
    %c0_16 = arith.constant 0 : index
    %c0_17 = arith.constant 0 : index
    %c12 = arith.constant 12 : index
    %15 = vector.load %arg1[%c0_16, %c0_17, %c12] : memref<1x16x226xbf16, #tpu.memory_space<vmem>>, vector<1x16x204xbf16>
    %16 = vector.shape_cast %15 : vector<1x16x204xbf16> to vector<16x204xbf16>
    %c80 = arith.constant 80 : index
    %c0_18 = arith.constant 0 : index
    %17 = vector.load %arg5[%c80, %c0_18] : memref<144x204xbf16, #tpu.memory_space<vmem>>, vector<16x204xbf16>
    tpu.vector_store %arg5[%c80, %c0_18], %16 {strides = array<i32>} : memref<144x204xbf16, #tpu.memory_space<vmem>>, vector<16x204xbf16>,
    %c0_19 = arith.constant 0 : index
    %c0_20 = arith.constant 0 : index
    %c20 = arith.constant 20 : index
    %18 = vector.load %arg1[%c0_19, %c0_20, %c20] : memref<1x16x226xbf16, #tpu.memory_space<vmem>>, vector<1x16x204xbf16>
    %19 = vector.shape_cast %18 : vector<1x16x204xbf16> to vector<16x204xbf16>
    %c96 = arith.constant 96 : index
    %c0_21 = arith.constant 0 : index
    %20 = vector.load %arg5[%c96, %c0_21] : memref<144x204xbf16, #tpu.memory_space<vmem>>, vector<16x204xbf16>
    tpu.vector_store %arg5[%c96, %c0_21], %19 {strides = array<i32>} : memref<144x204xbf16, #tpu.memory_space<vmem>>, vector<16x204xbf16>,
    %c0_22 = arith.constant 0 : index
    %c0_23 = arith.constant 0 : index
    %c21 = arith.constant 21 : index
    %21 = vector.load %arg1[%c0_22, %c0_23, %c21] : memref<1x16x226xbf16, #tpu.memory_space<vmem>>, vector<1x16x204xbf16>
    %22 = vector.shape_cast %21 : vector<1x16x204xbf16> to vector<16x204xbf16>
    %c112 = arith.constant 112 : index
    %c0_24 = arith.constant 0 : index
    %23 = vector.load %arg5[%c112, %c0_24] : memref<144x204xbf16, #tpu.memory_space<vmem>>, vector<16x204xbf16>
    tpu.vector_store %arg5[%c112, %c0_24], %22 {strides = array<i32>} : memref<144x204xbf16, #tpu.memory_space<vmem>>, vector<16x204xbf16>,
    %c0_25 = arith.constant 0 : index
    %c0_26 = arith.constant 0 : index
    %c22 = arith.constant 22 : index
    %24 = vector.load %arg1[%c0_25, %c0_26, %c22] : memref<1x16x226xbf16, #tpu.memory_space<vmem>>, vector<1x16x204xbf16>
    %25 = vector.shape_cast %24 : vector<1x16x204xbf16> to vector<16x204xbf16>
    %c128 = arith.constant 128 : index
    %c0_27 = arith.constant 0 : index
    %26 = vector.load %arg5[%c128, %c0_27] : memref<144x204xbf16, #tpu.memory_space<vmem>>, vector<16x204xbf16>
    tpu.vector_store %arg5[%c128, %c0_27], %25 {strides = array<i32>} : memref<144x204xbf16, #tpu.memory_space<vmem>>, vector<16x204xbf16>,
    %c0_28 = arith.constant 0 : index
    %c0_29 = arith.constant 0 : index
    %27 = vector.load %arg2[%c0_28, %c0_29] : memref<32x144xbf16, #tpu.memory_space<vmem>>, vector<32x144xbf16>
    %c0_30 = arith.constant 0 : index
    %c0_31 = arith.constant 0 : index
    %28 = vector.load %arg5[%c0_30, %c0_31] : memref<144x204xbf16, #tpu.memory_space<vmem>>, vector<144x204xbf16>
    %cst = arith.constant dense<0.000000e+00> : vector<32x204xf32>
    %29 = tpu.matmul %27, %28, %cst {dimension_numbers = #tpu.dot_dimension_numbers<[1], [0], [0], [1], [0, 0, 1, 1], [], []>} : vector<32x144xbf16>, vector<144x204xbf16>, vector<32x204xf32> -> vector<32x204xf32>
    %c0_32 = arith.constant 0 : index
    %c0_33 = arith.constant 0 : index
    %30 = vector.load %arg3[%c0_32, %c0_33] : memref<32x1xf32, #tpu.memory_space<vmem>>, vector<32x1xf32>
    %31 = vector.broadcast %30 : vector<32x1xf32> to vector<32x204xf32>
    %32 = arith.addf %29, %31 : vector<32x204xf32>
    %cst_34 = arith.constant 0.000000e+00 : f32
    %33 = vector.broadcast %cst_34 : f32 to vector<32x204xf32>
    %34 = arith.maximumf %32, %33 : vector<32x204xf32>
    %cst_35 = arith.constant 0.000000e+00 : f32
    %35 = vector.broadcast %cst_35 : f32 to vector<32x204xf32>
    %36 = arith.minimumf %32, %35 : vector<32x204xf32>
    %cst_36 = arith.constant 2.500000e-01 : f32
    %37 = vector.broadcast %cst_36 : f32 to vector<32x204xf32>
    %38 = arith.mulf %37, %36 : vector<32x204xf32>
    %39 = arith.addf %34, %38 : vector<32x204xf32>
    %40 = arith.truncf %39 : vector<32x204xf32> to vector<32x204xbf16>
    %c0_37 = arith.constant 0 : index
    %c0_38 = arith.constant 0 : index
    %c0_39 = arith.constant 0 : index
    %41 = vector.load %arg4[%c0_37, %c0_38, %c0_39] : memref<1x32x204xbf16, #tpu.memory_space<vmem>>, vector<1x32x204xbf16>
    %42 = vector.shape_cast %41 : vector<1x32x204xbf16> to vector<32x204xbf16>
    %43 = vector.shape_cast %40 : vector<32x204xbf16> to vector<1x32x204xbf16>
    tpu.vector_store %arg4[%c0_37, %c0_38, %c0_39], %43 {strides = array<i32>} : memref<1x32x204xbf16, #tpu.memory_space<vmem>>, vector<1x32x204xbf16>,
    return
  }
  func.func @transform_0(%arg0: i32) -> (i32, i32, i32) {
    %c0_i32 = arith.constant 0 : i32
    %c0_i32_0 = arith.constant 0 : i32
    %c0_i32_1 = arith.constant 0 : i32
    return %arg0, %c0_i32, %c0_i32_0 : i32, i32, i32
  }
  func.func @transform_1(%arg0: i32) -> (i32, i32) {
    %c0_i32 = arith.constant 0 : i32
    %c0_i32_0 = arith.constant 0 : i32
    %c0_i32_1 = arith.constant 0 : i32
    return %c0_i32, %c0_i32_0 : i32, i32
  }
  func.func @transform_2(%arg0: i32) -> (i32, i32) {
    %c0_i32 = arith.constant 0 : i32
    %c0_i32_0 = arith.constant 0 : i32
    %c0_i32_1 = arith.constant 0 : i32
    return %c0_i32, %c0_i32_0 : i32, i32
  }
  func.func @transform_3(%arg0: i32) -> (i32, i32, i32) {
    %c0_i32 = arith.constant 0 : i32
    %c0_i32_0 = arith.constant 0 : i32
    %c0_i32_1 = arith.constant 0 : i32
    return %arg0, %c0_i32, %c0_i32_0 : i32, i32, i32
  }
}

module attributes {stable_mosaic.version = 11 : i64} {
  func.func @_conv_kernel(%arg0: i32, %arg1: memref<1x16x1158xbf16, #tpu.memory_space<vmem>>, %arg2: memref<8x144xbf16, #tpu.memory_space<vmem>>, %arg3: memref<8x1xf32, #tpu.memory_space<vmem>>, %arg4: memref<1x8x1088xf32, #tpu.memory_space<vmem>>, %arg5: memref<144x1088xbf16, #tpu.memory_space<vmem>>) attributes {dimension_semantics = [#tpu.dimension_semantics<parallel>], iteration_bounds = array<i64: 2>, scalar_prefetch = 0 : i64, scratch_operands = 1 : i64, tpu.core_type = #tpu.core_type<tc>, window_params = [{transform_indices = @transform_0, window_bounds = array<i64: 1, 16, 1158>}, {pipeline_mode = #tpu.pipeline_mode<synchronous>, transform_indices = @transform_1, window_bounds = array<i64: 8, 144>}, {pipeline_mode = #tpu.pipeline_mode<synchronous>, transform_indices = @transform_2, window_bounds = array<i64: 8, 1>}, {transform_indices = @transform_3, window_bounds = array<i64: 1, 8, 1088>}]} {
    %c0 = arith.constant 0 : index
    %c0_0 = arith.constant 0 : index
    %c0_1 = arith.constant 0 : index
    %0 = vector.load %arg1[%c0, %c0_0, %c0_1] : memref<1x16x1158xbf16, #tpu.memory_space<vmem>>, vector<1x16x1088xbf16>
    %1 = vector.shape_cast %0 : vector<1x16x1088xbf16> to vector<16x1088xbf16>
    %c0_2 = arith.constant 0 : index
    %c0_3 = arith.constant 0 : index
    %2 = vector.load %arg5[%c0_2, %c0_3] : memref<144x1088xbf16, #tpu.memory_space<vmem>>, vector<16x1088xbf16>
    tpu.vector_store %arg5[%c0_2, %c0_3], %1 {strides = array<i32>} : memref<144x1088xbf16, #tpu.memory_space<vmem>>, vector<16x1088xbf16>,
    %c0_4 = arith.constant 0 : index
    %c0_5 = arith.constant 0 : index
    %c1 = arith.constant 1 : index
    %3 = vector.load %arg1[%c0_4, %c0_5, %c1] : memref<1x16x1158xbf16, #tpu.memory_space<vmem>>, vector<1x16x1088xbf16>
    %4 = vector.shape_cast %3 : vector<1x16x1088xbf16> to vector<16x1088xbf16>
    %c16 = arith.constant 16 : index
    %c0_6 = arith.constant 0 : index
    %5 = vector.load %arg5[%c16, %c0_6] : memref<144x1088xbf16, #tpu.memory_space<vmem>>, vector<16x1088xbf16>
    tpu.vector_store %arg5[%c16, %c0_6], %4 {strides = array<i32>} : memref<144x1088xbf16, #tpu.memory_space<vmem>>, vector<16x1088xbf16>,
    %c0_7 = arith.constant 0 : index
    %c0_8 = arith.constant 0 : index
    %c2 = arith.constant 2 : index
    %6 = vector.load %arg1[%c0_7, %c0_8, %c2] : memref<1x16x1158xbf16, #tpu.memory_space<vmem>>, vector<1x16x1088xbf16>
    %7 = vector.shape_cast %6 : vector<1x16x1088xbf16> to vector<16x1088xbf16>
    %c32 = arith.constant 32 : index
    %c0_9 = arith.constant 0 : index
    %8 = vector.load %arg5[%c32, %c0_9] : memref<144x1088xbf16, #tpu.memory_space<vmem>>, vector<16x1088xbf16>
    tpu.vector_store %arg5[%c32, %c0_9], %7 {strides = array<i32>} : memref<144x1088xbf16, #tpu.memory_space<vmem>>, vector<16x1088xbf16>,
    %c0_10 = arith.constant 0 : index
    %c0_11 = arith.constant 0 : index
    %c34 = arith.constant 34 : index
    %9 = vector.load %arg1[%c0_10, %c0_11, %c34] : memref<1x16x1158xbf16, #tpu.memory_space<vmem>>, vector<1x16x1088xbf16>
    %10 = vector.shape_cast %9 : vector<1x16x1088xbf16> to vector<16x1088xbf16>
    %c48 = arith.constant 48 : index
    %c0_12 = arith.constant 0 : index
    %11 = vector.load %arg5[%c48, %c0_12] : memref<144x1088xbf16, #tpu.memory_space<vmem>>, vector<16x1088xbf16>
    tpu.vector_store %arg5[%c48, %c0_12], %10 {strides = array<i32>} : memref<144x1088xbf16, #tpu.memory_space<vmem>>, vector<16x1088xbf16>,
    %c0_13 = arith.constant 0 : index
    %c0_14 = arith.constant 0 : index
    %c35 = arith.constant 35 : index
    %12 = vector.load %arg1[%c0_13, %c0_14, %c35] : memref<1x16x1158xbf16, #tpu.memory_space<vmem>>, vector<1x16x1088xbf16>
    %13 = vector.shape_cast %12 : vector<1x16x1088xbf16> to vector<16x1088xbf16>
    %c64 = arith.constant 64 : index
    %c0_15 = arith.constant 0 : index
    %14 = vector.load %arg5[%c64, %c0_15] : memref<144x1088xbf16, #tpu.memory_space<vmem>>, vector<16x1088xbf16>
    tpu.vector_store %arg5[%c64, %c0_15], %13 {strides = array<i32>} : memref<144x1088xbf16, #tpu.memory_space<vmem>>, vector<16x1088xbf16>,
    %c0_16 = arith.constant 0 : index
    %c0_17 = arith.constant 0 : index
    %c36 = arith.constant 36 : index
    %15 = vector.load %arg1[%c0_16, %c0_17, %c36] : memref<1x16x1158xbf16, #tpu.memory_space<vmem>>, vector<1x16x1088xbf16>
    %16 = vector.shape_cast %15 : vector<1x16x1088xbf16> to vector<16x1088xbf16>
    %c80 = arith.constant 80 : index
    %c0_18 = arith.constant 0 : index
    %17 = vector.load %arg5[%c80, %c0_18] : memref<144x1088xbf16, #tpu.memory_space<vmem>>, vector<16x1088xbf16>
    tpu.vector_store %arg5[%c80, %c0_18], %16 {strides = array<i32>} : memref<144x1088xbf16, #tpu.memory_space<vmem>>, vector<16x1088xbf16>,
    %c0_19 = arith.constant 0 : index
    %c0_20 = arith.constant 0 : index
    %c68 = arith.constant 68 : index
    %18 = vector.load %arg1[%c0_19, %c0_20, %c68] : memref<1x16x1158xbf16, #tpu.memory_space<vmem>>, vector<1x16x1088xbf16>
    %19 = vector.shape_cast %18 : vector<1x16x1088xbf16> to vector<16x1088xbf16>
    %c96 = arith.constant 96 : index
    %c0_21 = arith.constant 0 : index
    %20 = vector.load %arg5[%c96, %c0_21] : memref<144x1088xbf16, #tpu.memory_space<vmem>>, vector<16x1088xbf16>
    tpu.vector_store %arg5[%c96, %c0_21], %19 {strides = array<i32>} : memref<144x1088xbf16, #tpu.memory_space<vmem>>, vector<16x1088xbf16>,
    %c0_22 = arith.constant 0 : index
    %c0_23 = arith.constant 0 : index
    %c69 = arith.constant 69 : index
    %21 = vector.load %arg1[%c0_22, %c0_23, %c69] : memref<1x16x1158xbf16, #tpu.memory_space<vmem>>, vector<1x16x1088xbf16>
    %22 = vector.shape_cast %21 : vector<1x16x1088xbf16> to vector<16x1088xbf16>
    %c112 = arith.constant 112 : index
    %c0_24 = arith.constant 0 : index
    %23 = vector.load %arg5[%c112, %c0_24] : memref<144x1088xbf16, #tpu.memory_space<vmem>>, vector<16x1088xbf16>
    tpu.vector_store %arg5[%c112, %c0_24], %22 {strides = array<i32>} : memref<144x1088xbf16, #tpu.memory_space<vmem>>, vector<16x1088xbf16>,
    %c0_25 = arith.constant 0 : index
    %c0_26 = arith.constant 0 : index
    %c70 = arith.constant 70 : index
    %24 = vector.load %arg1[%c0_25, %c0_26, %c70] : memref<1x16x1158xbf16, #tpu.memory_space<vmem>>, vector<1x16x1088xbf16>
    %25 = vector.shape_cast %24 : vector<1x16x1088xbf16> to vector<16x1088xbf16>
    %c128 = arith.constant 128 : index
    %c0_27 = arith.constant 0 : index
    %26 = vector.load %arg5[%c128, %c0_27] : memref<144x1088xbf16, #tpu.memory_space<vmem>>, vector<16x1088xbf16>
    tpu.vector_store %arg5[%c128, %c0_27], %25 {strides = array<i32>} : memref<144x1088xbf16, #tpu.memory_space<vmem>>, vector<16x1088xbf16>,
    %c0_28 = arith.constant 0 : index
    %c0_29 = arith.constant 0 : index
    %27 = vector.load %arg2[%c0_28, %c0_29] : memref<8x144xbf16, #tpu.memory_space<vmem>>, vector<8x144xbf16>
    %c0_30 = arith.constant 0 : index
    %c0_31 = arith.constant 0 : index
    %28 = vector.load %arg5[%c0_30, %c0_31] : memref<144x1088xbf16, #tpu.memory_space<vmem>>, vector<144x1088xbf16>
    %cst = arith.constant dense<0.000000e+00> : vector<8x1088xf32>
    %29 = tpu.matmul %27, %28, %cst {dimension_numbers = #tpu.dot_dimension_numbers<[1], [0], [0], [1], [0, 0, 1, 1], [], []>} : vector<8x144xbf16>, vector<144x1088xbf16>, vector<8x1088xf32> -> vector<8x1088xf32>
    %c0_32 = arith.constant 0 : index
    %c0_33 = arith.constant 0 : index
    %30 = vector.load %arg3[%c0_32, %c0_33] : memref<8x1xf32, #tpu.memory_space<vmem>>, vector<8x1xf32>
    %31 = vector.broadcast %30 : vector<8x1xf32> to vector<8x1088xf32>
    %32 = arith.addf %29, %31 : vector<8x1088xf32>
    %cst_34 = arith.constant 0.000000e+00 : f32
    %33 = vector.broadcast %cst_34 : f32 to vector<8x1088xf32>
    %34 = arith.cmpf ogt, %32, %33 : vector<8x1088xf32>
    %cst_35 = arith.constant 2.000000e-01 : f32
    %35 = vector.broadcast %cst_35 : f32 to vector<8x1088xf32>
    %36 = arith.mulf %35, %32 : vector<8x1088xf32>
    %37 = arith.select %34, %32, %36 : vector<8x1088xi1>, vector<8x1088xf32>
    %c0_36 = arith.constant 0 : index
    %c0_37 = arith.constant 0 : index
    %c0_38 = arith.constant 0 : index
    %38 = vector.load %arg4[%c0_36, %c0_37, %c0_38] : memref<1x8x1088xf32, #tpu.memory_space<vmem>>, vector<1x8x1088xf32>
    %39 = vector.shape_cast %38 : vector<1x8x1088xf32> to vector<8x1088xf32>
    %40 = vector.shape_cast %37 : vector<8x1088xf32> to vector<1x8x1088xf32>
    tpu.vector_store %arg4[%c0_36, %c0_37, %c0_38], %40 {strides = array<i32>} : memref<1x8x1088xf32, #tpu.memory_space<vmem>>, vector<1x8x1088xf32>,
    return
  }
  func.func @transform_0(%arg0: i32) -> (i32, i32, i32) {
    %c0_i32 = arith.constant 0 : i32
    %c0_i32_0 = arith.constant 0 : i32
    %c0_i32_1 = arith.constant 0 : i32
    return %arg0, %c0_i32, %c0_i32_0 : i32, i32, i32
  }
  func.func @transform_1(%arg0: i32) -> (i32, i32) {
    %c0_i32 = arith.constant 0 : i32
    %c0_i32_0 = arith.constant 0 : i32
    %c0_i32_1 = arith.constant 0 : i32
    return %c0_i32, %c0_i32_0 : i32, i32
  }
  func.func @transform_2(%arg0: i32) -> (i32, i32) {
    %c0_i32 = arith.constant 0 : i32
    %c0_i32_0 = arith.constant 0 : i32
    %c0_i32_1 = arith.constant 0 : i32
    return %c0_i32, %c0_i32_0 : i32, i32
  }
  func.func @transform_3(%arg0: i32) -> (i32, i32, i32) {
    %c0_i32 = arith.constant 0 : i32
    %c0_i32_0 = arith.constant 0 : i32
    %c0_i32_1 = arith.constant 0 : i32
    return %arg0, %c0_i32, %c0_i32_0 : i32, i32, i32
  }
}

module attributes {stable_mosaic.version = 11 : i64} {
  func.func @_conv_kernel(%arg0: i32, %arg1: memref<1x16x1158xbf16, #tpu.memory_space<vmem>>, %arg2: memref<16x144xbf16, #tpu.memory_space<vmem>>, %arg3: memref<16x1xf32, #tpu.memory_space<vmem>>, %arg4: memref<1x16x1088xbf16, #tpu.memory_space<vmem>>, %arg5: memref<144x1088xbf16, #tpu.memory_space<vmem>>) attributes {dimension_semantics = [#tpu.dimension_semantics<parallel>], iteration_bounds = array<i64: 2>, scalar_prefetch = 0 : i64, scratch_operands = 1 : i64, tpu.core_type = #tpu.core_type<tc>, window_params = [{transform_indices = @transform_0, window_bounds = array<i64: 1, 16, 1158>}, {pipeline_mode = #tpu.pipeline_mode<synchronous>, transform_indices = @transform_1, window_bounds = array<i64: 16, 144>}, {pipeline_mode = #tpu.pipeline_mode<synchronous>, transform_indices = @transform_2, window_bounds = array<i64: 16, 1>}, {transform_indices = @transform_3, window_bounds = array<i64: 1, 16, 1088>}]} {
    %c0 = arith.constant 0 : index
    %c0_0 = arith.constant 0 : index
    %c0_1 = arith.constant 0 : index
    %0 = vector.load %arg1[%c0, %c0_0, %c0_1] : memref<1x16x1158xbf16, #tpu.memory_space<vmem>>, vector<1x16x1088xbf16>
    %1 = vector.shape_cast %0 : vector<1x16x1088xbf16> to vector<16x1088xbf16>
    %c0_2 = arith.constant 0 : index
    %c0_3 = arith.constant 0 : index
    %2 = vector.load %arg5[%c0_2, %c0_3] : memref<144x1088xbf16, #tpu.memory_space<vmem>>, vector<16x1088xbf16>
    tpu.vector_store %arg5[%c0_2, %c0_3], %1 {strides = array<i32>} : memref<144x1088xbf16, #tpu.memory_space<vmem>>, vector<16x1088xbf16>,
    %c0_4 = arith.constant 0 : index
    %c0_5 = arith.constant 0 : index
    %c1 = arith.constant 1 : index
    %3 = vector.load %arg1[%c0_4, %c0_5, %c1] : memref<1x16x1158xbf16, #tpu.memory_space<vmem>>, vector<1x16x1088xbf16>
    %4 = vector.shape_cast %3 : vector<1x16x1088xbf16> to vector<16x1088xbf16>
    %c16 = arith.constant 16 : index
    %c0_6 = arith.constant 0 : index
    %5 = vector.load %arg5[%c16, %c0_6] : memref<144x1088xbf16, #tpu.memory_space<vmem>>, vector<16x1088xbf16>
    tpu.vector_store %arg5[%c16, %c0_6], %4 {strides = array<i32>} : memref<144x1088xbf16, #tpu.memory_space<vmem>>, vector<16x1088xbf16>,
    %c0_7 = arith.constant 0 : index
    %c0_8 = arith.constant 0 : index
    %c2 = arith.constant 2 : index
    %6 = vector.load %arg1[%c0_7, %c0_8, %c2] : memref<1x16x1158xbf16, #tpu.memory_space<vmem>>, vector<1x16x1088xbf16>
    %7 = vector.shape_cast %6 : vector<1x16x1088xbf16> to vector<16x1088xbf16>
    %c32 = arith.constant 32 : index
    %c0_9 = arith.constant 0 : index
    %8 = vector.load %arg5[%c32, %c0_9] : memref<144x1088xbf16, #tpu.memory_space<vmem>>, vector<16x1088xbf16>
    tpu.vector_store %arg5[%c32, %c0_9], %7 {strides = array<i32>} : memref<144x1088xbf16, #tpu.memory_space<vmem>>, vector<16x1088xbf16>,
    %c0_10 = arith.constant 0 : index
    %c0_11 = arith.constant 0 : index
    %c34 = arith.constant 34 : index
    %9 = vector.load %arg1[%c0_10, %c0_11, %c34] : memref<1x16x1158xbf16, #tpu.memory_space<vmem>>, vector<1x16x1088xbf16>
    %10 = vector.shape_cast %9 : vector<1x16x1088xbf16> to vector<16x1088xbf16>
    %c48 = arith.constant 48 : index
    %c0_12 = arith.constant 0 : index
    %11 = vector.load %arg5[%c48, %c0_12] : memref<144x1088xbf16, #tpu.memory_space<vmem>>, vector<16x1088xbf16>
    tpu.vector_store %arg5[%c48, %c0_12], %10 {strides = array<i32>} : memref<144x1088xbf16, #tpu.memory_space<vmem>>, vector<16x1088xbf16>,
    %c0_13 = arith.constant 0 : index
    %c0_14 = arith.constant 0 : index
    %c35 = arith.constant 35 : index
    %12 = vector.load %arg1[%c0_13, %c0_14, %c35] : memref<1x16x1158xbf16, #tpu.memory_space<vmem>>, vector<1x16x1088xbf16>
    %13 = vector.shape_cast %12 : vector<1x16x1088xbf16> to vector<16x1088xbf16>
    %c64 = arith.constant 64 : index
    %c0_15 = arith.constant 0 : index
    %14 = vector.load %arg5[%c64, %c0_15] : memref<144x1088xbf16, #tpu.memory_space<vmem>>, vector<16x1088xbf16>
    tpu.vector_store %arg5[%c64, %c0_15], %13 {strides = array<i32>} : memref<144x1088xbf16, #tpu.memory_space<vmem>>, vector<16x1088xbf16>,
    %c0_16 = arith.constant 0 : index
    %c0_17 = arith.constant 0 : index
    %c36 = arith.constant 36 : index
    %15 = vector.load %arg1[%c0_16, %c0_17, %c36] : memref<1x16x1158xbf16, #tpu.memory_space<vmem>>, vector<1x16x1088xbf16>
    %16 = vector.shape_cast %15 : vector<1x16x1088xbf16> to vector<16x1088xbf16>
    %c80 = arith.constant 80 : index
    %c0_18 = arith.constant 0 : index
    %17 = vector.load %arg5[%c80, %c0_18] : memref<144x1088xbf16, #tpu.memory_space<vmem>>, vector<16x1088xbf16>
    tpu.vector_store %arg5[%c80, %c0_18], %16 {strides = array<i32>} : memref<144x1088xbf16, #tpu.memory_space<vmem>>, vector<16x1088xbf16>,
    %c0_19 = arith.constant 0 : index
    %c0_20 = arith.constant 0 : index
    %c68 = arith.constant 68 : index
    %18 = vector.load %arg1[%c0_19, %c0_20, %c68] : memref<1x16x1158xbf16, #tpu.memory_space<vmem>>, vector<1x16x1088xbf16>
    %19 = vector.shape_cast %18 : vector<1x16x1088xbf16> to vector<16x1088xbf16>
    %c96 = arith.constant 96 : index
    %c0_21 = arith.constant 0 : index
    %20 = vector.load %arg5[%c96, %c0_21] : memref<144x1088xbf16, #tpu.memory_space<vmem>>, vector<16x1088xbf16>
    tpu.vector_store %arg5[%c96, %c0_21], %19 {strides = array<i32>} : memref<144x1088xbf16, #tpu.memory_space<vmem>>, vector<16x1088xbf16>,
    %c0_22 = arith.constant 0 : index
    %c0_23 = arith.constant 0 : index
    %c69 = arith.constant 69 : index
    %21 = vector.load %arg1[%c0_22, %c0_23, %c69] : memref<1x16x1158xbf16, #tpu.memory_space<vmem>>, vector<1x16x1088xbf16>
    %22 = vector.shape_cast %21 : vector<1x16x1088xbf16> to vector<16x1088xbf16>
    %c112 = arith.constant 112 : index
    %c0_24 = arith.constant 0 : index
    %23 = vector.load %arg5[%c112, %c0_24] : memref<144x1088xbf16, #tpu.memory_space<vmem>>, vector<16x1088xbf16>
    tpu.vector_store %arg5[%c112, %c0_24], %22 {strides = array<i32>} : memref<144x1088xbf16, #tpu.memory_space<vmem>>, vector<16x1088xbf16>,
    %c0_25 = arith.constant 0 : index
    %c0_26 = arith.constant 0 : index
    %c70 = arith.constant 70 : index
    %24 = vector.load %arg1[%c0_25, %c0_26, %c70] : memref<1x16x1158xbf16, #tpu.memory_space<vmem>>, vector<1x16x1088xbf16>
    %25 = vector.shape_cast %24 : vector<1x16x1088xbf16> to vector<16x1088xbf16>
    %c128 = arith.constant 128 : index
    %c0_27 = arith.constant 0 : index
    %26 = vector.load %arg5[%c128, %c0_27] : memref<144x1088xbf16, #tpu.memory_space<vmem>>, vector<16x1088xbf16>
    tpu.vector_store %arg5[%c128, %c0_27], %25 {strides = array<i32>} : memref<144x1088xbf16, #tpu.memory_space<vmem>>, vector<16x1088xbf16>,
    %c0_28 = arith.constant 0 : index
    %c0_29 = arith.constant 0 : index
    %27 = vector.load %arg2[%c0_28, %c0_29] : memref<16x144xbf16, #tpu.memory_space<vmem>>, vector<16x144xbf16>
    %c0_30 = arith.constant 0 : index
    %c0_31 = arith.constant 0 : index
    %28 = vector.load %arg5[%c0_30, %c0_31] : memref<144x1088xbf16, #tpu.memory_space<vmem>>, vector<144x1088xbf16>
    %cst = arith.constant dense<0.000000e+00> : vector<16x1088xf32>
    %29 = tpu.matmul %27, %28, %cst {dimension_numbers = #tpu.dot_dimension_numbers<[1], [0], [0], [1], [0, 0, 1, 1], [], []>} : vector<16x144xbf16>, vector<144x1088xbf16>, vector<16x1088xf32> -> vector<16x1088xf32>
    %c0_32 = arith.constant 0 : index
    %c0_33 = arith.constant 0 : index
    %30 = vector.load %arg3[%c0_32, %c0_33] : memref<16x1xf32, #tpu.memory_space<vmem>>, vector<16x1xf32>
    %31 = vector.broadcast %30 : vector<16x1xf32> to vector<16x1088xf32>
    %32 = arith.addf %29, %31 : vector<16x1088xf32>
    %cst_34 = arith.constant 0.000000e+00 : f32
    %33 = vector.broadcast %cst_34 : f32 to vector<16x1088xf32>
    %34 = arith.maximumf %32, %33 : vector<16x1088xf32>
    %35 = arith.truncf %34 : vector<16x1088xf32> to vector<16x1088xbf16>
    %c0_35 = arith.constant 0 : index
    %c0_36 = arith.constant 0 : index
    %c0_37 = arith.constant 0 : index
    %36 = vector.load %arg4[%c0_35, %c0_36, %c0_37] : memref<1x16x1088xbf16, #tpu.memory_space<vmem>>, vector<1x16x1088xbf16>
    %37 = vector.shape_cast %36 : vector<1x16x1088xbf16> to vector<16x1088xbf16>
    %38 = vector.shape_cast %35 : vector<16x1088xbf16> to vector<1x16x1088xbf16>
    tpu.vector_store %arg4[%c0_35, %c0_36, %c0_37], %38 {strides = array<i32>} : memref<1x16x1088xbf16, #tpu.memory_space<vmem>>, vector<1x16x1088xbf16>,
    return
  }
  func.func @transform_0(%arg0: i32) -> (i32, i32, i32) {
    %c0_i32 = arith.constant 0 : i32
    %c0_i32_0 = arith.constant 0 : i32
    %c0_i32_1 = arith.constant 0 : i32
    return %arg0, %c0_i32, %c0_i32_0 : i32, i32, i32
  }
  func.func @transform_1(%arg0: i32) -> (i32, i32) {
    %c0_i32 = arith.constant 0 : i32
    %c0_i32_0 = arith.constant 0 : i32
    %c0_i32_1 = arith.constant 0 : i32
    return %c0_i32, %c0_i32_0 : i32, i32
  }
  func.func @transform_2(%arg0: i32) -> (i32, i32) {
    %c0_i32 = arith.constant 0 : i32
    %c0_i32_0 = arith.constant 0 : i32
    %c0_i32_1 = arith.constant 0 : i32
    return %c0_i32, %c0_i32_0 : i32, i32
  }
  func.func @transform_3(%arg0: i32) -> (i32, i32, i32) {
    %c0_i32 = arith.constant 0 : i32
    %c0_i32_0 = arith.constant 0 : i32
    %c0_i32_1 = arith.constant 0 : i32
    return %arg0, %c0_i32, %c0_i32_0 : i32, i32, i32
  }
}

module attributes {stable_mosaic.version = 11 : i64} {
  func.func @_conv_kernel(%arg0: i32, %arg1: memref<1x16x326xbf16, #tpu.memory_space<vmem>>, %arg2: memref<32x144xbf16, #tpu.memory_space<vmem>>, %arg3: memref<32x1xf32, #tpu.memory_space<vmem>>, %arg4: memref<1x32x288xbf16, #tpu.memory_space<vmem>>, %arg5: memref<144x288xbf16, #tpu.memory_space<vmem>>) attributes {dimension_semantics = [#tpu.dimension_semantics<parallel>], iteration_bounds = array<i64: 2>, scalar_prefetch = 0 : i64, scratch_operands = 1 : i64, tpu.core_type = #tpu.core_type<tc>, window_params = [{transform_indices = @transform_0, window_bounds = array<i64: 1, 16, 326>}, {pipeline_mode = #tpu.pipeline_mode<synchronous>, transform_indices = @transform_1, window_bounds = array<i64: 32, 144>}, {pipeline_mode = #tpu.pipeline_mode<synchronous>, transform_indices = @transform_2, window_bounds = array<i64: 32, 1>}, {transform_indices = @transform_3, window_bounds = array<i64: 1, 32, 288>}]} {
    %c0 = arith.constant 0 : index
    %c0_0 = arith.constant 0 : index
    %c0_1 = arith.constant 0 : index
    %0 = vector.load %arg1[%c0, %c0_0, %c0_1] : memref<1x16x326xbf16, #tpu.memory_space<vmem>>, vector<1x16x288xbf16>
    %1 = vector.shape_cast %0 : vector<1x16x288xbf16> to vector<16x288xbf16>
    %c0_2 = arith.constant 0 : index
    %c0_3 = arith.constant 0 : index
    %2 = vector.load %arg5[%c0_2, %c0_3] : memref<144x288xbf16, #tpu.memory_space<vmem>>, vector<16x288xbf16>
    tpu.vector_store %arg5[%c0_2, %c0_3], %1 {strides = array<i32>} : memref<144x288xbf16, #tpu.memory_space<vmem>>, vector<16x288xbf16>,
    %c0_4 = arith.constant 0 : index
    %c0_5 = arith.constant 0 : index
    %c1 = arith.constant 1 : index
    %3 = vector.load %arg1[%c0_4, %c0_5, %c1] : memref<1x16x326xbf16, #tpu.memory_space<vmem>>, vector<1x16x288xbf16>
    %4 = vector.shape_cast %3 : vector<1x16x288xbf16> to vector<16x288xbf16>
    %c16 = arith.constant 16 : index
    %c0_6 = arith.constant 0 : index
    %5 = vector.load %arg5[%c16, %c0_6] : memref<144x288xbf16, #tpu.memory_space<vmem>>, vector<16x288xbf16>
    tpu.vector_store %arg5[%c16, %c0_6], %4 {strides = array<i32>} : memref<144x288xbf16, #tpu.memory_space<vmem>>, vector<16x288xbf16>,
    %c0_7 = arith.constant 0 : index
    %c0_8 = arith.constant 0 : index
    %c2 = arith.constant 2 : index
    %6 = vector.load %arg1[%c0_7, %c0_8, %c2] : memref<1x16x326xbf16, #tpu.memory_space<vmem>>, vector<1x16x288xbf16>
    %7 = vector.shape_cast %6 : vector<1x16x288xbf16> to vector<16x288xbf16>
    %c32 = arith.constant 32 : index
    %c0_9 = arith.constant 0 : index
    %8 = vector.load %arg5[%c32, %c0_9] : memref<144x288xbf16, #tpu.memory_space<vmem>>, vector<16x288xbf16>
    tpu.vector_store %arg5[%c32, %c0_9], %7 {strides = array<i32>} : memref<144x288xbf16, #tpu.memory_space<vmem>>, vector<16x288xbf16>,
    %c0_10 = arith.constant 0 : index
    %c0_11 = arith.constant 0 : index
    %c18 = arith.constant 18 : index
    %9 = vector.load %arg1[%c0_10, %c0_11, %c18] : memref<1x16x326xbf16, #tpu.memory_space<vmem>>, vector<1x16x288xbf16>
    %10 = vector.shape_cast %9 : vector<1x16x288xbf16> to vector<16x288xbf16>
    %c48 = arith.constant 48 : index
    %c0_12 = arith.constant 0 : index
    %11 = vector.load %arg5[%c48, %c0_12] : memref<144x288xbf16, #tpu.memory_space<vmem>>, vector<16x288xbf16>
    tpu.vector_store %arg5[%c48, %c0_12], %10 {strides = array<i32>} : memref<144x288xbf16, #tpu.memory_space<vmem>>, vector<16x288xbf16>,
    %c0_13 = arith.constant 0 : index
    %c0_14 = arith.constant 0 : index
    %c19 = arith.constant 19 : index
    %12 = vector.load %arg1[%c0_13, %c0_14, %c19] : memref<1x16x326xbf16, #tpu.memory_space<vmem>>, vector<1x16x288xbf16>
    %13 = vector.shape_cast %12 : vector<1x16x288xbf16> to vector<16x288xbf16>
    %c64 = arith.constant 64 : index
    %c0_15 = arith.constant 0 : index
    %14 = vector.load %arg5[%c64, %c0_15] : memref<144x288xbf16, #tpu.memory_space<vmem>>, vector<16x288xbf16>
    tpu.vector_store %arg5[%c64, %c0_15], %13 {strides = array<i32>} : memref<144x288xbf16, #tpu.memory_space<vmem>>, vector<16x288xbf16>,
    %c0_16 = arith.constant 0 : index
    %c0_17 = arith.constant 0 : index
    %c20 = arith.constant 20 : index
    %15 = vector.load %arg1[%c0_16, %c0_17, %c20] : memref<1x16x326xbf16, #tpu.memory_space<vmem>>, vector<1x16x288xbf16>
    %16 = vector.shape_cast %15 : vector<1x16x288xbf16> to vector<16x288xbf16>
    %c80 = arith.constant 80 : index
    %c0_18 = arith.constant 0 : index
    %17 = vector.load %arg5[%c80, %c0_18] : memref<144x288xbf16, #tpu.memory_space<vmem>>, vector<16x288xbf16>
    tpu.vector_store %arg5[%c80, %c0_18], %16 {strides = array<i32>} : memref<144x288xbf16, #tpu.memory_space<vmem>>, vector<16x288xbf16>,
    %c0_19 = arith.constant 0 : index
    %c0_20 = arith.constant 0 : index
    %c36 = arith.constant 36 : index
    %18 = vector.load %arg1[%c0_19, %c0_20, %c36] : memref<1x16x326xbf16, #tpu.memory_space<vmem>>, vector<1x16x288xbf16>
    %19 = vector.shape_cast %18 : vector<1x16x288xbf16> to vector<16x288xbf16>
    %c96 = arith.constant 96 : index
    %c0_21 = arith.constant 0 : index
    %20 = vector.load %arg5[%c96, %c0_21] : memref<144x288xbf16, #tpu.memory_space<vmem>>, vector<16x288xbf16>
    tpu.vector_store %arg5[%c96, %c0_21], %19 {strides = array<i32>} : memref<144x288xbf16, #tpu.memory_space<vmem>>, vector<16x288xbf16>,
    %c0_22 = arith.constant 0 : index
    %c0_23 = arith.constant 0 : index
    %c37 = arith.constant 37 : index
    %21 = vector.load %arg1[%c0_22, %c0_23, %c37] : memref<1x16x326xbf16, #tpu.memory_space<vmem>>, vector<1x16x288xbf16>
    %22 = vector.shape_cast %21 : vector<1x16x288xbf16> to vector<16x288xbf16>
    %c112 = arith.constant 112 : index
    %c0_24 = arith.constant 0 : index
    %23 = vector.load %arg5[%c112, %c0_24] : memref<144x288xbf16, #tpu.memory_space<vmem>>, vector<16x288xbf16>
    tpu.vector_store %arg5[%c112, %c0_24], %22 {strides = array<i32>} : memref<144x288xbf16, #tpu.memory_space<vmem>>, vector<16x288xbf16>,
    %c0_25 = arith.constant 0 : index
    %c0_26 = arith.constant 0 : index
    %c38 = arith.constant 38 : index
    %24 = vector.load %arg1[%c0_25, %c0_26, %c38] : memref<1x16x326xbf16, #tpu.memory_space<vmem>>, vector<1x16x288xbf16>
    %25 = vector.shape_cast %24 : vector<1x16x288xbf16> to vector<16x288xbf16>
    %c128 = arith.constant 128 : index
    %c0_27 = arith.constant 0 : index
    %26 = vector.load %arg5[%c128, %c0_27] : memref<144x288xbf16, #tpu.memory_space<vmem>>, vector<16x288xbf16>
    tpu.vector_store %arg5[%c128, %c0_27], %25 {strides = array<i32>} : memref<144x288xbf16, #tpu.memory_space<vmem>>, vector<16x288xbf16>,
    %c0_28 = arith.constant 0 : index
    %c0_29 = arith.constant 0 : index
    %27 = vector.load %arg2[%c0_28, %c0_29] : memref<32x144xbf16, #tpu.memory_space<vmem>>, vector<32x144xbf16>
    %c0_30 = arith.constant 0 : index
    %c0_31 = arith.constant 0 : index
    %28 = vector.load %arg5[%c0_30, %c0_31] : memref<144x288xbf16, #tpu.memory_space<vmem>>, vector<144x288xbf16>
    %cst = arith.constant dense<0.000000e+00> : vector<32x288xf32>
    %29 = tpu.matmul %27, %28, %cst {dimension_numbers = #tpu.dot_dimension_numbers<[1], [0], [0], [1], [0, 0, 1, 1], [], []>} : vector<32x144xbf16>, vector<144x288xbf16>, vector<32x288xf32> -> vector<32x288xf32>
    %c0_32 = arith.constant 0 : index
    %c0_33 = arith.constant 0 : index
    %30 = vector.load %arg3[%c0_32, %c0_33] : memref<32x1xf32, #tpu.memory_space<vmem>>, vector<32x1xf32>
    %31 = vector.broadcast %30 : vector<32x1xf32> to vector<32x288xf32>
    %32 = arith.addf %29, %31 : vector<32x288xf32>
    %cst_34 = arith.constant 0.000000e+00 : f32
    %33 = vector.broadcast %cst_34 : f32 to vector<32x288xf32>
    %34 = arith.maximumf %32, %33 : vector<32x288xf32>
    %cst_35 = arith.constant 0.000000e+00 : f32
    %35 = vector.broadcast %cst_35 : f32 to vector<32x288xf32>
    %36 = arith.minimumf %32, %35 : vector<32x288xf32>
    %cst_36 = arith.constant 2.500000e-01 : f32
    %37 = vector.broadcast %cst_36 : f32 to vector<32x288xf32>
    %38 = arith.mulf %37, %36 : vector<32x288xf32>
    %39 = arith.addf %34, %38 : vector<32x288xf32>
    %40 = arith.truncf %39 : vector<32x288xf32> to vector<32x288xbf16>
    %c0_37 = arith.constant 0 : index
    %c0_38 = arith.constant 0 : index
    %c0_39 = arith.constant 0 : index
    %41 = vector.load %arg4[%c0_37, %c0_38, %c0_39] : memref<1x32x288xbf16, #tpu.memory_space<vmem>>, vector<1x32x288xbf16>
    %42 = vector.shape_cast %41 : vector<1x32x288xbf16> to vector<32x288xbf16>
    %43 = vector.shape_cast %40 : vector<32x288xbf16> to vector<1x32x288xbf16>
    tpu.vector_store %arg4[%c0_37, %c0_38, %c0_39], %43 {strides = array<i32>} : memref<1x32x288xbf16, #tpu.memory_space<vmem>>, vector<1x32x288xbf16>,
    return
  }
  func.func @transform_0(%arg0: i32) -> (i32, i32, i32) {
    %c0_i32 = arith.constant 0 : i32
    %c0_i32_0 = arith.constant 0 : i32
    %c0_i32_1 = arith.constant 0 : i32
    return %arg0, %c0_i32, %c0_i32_0 : i32, i32, i32
  }
  func.func @transform_1(%arg0: i32) -> (i32, i32) {
    %c0_i32 = arith.constant 0 : i32
    %c0_i32_0 = arith.constant 0 : i32
    %c0_i32_1 = arith.constant 0 : i32
    return %c0_i32, %c0_i32_0 : i32, i32
  }
  func.func @transform_2(%arg0: i32) -> (i32, i32) {
    %c0_i32 = arith.constant 0 : i32
    %c0_i32_0 = arith.constant 0 : i32
    %c0_i32_1 = arith.constant 0 : i32
    return %c0_i32, %c0_i32_0 : i32, i32
  }
  func.func @transform_3(%arg0: i32) -> (i32, i32, i32) {
    %c0_i32 = arith.constant 0 : i32
    %c0_i32_0 = arith.constant 0 : i32
    %c0_i32_1 = arith.constant 0 : i32
    return %arg0, %c0_i32, %c0_i32_0 : i32, i32, i32
  }
}

module attributes {stable_mosaic.version = 11 : i64} {
  func.func @_fc_kernel(%arg0: memref<2x8192xf32, #tpu.memory_space<vmem>>, %arg1: memref<1x8192xf32, #tpu.memory_space<vmem>>, %arg2: memref<1x1xf32, #tpu.memory_space<smem>>, %arg3: memref<2x1xf32, #tpu.memory_space<vmem>>) attributes {dimension_semantics = [], scalar_prefetch = 0 : i64, scratch_operands = 0 : i64, tpu.core_type = #tpu.core_type<tc>} {
    %c0 = arith.constant 0 : index
    %c0_0 = arith.constant 0 : index
    %0 = vector.load %arg0[%c0, %c0_0] : memref<2x8192xf32, #tpu.memory_space<vmem>>, vector<2x8192xf32>
    %c0_1 = arith.constant 0 : index
    %c0_2 = arith.constant 0 : index
    %1 = vector.load %arg1[%c0_1, %c0_2] : memref<1x8192xf32, #tpu.memory_space<vmem>>, vector<1x8192xf32>
    %2 = vector.broadcast %1 : vector<1x8192xf32> to vector<2x8192xf32>
    %3 = arith.mulf %0, %2 : vector<2x8192xf32>
    %cst = arith.constant dense<0.000000e+00> : vector<2xf32>
    %4 = vector.multi_reduction <add>, %3, %cst [1] : vector<2x8192xf32> to vector<2xf32>
    %5 = vector.shape_cast %4 : vector<2xf32> to vector<2x1xf32>
    %c0_3 = arith.constant 0 : index
    %c0_4 = arith.constant 0 : index
    %6 = memref.load %arg2[%c0_3, %c0_4] : memref<1x1xf32, #tpu.memory_space<smem>>
    %7 = vector.broadcast %6 : f32 to vector<2x1xf32>
    %8 = arith.addf %5, %7 : vector<2x1xf32>
    %c0_5 = arith.constant 0 : index
    %c0_6 = arith.constant 0 : index
    %9 = vector.load %arg3[%c0_5, %c0_6] : memref<2x1xf32, #tpu.memory_space<vmem>>, vector<2x1xf32>
    tpu.vector_store %arg3[%c0_5, %c0_6], %8 {strides = array<i32>} : memref<2x1xf32, #tpu.memory_space<vmem>>, vector<2x1xf32>,
    return
  }
}

module attributes {stable_mosaic.version = 11 : i64} {
  func.func @_conv_kernel(%arg0: i32, %arg1: memref<1x16x1158xbf16, #tpu.memory_space<vmem>>, %arg2: memref<16x144xbf16, #tpu.memory_space<vmem>>, %arg3: memref<16x1xf32, #tpu.memory_space<vmem>>, %arg4: memref<1x16x1088xf32, #tpu.memory_space<vmem>>, %arg5: memref<144x1088xbf16, #tpu.memory_space<vmem>>) attributes {dimension_semantics = [#tpu.dimension_semantics<parallel>], iteration_bounds = array<i64: 2>, scalar_prefetch = 0 : i64, scratch_operands = 1 : i64, tpu.core_type = #tpu.core_type<tc>, window_params = [{transform_indices = @transform_0, window_bounds = array<i64: 1, 16, 1158>}, {pipeline_mode = #tpu.pipeline_mode<synchronous>, transform_indices = @transform_1, window_bounds = array<i64: 16, 144>}, {pipeline_mode = #tpu.pipeline_mode<synchronous>, transform_indices = @transform_2, window_bounds = array<i64: 16, 1>}, {transform_indices = @transform_3, window_bounds = array<i64: 1, 16, 1088>}]} {
    %c0 = arith.constant 0 : index
    %c0_0 = arith.constant 0 : index
    %c0_1 = arith.constant 0 : index
    %0 = vector.load %arg1[%c0, %c0_0, %c0_1] : memref<1x16x1158xbf16, #tpu.memory_space<vmem>>, vector<1x16x1088xbf16>
    %1 = vector.shape_cast %0 : vector<1x16x1088xbf16> to vector<16x1088xbf16>
    %c0_2 = arith.constant 0 : index
    %c0_3 = arith.constant 0 : index
    %2 = vector.load %arg5[%c0_2, %c0_3] : memref<144x1088xbf16, #tpu.memory_space<vmem>>, vector<16x1088xbf16>
    tpu.vector_store %arg5[%c0_2, %c0_3], %1 {strides = array<i32>} : memref<144x1088xbf16, #tpu.memory_space<vmem>>, vector<16x1088xbf16>,
    %c0_4 = arith.constant 0 : index
    %c0_5 = arith.constant 0 : index
    %c1 = arith.constant 1 : index
    %3 = vector.load %arg1[%c0_4, %c0_5, %c1] : memref<1x16x1158xbf16, #tpu.memory_space<vmem>>, vector<1x16x1088xbf16>
    %4 = vector.shape_cast %3 : vector<1x16x1088xbf16> to vector<16x1088xbf16>
    %c16 = arith.constant 16 : index
    %c0_6 = arith.constant 0 : index
    %5 = vector.load %arg5[%c16, %c0_6] : memref<144x1088xbf16, #tpu.memory_space<vmem>>, vector<16x1088xbf16>
    tpu.vector_store %arg5[%c16, %c0_6], %4 {strides = array<i32>} : memref<144x1088xbf16, #tpu.memory_space<vmem>>, vector<16x1088xbf16>,
    %c0_7 = arith.constant 0 : index
    %c0_8 = arith.constant 0 : index
    %c2 = arith.constant 2 : index
    %6 = vector.load %arg1[%c0_7, %c0_8, %c2] : memref<1x16x1158xbf16, #tpu.memory_space<vmem>>, vector<1x16x1088xbf16>
    %7 = vector.shape_cast %6 : vector<1x16x1088xbf16> to vector<16x1088xbf16>
    %c32 = arith.constant 32 : index
    %c0_9 = arith.constant 0 : index
    %8 = vector.load %arg5[%c32, %c0_9] : memref<144x1088xbf16, #tpu.memory_space<vmem>>, vector<16x1088xbf16>
    tpu.vector_store %arg5[%c32, %c0_9], %7 {strides = array<i32>} : memref<144x1088xbf16, #tpu.memory_space<vmem>>, vector<16x1088xbf16>,
    %c0_10 = arith.constant 0 : index
    %c0_11 = arith.constant 0 : index
    %c34 = arith.constant 34 : index
    %9 = vector.load %arg1[%c0_10, %c0_11, %c34] : memref<1x16x1158xbf16, #tpu.memory_space<vmem>>, vector<1x16x1088xbf16>
    %10 = vector.shape_cast %9 : vector<1x16x1088xbf16> to vector<16x1088xbf16>
    %c48 = arith.constant 48 : index
    %c0_12 = arith.constant 0 : index
    %11 = vector.load %arg5[%c48, %c0_12] : memref<144x1088xbf16, #tpu.memory_space<vmem>>, vector<16x1088xbf16>
    tpu.vector_store %arg5[%c48, %c0_12], %10 {strides = array<i32>} : memref<144x1088xbf16, #tpu.memory_space<vmem>>, vector<16x1088xbf16>,
    %c0_13 = arith.constant 0 : index
    %c0_14 = arith.constant 0 : index
    %c35 = arith.constant 35 : index
    %12 = vector.load %arg1[%c0_13, %c0_14, %c35] : memref<1x16x1158xbf16, #tpu.memory_space<vmem>>, vector<1x16x1088xbf16>
    %13 = vector.shape_cast %12 : vector<1x16x1088xbf16> to vector<16x1088xbf16>
    %c64 = arith.constant 64 : index
    %c0_15 = arith.constant 0 : index
    %14 = vector.load %arg5[%c64, %c0_15] : memref<144x1088xbf16, #tpu.memory_space<vmem>>, vector<16x1088xbf16>
    tpu.vector_store %arg5[%c64, %c0_15], %13 {strides = array<i32>} : memref<144x1088xbf16, #tpu.memory_space<vmem>>, vector<16x1088xbf16>,
    %c0_16 = arith.constant 0 : index
    %c0_17 = arith.constant 0 : index
    %c36 = arith.constant 36 : index
    %15 = vector.load %arg1[%c0_16, %c0_17, %c36] : memref<1x16x1158xbf16, #tpu.memory_space<vmem>>, vector<1x16x1088xbf16>
    %16 = vector.shape_cast %15 : vector<1x16x1088xbf16> to vector<16x1088xbf16>
    %c80 = arith.constant 80 : index
    %c0_18 = arith.constant 0 : index
    %17 = vector.load %arg5[%c80, %c0_18] : memref<144x1088xbf16, #tpu.memory_space<vmem>>, vector<16x1088xbf16>
    tpu.vector_store %arg5[%c80, %c0_18], %16 {strides = array<i32>} : memref<144x1088xbf16, #tpu.memory_space<vmem>>, vector<16x1088xbf16>,
    %c0_19 = arith.constant 0 : index
    %c0_20 = arith.constant 0 : index
    %c68 = arith.constant 68 : index
    %18 = vector.load %arg1[%c0_19, %c0_20, %c68] : memref<1x16x1158xbf16, #tpu.memory_space<vmem>>, vector<1x16x1088xbf16>
    %19 = vector.shape_cast %18 : vector<1x16x1088xbf16> to vector<16x1088xbf16>
    %c96 = arith.constant 96 : index
    %c0_21 = arith.constant 0 : index
    %20 = vector.load %arg5[%c96, %c0_21] : memref<144x1088xbf16, #tpu.memory_space<vmem>>, vector<16x1088xbf16>
    tpu.vector_store %arg5[%c96, %c0_21], %19 {strides = array<i32>} : memref<144x1088xbf16, #tpu.memory_space<vmem>>, vector<16x1088xbf16>,
    %c0_22 = arith.constant 0 : index
    %c0_23 = arith.constant 0 : index
    %c69 = arith.constant 69 : index
    %21 = vector.load %arg1[%c0_22, %c0_23, %c69] : memref<1x16x1158xbf16, #tpu.memory_space<vmem>>, vector<1x16x1088xbf16>
    %22 = vector.shape_cast %21 : vector<1x16x1088xbf16> to vector<16x1088xbf16>
    %c112 = arith.constant 112 : index
    %c0_24 = arith.constant 0 : index
    %23 = vector.load %arg5[%c112, %c0_24] : memref<144x1088xbf16, #tpu.memory_space<vmem>>, vector<16x1088xbf16>
    tpu.vector_store %arg5[%c112, %c0_24], %22 {strides = array<i32>} : memref<144x1088xbf16, #tpu.memory_space<vmem>>, vector<16x1088xbf16>,
    %c0_25 = arith.constant 0 : index
    %c0_26 = arith.constant 0 : index
    %c70 = arith.constant 70 : index
    %24 = vector.load %arg1[%c0_25, %c0_26, %c70] : memref<1x16x1158xbf16, #tpu.memory_space<vmem>>, vector<1x16x1088xbf16>
    %25 = vector.shape_cast %24 : vector<1x16x1088xbf16> to vector<16x1088xbf16>
    %c128 = arith.constant 128 : index
    %c0_27 = arith.constant 0 : index
    %26 = vector.load %arg5[%c128, %c0_27] : memref<144x1088xbf16, #tpu.memory_space<vmem>>, vector<16x1088xbf16>
    tpu.vector_store %arg5[%c128, %c0_27], %25 {strides = array<i32>} : memref<144x1088xbf16, #tpu.memory_space<vmem>>, vector<16x1088xbf16>,
    %c0_28 = arith.constant 0 : index
    %c0_29 = arith.constant 0 : index
    %27 = vector.load %arg2[%c0_28, %c0_29] : memref<16x144xbf16, #tpu.memory_space<vmem>>, vector<16x144xbf16>
    %c0_30 = arith.constant 0 : index
    %c0_31 = arith.constant 0 : index
    %28 = vector.load %arg5[%c0_30, %c0_31] : memref<144x1088xbf16, #tpu.memory_space<vmem>>, vector<144x1088xbf16>
    %cst = arith.constant dense<0.000000e+00> : vector<16x1088xf32>
    %29 = tpu.matmul %27, %28, %cst {dimension_numbers = #tpu.dot_dimension_numbers<[1], [0], [0], [1], [0, 0, 1, 1], [], []>} : vector<16x144xbf16>, vector<144x1088xbf16>, vector<16x1088xf32> -> vector<16x1088xf32>
    %c0_32 = arith.constant 0 : index
    %c0_33 = arith.constant 0 : index
    %30 = vector.load %arg3[%c0_32, %c0_33] : memref<16x1xf32, #tpu.memory_space<vmem>>, vector<16x1xf32>
    %31 = vector.broadcast %30 : vector<16x1xf32> to vector<16x1088xf32>
    %32 = arith.addf %29, %31 : vector<16x1088xf32>
    %cst_34 = arith.constant 0.000000e+00 : f32
    %33 = vector.broadcast %cst_34 : f32 to vector<16x1088xf32>
    %34 = arith.maximumf %32, %33 : vector<16x1088xf32>
    %c0_35 = arith.constant 0 : index
    %c0_36 = arith.constant 0 : index
    %c0_37 = arith.constant 0 : index
    %35 = vector.load %arg4[%c0_35, %c0_36, %c0_37] : memref<1x16x1088xf32, #tpu.memory_space<vmem>>, vector<1x16x1088xf32>
    %36 = vector.shape_cast %35 : vector<1x16x1088xf32> to vector<16x1088xf32>
    %37 = vector.shape_cast %34 : vector<16x1088xf32> to vector<1x16x1088xf32>
    tpu.vector_store %arg4[%c0_35, %c0_36, %c0_37], %37 {strides = array<i32>} : memref<1x16x1088xf32, #tpu.memory_space<vmem>>, vector<1x16x1088xf32>,
    return
  }
  func.func @transform_0(%arg0: i32) -> (i32, i32, i32) {
    %c0_i32 = arith.constant 0 : i32
    %c0_i32_0 = arith.constant 0 : i32
    %c0_i32_1 = arith.constant 0 : i32
    return %arg0, %c0_i32, %c0_i32_0 : i32, i32, i32
  }
  func.func @transform_1(%arg0: i32) -> (i32, i32) {
    %c0_i32 = arith.constant 0 : i32
    %c0_i32_0 = arith.constant 0 : i32
    %c0_i32_1 = arith.constant 0 : i32
    return %c0_i32, %c0_i32_0 : i32, i32
  }
  func.func @transform_2(%arg0: i32) -> (i32, i32) {
    %c0_i32 = arith.constant 0 : i32
    %c0_i32_0 = arith.constant 0 : i32
    %c0_i32_1 = arith.constant 0 : i32
    return %c0_i32, %c0_i32_0 : i32, i32
  }
  func.func @transform_3(%arg0: i32) -> (i32, i32, i32) {
    %c0_i32 = arith.constant 0 : i32
    %c0_i32_0 = arith.constant 0 : i32
    %c0_i32_1 = arith.constant 0 : i32
    return %arg0, %c0_i32, %c0_i32_0 : i32, i32, i32
  }
}

module attributes {stable_mosaic.version = 11 : i64} {
  func.func @_conv_kernel(%arg0: i32, %arg1: memref<1x16x1158xbf16, #tpu.memory_space<vmem>>, %arg2: memref<3x144xbf16, #tpu.memory_space<vmem>>, %arg3: memref<3x1xf32, #tpu.memory_space<vmem>>, %arg4: memref<1x3x1088xf32, #tpu.memory_space<vmem>>, %arg5: memref<144x1088xbf16, #tpu.memory_space<vmem>>) attributes {dimension_semantics = [#tpu.dimension_semantics<parallel>], iteration_bounds = array<i64: 2>, scalar_prefetch = 0 : i64, scratch_operands = 1 : i64, tpu.core_type = #tpu.core_type<tc>, window_params = [{transform_indices = @transform_0, window_bounds = array<i64: 1, 16, 1158>}, {pipeline_mode = #tpu.pipeline_mode<synchronous>, transform_indices = @transform_1, window_bounds = array<i64: 3, 144>}, {pipeline_mode = #tpu.pipeline_mode<synchronous>, transform_indices = @transform_2, window_bounds = array<i64: 3, 1>}, {transform_indices = @transform_3, window_bounds = array<i64: 1, 3, 1088>}]} {
    %c0 = arith.constant 0 : index
    %c0_0 = arith.constant 0 : index
    %c0_1 = arith.constant 0 : index
    %0 = vector.load %arg1[%c0, %c0_0, %c0_1] : memref<1x16x1158xbf16, #tpu.memory_space<vmem>>, vector<1x16x1088xbf16>
    %1 = vector.shape_cast %0 : vector<1x16x1088xbf16> to vector<16x1088xbf16>
    %c0_2 = arith.constant 0 : index
    %c0_3 = arith.constant 0 : index
    %2 = vector.load %arg5[%c0_2, %c0_3] : memref<144x1088xbf16, #tpu.memory_space<vmem>>, vector<16x1088xbf16>
    tpu.vector_store %arg5[%c0_2, %c0_3], %1 {strides = array<i32>} : memref<144x1088xbf16, #tpu.memory_space<vmem>>, vector<16x1088xbf16>,
    %c0_4 = arith.constant 0 : index
    %c0_5 = arith.constant 0 : index
    %c1 = arith.constant 1 : index
    %3 = vector.load %arg1[%c0_4, %c0_5, %c1] : memref<1x16x1158xbf16, #tpu.memory_space<vmem>>, vector<1x16x1088xbf16>
    %4 = vector.shape_cast %3 : vector<1x16x1088xbf16> to vector<16x1088xbf16>
    %c16 = arith.constant 16 : index
    %c0_6 = arith.constant 0 : index
    %5 = vector.load %arg5[%c16, %c0_6] : memref<144x1088xbf16, #tpu.memory_space<vmem>>, vector<16x1088xbf16>
    tpu.vector_store %arg5[%c16, %c0_6], %4 {strides = array<i32>} : memref<144x1088xbf16, #tpu.memory_space<vmem>>, vector<16x1088xbf16>,
    %c0_7 = arith.constant 0 : index
    %c0_8 = arith.constant 0 : index
    %c2 = arith.constant 2 : index
    %6 = vector.load %arg1[%c0_7, %c0_8, %c2] : memref<1x16x1158xbf16, #tpu.memory_space<vmem>>, vector<1x16x1088xbf16>
    %7 = vector.shape_cast %6 : vector<1x16x1088xbf16> to vector<16x1088xbf16>
    %c32 = arith.constant 32 : index
    %c0_9 = arith.constant 0 : index
    %8 = vector.load %arg5[%c32, %c0_9] : memref<144x1088xbf16, #tpu.memory_space<vmem>>, vector<16x1088xbf16>
    tpu.vector_store %arg5[%c32, %c0_9], %7 {strides = array<i32>} : memref<144x1088xbf16, #tpu.memory_space<vmem>>, vector<16x1088xbf16>,
    %c0_10 = arith.constant 0 : index
    %c0_11 = arith.constant 0 : index
    %c34 = arith.constant 34 : index
    %9 = vector.load %arg1[%c0_10, %c0_11, %c34] : memref<1x16x1158xbf16, #tpu.memory_space<vmem>>, vector<1x16x1088xbf16>
    %10 = vector.shape_cast %9 : vector<1x16x1088xbf16> to vector<16x1088xbf16>
    %c48 = arith.constant 48 : index
    %c0_12 = arith.constant 0 : index
    %11 = vector.load %arg5[%c48, %c0_12] : memref<144x1088xbf16, #tpu.memory_space<vmem>>, vector<16x1088xbf16>
    tpu.vector_store %arg5[%c48, %c0_12], %10 {strides = array<i32>} : memref<144x1088xbf16, #tpu.memory_space<vmem>>, vector<16x1088xbf16>,
    %c0_13 = arith.constant 0 : index
    %c0_14 = arith.constant 0 : index
    %c35 = arith.constant 35 : index
    %12 = vector.load %arg1[%c0_13, %c0_14, %c35] : memref<1x16x1158xbf16, #tpu.memory_space<vmem>>, vector<1x16x1088xbf16>
    %13 = vector.shape_cast %12 : vector<1x16x1088xbf16> to vector<16x1088xbf16>
    %c64 = arith.constant 64 : index
    %c0_15 = arith.constant 0 : index
    %14 = vector.load %arg5[%c64, %c0_15] : memref<144x1088xbf16, #tpu.memory_space<vmem>>, vector<16x1088xbf16>
    tpu.vector_store %arg5[%c64, %c0_15], %13 {strides = array<i32>} : memref<144x1088xbf16, #tpu.memory_space<vmem>>, vector<16x1088xbf16>,
    %c0_16 = arith.constant 0 : index
    %c0_17 = arith.constant 0 : index
    %c36 = arith.constant 36 : index
    %15 = vector.load %arg1[%c0_16, %c0_17, %c36] : memref<1x16x1158xbf16, #tpu.memory_space<vmem>>, vector<1x16x1088xbf16>
    %16 = vector.shape_cast %15 : vector<1x16x1088xbf16> to vector<16x1088xbf16>
    %c80 = arith.constant 80 : index
    %c0_18 = arith.constant 0 : index
    %17 = vector.load %arg5[%c80, %c0_18] : memref<144x1088xbf16, #tpu.memory_space<vmem>>, vector<16x1088xbf16>
    tpu.vector_store %arg5[%c80, %c0_18], %16 {strides = array<i32>} : memref<144x1088xbf16, #tpu.memory_space<vmem>>, vector<16x1088xbf16>,
    %c0_19 = arith.constant 0 : index
    %c0_20 = arith.constant 0 : index
    %c68 = arith.constant 68 : index
    %18 = vector.load %arg1[%c0_19, %c0_20, %c68] : memref<1x16x1158xbf16, #tpu.memory_space<vmem>>, vector<1x16x1088xbf16>
    %19 = vector.shape_cast %18 : vector<1x16x1088xbf16> to vector<16x1088xbf16>
    %c96 = arith.constant 96 : index
    %c0_21 = arith.constant 0 : index
    %20 = vector.load %arg5[%c96, %c0_21] : memref<144x1088xbf16, #tpu.memory_space<vmem>>, vector<16x1088xbf16>
    tpu.vector_store %arg5[%c96, %c0_21], %19 {strides = array<i32>} : memref<144x1088xbf16, #tpu.memory_space<vmem>>, vector<16x1088xbf16>,
    %c0_22 = arith.constant 0 : index
    %c0_23 = arith.constant 0 : index
    %c69 = arith.constant 69 : index
    %21 = vector.load %arg1[%c0_22, %c0_23, %c69] : memref<1x16x1158xbf16, #tpu.memory_space<vmem>>, vector<1x16x1088xbf16>
    %22 = vector.shape_cast %21 : vector<1x16x1088xbf16> to vector<16x1088xbf16>
    %c112 = arith.constant 112 : index
    %c0_24 = arith.constant 0 : index
    %23 = vector.load %arg5[%c112, %c0_24] : memref<144x1088xbf16, #tpu.memory_space<vmem>>, vector<16x1088xbf16>
    tpu.vector_store %arg5[%c112, %c0_24], %22 {strides = array<i32>} : memref<144x1088xbf16, #tpu.memory_space<vmem>>, vector<16x1088xbf16>,
    %c0_25 = arith.constant 0 : index
    %c0_26 = arith.constant 0 : index
    %c70 = arith.constant 70 : index
    %24 = vector.load %arg1[%c0_25, %c0_26, %c70] : memref<1x16x1158xbf16, #tpu.memory_space<vmem>>, vector<1x16x1088xbf16>
    %25 = vector.shape_cast %24 : vector<1x16x1088xbf16> to vector<16x1088xbf16>
    %c128 = arith.constant 128 : index
    %c0_27 = arith.constant 0 : index
    %26 = vector.load %arg5[%c128, %c0_27] : memref<144x1088xbf16, #tpu.memory_space<vmem>>, vector<16x1088xbf16>
    tpu.vector_store %arg5[%c128, %c0_27], %25 {strides = array<i32>} : memref<144x1088xbf16, #tpu.memory_space<vmem>>, vector<16x1088xbf16>,
    %c0_28 = arith.constant 0 : index
    %c0_29 = arith.constant 0 : index
    %27 = vector.load %arg2[%c0_28, %c0_29] : memref<3x144xbf16, #tpu.memory_space<vmem>>, vector<3x144xbf16>
    %c0_30 = arith.constant 0 : index
    %c0_31 = arith.constant 0 : index
    %28 = vector.load %arg5[%c0_30, %c0_31] : memref<144x1088xbf16, #tpu.memory_space<vmem>>, vector<144x1088xbf16>
    %cst = arith.constant dense<0.000000e+00> : vector<3x1088xf32>
    %29 = tpu.matmul %27, %28, %cst {dimension_numbers = #tpu.dot_dimension_numbers<[1], [0], [0], [1], [0, 0, 1, 1], [], []>} : vector<3x144xbf16>, vector<144x1088xbf16>, vector<3x1088xf32> -> vector<3x1088xf32>
    %c0_32 = arith.constant 0 : index
    %c0_33 = arith.constant 0 : index
    %30 = vector.load %arg3[%c0_32, %c0_33] : memref<3x1xf32, #tpu.memory_space<vmem>>, vector<3x1xf32>
    %31 = vector.broadcast %30 : vector<3x1xf32> to vector<3x1088xf32>
    %32 = arith.addf %29, %31 : vector<3x1088xf32>
    %33 = math.tanh %32 : vector<3x1088xf32>
    %c0_34 = arith.constant 0 : index
    %c0_35 = arith.constant 0 : index
    %c0_36 = arith.constant 0 : index
    %34 = vector.load %arg4[%c0_34, %c0_35, %c0_36] : memref<1x3x1088xf32, #tpu.memory_space<vmem>>, vector<1x3x1088xf32>
    %35 = vector.shape_cast %34 : vector<1x3x1088xf32> to vector<3x1088xf32>
    %36 = vector.shape_cast %33 : vector<3x1088xf32> to vector<1x3x1088xf32>
    tpu.vector_store %arg4[%c0_34, %c0_35, %c0_36], %36 {strides = array<i32>} : memref<1x3x1088xf32, #tpu.memory_space<vmem>>, vector<1x3x1088xf32>,
    return
  }
  func.func @transform_0(%arg0: i32) -> (i32, i32, i32) {
    %c0_i32 = arith.constant 0 : i32
    %c0_i32_0 = arith.constant 0 : i32
    %c0_i32_1 = arith.constant 0 : i32
    return %arg0, %c0_i32, %c0_i32_0 : i32, i32, i32
  }
  func.func @transform_1(%arg0: i32) -> (i32, i32) {
    %c0_i32 = arith.constant 0 : i32
    %c0_i32_0 = arith.constant 0 : i32
    %c0_i32_1 = arith.constant 0 : i32
    return %c0_i32, %c0_i32_0 : i32, i32
  }
  func.func @transform_2(%arg0: i32) -> (i32, i32) {
    %c0_i32 = arith.constant 0 : i32
    %c0_i32_0 = arith.constant 0 : i32
    %c0_i32_1 = arith.constant 0 : i32
    return %c0_i32, %c0_i32_0 : i32, i32
  }
  func.func @transform_3(%arg0: i32) -> (i32, i32, i32) {
    %c0_i32 = arith.constant 0 : i32
    %c0_i32_0 = arith.constant 0 : i32
    %c0_i32_1 = arith.constant 0 : i32
    return %arg0, %c0_i32, %c0_i32_0 : i32, i32, i32
  }
}

module attributes {stable_mosaic.version = 11 : i64} {
  func.func @_loss_kernel(%arg0: i32, %arg1: memref<48x128xf32, #tpu.memory_space<vmem>>, %arg2: memref<48x128xf32, #tpu.memory_space<vmem>>, %arg3: memref<256x128xf32, #tpu.memory_space<vmem>>, %arg4: memref<256x128xf32, #tpu.memory_space<vmem>>, %arg5: memref<2x1xf32, #tpu.memory_space<vmem>>, %arg6: memref<2x1xf32, #tpu.memory_space<vmem>>, %arg7: memref<1x1xf32, #tpu.memory_space<smem>>, %arg8: memref<1x1xf32, #tpu.memory_space<smem>>, %arg9: memref<2x128xf32, #tpu.memory_space<vmem>>) attributes {dimension_semantics = [#tpu.dimension_semantics<arbitrary>], iteration_bounds = array<i64: 1>, scalar_prefetch = 0 : i64, scratch_operands = 1 : i64, tpu.core_type = #tpu.core_type<tc>, window_params = [{transform_indices = @transform_0, window_bounds = array<i64: 48, 128>}, {transform_indices = @transform_1, window_bounds = array<i64: 48, 128>}, {transform_indices = @transform_2, window_bounds = array<i64: 256, 128>}, {transform_indices = @transform_3, window_bounds = array<i64: 256, 128>}, {pipeline_mode = #tpu.pipeline_mode<synchronous>, transform_indices = @transform_4, window_bounds = array<i64: 2, 1>}, {pipeline_mode = #tpu.pipeline_mode<synchronous>, transform_indices = @transform_5, window_bounds = array<i64: 2, 1>}, {transform_indices = @transform_6, window_bounds = array<i64: 1, 1>}, {transform_indices = @transform_7, window_bounds = array<i64: 1, 1>}]} {
    %c0_i32 = arith.constant 0 : i32
    %0 = arith.cmpi eq, %arg0, %c0_i32 : i32
    %1 = arith.extui %0 : i1 to i32
    %c0_i32_0 = arith.constant 0 : i32
    %2 = arith.cmpi ne, %1, %c0_i32_0 : i32
    scf.if %2 {
      %cst_18 = arith.constant 0.000000e+00 : f32
      %24 = vector.broadcast %cst_18 : f32 to vector<2x128xf32>
      %c0_19 = arith.constant 0 : index
      %c0_20 = arith.constant 0 : index
      %25 = vector.load %arg9[%c0_19, %c0_20] : memref<2x128xf32, #tpu.memory_space<vmem>>, vector<2x128xf32>
      tpu.vector_store %arg9[%c0_19, %c0_20], %24 {strides = array<i32>} : memref<2x128xf32, #tpu.memory_space<vmem>>, vector<2x128xf32>,
    } else {
    }
    %c0 = arith.constant 0 : index
    %c0_1 = arith.constant 0 : index
    %3 = vector.load %arg1[%c0, %c0_1] : memref<48x128xf32, #tpu.memory_space<vmem>>, vector<48x128xf32>
    %c0_2 = arith.constant 0 : index
    %c0_3 = arith.constant 0 : index
    %4 = vector.load %arg2[%c0_2, %c0_3] : memref<48x128xf32, #tpu.memory_space<vmem>>, vector<48x128xf32>
    %5 = arith.subf %3, %4 : vector<48x128xf32>
    %c0_4 = arith.constant 0 : index
    %c0_5 = arith.constant 0 : index
    %6 = vector.load %arg3[%c0_4, %c0_5] : memref<256x128xf32, #tpu.memory_space<vmem>>, vector<256x128xf32>
    %c0_6 = arith.constant 0 : index
    %c0_7 = arith.constant 0 : index
    %7 = vector.load %arg4[%c0_6, %c0_7] : memref<256x128xf32, #tpu.memory_space<vmem>>, vector<256x128xf32>
    %8 = arith.subf %6, %7 : vector<256x128xf32>
    %c0_8 = arith.constant 0 : index
    %c0_9 = arith.constant 0 : index
    %9 = vector.load %arg9[%c0_8, %c0_9] : memref<2x128xf32, #tpu.memory_space<vmem>>, vector<1x128xf32>
    %10 = arith.mulf %5, %5 : vector<48x128xf32>
    %cst = arith.constant dense<0.000000e+00> : vector<128xf32>
    %11 = vector.multi_reduction <add>, %10, %cst [0] : vector<48x128xf32> to vector<128xf32>
    %12 = vector.shape_cast %11 : vector<128xf32> to vector<1x128xf32>
    %13 = arith.addf %9, %12 : vector<1x128xf32>
    %c0_10 = arith.constant 0 : index
    %c0_11 = arith.constant 0 : index
    %14 = vector.load %arg9[%c0_10, %c0_11] : memref<2x128xf32, #tpu.memory_space<vmem>>, vector<1x128xf32>
    tpu.vector_store %arg9[%c0_10, %c0_11], %13 {strides = array<i32>} : memref<2x128xf32, #tpu.memory_space<vmem>>, vector<1x128xf32>,
    %c1 = arith.constant 1 : index
    %c0_12 = arith.constant 0 : index
    %15 = vector.load %arg9[%c1, %c0_12] : memref<2x128xf32, #tpu.memory_space<vmem>>, vector<1x128xf32>
    %16 = arith.mulf %8, %8 : vector<256x128xf32>
    %cst_13 = arith.constant dense<0.000000e+00> : vector<128xf32>
    %17 = vector.multi_reduction <add>, %16, %cst_13 [0] : vector<256x128xf32> to vector<128xf32>
    %18 = vector.shape_cast %17 : vector<128xf32> to vector<1x128xf32>
    %19 = arith.addf %15, %18 : vector<1x128xf32>
    %c1_14 = arith.constant 1 : index
    %c0_15 = arith.constant 0 : index
    %20 = vector.load %arg9[%c1_14, %c0_15] : memref<2x128xf32, #tpu.memory_space<vmem>>, vector<1x128xf32>
    tpu.vector_store %arg9[%c1_14, %c0_15], %19 {strides = array<i32>} : memref<2x128xf32, #tpu.memory_space<vmem>>, vector<1x128xf32>,
    %c0_i32_16 = arith.constant 0 : i32
    %21 = arith.cmpi eq, %arg0, %c0_i32_16 : i32
    %22 = arith.extui %21 : i1 to i32
    %c0_i32_17 = arith.constant 0 : i32
    %23 = arith.cmpi ne, %22, %c0_i32_17 : i32
    scf.if %23 {
      %c0_18 = arith.constant 0 : index
      %c0_19 = arith.constant 0 : index
      %24 = vector.load %arg5[%c0_18, %c0_19] : memref<2x1xf32, #tpu.memory_space<vmem>>, vector<2x1xf32>
      %cst_20 = arith.constant 0.000000e+00 : f32
      %25 = vector.broadcast %cst_20 : f32 to vector<2x1xf32>
      %26 = arith.maximumf %24, %25 : vector<2x1xf32>
      %cst_21 = arith.constant 1.000000e+00 : f32
      %27 = vector.broadcast %cst_21 : f32 to vector<2x1xf32>
      %28 = arith.mulf %24, %27 : vector<2x1xf32>
      %29 = arith.subf %26, %28 : vector<2x1xf32>
      %30 = math.absf %24 : vector<2x1xf32>
      %cst_22 = arith.constant 0.000000e+00 : f32
      %31 = vector.broadcast %cst_22 : f32 to vector<2x1xf32>
      %32 = arith.subf %31, %30 : vector<2x1xf32>
      %33 = math.exp %32 : vector<2x1xf32>
      %34 = math.log1p %33 : vector<2x1xf32>
      %35 = arith.addf %29, %34 : vector<2x1xf32>
      %36 = vector.shape_cast %35 : vector<2x1xf32> to vector<1x2x1xf32>
      %cst_23 = arith.constant dense<0.000000e+00> : vector<1xf32>
      %37 = vector.multi_reduction <add>, %36, %cst_23 [1, 2] : vector<1x2x1xf32> to vector<1xf32>
      %38 = vector.shape_cast %37 : vector<1xf32> to vector<1x1x1xf32>
      %39 = vector.extract %38[0, 0, 0] : f32 from vector<1x1x1xf32>
      %cst_24 = arith.constant 5.000000e-01 : f32
      %40 = arith.mulf %39, %cst_24 : f32
      %c0_25 = arith.constant 0 : index
      %c0_26 = arith.constant 0 : index
      %41 = vector.load %arg6[%c0_25, %c0_26] : memref<2x1xf32, #tpu.memory_space<vmem>>, vector<2x1xf32>
      %cst_27 = arith.constant 0.000000e+00 : f32
      %42 = vector.broadcast %cst_27 : f32 to vector<2x1xf32>
      %43 = arith.maximumf %41, %42 : vector<2x1xf32>
      %cst_28 = arith.constant 0.000000e+00 : f32
      %44 = vector.broadcast %cst_28 : f32 to vector<2x1xf32>
      %45 = arith.mulf %41, %44 : vector<2x1xf32>
      %46 = arith.subf %43, %45 : vector<2x1xf32>
      %47 = math.absf %41 : vector<2x1xf32>
      %cst_29 = arith.constant 0.000000e+00 : f32
      %48 = vector.broadcast %cst_29 : f32 to vector<2x1xf32>
      %49 = arith.subf %48, %47 : vector<2x1xf32>
      %50 = math.exp %49 : vector<2x1xf32>
      %51 = math.log1p %50 : vector<2x1xf32>
      %52 = arith.addf %46, %51 : vector<2x1xf32>
      %53 = vector.shape_cast %52 : vector<2x1xf32> to vector<1x2x1xf32>
      %cst_30 = arith.constant dense<0.000000e+00> : vector<1xf32>
      %54 = vector.multi_reduction <add>, %53, %cst_30 [1, 2] : vector<1x2x1xf32> to vector<1xf32>
      %55 = vector.shape_cast %54 : vector<1xf32> to vector<1x1x1xf32>
      %56 = vector.extract %55[0, 0, 0] : f32 from vector<1x1x1xf32>
      %cst_31 = arith.constant 5.000000e-01 : f32
      %57 = arith.mulf %56, %cst_31 : f32
      %c0_32 = arith.constant 0 : index
      %c0_33 = arith.constant 0 : index
      %58 = vector.load %arg9[%c0_32, %c0_33] : memref<2x128xf32, #tpu.memory_space<vmem>>, vector<1x128xf32>
      %59 = vector.shape_cast %58 : vector<1x128xf32> to vector<1x1x128xf32>
      %cst_34 = arith.constant dense<0.000000e+00> : vector<1xf32>
      %60 = vector.multi_reduction <add>, %59, %cst_34 [1, 2] : vector<1x1x128xf32> to vector<1xf32>
      %61 = vector.shape_cast %60 : vector<1xf32> to vector<1x1x1xf32>
      %62 = vector.extract %61[0, 0, 0] : f32 from vector<1x1x1xf32>
      %cst_35 = arith.constant 1.62760422E-4 : f32
      %63 = arith.mulf %62, %cst_35 : f32
      %c1_36 = arith.constant 1 : index
      %c0_37 = arith.constant 0 : index
      %64 = vector.load %arg9[%c1_36, %c0_37] : memref<2x128xf32, #tpu.memory_space<vmem>>, vector<1x128xf32>
      %65 = vector.shape_cast %64 : vector<1x128xf32> to vector<1x1x128xf32>
      %cst_38 = arith.constant dense<0.000000e+00> : vector<1xf32>
      %66 = vector.multi_reduction <add>, %65, %cst_38 [1, 2] : vector<1x1x128xf32> to vector<1xf32>
      %67 = vector.shape_cast %66 : vector<1xf32> to vector<1x1x1xf32>
      %68 = vector.extract %67[0, 0, 0] : f32 from vector<1x1x1xf32>
      %cst_39 = arith.constant 3.05175781E-5 : f32
      %69 = arith.mulf %68, %cst_39 : f32
      %cst_40 = arith.constant 1.000000e-03 : f32
      %70 = arith.mulf %cst_40, %40 : f32
      %cst_41 = arith.constant 6.000000e-03 : f32
      %71 = arith.mulf %cst_41, %69 : f32
      %72 = arith.addf %70, %71 : f32
      %73 = arith.addf %72, %63 : f32
      %c0_42 = arith.constant 0 : index
      %c0_43 = arith.constant 0 : index
      %74 = memref.load %arg7[%c0_42, %c0_43] : memref<1x1xf32, #tpu.memory_space<smem>>
      memref.store %73, %arg7[%c0_42, %c0_43] : memref<1x1xf32, #tpu.memory_space<smem>>
      %75 = arith.addf %57, %40 : f32
      %cst_44 = arith.constant 5.000000e-01 : f32
      %76 = arith.mulf %cst_44, %75 : f32
      %c0_45 = arith.constant 0 : index
      %c0_46 = arith.constant 0 : index
      %77 = memref.load %arg8[%c0_45, %c0_46] : memref<1x1xf32, #tpu.memory_space<smem>>
      memref.store %76, %arg8[%c0_45, %c0_46] : memref<1x1xf32, #tpu.memory_space<smem>>
    } else {
    }
    return
  }
  func.func @transform_0(%arg0: i32) -> (i32, i32) {
    %c0_i32 = arith.constant 0 : i32
    %c0_i32_0 = arith.constant 0 : i32
    return %arg0, %c0_i32 : i32, i32
  }
  func.func @transform_1(%arg0: i32) -> (i32, i32) {
    %c0_i32 = arith.constant 0 : i32
    %c0_i32_0 = arith.constant 0 : i32
    return %arg0, %c0_i32 : i32, i32
  }
  func.func @transform_2(%arg0: i32) -> (i32, i32) {
    %c0_i32 = arith.constant 0 : i32
    %c0_i32_0 = arith.constant 0 : i32
    return %arg0, %c0_i32 : i32, i32
  }
  func.func @transform_3(%arg0: i32) -> (i32, i32) {
    %c0_i32 = arith.constant 0 : i32
    %c0_i32_0 = arith.constant 0 : i32
    return %arg0, %c0_i32 : i32, i32
  }
  func.func @transform_4(%arg0: i32) -> (i32, i32) {
    %c0_i32 = arith.constant 0 : i32
    %c0_i32_0 = arith.constant 0 : i32
    %c0_i32_1 = arith.constant 0 : i32
    return %c0_i32, %c0_i32_0 : i32, i32
  }
  func.func @transform_5(%arg0: i32) -> (i32, i32) {
    %c0_i32 = arith.constant 0 : i32
    %c0_i32_0 = arith.constant 0 : i32
    %c0_i32_1 = arith.constant 0 : i32
    return %c0_i32, %c0_i32_0 : i32, i32
  }
  func.func @transform_6(%arg0: i32) -> (i32, i32) {
    %c0_i32 = arith.constant 0 : i32
    %c0_i32_0 = arith.constant 0 : i32
    %c0_i32_1 = arith.constant 0 : i32
    return %c0_i32, %c0_i32_0 : i32, i32
  }
  func.func @transform_7(%arg0: i32) -> (i32, i32) {
    %c0_i32 = arith.constant 0 : i32
    %c0_i32_0 = arith.constant 0 : i32
    %c0_i32_1 = arith.constant 0 : i32
    return %c0_i32, %c0_i32_0 : i32, i32
  }
}

</mosaic_0001>

<bundles_post_ra>
// kernel: loss_forward.18
= control target key start
LH: loop header
LB: loop body
LE: loop exit
PB: predicated region body
PF: predicated region fallthrough
CT: control target
= control target key end

     0   :  { %vm17_vm0 = vcmask 1043456   ;;  %vm18_vm1 = vcmask 621572   ;;  %s403_s16 = smov 107   ;;  %s404_s17 = smov 108   ;;  %vm279_vm3 = vcmask 130048   ;;  %v411_v5 = vmov 0   ;;  %s495_s0 = inlined_call_operand.vmem [shape: bf16[1,16,226], index: 0, kind: input, shape index: {}]   ;;  %s496_s1 = inlined_call_operand.vmem [shape: bf16[8,144], index: 1, kind: input, shape index: {}]   ;;  %s497_s2 = inlined_call_operand.vmem [shape: f32[8,1], index: 2, kind: input, shape index: {}]   ;;  %s498_s3 = inlined_call_operand.vmem [shape: bf16[1,8,204], index: 3, kind: output, shape index: {}]  }
   0x1   :  { %v124_v0 = vld [vmem:[%s495_s0] sm:$0xff]  ;;  %v125_v1 = vld [vmem:[%s495_s0 + $0x8] sm:$0xff]  ;;  %vm438_vm2 = vmor %vm18_vm1, %vm17_vm0  ;;  %s405_s18 = smov 116   ;;  %s406_s0 = smov 117   ;;  %377 = vset.pattern.permute.xlu0 %v411_v5  ;;  %vm134_vm4 = vcmask 875520   ;;  %vm117_vm5 = vcmask 883712  }
   0x2   :  { %128 = vrot.lane.b32.xlu0 %v124_v0, %s403_s16  ;;  %111 = vrot.lane.b32.xlu1 %v124_v0, %s404_s17  ;;  %20 = vst.msk [vmem:[#allocation2] sm:$0xff] %vm438_vm2, %v124_v0  ;;  %21 = vst.msk [vmem:[#allocation2 + $0x8] sm:$0xff] %vm438_vm2, %v125_v1  ;;  %s407_s19 = smov 118   ;;  %s408_s20 = smov 126   ;;  %v449_v3 = vld [vmem:[%s496_s1] sm:$0xff]  ;;  %vm100_vm6 = vcmask 949248  }
   0x3   :  { %s409_s21 = smov 127   ;;  %s410_s22 = smov 106   ;;  %v346_v4 = vcombine.high %v449_v3, %v449_v3  ;;  %v177_v6 = vld [vmem:[%s497_s2] sm:$0xff]  ;;  %vm83_vm7 = vcmask 957440   ;;  %vm66_vm8 = vcmask 965632   ;;  %vm49_vm9 = vcmask 1031168  }
   0x4   :  { %vm32_vm10 = vcmask 1039360   ;;  %vm151_vm11 = vcmask 867328  }
   0x5   :  { %365 = vmatprep.mubr.msk.bf16.mxu0 %vm279_vm3, %v346_v4 }
   0x6   :  { %130 = vrot.lane.b32.xlu0 %v125_v1, %s403_s16  ;;  %113 = vrot.lane.b32.xlu1 %v125_v1, %s404_s17 }
   0xa   :  { %96 = vrot.lane.b32.xlu1 %v125_v1, %s405_s18  ;;  %94 = vrot.lane.b32.xlu0 %v124_v0, %s405_s18 }
   0xe   :  { %79 = vrot.lane.b32.xlu1 %v125_v1, %s406_s0  ;;  %77 = vrot.lane.b32.xlu0 %v124_v0, %s406_s0 }
  0x12   :  { %62 = vrot.lane.b32.xlu1 %v125_v1, %s407_s19  ;;  %60 = vrot.lane.b32.xlu0 %v124_v0, %s407_s19 }
  0x16   :  { %45 = vrot.lane.b32.xlu1 %v125_v1, %s408_s20  ;;  %43 = vrot.lane.b32.xlu0 %v124_v0, %s408_s20 }
  0x1a   :  { %28 = vrot.lane.b32.xlu1 %v125_v1, %s409_s21  ;;  %26 = vrot.lane.b32.xlu0 %v124_v0, %s409_s21 }
  0x1e   :  { %147 = vrot.lane.b32.xlu1 %v125_v1, %s410_s22  ;;  %145 = vrot.lane.b32.xlu0 %v124_v0, %s410_s22 }
  0x22   :  { %180 = vperm.xlu0 %377, %v177_v6  }
  0x74   :  { %v129_v7 = vpop.permute.xlu0 %128  ;;  %v112_v8 = vpop.permute.xlu1 %111 }
  0x75   :  { %v132_v9 = vrot.slane %v129_v7, 4  ;;  %v115_v10 = vrot.slane %v112_v8, 4 }
  0x77   :  { %v135_v11 = vsel %vm134_vm4, %v129_v7, %v132_v9  ;;  %v118_v12 = vsel %vm117_vm5, %v112_v8, %v115_v10 }
  0x78   :  { %139 = vst.msk [vmem:[#allocation2 + $0x70] sm:$0xff] %vm438_vm2, %v135_v11  ;;  %122 = vst.msk [vmem:[#allocation2 + $0x60] sm:$0xff] %vm438_vm2, %v118_v12  ;;  %v131_v13 = vpop.permute.xlu0 %130  ;;  %v114_v14 = vpop.permute.xlu1 %113 }
  0x79   :  { %v133_v15 = vrot.slane %v131_v13, 4  ;;  %v116_v16 = vrot.slane %v114_v14, 4 }
  0x7b   :  { %v136_v17 = vsel %vm134_vm4, %v131_v13, %v133_v15  ;;  %v119_v18 = vsel %vm117_vm5, %v114_v14, %v116_v16  ;;  %v395_v14 = vld [vmem:[#allocation2 + $0x4] ss:$8 sps:$4 sm:$0xff]   ;;  %v397_v16 = vld [vmem:[#allocation2] ss:$8 sps:$4 sm:$0xff]  }
  0x7c   :  { %140 = vst.msk [vmem:[#allocation2 + $0x78] sm:$0xff] %vm438_vm2, %v136_v17  ;;  %123 = vst.msk [vmem:[#allocation2 + $0x68] sm:$0xff] %vm438_vm2, %v119_v18  ;;  %v97_v19 = vpop.permute.xlu1 %96  ;;  %v95_v20 = vpop.permute.xlu0 %94 }
  0x7d   :  { %v99_v21 = vrot.slane %v97_v19, 4  ;;  %v98_v22 = vrot.slane %v95_v20, 4 }
  0x7f   :  { %v102_v23 = vsel %vm100_vm6, %v97_v19, %v99_v21  ;;  %v101_v24 = vsel %vm100_vm6, %v95_v20, %v98_v22  ;;  %v173_v31 = vld [vmem:[#allocation2 + $0x70] sm:$0xff]  ;;  %v171_v43 = vld [vmem:[#allocation2 + $0x60] sm:$0xff]  ;;  %v345_v19 = vcombine.low %v449_v3, %v449_v3 }
  0x80   :  { %106 = vst.msk [vmem:[#allocation2 + $0x58] sm:$0xff] %vm438_vm2, %v102_v23  ;;  %105 = vst.msk [vmem:[#allocation2 + $0x50] sm:$0xff] %vm438_vm2, %v101_v24  ;;  %v80_v25 = vpop.permute.xlu1 %79  ;;  %v78_v26 = vpop.permute.xlu0 %77 }
  0x81   :  { %v82_v27 = vrot.slane %v80_v25, 4  ;;  %v81_v28 = vrot.slane %v78_v26, 4 }
  0x83   :  { %v85_v29 = vsel %vm83_vm7, %v80_v25, %v82_v27  ;;  %v84_v30 = vsel %vm83_vm7, %v78_v26, %v81_v28  ;;  %v174_v32 = vld [vmem:[#allocation2 + $0x78] sm:$0xff]  ;;  %v172_v39 = vld [vmem:[#allocation2 + $0x68] sm:$0xff] }
  0x84   :  { %v378_v33 = vld [vmem:[#allocation2 + $0x74] ss:$8 sps:$4 sm:$0xff]   ;;  %89 = vst.msk [vmem:[#allocation2 + $0x48] sm:$0xff] %vm438_vm2, %v85_v29  ;;  %88 = vst.msk [vmem:[#allocation2 + $0x40] sm:$0xff] %vm438_vm2, %v84_v30  ;;  %v63_v34 = vpop.permute.xlu1 %62  ;;  %v61_v35 = vpop.permute.xlu0 %60  ;;  %v361_v36 = vcombine.low %v173_v31, %v174_v32  ;;  %v380_v40 = vld [vmem:[#allocation2 + $0x64] ss:$8 sps:$4 sm:$0xff]   ;;  %v359_v47 = vcombine.low %v171_v43, %v172_v39 }
  0x85   :  { %283 = vmatprep.subr.bf16.mxu0 %v378_v33  ;;  %v65_v37 = vrot.slane %v63_v34, 4  ;;  %v64_v38 = vrot.slane %v61_v35, 4 }
  0x86   :  { %284 = vmatpush1.bf16.msra.mxu0 %v361_v36 }
  0x87   :  { %v68_v41 = vsel %vm66_vm8, %v63_v34, %v65_v37  ;;  %v67_v42 = vsel %vm66_vm8, %v61_v35, %v64_v38  ;;  %285 = vmatprep.subr.bf16.mxu0 %v380_v40  ;;  %v382_v44 = vld [vmem:[#allocation2 + $0x54] ss:$8 sps:$4 sm:$0xff]  }
  0x88   :  { %72 = vst.msk [vmem:[#allocation2 + $0x38] sm:$0xff] %vm438_vm2, %v68_v41  ;;  %71 = vst.msk [vmem:[#allocation2 + $0x30] sm:$0xff] %vm438_vm2, %v67_v42  ;;  %v46_v45 = vpop.permute.xlu1 %45  ;;  %v44_v46 = vpop.permute.xlu0 %43  ;;  %v169_v50 = vld [vmem:[#allocation2 + $0x50] sm:$0xff]  ;;  %v170_v51 = vld [vmem:[#allocation2 + $0x58] sm:$0xff] }
  0x89   :  { %v48_v48 = vrot.slane %v46_v45, 4  ;;  %v47_v49 = vrot.slane %v44_v46, 4  ;;  %v357_v57 = vcombine.low %v169_v50, %v170_v51 }
  0x8a   :  { %286 = vmatpush1.bf16.msra.mxu0 %v359_v47 }
  0x8b   :  { %v51_v52 = vsel %vm49_vm9, %v46_v45, %v48_v48  ;;  %v50_v53 = vsel %vm49_vm9, %v44_v46, %v47_v49  ;;  %287 = vmatprep.subr.bf16.mxu0 %v382_v44  ;;  %v384_v54 = vld [vmem:[#allocation2 + $0x44] ss:$8 sps:$4 sm:$0xff]   ;;  %v386_v63 = vld [vmem:[#allocation2 + $0x40] ss:$8 sps:$4 sm:$0xff]  }
  0x8c   :  { %55 = vst.msk [vmem:[#allocation2 + $0x28] sm:$0xff] %vm438_vm2, %v51_v52  ;;  %54 = vst.msk [vmem:[#allocation2 + $0x20] sm:$0xff] %vm438_vm2, %v50_v53  ;;  %v29_v55 = vpop.permute.xlu1 %28  ;;  %v27_v56 = vpop.permute.xlu0 %26 }
  0x8d   :  { %v31_v58 = vrot.slane %v29_v55, 4  ;;  %v30_v59 = vrot.slane %v27_v56, 4 }
  0x8e   :  { %288 = vmatpush1.bf16.msra.mxu0 %v357_v57 }
  0x8f   :  { %v34_v60 = vsel %vm32_vm10, %v29_v55, %v31_v58  ;;  %v33_v61 = vsel %vm32_vm10, %v27_v56, %v30_v59  ;;  %289 = vmatprep.subr.bf16.mxu0 %v384_v54  ;;  %v387_v62 = vld [vmem:[#allocation2 + $0x34] ss:$8 sps:$4 sm:$0xff]  }
  0x90   :  { %38 = vst.msk [vmem:[#allocation2 + $0x18] sm:$0xff] %vm438_vm2, %v34_v60  ;;  %37 = vst.msk [vmem:[#allocation2 + $0x10] sm:$0xff] %vm438_vm2, %v33_v61  ;;  %v148_v0 = vpop.permute.xlu1 %147  ;;  %v146_v1 = vpop.permute.xlu0 %145  ;;  %v165_v4 = vld [vmem:[#allocation2 + $0x30] sm:$0xff]  ;;  %v166_v5 = vld [vmem:[#allocation2 + $0x38] sm:$0xff] }
  0x91   :  { %v150_v6 = vrot.slane %v148_v0, 4  ;;  %v149_v7 = vrot.slane %v146_v1, 4  ;;  %v353_v11 = vcombine.low %v165_v4, %v166_v5 }
  0x92   :  { %290 = vmatpush1.bf16.msra.mxu0 %v386_v63 }
  0x93   :  { %291 = vmatprep.subr.bf16.mxu0 %v387_v62  ;;  %v153_v8 = vsel %vm151_vm11, %v148_v0, %v150_v6  ;;  %v152_v9 = vsel %vm151_vm11, %v146_v1, %v149_v7  ;;  %v389_v10 = vld [vmem:[#allocation2 + $0x24] ss:$8 sps:$4 sm:$0xff]   ;;  %v391_v13 = vld [vmem:[#allocation2 + $0x20] ss:$8 sps:$4 sm:$0xff]  }
  0x94   :  { %157 = vst.msk [vmem:[#allocation2 + $0x88] sm:$0xff] %vm438_vm2, %v153_v8  ;;  %156 = vst.msk [vmem:[#allocation2 + $0x80] sm:$0xff] %vm438_vm2, %v152_v9 }
  0x96   :  { %292 = vmatpush1.bf16.msra.mxu0 %v353_v11 }
  0x97   :  { %293 = vmatprep.subr.bf16.mxu0 %v389_v10  ;;  %v392_v12 = vld [vmem:[#allocation2 + $0x14] ss:$8 sps:$4 sm:$0xff]   ;;  %v394_v15 = vld [vmem:[#allocation2 + $0x10] ss:$8 sps:$4 sm:$0xff]  }
  0x9a   :  { %294 = vmatpush1.bf16.msra.mxu0 %v391_v13 }
  0x9b   :  { %295 = vmatprep.subr.bf16.mxu0 %v392_v12  ;;  %v398_v17 = vld [vmem:[#allocation2 + $0x84] ss:$8 sps:$4 sm:$0xff]   ;;  %v400_v18 = vld [vmem:[#allocation2 + $0x80] ss:$8 sps:$4 sm:$0xff]  }
  0x9d   :  { %v181_v20 = vpop.permute.xlu0 %180 }
  0x9e   :  { %296 = vmatpush1.bf16.msra.mxu0 %v394_v15 }
  0x9f   :  { %297 = vmatprep.subr.bf16.mxu0 %v395_v14 }
  0xa2   :  { %298 = vmatpush1.bf16.msra.mxu0 %v397_v16 }
  0xa3   :  { %313 = vmatprep.subr.bf16.mxu0 %v398_v17 }
  0xa6   :  { %314 = vmatpush2.bf16.msra.mxu0 %v400_v18 }
  0xa9   :  { %316 = vmatmul.mubr.bf16.vlgmr.msra.gmra.mxu0 %v345_v19 }
 0x169   :  { %v317_v21 = vpop.f32.mrf.mxu0 }
 0x16a   :  { %v318_v22 = vadd.f32 %v317_v21, %v181_v20 }
 0x16b   :  { %v319_v23 = vpop.f32.mrf.mxu0 }
 0x16c   :  { %v326_v24 = vmin.f32 %v318_v22, 0.0  ;;  %v320_v25 = vadd.f32 %v319_v23, %v181_v20  ;;  %v324_v30 = vmax.f32 %v318_v22, 0.0 }
 0x16d   :  { %v321_v26 = vpop.f32.mrf.mxu0 }
 0x16e   :  { %v328_v27 = vmul.f32 0.25, %v326_v24  ;;  %v327_v28 = vmin.f32 %v320_v25, 0.0  ;;  %v325_v31 = vmax.f32 %v320_v25, 0.0 }
 0x16f   :  { %v322_v29 = vpop.f32.mrf.mxu0 }
 0x170   :  { %v329_v32 = vmul.f32 0.25, %v327_v28  ;;  %v330_v33 = vadd.f32 %v328_v27, %v324_v30 }
 0x172   :  { %v331_v34 = vadd.f32 %v329_v32, %v325_v31 }
 0x174   :  { %v367_v35 = vpack.c.bf16 %v331_v34, %v330_v33 }
 0x176   :  { %340 = vst.msk [vmem:[%s498_s3] sm:$0xff] %vm438_vm2, %v367_v35 }

// kernel: loss_forward.20
= control target key start
LH: loop header
LB: loop body
LE: loop exit
PB: predicated region body
PF: predicated region fallthrough
CT: control target
= control target key end

     0   :  { %vm17_vm0 = vcmask 1043456   ;;  %vm18_vm1 = vcmask 621572   ;;  %s395_s16 = smov 107   ;;  %s396_s17 = smov 108   ;;  %vm279_vm3 = vcmask 130048   ;;  %v403_v5 = vmov 0   ;;  %s487_s0 = inlined_call_operand.vmem [shape: bf16[1,16,226], index: 0, kind: input, shape index: {}]   ;;  %s488_s1 = inlined_call_operand.vmem [shape: bf16[8,144], index: 1, kind: input, shape index: {}]   ;;  %s489_s2 = inlined_call_operand.vmem [shape: f32[8,1], index: 2, kind: input, shape index: {}]   ;;  %s490_s3 = inlined_call_operand.vmem [shape: bf16[1,8,204], index: 3, kind: output, shape index: {}]  }
   0x1   :  { %v124_v0 = vld [vmem:[%s487_s0] sm:$0xff]  ;;  %v125_v1 = vld [vmem:[%s487_s0 + $0x8] sm:$0xff]  ;;  %vm430_vm2 = vmor %vm18_vm1, %vm17_vm0  ;;  %s397_s18 = smov 116   ;;  %s398_s0 = smov 117   ;;  %369 = vset.pattern.permute.xlu0 %v403_v5  ;;  %vm134_vm4 = vcmask 875520   ;;  %vm117_vm5 = vcmask 883712  }
   0x2   :  { %128 = vrot.lane.b32.xlu0 %v124_v0, %s395_s16  ;;  %111 = vrot.lane.b32.xlu1 %v124_v0, %s396_s17  ;;  %20 = vst.msk [vmem:[#allocation2] sm:$0xff] %vm430_vm2, %v124_v0  ;;  %21 = vst.msk [vmem:[#allocation2 + $0x8] sm:$0xff] %vm430_vm2, %v125_v1  ;;  %s399_s19 = smov 118   ;;  %s400_s20 = smov 126   ;;  %v441_v3 = vld [vmem:[%s488_s1] sm:$0xff]  ;;  %vm100_vm6 = vcmask 949248  }
   0x3   :  { %s401_s21 = smov 127   ;;  %s402_s22 = smov 106   ;;  %v338_v4 = vcombine.high %v441_v3, %v441_v3  ;;  %v177_v6 = vld [vmem:[%s489_s2] sm:$0xff]  ;;  %vm83_vm7 = vcmask 957440   ;;  %vm66_vm8 = vcmask 965632   ;;  %vm49_vm9 = vcmask 1031168  }
   0x4   :  { %vm32_vm10 = vcmask 1039360   ;;  %vm151_vm11 = vcmask 867328  }
   0x5   :  { %357 = vmatprep.mubr.msk.bf16.mxu0 %vm279_vm3, %v338_v4 }
   0x6   :  { %130 = vrot.lane.b32.xlu0 %v125_v1, %s395_s16  ;;  %113 = vrot.lane.b32.xlu1 %v125_v1, %s396_s17 }
   0xa   :  { %96 = vrot.lane.b32.xlu1 %v125_v1, %s397_s18  ;;  %94 = vrot.lane.b32.xlu0 %v124_v0, %s397_s18 }
   0xe   :  { %79 = vrot.lane.b32.xlu1 %v125_v1, %s398_s0  ;;  %77 = vrot.lane.b32.xlu0 %v124_v0, %s398_s0 }
  0x12   :  { %62 = vrot.lane.b32.xlu1 %v125_v1, %s399_s19  ;;  %60 = vrot.lane.b32.xlu0 %v124_v0, %s399_s19 }
  0x16   :  { %45 = vrot.lane.b32.xlu1 %v125_v1, %s400_s20  ;;  %43 = vrot.lane.b32.xlu0 %v124_v0, %s400_s20 }
  0x1a   :  { %28 = vrot.lane.b32.xlu1 %v125_v1, %s401_s21  ;;  %26 = vrot.lane.b32.xlu0 %v124_v0, %s401_s21 }
  0x1e   :  { %147 = vrot.lane.b32.xlu1 %v125_v1, %s402_s22  ;;  %145 = vrot.lane.b32.xlu0 %v124_v0, %s402_s22 }
  0x22   :  { %180 = vperm.xlu0 %369, %v177_v6  }
  0x74   :  { %v129_v7 = vpop.permute.xlu0 %128  ;;  %v112_v8 = vpop.permute.xlu1 %111 }
  0x75   :  { %v132_v9 = vrot.slane %v129_v7, 4  ;;  %v115_v10 = vrot.slane %v112_v8, 4 }
  0x77   :  { %v135_v11 = vsel %vm134_vm4, %v129_v7, %v132_v9  ;;  %v118_v12 = vsel %vm117_vm5, %v112_v8, %v115_v10 }
  0x78   :  { %139 = vst.msk [vmem:[#allocation2 + $0x70] sm:$0xff] %vm430_vm2, %v135_v11  ;;  %122 = vst.msk [vmem:[#allocation2 + $0x60] sm:$0xff] %vm430_vm2, %v118_v12  ;;  %v131_v13 = vpop.permute.xlu0 %130  ;;  %v114_v14 = vpop.permute.xlu1 %113 }
  0x79   :  { %v133_v15 = vrot.slane %v131_v13, 4  ;;  %v116_v16 = vrot.slane %v114_v14, 4 }
  0x7b   :  { %v136_v17 = vsel %vm134_vm4, %v131_v13, %v133_v15  ;;  %v119_v18 = vsel %vm117_vm5, %v114_v14, %v116_v16  ;;  %v387_v14 = vld [vmem:[#allocation2 + $0x4] ss:$8 sps:$4 sm:$0xff]   ;;  %v389_v16 = vld [vmem:[#allocation2] ss:$8 sps:$4 sm:$0xff]  }
  0x7c   :  { %140 = vst.msk [vmem:[#allocation2 + $0x78] sm:$0xff] %vm430_vm2, %v136_v17  ;;  %123 = vst.msk [vmem:[#allocation2 + $0x68] sm:$0xff] %vm430_vm2, %v119_v18  ;;  %v97_v19 = vpop.permute.xlu1 %96  ;;  %v95_v20 = vpop.permute.xlu0 %94 }
  0x7d   :  { %v99_v21 = vrot.slane %v97_v19, 4  ;;  %v98_v22 = vrot.slane %v95_v20, 4 }
  0x7f   :  { %v102_v23 = vsel %vm100_vm6, %v97_v19, %v99_v21  ;;  %v101_v24 = vsel %vm100_vm6, %v95_v20, %v98_v22  ;;  %v173_v31 = vld [vmem:[#allocation2 + $0x70] sm:$0xff]  ;;  %v171_v43 = vld [vmem:[#allocation2 + $0x60] sm:$0xff]  ;;  %v337_v19 = vcombine.low %v441_v3, %v441_v3 }
  0x80   :  { %106 = vst.msk [vmem:[#allocation2 + $0x58] sm:$0xff] %vm430_vm2, %v102_v23  ;;  %105 = vst.msk [vmem:[#allocation2 + $0x50] sm:$0xff] %vm430_vm2, %v101_v24  ;;  %v80_v25 = vpop.permute.xlu1 %79  ;;  %v78_v26 = vpop.permute.xlu0 %77 }
  0x81   :  { %v82_v27 = vrot.slane %v80_v25, 4  ;;  %v81_v28 = vrot.slane %v78_v26, 4 }
  0x83   :  { %v85_v29 = vsel %vm83_vm7, %v80_v25, %v82_v27  ;;  %v84_v30 = vsel %vm83_vm7, %v78_v26, %v81_v28  ;;  %v174_v32 = vld [vmem:[#allocation2 + $0x78] sm:$0xff]  ;;  %v172_v39 = vld [vmem:[#allocation2 + $0x68] sm:$0xff] }
  0x84   :  { %v370_v33 = vld [vmem:[#allocation2 + $0x74] ss:$8 sps:$4 sm:$0xff]   ;;  %89 = vst.msk [vmem:[#allocation2 + $0x48] sm:$0xff] %vm430_vm2, %v85_v29  ;;  %88 = vst.msk [vmem:[#allocation2 + $0x40] sm:$0xff] %vm430_vm2, %v84_v30  ;;  %v63_v34 = vpop.permute.xlu1 %62  ;;  %v61_v35 = vpop.permute.xlu0 %60  ;;  %v353_v36 = vcombine.low %v173_v31, %v174_v32  ;;  %v372_v40 = vld [vmem:[#allocation2 + $0x64] ss:$8 sps:$4 sm:$0xff]   ;;  %v351_v47 = vcombine.low %v171_v43, %v172_v39 }
  0x85   :  { %283 = vmatprep.subr.bf16.mxu0 %v370_v33  ;;  %v65_v37 = vrot.slane %v63_v34, 4  ;;  %v64_v38 = vrot.slane %v61_v35, 4 }
  0x86   :  { %284 = vmatpush1.bf16.msra.mxu0 %v353_v36 }
  0x87   :  { %v68_v41 = vsel %vm66_vm8, %v63_v34, %v65_v37  ;;  %v67_v42 = vsel %vm66_vm8, %v61_v35, %v64_v38  ;;  %285 = vmatprep.subr.bf16.mxu0 %v372_v40  ;;  %v374_v44 = vld [vmem:[#allocation2 + $0x54] ss:$8 sps:$4 sm:$0xff]  }
  0x88   :  { %72 = vst.msk [vmem:[#allocation2 + $0x38] sm:$0xff] %vm430_vm2, %v68_v41  ;;  %71 = vst.msk [vmem:[#allocation2 + $0x30] sm:$0xff] %vm430_vm2, %v67_v42  ;;  %v46_v45 = vpop.permute.xlu1 %45  ;;  %v44_v46 = vpop.permute.xlu0 %43  ;;  %v169_v50 = vld [vmem:[#allocation2 + $0x50] sm:$0xff]  ;;  %v170_v51 = vld [vmem:[#allocation2 + $0x58] sm:$0xff] }
  0x89   :  { %v48_v48 = vrot.slane %v46_v45, 4  ;;  %v47_v49 = vrot.slane %v44_v46, 4  ;;  %v349_v57 = vcombine.low %v169_v50, %v170_v51 }
  0x8a   :  { %286 = vmatpush1.bf16.msra.mxu0 %v351_v47 }
  0x8b   :  { %v51_v52 = vsel %vm49_vm9, %v46_v45, %v48_v48  ;;  %v50_v53 = vsel %vm49_vm9, %v44_v46, %v47_v49  ;;  %287 = vmatprep.subr.bf16.mxu0 %v374_v44  ;;  %v376_v54 = vld [vmem:[#allocation2 + $0x44] ss:$8 sps:$4 sm:$0xff]   ;;  %v378_v63 = vld [vmem:[#allocation2 + $0x40] ss:$8 sps:$4 sm:$0xff]  }
  0x8c   :  { %55 = vst.msk [vmem:[#allocation2 + $0x28] sm:$0xff] %vm430_vm2, %v51_v52  ;;  %54 = vst.msk [vmem:[#allocation2 + $0x20] sm:$0xff] %vm430_vm2, %v50_v53  ;;  %v29_v55 = vpop.permute.xlu1 %28  ;;  %v27_v56 = vpop.permute.xlu0 %26 }
  0x8d   :  { %v31_v58 = vrot.slane %v29_v55, 4  ;;  %v30_v59 = vrot.slane %v27_v56, 4 }
  0x8e   :  { %288 = vmatpush1.bf16.msra.mxu0 %v349_v57 }
  0x8f   :  { %v34_v60 = vsel %vm32_vm10, %v29_v55, %v31_v58  ;;  %v33_v61 = vsel %vm32_vm10, %v27_v56, %v30_v59  ;;  %289 = vmatprep.subr.bf16.mxu0 %v376_v54  ;;  %v379_v62 = vld [vmem:[#allocation2 + $0x34] ss:$8 sps:$4 sm:$0xff]  }
  0x90   :  { %38 = vst.msk [vmem:[#allocation2 + $0x18] sm:$0xff] %vm430_vm2, %v34_v60  ;;  %37 = vst.msk [vmem:[#allocation2 + $0x10] sm:$0xff] %vm430_vm2, %v33_v61  ;;  %v148_v0 = vpop.permute.xlu1 %147  ;;  %v146_v1 = vpop.permute.xlu0 %145  ;;  %v165_v4 = vld [vmem:[#allocation2 + $0x30] sm:$0xff]  ;;  %v166_v5 = vld [vmem:[#allocation2 + $0x38] sm:$0xff] }
  0x91   :  { %v150_v6 = vrot.slane %v148_v0, 4  ;;  %v149_v7 = vrot.slane %v146_v1, 4  ;;  %v345_v11 = vcombine.low %v165_v4, %v166_v5 }
  0x92   :  { %290 = vmatpush1.bf16.msra.mxu0 %v378_v63 }
  0x93   :  { %291 = vmatprep.subr.bf16.mxu0 %v379_v62  ;;  %v153_v8 = vsel %vm151_vm11, %v148_v0, %v150_v6  ;;  %v152_v9 = vsel %vm151_vm11, %v146_v1, %v149_v7  ;;  %v381_v10 = vld [vmem:[#allocation2 + $0x24] ss:$8 sps:$4 sm:$0xff]   ;;  %v383_v13 = vld [vmem:[#allocation2 + $0x20] ss:$8 sps:$4 sm:$0xff]  }
  0x94   :  { %157 = vst.msk [vmem:[#allocation2 + $0x88] sm:$0xff] %vm430_vm2, %v153_v8  ;;  %156 = vst.msk [vmem:[#allocation2 + $0x80] sm:$0xff] %vm430_vm2, %v152_v9 }
  0x96   :  { %292 = vmatpush1.bf16.msra.mxu0 %v345_v11 }
  0x97   :  { %293 = vmatprep.subr.bf16.mxu0 %v381_v10  ;;  %v384_v12 = vld [vmem:[#allocation2 + $0x14] ss:$8 sps:$4 sm:$0xff]   ;;  %v386_v15 = vld [vmem:[#allocation2 + $0x10] ss:$8 sps:$4 sm:$0xff]  }
  0x9a   :  { %294 = vmatpush1.bf16.msra.mxu0 %v383_v13 }
  0x9b   :  { %295 = vmatprep.subr.bf16.mxu0 %v384_v12  ;;  %v390_v17 = vld [vmem:[#allocation2 + $0x84] ss:$8 sps:$4 sm:$0xff]   ;;  %v392_v18 = vld [vmem:[#allocation2 + $0x80] ss:$8 sps:$4 sm:$0xff]  }
  0x9d   :  { %v181_v20 = vpop.permute.xlu0 %180 }
  0x9e   :  { %296 = vmatpush1.bf16.msra.mxu0 %v386_v15 }
  0x9f   :  { %297 = vmatprep.subr.bf16.mxu0 %v387_v14 }
  0xa2   :  { %298 = vmatpush1.bf16.msra.mxu0 %v389_v16 }
  0xa3   :  { %313 = vmatprep.subr.bf16.mxu0 %v390_v17 }
  0xa6   :  { %314 = vmatpush2.bf16.msra.mxu0 %v392_v18 }
  0xa9   :  { %316 = vmatmul.mubr.bf16.vlgmr.msra.gmra.mxu0 %v337_v19 }
 0x169   :  { %v317_v21 = vpop.f32.mrf.mxu0 }
 0x16a   :  { %v318_v23 = vadd.f32 %v317_v21, %v181_v20 }
 0x16b   :  { %v319_v22 = vpop.f32.mrf.mxu0 }
 0x16c   :  { %v320_v24 = vadd.f32 %v319_v22, %v181_v20 }
 0x16d   :  { %v321_v25 = vpop.f32.mrf.mxu0 }
 0x16e   :  { %v359_v26 = vpack.c.bf16 %v320_v24, %v318_v23 }
 0x16f   :  { %v322_v27 = vpop.f32.mrf.mxu0 }
 0x170   :  { %332 = vst.msk [vmem:[%s490_s3] sm:$0xff] %vm430_vm2, %v359_v26 }

// kernel: loss_forward.24
= control target key start
LH: loop header
LB: loop body
LE: loop exit
PB: predicated region body
PF: predicated region fallthrough
CT: control target
= control target key end

     0   :  { %vm17_vm0 = vcmask 1043456   ;;  %vm18_vm1 = vcmask 621572   ;;  %s526_s16 = smov 107   ;;  %s527_s17 = smov 108   ;;  %vm312_vm3 = vcmask 130048   ;;  %v534_v5 = vmov 0   ;;  %s645_s0 = inlined_call_operand.vmem [shape: bf16[1,16,226], index: 0, kind: input, shape index: {}]   ;;  %s646_s1 = inlined_call_operand.vmem [shape: bf16[32,144], index: 1, kind: input, shape index: {}]   ;;  %s647_s2 = inlined_call_operand.vmem [shape: f32[32,1], index: 2, kind: input, shape index: {}]   ;;  %s648_s3 = inlined_call_operand.vmem [shape: bf16[1,32,204], index: 3, kind: output, shape index: {}]  }
   0x1   :  { %v124_v0 = vld [vmem:[%s645_s0] sm:$0xff]  ;;  %v125_v1 = vld [vmem:[%s645_s0 + $0x8] sm:$0xff]  ;;  %vm561_vm2 = vmor %vm18_vm1, %vm17_vm0  ;;  %s528_s18 = smov 116   ;;  %s529_s0 = smov 117   ;;  %496 = vset.pattern.permute.xlu1 %v534_v5  ;;  %495 = vset.pattern.permute.xlu0 %v534_v5  ;;  %vm134_vm4 = vcmask 875520   ;;  %vm117_vm5 = vcmask 883712  }
   0x2   :  { %128 = vrot.lane.b32.xlu0 %v124_v0, %s526_s16  ;;  %111 = vrot.lane.b32.xlu1 %v124_v0, %s527_s17  ;;  %20 = vst.msk [vmem:[#allocation2] sm:$0xff] %vm561_vm2, %v124_v0  ;;  %21 = vst.msk [vmem:[#allocation2 + $0x8] sm:$0xff] %vm561_vm2, %v125_v1  ;;  %s530_s19 = smov 118   ;;  %s531_s20 = smov 126   ;;  %v522_v3 = vld [vmem:[%s646_s1 + $0x4] ss:$8 sps:$4 sm:$0xff]  }
   0x3   :  { %s532_s21 = smov 127   ;;  %s533_s22 = smov 106   ;;  %v525_v4 = vld [vmem:[%s646_s1 + $0x14] ss:$8 sps:$4 sm:$0xff]   ;;  %458 = vmatprep.mubr.msk.bf16.mxu0 %vm312_vm3, %v522_v3  ;;  %v181_v6 = vld [vmem:[%s647_s2 + $0x8] sm:$0xff]  ;;  %v180_v7 = vld [vmem:[%s647_s2] sm:$0xff] }
   0x4   :  { %459 = vmatprep.mubr.msk.bf16.mxu1 %vm312_vm3, %v525_v4  ;;  %v182_v8 = vld [vmem:[%s647_s2 + $0x10] sm:$0xff]  ;;  %v183_v9 = vld [vmem:[%s647_s2 + $0x18] sm:$0xff]  ;;  %vm100_vm6 = vcmask 949248   ;;  %vm83_vm7 = vcmask 957440   ;;  %vm66_vm8 = vcmask 965632   ;;  %vm49_vm9 = vcmask 1031168  }
   0x5   :  { %vm32_vm10 = vcmask 1039360   ;;  %vm151_vm11 = vcmask 867328  }
   0x6   :  { %130 = vrot.lane.b32.xlu0 %v125_v1, %s526_s16  ;;  %113 = vrot.lane.b32.xlu1 %v125_v1, %s527_s17 }
   0xa   :  { %96 = vrot.lane.b32.xlu1 %v125_v1, %s528_s18  ;;  %94 = vrot.lane.b32.xlu0 %v124_v0, %s528_s18 }
   0xe   :  { %79 = vrot.lane.b32.xlu1 %v125_v1, %s529_s0  ;;  %77 = vrot.lane.b32.xlu0 %v124_v0, %s529_s0 }
  0x12   :  { %62 = vrot.lane.b32.xlu1 %v125_v1, %s530_s19  ;;  %60 = vrot.lane.b32.xlu0 %v124_v0, %s530_s19 }
  0x16   :  { %45 = vrot.lane.b32.xlu1 %v125_v1, %s531_s20  ;;  %43 = vrot.lane.b32.xlu0 %v124_v0, %s531_s20 }
  0x1a   :  { %28 = vrot.lane.b32.xlu1 %v125_v1, %s532_s21  ;;  %26 = vrot.lane.b32.xlu0 %v124_v0, %s532_s21 }
  0x1e   :  { %147 = vrot.lane.b32.xlu1 %v125_v1, %s533_s22  ;;  %145 = vrot.lane.b32.xlu0 %v124_v0, %s533_s22 }
  0x22   :  { %191 = vperm.xlu1 %496, %v181_v6   ;;  %186 = vperm.xlu0 %495, %v180_v7  }
  0x26   :  { %196 = vperm.xlu1 %496, %v182_v8   ;;  %201 = vperm.xlu0 %495, %v183_v9  }
  0x74   :  { %v129_v10 = vpop.permute.xlu0 %128  ;;  %v112_v11 = vpop.permute.xlu1 %111 }
  0x75   :  { %v132_v12 = vrot.slane %v129_v10, 4  ;;  %v115_v13 = vrot.slane %v112_v11, 4 }
  0x77   :  { %v135_v14 = vsel %vm134_vm4, %v129_v10, %v132_v12  ;;  %v118_v15 = vsel %vm117_vm5, %v112_v11, %v115_v13 }
  0x78   :  { %139 = vst.msk [vmem:[#allocation2 + $0x70] sm:$0xff] %vm561_vm2, %v135_v14  ;;  %122 = vst.msk [vmem:[#allocation2 + $0x60] sm:$0xff] %vm561_vm2, %v118_v15  ;;  %v131_v16 = vpop.permute.xlu0 %130  ;;  %v114_v17 = vpop.permute.xlu1 %113 }
  0x79   :  { %v133_v18 = vrot.slane %v131_v16, 4  ;;  %v116_v19 = vrot.slane %v114_v17, 4 }
  0x7b   :  { %v136_v20 = vsel %vm134_vm4, %v131_v16, %v133_v18  ;;  %v119_v21 = vsel %vm117_vm5, %v114_v17, %v116_v19  ;;  %v514_v16 = vld [vmem:[#allocation2 + $0x4] ss:$8 sps:$4 sm:$0xff]   ;;  %v516_v18 = vld [vmem:[#allocation2] ss:$8 sps:$4 sm:$0xff]  }
  0x7c   :  { %140 = vst.msk [vmem:[#allocation2 + $0x78] sm:$0xff] %vm561_vm2, %v136_v20  ;;  %123 = vst.msk [vmem:[#allocation2 + $0x68] sm:$0xff] %vm561_vm2, %v119_v21  ;;  %v97_v22 = vpop.permute.xlu1 %96  ;;  %v95_v23 = vpop.permute.xlu0 %94  ;;  %v520_v21 = vld [vmem:[%s646_s1] ss:$8 sps:$4 sm:$0xff]  }
  0x7d   :  { %v99_v24 = vrot.slane %v97_v22, 4  ;;  %v98_v25 = vrot.slane %v95_v23, 4 }
  0x7f   :  { %v102_v26 = vsel %vm100_vm6, %v97_v22, %v99_v24  ;;  %v101_v27 = vsel %vm100_vm6, %v95_v23, %v98_v25  ;;  %v176_v34 = vld [vmem:[#allocation2 + $0x70] sm:$0xff]  ;;  %v174_v46 = vld [vmem:[#allocation2 + $0x60] sm:$0xff] }
  0x80   :  { %106 = vst.msk [vmem:[#allocation2 + $0x58] sm:$0xff] %vm561_vm2, %v102_v26  ;;  %105 = vst.msk [vmem:[#allocation2 + $0x50] sm:$0xff] %vm561_vm2, %v101_v27  ;;  %v80_v28 = vpop.permute.xlu1 %79  ;;  %v78_v29 = vpop.permute.xlu0 %77  ;;  %v523_v22 = vld [vmem:[%s646_s1 + $0x10] ss:$8 sps:$4 sm:$0xff]  }
  0x81   :  { %v82_v30 = vrot.slane %v80_v28, 4  ;;  %v81_v31 = vrot.slane %v78_v29, 4 }
  0x83   :  { %v85_v32 = vsel %vm83_vm7, %v80_v28, %v82_v30  ;;  %v84_v33 = vsel %vm83_vm7, %v78_v29, %v81_v31  ;;  %v177_v35 = vld [vmem:[#allocation2 + $0x78] sm:$0xff]  ;;  %v175_v42 = vld [vmem:[#allocation2 + $0x68] sm:$0xff] }
  0x84   :  { %v497_v36 = vld [vmem:[#allocation2 + $0x74] ss:$8 sps:$4 sm:$0xff]   ;;  %89 = vst.msk [vmem:[#allocation2 + $0x48] sm:$0xff] %vm561_vm2, %v85_v32  ;;  %88 = vst.msk [vmem:[#allocation2 + $0x40] sm:$0xff] %vm561_vm2, %v84_v33  ;;  %v63_v37 = vpop.permute.xlu1 %62  ;;  %v61_v38 = vpop.permute.xlu0 %60  ;;  %v454_v39 = vcombine.low %v176_v34, %v177_v35  ;;  %v499_v43 = vld [vmem:[#allocation2 + $0x64] ss:$8 sps:$4 sm:$0xff]   ;;  %v452_v50 = vcombine.low %v174_v46, %v175_v42 }
  0x85   :  { %319 = vmatprep.subr.bf16.mxu0 %v497_v36  ;;  %468 = vmatprep.subr.bf16.mxu1 %v497_v36  ;;  %v65_v40 = vrot.slane %v63_v37, 4  ;;  %v64_v41 = vrot.slane %v61_v38, 4 }
  0x86   :  { %320 = vmatpush1.bf16.msra.mxu0 %v454_v39  ;;  %477 = vmatpush1.bf16.msra.mxu1 %v454_v39 }
  0x87   :  { %v68_v44 = vsel %vm66_vm8, %v63_v37, %v65_v40  ;;  %v67_v45 = vsel %vm66_vm8, %v61_v38, %v64_v41  ;;  %321 = vmatprep.subr.bf16.mxu0 %v499_v43  ;;  %469 = vmatprep.subr.bf16.mxu1 %v499_v43  ;;  %v501_v47 = vld [vmem:[#allocation2 + $0x54] ss:$8 sps:$4 sm:$0xff]  }
  0x88   :  { %72 = vst.msk [vmem:[#allocation2 + $0x38] sm:$0xff] %vm561_vm2, %v68_v44  ;;  %71 = vst.msk [vmem:[#allocation2 + $0x30] sm:$0xff] %vm561_vm2, %v67_v45  ;;  %v46_v48 = vpop.permute.xlu1 %45  ;;  %v44_v49 = vpop.permute.xlu0 %43  ;;  %v172_v53 = vld [vmem:[#allocation2 + $0x50] sm:$0xff]  ;;  %v173_v54 = vld [vmem:[#allocation2 + $0x58] sm:$0xff] }
  0x89   :  { %v48_v51 = vrot.slane %v46_v48, 4  ;;  %v47_v52 = vrot.slane %v44_v49, 4  ;;  %v450_v60 = vcombine.low %v172_v53, %v173_v54 }
  0x8a   :  { %322 = vmatpush1.bf16.msra.mxu0 %v452_v50  ;;  %478 = vmatpush1.bf16.msra.mxu1 %v452_v50 }
  0x8b   :  { %v51_v55 = vsel %vm49_vm9, %v46_v48, %v48_v51  ;;  %v50_v56 = vsel %vm49_vm9, %v44_v49, %v47_v52  ;;  %323 = vmatprep.subr.bf16.mxu0 %v501_v47  ;;  %470 = vmatprep.subr.bf16.mxu1 %v501_v47  ;;  %v503_v57 = vld [vmem:[#allocation2 + $0x44] ss:$8 sps:$4 sm:$0xff]   ;;  %v505_v3 = vld [vmem:[#allocation2 + $0x40] ss:$8 sps:$4 sm:$0xff]  }
  0x8c   :  { %55 = vst.msk [vmem:[#allocation2 + $0x28] sm:$0xff] %vm561_vm2, %v51_v55  ;;  %54 = vst.msk [vmem:[#allocation2 + $0x20] sm:$0xff] %vm561_vm2, %v50_v56  ;;  %v29_v58 = vpop.permute.xlu1 %28  ;;  %v27_v59 = vpop.permute.xlu0 %26 }
  0x8d   :  { %v31_v61 = vrot.slane %v29_v58, 4  ;;  %v30_v62 = vrot.slane %v27_v59, 4 }
  0x8e   :  { %324 = vmatpush1.bf16.msra.mxu0 %v450_v60  ;;  %479 = vmatpush1.bf16.msra.mxu1 %v450_v60 }
  0x8f   :  { %v34_v63 = vsel %vm32_vm10, %v29_v58, %v31_v61  ;;  %v33_v0 = vsel %vm32_vm10, %v27_v59, %v30_v62  ;;  %325 = vmatprep.subr.bf16.mxu0 %v503_v57  ;;  %471 = vmatprep.subr.bf16.mxu1 %v503_v57  ;;  %v506_v1 = vld [vmem:[#allocation2 + $0x34] ss:$8 sps:$4 sm:$0xff]  }
  0x90   :  { %38 = vst.msk [vmem:[#allocation2 + $0x18] sm:$0xff] %vm561_vm2, %v34_v63  ;;  %37 = vst.msk [vmem:[#allocation2 + $0x10] sm:$0xff] %vm561_vm2, %v33_v0  ;;  %v148_v4 = vpop.permute.xlu1 %147  ;;  %v146_v5 = vpop.permute.xlu0 %145  ;;  %v168_v6 = vld [vmem:[#allocation2 + $0x30] sm:$0xff]  ;;  %v169_v7 = vld [vmem:[#allocation2 + $0x38] sm:$0xff] }
  0x91   :  { %v150_v8 = vrot.slane %v148_v4, 4  ;;  %v149_v9 = vrot.slane %v146_v5, 4  ;;  %v446_v13 = vcombine.low %v168_v6, %v169_v7 }
  0x92   :  { %326 = vmatpush1.bf16.msra.mxu0 %v505_v3  ;;  %480 = vmatpush1.bf16.msra.mxu1 %v505_v3 }
  0x93   :  { %327 = vmatprep.subr.bf16.mxu0 %v506_v1  ;;  %472 = vmatprep.subr.bf16.mxu1 %v506_v1  ;;  %v153_v10 = vsel %vm151_vm11, %v148_v4, %v150_v8  ;;  %v152_v11 = vsel %vm151_vm11, %v146_v5, %v149_v9  ;;  %v508_v12 = vld [vmem:[#allocation2 + $0x24] ss:$8 sps:$4 sm:$0xff]   ;;  %v510_v15 = vld [vmem:[#allocation2 + $0x20] ss:$8 sps:$4 sm:$0xff]  }
  0x94   :  { %157 = vst.msk [vmem:[#allocation2 + $0x88] sm:$0xff] %vm561_vm2, %v153_v10  ;;  %156 = vst.msk [vmem:[#allocation2 + $0x80] sm:$0xff] %vm561_vm2, %v152_v11 }
  0x96   :  { %328 = vmatpush1.bf16.msra.mxu0 %v446_v13  ;;  %481 = vmatpush1.bf16.msra.mxu1 %v446_v13 }
  0x97   :  { %329 = vmatprep.subr.bf16.mxu0 %v508_v12  ;;  %473 = vmatprep.subr.bf16.mxu1 %v508_v12  ;;  %v511_v14 = vld [vmem:[#allocation2 + $0x14] ss:$8 sps:$4 sm:$0xff]   ;;  %v513_v17 = vld [vmem:[#allocation2 + $0x10] ss:$8 sps:$4 sm:$0xff]  }
  0x9a   :  { %330 = vmatpush1.bf16.msra.mxu0 %v510_v15  ;;  %482 = vmatpush1.bf16.msra.mxu1 %v510_v15 }
  0x9b   :  { %331 = vmatprep.subr.bf16.mxu0 %v511_v14  ;;  %474 = vmatprep.subr.bf16.mxu1 %v511_v14  ;;  %v517_v19 = vld [vmem:[#allocation2 + $0x84] ss:$8 sps:$4 sm:$0xff]   ;;  %v519_v20 = vld [vmem:[#allocation2 + $0x80] ss:$8 sps:$4 sm:$0xff]  }
  0x9d   :  { %v192_v23 = vpop.permute.xlu1 %191  ;;  %v187_v24 = vpop.permute.xlu0 %186 }
  0x9e   :  { %332 = vmatpush1.bf16.msra.mxu0 %v513_v17  ;;  %483 = vmatpush1.bf16.msra.mxu1 %v513_v17 }
  0x9f   :  { %333 = vmatprep.subr.bf16.mxu0 %v514_v16  ;;  %475 = vmatprep.subr.bf16.mxu1 %v514_v16 }
  0xa1   :  { %v197_v25 = vpop.permute.xlu1 %196  ;;  %v202_v34 = vpop.permute.xlu0 %201 }
  0xa2   :  { %334 = vmatpush1.bf16.msra.mxu0 %v516_v18  ;;  %484 = vmatpush1.bf16.msra.mxu1 %v516_v18 }
  0xa3   :  { %349 = vmatprep.subr.bf16.mxu0 %v517_v19  ;;  %476 = vmatprep.subr.bf16.mxu1 %v517_v19 }
  0xa6   :  { %350 = vmatpush2.bf16.msra.mxu0 %v519_v20  ;;  %485 = vmatpush2.bf16.msra.mxu1 %v519_v20 }
  0xa9   :  { %352 = vmatmul.mubr.bf16.vlgmr.msra.gmra.mxu0 %v520_v21  ;;  %362 = vmatmul.mubr.bf16.vlgmr.msra.gmra.mxu1 %v523_v22 }
 0x169   :  { %v353_v26 = vpop.f32.mrf.mxu0  ;;  %v363_v27 = vpop.f32.mrf.mxu1 }
 0x16a   :  { %v354_v28 = vadd.f32 %v353_v26, %v187_v24  ;;  %v364_v29 = vadd.f32 %v363_v27, %v197_v25 }
 0x16b   :  { %v355_v30 = vpop.f32.mrf.mxu0  ;;  %v365_v31 = vpop.f32.mrf.mxu1 }
 0x16c   :  { %v380_v32 = vmin.f32 %v354_v28, 0.0  ;;  %v384_v33 = vmin.f32 %v364_v29, 0.0  ;;  %v356_v35 = vadd.f32 %v355_v30, %v187_v24  ;;  %v366_v36 = vadd.f32 %v365_v31, %v197_v25 }
 0x16d   :  { %v357_v37 = vpop.f32.mrf.mxu0  ;;  %v367_v38 = vpop.f32.mrf.mxu1  ;;  %v372_v47 = vmax.f32 %v354_v28, 0.0  ;;  %v376_v48 = vmax.f32 %v364_v29, 0.0 }
 0x16e   :  { %v358_v39 = vadd.f32 %v357_v37, %v192_v23  ;;  %v368_v40 = vadd.f32 %v367_v38, %v202_v34  ;;  %v388_v41 = vmul.f32 0.25, %v380_v32  ;;  %v392_v42 = vmul.f32 0.25, %v384_v33 }
 0x16f   :  { %v381_v43 = vmin.f32 %v356_v35, 0.0  ;;  %v385_v44 = vmin.f32 %v366_v36, 0.0  ;;  %v359_v45 = vpop.f32.mrf.mxu0  ;;  %v369_v46 = vpop.f32.mrf.mxu1  ;;  %v373_v49 = vmax.f32 %v356_v35, 0.0  ;;  %v377_v52 = vmax.f32 %v366_v36, 0.0 }
 0x170   :  { %v382_v50 = vmin.f32 %v358_v39, 0.0  ;;  %v386_v54 = vmin.f32 %v368_v40, 0.0  ;;  %v360_v55 = vadd.f32 %v359_v45, %v192_v23  ;;  %v370_v56 = vadd.f32 %v369_v46, %v202_v34 }
 0x171   :  { %v389_v51 = vmul.f32 0.25, %v381_v43  ;;  %v393_v53 = vmul.f32 0.25, %v385_v44  ;;  %v396_v57 = vadd.f32 %v388_v41, %v372_v47  ;;  %v400_v58 = vadd.f32 %v392_v42, %v376_v48 }
 0x172   :  { %v390_v61 = vmul.f32 0.25, %v382_v50  ;;  %v383_v62 = vmin.f32 %v360_v55, 0.0  ;;  %v394_v1 = vmul.f32 0.25, %v386_v54  ;;  %v387_v3 = vmin.f32 %v370_v56, 0.0 }
 0x173   :  { %v397_v59 = vadd.f32 %v389_v51, %v373_v49  ;;  %v401_v60 = vadd.f32 %v393_v53, %v377_v52  ;;  %v374_v4 = vmax.f32 %v358_v39, 0.0  ;;  %v375_v5 = vmax.f32 %v360_v55, 0.0 }
 0x174   :  { %v391_v6 = vmul.f32 0.25, %v383_v62  ;;  %v378_v7 = vmax.f32 %v368_v40, 0.0  ;;  %v379_v8 = vmax.f32 %v370_v56, 0.0  ;;  %v395_v9 = vmul.f32 0.25, %v387_v3 }
 0x175   :  { %v464_v63 = vpack.c.bf16 %v397_v59, %v396_v57  ;;  %v466_v0 = vpack.c.bf16 %v401_v60, %v400_v58  ;;  %v398_v10 = vadd.f32 %v390_v61, %v374_v4 }
 0x176   :  { %v399_v11 = vadd.f32 %v391_v6, %v375_v5  ;;  %v402_v12 = vadd.f32 %v394_v1, %v378_v7  ;;  %v403_v13 = vadd.f32 %v395_v9, %v379_v8 }
 0x177   :  { %428 = vst.msk [vmem:[%s648_s3] sm:$0xff] %vm561_vm2, %v464_v63  ;;  %430 = vst.msk [vmem:[%s648_s3 + $0x10] sm:$0xff] %vm561_vm2, %v466_v0 }
 0x178   :  { %v465_v14 = vpack.c.bf16 %v399_v11, %v398_v10  ;;  %v467_v15 = vpack.c.bf16 %v403_v13, %v402_v12 }
 0x17a   :  { %429 = vst.msk [vmem:[%s648_s3 + $0x8] sm:$0xff] %vm561_vm2, %v465_v14  ;;  %431 = vst.msk [vmem:[%s648_s3 + $0x18] sm:$0xff] %vm561_vm2, %v467_v15 }

// kernel: loss_forward.29
= control target key start
LH: loop header
LB: loop body
LE: loop exit
PB: predicated region body
PF: predicated region fallthrough
CT: control target
= control target key end

     0   :  { %s1885_s12 = smov 0   ;;  %s2558_s0 = inlined_call_operand.vmem [shape: bf16[2,16,1158], index: 0, kind: input, shape index: {}]   ;;  %s2559_s1 = inlined_call_operand.vmem [shape: bf16[8,144], index: 1, kind: input, shape index: {}]   ;;  %s2560_s2 = inlined_call_operand.vmem [shape: f32[8,1], index: 2, kind: input, shape index: {}]   ;;  %s2561_s3 = inlined_call_operand.vmem [shape: f32[2,8,1088], index: 3, kind: output, shape index: {}]  }
   0x1 LB: > { %s1713_s13 = sadd.s32 4294967295, %s1854_s12   ;;  %p1717_p0 = scmp.ge.s32.totalorder %s1854_s12, 1  ;;  %s1854_s12 = sphi %s1885_s12, %s13_s12  }
   0x2   : > { %p137_p1 = scmp.lt.s32.totalorder %s1854_s12, 3 }
   0x4   : > { %p138_p2 = pnand %p1717_p0, %p137_p1 }
   0x5   : > { %p161_p3 = scmp.lt.s32.totalorder (!%p138_p2), %s1713_s13, 1  ;;  %s1856_s18 = smov (!%p138_p2), 59  }
   0x6   : > { %141 = sbr.rel (%p138_p2) target bundleno = 504 (0x1f8), region = 32  ;;  %s1857_s19 = smov (!%p138_p2), 60  }
   0x7   : > { %s1858_s20 = smov (!%p138_p2), 92   ;;  %s1859_s21 = smov (!%p138_p2), 93  }
   0x8   : > { %s1860_s22 = smov (!%p138_p2), 94   ;;  %s1861_s23 = smov (!%p138_p2), 126  }
   0x9   : > { %s1862_s24 = smov (!%p138_p2), 127   ;;  %s1863_s25 = smov (!%p138_p2), 58  }
   0xb   : > { %s2563_s13 = smov (!%p161_p3, %s1713_s13), 1  ;;  %v1961_v6 = vld [vmem:[%s2559_s1] sm:$0xff]  ;;  %vm1413_vm0 = vcmask 130048   ;;  %vm243_vm1 = vcmask 1043456   ;;  %vm769_vm2 = vcmask 482304   ;;  %vm680_vm3 = vcmask 490496  }
   0xc   : > { %s1810_s14 = smul.u32 80, %s2563_s13  ;;  %v1965_v7 = vcombine.high %v1961_v6, %v1961_v6  ;;  %v1864_v46 = vmov 0   ;;  %vm593_vm4 = vcmask 752640   ;;  %vm506_vm5 = vcmask 760832  }
   0xd   : > { %1829 = vset.pattern.permute.xlu0 %v1864_v46  ;;  %vm419_vm6 = vcmask 769024   ;;  %vm186_vm7 = vcmask 519168   ;;  %vm332_vm8 = vcmask 1031168   ;;  %vm245_vm9 = vcmask 1039360   ;;  %s1811_s30 = smul.u32 72, %s2563_s13 }
   0xe   : > { %s1899_s17 = scalar_lea.vmem %s2558_s0, %s1810_s14  ;;  %1803 = vmatprep.mubr.msk.bf16.mxu0 %vm1413_vm0, %v1965_v7  ;;  %1804 = vmatprep.mubr.msk.bf16.mxu1 %vm1413_vm0, %v1965_v7  ;;  %vm858_vm10 = vcmask 474112  }
   0xf   : > { %v1902_v0 = vld [vmem:[%s1899_s17 + $0x28] sm:$0xff]  ;;  %v1905_v1 = vld [vmem:[%s1899_s17] sm:$0xff]  ;;  %v724_v2 = vld [vmem:[%s1899_s17 + $0x30] sm:$0xff]  ;;  %s2544_s6 = scalar_lea.vmem %s2561_s3, %s1811_s30 }
  0x10   : > { %748 = vrot.lane.b32.xlu1 %v1902_v0, %s1856_s18  ;;  %738 = vrot.lane.b32.xlu0 %v1905_v1, %s1856_s18  ;;  %v719_v3 = vld [vmem:[%s1899_s17 + $0x8] sm:$0xff]  ;;  %v1723_v4 = vcombine.high %v1905_v1, %v1902_v0  ;;  %v1722_v5 = vcombine.low %v1905_v1, %v1902_v0  ;;  %v725_v8 = vld [vmem:[%s1899_s17 + $0x38] sm:$0xff] }
  0x11   : > { %v720_v9 = vld [vmem:[%s1899_s17 + $0x10] sm:$0xff]  ;;  %v726_v10 = vld [vmem:[%s1899_s17 + $0x40] sm:$0xff]  ;;  %v721_v11 = vld [vmem:[%s1899_s17 + $0x18] sm:$0xff] }
  0x12   : > { %v2001_v12 = vld [vmem:[%s1899_s17 + $0x8] sm:$0xff]  ;;  %v2004_v13 = vld [vmem:[%s1899_s17 + $0x30] sm:$0xff]  ;;  %v2016_v17 = vld [vmem:[%s1899_s17 + $0x38] sm:$0xff] }
  0x13   : > { %v1725_v14 = vcombine.high %v2001_v12, %v2004_v13  ;;  %v1724_v15 = vcombine.low %v2001_v12, %v2004_v13  ;;  %v2013_v16 = vld [vmem:[%s1899_s17 + $0x10] sm:$0xff]  ;;  %v2051_v39 = vld [vmem:[%s1899_s17 + $0x48] sm:$0xff]  ;;  %v2054_v40 = vld [vmem:[%s1899_s17 + $0x20] sm:$0xff] }
  0x14   : > { %750 = vrot.lane.b32.xlu1 %v724_v2, %s1856_s18  ;;  %740 = vrot.lane.b32.xlu0 %v719_v3, %s1856_s18  ;;  %v1727_v18 = vcombine.high %v2013_v16, %v2016_v17  ;;  %v1726_v19 = vcombine.low %v2013_v16, %v2016_v17  ;;  %v551_v56 = vld [vmem:[%s1899_s17 + $0x48] sm:$0xf]  ;;  %v546_v57 = vld [vmem:[%s1899_s17 + $0x20] sm:$0xf] }
  0x18   : > { %651 = vrot.lane.b32.xlu1 %v719_v3, %s1857_s19  ;;  %649 = vrot.lane.b32.xlu0 %v1905_v1, %s1857_s19 }
  0x1c   : > { %661 = vrot.lane.b32.xlu1 %v724_v2, %s1857_s19  ;;  %659 = vrot.lane.b32.xlu0 %v1902_v0, %s1857_s19 }
  0x20   : > { %564 = vrot.lane.b32.xlu1 %v719_v3, %s1858_s20  ;;  %562 = vrot.lane.b32.xlu0 %v1905_v1, %s1858_s20 }
  0x24   : > { %574 = vrot.lane.b32.xlu1 %v724_v2, %s1858_s20  ;;  %572 = vrot.lane.b32.xlu0 %v1902_v0, %s1858_s20 }
  0x28   : > { %477 = vrot.lane.b32.xlu1 %v719_v3, %s1859_s21  ;;  %475 = vrot.lane.b32.xlu0 %v1905_v1, %s1859_s21 }
  0x2c   : > { %487 = vrot.lane.b32.xlu1 %v724_v2, %s1859_s21  ;;  %485 = vrot.lane.b32.xlu0 %v1902_v0, %s1859_s21 }
  0x30   : > { %390 = vrot.lane.b32.xlu1 %v719_v3, %s1860_s22  ;;  %388 = vrot.lane.b32.xlu0 %v1905_v1, %s1860_s22 }
  0x34   : > { %400 = vrot.lane.b32.xlu1 %v724_v2, %s1860_s22  ;;  %398 = vrot.lane.b32.xlu0 %v1902_v0, %s1860_s22 }
  0x38   : > { %303 = vrot.lane.b32.xlu1 %v719_v3, %s1861_s23  ;;  %301 = vrot.lane.b32.xlu0 %v1905_v1, %s1861_s23 }
  0x3c   : > { %313 = vrot.lane.b32.xlu1 %v724_v2, %s1861_s23  ;;  %311 = vrot.lane.b32.xlu0 %v1902_v0, %s1861_s23 }
  0x40   : > { %215 = vrot.lane.b32.xlu1 %v719_v3, %s1862_s24  ;;  %213 = vrot.lane.b32.xlu0 %v1905_v1, %s1862_s24 }
  0x44   : > { %225 = vrot.lane.b32.xlu1 %v724_v2, %s1862_s24  ;;  %223 = vrot.lane.b32.xlu0 %v1902_v0, %s1862_s24 }
  0x48   : > { %829 = vrot.lane.b32.xlu1 %v719_v3, %s1863_s25  ;;  %827 = vrot.lane.b32.xlu0 %v1905_v1, %s1863_s25  ;;  %v459_v3 = vld [vmem:[%s1899_s17 + $0x20] sm:$0xf] }
  0x4c   : > { %839 = vrot.lane.b32.xlu1 %v724_v2, %s1863_s25  ;;  %837 = vrot.lane.b32.xlu0 %v1902_v0, %s1863_s25  ;;  %v464_v2 = vld [vmem:[%s1899_s17 + $0x48] sm:$0xf] }
  0x50   : > { %752 = vrot.lane.b32.xlu1 %v725_v8, %s1856_s18  ;;  %742 = vrot.lane.b32.xlu0 %v720_v9, %s1856_s18 }
  0x54   : > { %754 = vrot.lane.b32.xlu1 %v726_v10, %s1856_s18  ;;  %744 = vrot.lane.b32.xlu0 %v721_v11, %s1856_s18 }
  0x58   : > { %663 = vrot.lane.b32.xlu1 %v725_v8, %s1857_s19  ;;  %653 = vrot.lane.b32.xlu0 %v720_v9, %s1857_s19 }
  0x5c   : > { %665 = vrot.lane.b32.xlu1 %v726_v10, %s1857_s19  ;;  %655 = vrot.lane.b32.xlu0 %v721_v11, %s1857_s19 }
  0x60   : > { %576 = vrot.lane.b32.xlu1 %v725_v8, %s1858_s20  ;;  %566 = vrot.lane.b32.xlu0 %v720_v9, %s1858_s20 }
  0x64   : > { %578 = vrot.lane.b32.xlu1 %v726_v10, %s1858_s20  ;;  %568 = vrot.lane.b32.xlu0 %v721_v11, %s1858_s20 }
  0x68   : > { %489 = vrot.lane.b32.xlu1 %v725_v8, %s1859_s21  ;;  %479 = vrot.lane.b32.xlu0 %v720_v9, %s1859_s21 }
  0x6c   : > { %491 = vrot.lane.b32.xlu1 %v726_v10, %s1859_s21  ;;  %481 = vrot.lane.b32.xlu0 %v721_v11, %s1859_s21 }
  0x70   : > { %402 = vrot.lane.b32.xlu1 %v725_v8, %s1860_s22  ;;  %392 = vrot.lane.b32.xlu0 %v720_v9, %s1860_s22 }
  0x74   : > { %404 = vrot.lane.b32.xlu1 %v726_v10, %s1860_s22  ;;  %394 = vrot.lane.b32.xlu0 %v721_v11, %s1860_s22 }
  0x78   : > { %315 = vrot.lane.b32.xlu1 %v725_v8, %s1861_s23  ;;  %305 = vrot.lane.b32.xlu0 %v720_v9, %s1861_s23 }
  0x7c   : > { %317 = vrot.lane.b32.xlu1 %v726_v10, %s1861_s23  ;;  %307 = vrot.lane.b32.xlu0 %v721_v11, %s1861_s23 }
  0x80   : > { %227 = vrot.lane.b32.xlu1 %v725_v8, %s1862_s24  ;;  %217 = vrot.lane.b32.xlu0 %v720_v9, %s1862_s24 }
  0x82   : > { %v749_v20 = vpop.permute.xlu1 %748  ;;  %v739_v21 = vpop.permute.xlu0 %738 }
  0x83   : > { %v763_v24 = vrot.slane %v749_v20, 4  ;;  %v758_v25 = vrot.slane %v739_v21, 4 }
  0x84   : > { %229 = vrot.lane.b32.xlu1 %v726_v10, %s1862_s24  ;;  %219 = vrot.lane.b32.xlu0 %v721_v11, %s1862_s24 }
  0x86   : > { %v2026_v22 = vpop.permute.xlu1 %750  ;;  %v2028_v23 = vpop.permute.xlu0 %740 }
  0x87   : > { %v764_v26 = vrot.slane %v2026_v22, 4  ;;  %v759_v27 = vrot.slane %v2028_v23, 4 }
  0x88   : > { %841 = vrot.lane.b32.xlu1 %v725_v8, %s1863_s25  ;;  %831 = vrot.lane.b32.xlu0 %v720_v9, %s1863_s25 }
  0x89   : > { %v778_v28 = vsel %vm243_vm1, %v763_v24, %v764_v26  ;;  %v768_v29 = vsel %vm243_vm1, %v758_v25, %v759_v27 }
  0x8a   : > { %v779_v30 = vsel %vm769_vm2, %v749_v20, %v778_v28  ;;  %v770_v31 = vsel %vm769_vm2, %v739_v21, %v768_v29  ;;  %v2042_v32 = vpop.permute.xlu1 %651  ;;  %v650_v33 = vpop.permute.xlu0 %649  ;;  %v377_v28 = vld [vmem:[%s1899_s17 + $0x48] sm:$0xf]  ;;  %v372_v29 = vld [vmem:[%s1899_s17 + $0x20] sm:$0xf] }
  0x8b   : > { %v670_v34 = vrot.slane %v2042_v32, 4  ;;  %v669_v35 = vrot.slane %v650_v33, 4  ;;  %v1786_v36 = vcombine.high %v770_v31, %v779_v30  ;;  %v1785_v37 = vcombine.low %v770_v31, %v779_v30 }
  0x8c   : > { %843 = vrot.lane.b32.xlu1 %v726_v10, %s1863_s25  ;;  %833 = vrot.lane.b32.xlu0 %v721_v11, %s1863_s25 }
  0x8d   : > { %v679_v38 = vsel %vm243_vm1, %v669_v35, %v670_v34  ;;  %1417 = vmatprep.subr.bf16.mxu0 %v1786_v36 }
  0x8e   : > { %v681_v41 = vsel %vm680_vm3, %v650_v33, %v679_v38  ;;  %v2057_v42 = vpop.permute.xlu1 %661  ;;  %v660_v43 = vpop.permute.xlu0 %659  ;;  %1418 = vmatpush1.bf16.msra.mxu0 %v1785_v37  ;;  %v290_v38 = vld [vmem:[%s1899_s17 + $0x48] sm:$0xf] }
  0x8f   : > { %v675_v44 = vrot.slane %v2057_v42, 4  ;;  %v674_v45 = vrot.slane %v660_v43, 4 }
  0x90   : > { %756 = vrot.lane.b32.xlu1 %v2051_v39, %s1856_s18  ;;  %746 = vrot.lane.b32.xlu0 %v2054_v40, %s1856_s18 }
  0x91   : > { %v689_v47 = vsel %vm243_vm1, %v674_v45, %v675_v44 }
  0x92   : > { %v690_v48 = vsel %vm680_vm3, %v660_v43, %v689_v47  ;;  %v2069_v49 = vpop.permute.xlu1 %564  ;;  %v563_v50 = vpop.permute.xlu0 %562 }
  0x93   : > { %v583_v51 = vrot.slane %v2069_v49, 4  ;;  %v582_v52 = vrot.slane %v563_v50, 4  ;;  %v1777_v53 = vcombine.high %v681_v41, %v690_v48  ;;  %v1776_v54 = vcombine.low %v681_v41, %v690_v48  ;;  %v285_v41 = vld [vmem:[%s1899_s17 + $0x20] sm:$0xf] }
  0x94   : > { %667 = vrot.lane.b32.xlu1 %v2051_v39, %s1857_s19  ;;  %657 = vrot.lane.b32.xlu0 %v2054_v40, %s1857_s19  ;;  %v176_v48 = vld [vmem:[%s1899_s17 + $0x20] sm:$0xf] }
  0x95   : > { %v592_v55 = vsel %vm243_vm1, %v582_v52, %v583_v51  ;;  %1419 = vmatprep.subr.bf16.mxu0 %v1777_v53  ;;  %187 = vst.msk [vmem:[#allocation2 + $0x20] sm:$0xf] %vm186_vm7, %v176_v48  ;;  %v987_v48 = vld [vmem:[%s2560_s2] sm:$0xff] }
  0x96   : > { %v594_v58 = vsel %vm593_vm4, %v563_v50, %v592_v55  ;;  %v2082_v59 = vpop.permute.xlu1 %574  ;;  %v573_v60 = vpop.permute.xlu0 %572  ;;  %1420 = vmatpush1.bf16.msra.mxu0 %v1776_v54  ;;  %v181_v50 = vld [vmem:[%s1899_s17 + $0x48] sm:$0xf] }
  0x97   : > { %v588_v61 = vrot.slane %v2082_v59, 4  ;;  %v587_v62 = vrot.slane %v573_v60, 4  ;;  %192 = vst.msk [vmem:[#allocation2 + $0x44] sm:$0xf] %vm186_vm7, %v181_v50 }
  0x98   : > { %580 = vrot.lane.b32.xlu1 %v551_v56, %s1858_s20  ;;  %570 = vrot.lane.b32.xlu0 %v546_v57, %s1858_s20  ;;  %v2121_v56 = vld [vmem:[%s1899_s17 + $0x18] sm:$0xff]  ;;  %v2124_v57 = vld [vmem:[%s1899_s17 + $0x40] sm:$0xff] }
  0x99   : > { %v601_v63 = vsel %vm243_vm1, %v587_v62, %v588_v61  ;;  %v202_v62 = vld [vmem:[%s1899_s17 + $0x48] sm:$0xf] }
  0x9a   : > { %v602_v8 = vsel %vm593_vm4, %v573_v60, %v601_v63  ;;  %v2093_v9 = vpop.permute.xlu1 %477  ;;  %v476_v10 = vpop.permute.xlu0 %475  ;;  %v197_v63 = vld [vmem:[%s1899_s17 + $0x20] sm:$0xf] }
  0x9b   : > { %v496_v11 = vrot.slane %v2093_v9, 4  ;;  %v495_v20 = vrot.slane %v476_v10, 4  ;;  %v1768_v21 = vcombine.high %v594_v58, %v602_v8  ;;  %v1767_v24 = vcombine.low %v594_v58, %v602_v8 }
  0x9c   : > { %493 = vrot.lane.b32.xlu1 %v464_v2, %s1859_s21  ;;  %483 = vrot.lane.b32.xlu0 %v459_v3, %s1859_s21  ;;  %v1729_v58 = vcombine.high %v2121_v56, %v2124_v57  ;;  %v1728_v2 = vcombine.low %v2121_v56, %v2124_v57 }
  0x9d   : > { %v505_v25 = vsel %vm243_vm1, %v495_v20, %v496_v11  ;;  %1421 = vmatprep.subr.bf16.mxu0 %v1768_v21 }
  0x9e   : > { %v507_v30 = vsel %vm506_vm5, %v476_v10, %v505_v25  ;;  %v2104_v31 = vpop.permute.xlu1 %487  ;;  %v486_v33 = vpop.permute.xlu0 %485  ;;  %1422 = vmatpush1.bf16.msra.mxu0 %v1767_v24 }
  0x9f   : > { %v501_v35 = vrot.slane %v2104_v31, 4  ;;  %v500_v36 = vrot.slane %v486_v33, 4 }
  0xa0   : > { %406 = vrot.lane.b32.xlu1 %v377_v28, %s1860_s22  ;;  %396 = vrot.lane.b32.xlu0 %v372_v29, %s1860_s22 }
  0xa1   : > { %v514_v37 = vsel %vm243_vm1, %v500_v36, %v501_v35 }
  0xa2   : > { %v515_v43 = vsel %vm506_vm5, %v486_v33, %v514_v37  ;;  %v2115_v45 = vpop.permute.xlu1 %390  ;;  %v389_v47 = vpop.permute.xlu0 %388 }
  0xa3   : > { %v409_v52 = vrot.slane %v2115_v45, 4  ;;  %v408_v53 = vrot.slane %v389_v47, 4  ;;  %v1759_v54 = vcombine.high %v507_v30, %v515_v43  ;;  %v1758_v55 = vcombine.low %v507_v30, %v515_v43 }
  0xa4   : > { %319 = vrot.lane.b32.xlu1 %v290_v38, %s1861_s23  ;;  %309 = vrot.lane.b32.xlu0 %v285_v41, %s1861_s23 }
  0xa5   : > { %v418_v60 = vsel %vm243_vm1, %v408_v53, %v409_v52  ;;  %1423 = vmatprep.subr.bf16.mxu0 %v1759_v54 }
  0xa6   : > { %v420_v3 = vsel %vm419_vm6, %v389_v47, %v418_v60  ;;  %v2140_v8 = vpop.permute.xlu1 %400  ;;  %v399_v10 = vpop.permute.xlu0 %398  ;;  %1424 = vmatpush1.bf16.msra.mxu0 %v1758_v55 }
  0xa7   : > { %v414_v20 = vrot.slane %v2140_v8, 4  ;;  %v413_v21 = vrot.slane %v399_v10, 4 }
  0xa8   : > { %231 = vrot.lane.b32.xlu1 %v202_v62, %s1862_s24  ;;  %221 = vrot.lane.b32.xlu0 %v197_v63, %s1862_s24 }
  0xa9   : > { %v427_v24 = vsel %vm243_vm1, %v413_v21, %v414_v20 }
  0xaa   : > { %v428_v25 = vsel %vm419_vm6, %v399_v10, %v427_v24  ;;  %v2149_v28 = vpop.permute.xlu1 %303  ;;  %v302_v29 = vpop.permute.xlu0 %301 }
  0xab   : > { %v322_v30 = vrot.slane %v2149_v28, 4  ;;  %v321_v33 = vrot.slane %v302_v29, 4  ;;  %v1750_v36 = vcombine.high %v420_v3, %v428_v25  ;;  %v1749_v37 = vcombine.low %v420_v3, %v428_v25 }
  0xac   : > { %845 = vrot.lane.b32.xlu1 %v2051_v39, %s1863_s25  ;;  %835 = vrot.lane.b32.xlu0 %v2054_v40, %s1863_s25 }
  0xad   : > { %v331_v38 = vsel %vm243_vm1, %v321_v33, %v322_v30  ;;  %1425 = vmatprep.subr.bf16.mxu0 %v1750_v36 }
  0xae   : > { %v333_v41 = vsel %vm332_vm8, %v302_v29, %v331_v38  ;;  %v2160_v43 = vpop.permute.xlu1 %313  ;;  %v312_v47 = vpop.permute.xlu0 %311  ;;  %1426 = vmatpush1.bf16.msra.mxu0 %v1749_v37 }
  0xaf   : > { %v327_v39 = vrot.slane %v2160_v43, 4  ;;  %v326_v50 = vrot.slane %v312_v47, 4 }
  0xb0   : > { %990 = vperm.xlu0 %1829, %v987_v48  }
  0xb1   : > { %v340_v40 = vsel %vm243_vm1, %v326_v50, %v327_v39 }
  0xb2   : > { %v341_v53 = vsel %vm332_vm8, %v312_v47, %v340_v40  ;;  %v2170_v54 = vpop.permute.xlu1 %215  ;;  %v214_v55 = vpop.permute.xlu0 %213 }
  0xb3   : > { %v234_v60 = vrot.slane %v2170_v54, 4  ;;  %v233_v62 = vrot.slane %v214_v55, 4  ;;  %v1741_v63 = vcombine.high %v333_v41, %v341_v53  ;;  %v1740_v3 = vcombine.low %v333_v41, %v341_v53 }
  0xb5   : > { %v244_v10 = vsel %vm243_vm1, %v233_v62, %v234_v60  ;;  %1427 = vmatprep.subr.bf16.mxu0 %v1741_v63 }
  0xb6   : > { %v246_v21 = vsel %vm245_vm9, %v214_v55, %v244_v10  ;;  %v2177_v24 = vpop.permute.xlu1 %225  ;;  %v224_v25 = vpop.permute.xlu0 %223  ;;  %1428 = vmatpush1.bf16.msra.mxu0 %v1740_v3 }
  0xb7   : > { %v239_v29 = vrot.slane %v2177_v24, 4  ;;  %v238_v33 = vrot.slane %v224_v25, 4 }
  0xb9   : > { %v253_v36 = vsel %vm243_vm1, %v238_v33, %v239_v29 }
  0xba   : > { %v254_v37 = vsel %vm245_vm9, %v224_v25, %v253_v36  ;;  %v2184_v38 = vpop.permute.xlu1 %829  ;;  %v828_v41 = vpop.permute.xlu0 %827 }
  0xbb   : > { %v848_v47 = vrot.slane %v2184_v38, 4  ;;  %v847_v48 = vrot.slane %v828_v41, 4  ;;  %v1732_v50 = vcombine.high %v246_v21, %v254_v37  ;;  %v1731_v40 = vcombine.low %v246_v21, %v254_v37 }
  0xbd   : > { %v857_v53 = vsel %vm243_vm1, %v847_v48, %v848_v47  ;;  %1429 = vmatprep.subr.bf16.mxu0 %v1732_v50 }
  0xbe   : > { %v859_v55 = vsel %vm858_vm10, %v828_v41, %v857_v53  ;;  %v2191_v62 = vpop.permute.xlu1 %839  ;;  %v838_v63 = vpop.permute.xlu0 %837  ;;  %1430 = vmatpush1.bf16.msra.mxu0 %v1731_v40  ;;  %v2212_v53 = vcombine.low %v1961_v6, %v1961_v6 }
  0xbf   : > { %v853_v3 = vrot.slane %v2191_v62, 4  ;;  %v852_v10 = vrot.slane %v838_v63, 4  ;;  %1431 = vmatprep.subr.bf16.mxu0 %v1723_v4 }
  0xc1   : > { %v867_v21 = vsel %vm243_vm1, %v852_v10, %v853_v3 }
  0xc2   : > { %v868_v25 = vsel %vm858_vm10, %v838_v63, %v867_v21  ;;  %v753_v33 = vpop.permute.xlu1 %752  ;;  %v743_v36 = vpop.permute.xlu0 %742  ;;  %1432 = vmatpush1.bf16.msra.mxu0 %v1722_v5 }
  0xc3   : > { %v765_v37 = vrot.slane %v753_v33, 4  ;;  %v760_v41 = vrot.slane %v743_v36, 4  ;;  %v1795_v48 = vcombine.high %v859_v55, %v868_v25  ;;  %v1794_v50 = vcombine.low %v859_v55, %v868_v25 }
  0xc5   : > { %v780_v4 = vsel %vm243_vm1, %v764_v26, %v765_v37  ;;  %v771_v40 = vsel %vm243_vm1, %v759_v27, %v760_v41  ;;  %1447 = vmatprep.subr.bf16.mxu0 %v1795_v48 }
  0xc6   : > { %v781_v0 = vsel %vm769_vm2, %v2026_v22, %v780_v4  ;;  %v772_v1 = vsel %vm769_vm2, %v2028_v23, %v771_v40  ;;  %v2218_v5 = vpop.permute.xlu1 %754  ;;  %v2220_v55 = vpop.permute.xlu0 %744  ;;  %1448 = vmatpush2.bf16.msra.mxu0 %v1794_v50 }
  0xc7   : > { %v766_v26 = vrot.slane %v2218_v5, 4  ;;  %v761_v27 = vrot.slane %v2220_v55, 4  ;;  %v1788_v63 = vcombine.high %v772_v1, %v781_v0  ;;  %v1787_v10 = vcombine.low %v772_v1, %v781_v0 }
  0xc9   : > { %v782_v6 = vsel %vm243_vm1, %v765_v37, %v766_v26  ;;  %v773_v22 = vsel %vm243_vm1, %v760_v41, %v761_v27  ;;  %1458 = vmatprep.subr.bf16.mxu1 %v1788_v63  ;;  %1450 = vmatmul.mubr.bf16.vlgmr.msra.gmra.mxu0 %v2212_v53 }
  0xca   : > { %v783_v23 = vsel %vm769_vm2, %v753_v33, %v782_v6  ;;  %v774_v21 = vsel %vm769_vm2, %v743_v36, %v773_v22  ;;  %v664_v25 = vpop.permute.xlu1 %663  ;;  %v654_v48 = vpop.permute.xlu0 %653  ;;  %1459 = vmatpush1.bf16.msra.mxu1 %v1787_v10  ;;  %1805 = vmatprep.mubr.msk.bf16.mxu0 %vm1413_vm0, %v1965_v7 }
  0xcb   : > { %v676_v50 = vrot.slane %v664_v25, 4  ;;  %v671_v4 = vrot.slane %v654_v48, 4  ;;  %v1789_v37 = vcombine.low %v774_v21, %v783_v23  ;;  %v1790_v40 = vcombine.high %v774_v21, %v783_v23 }
  0xcd   : > { %v691_v41 = vsel %vm243_vm1, %v675_v44, %v676_v50  ;;  %v682_v33 = vsel %vm243_vm1, %v670_v34, %v671_v4  ;;  %1499 = vmatprep.subr.bf16.mxu0 %v1790_v40 }
  0xce   : > { %v692_v36 = vsel %vm680_vm3, %v2057_v42, %v691_v41  ;;  %v683_v0 = vsel %vm680_vm3, %v2042_v32, %v682_v33  ;;  %v2245_v1 = vpop.permute.xlu1 %665  ;;  %v2247_v63 = vpop.permute.xlu0 %655  ;;  %1500 = vmatpush1.bf16.msra.mxu0 %v1789_v37 }
  0xcf   : > { %v677_v10 = vrot.slane %v2245_v1, 4  ;;  %v672_v44 = vrot.slane %v2247_v63, 4  ;;  %v1779_v6 = vcombine.high %v683_v0, %v692_v36  ;;  %v1778_v22 = vcombine.low %v683_v0, %v692_v36 }
  0xd1   : > { %v693_v34 = vsel %vm243_vm1, %v676_v50, %v677_v10  ;;  %v684_v42 = vsel %vm243_vm1, %v671_v4, %v672_v44  ;;  %1460 = vmatprep.subr.bf16.mxu1 %v1779_v6 }
  0xd2   : > { %v694_v32 = vsel %vm680_vm3, %v664_v25, %v693_v34  ;;  %v685_v23 = vsel %vm680_vm3, %v654_v48, %v684_v42  ;;  %v577_v21 = vpop.permute.xlu1 %576  ;;  %v567_v37 = vpop.permute.xlu0 %566  ;;  %1461 = vmatpush1.bf16.msra.mxu1 %v1778_v22 }
  0xd3   : > { %v589_v40 = vrot.slane %v577_v21, 4  ;;  %v584_v41 = vrot.slane %v567_v37, 4  ;;  %v1780_v33 = vcombine.low %v685_v23, %v694_v32  ;;  %v1781_v36 = vcombine.high %v685_v23, %v694_v32 }
  0xd5   : > { %v603_v50 = vsel %vm243_vm1, %v588_v61, %v589_v40  ;;  %v595_v4 = vsel %vm243_vm1, %v583_v51, %v584_v41  ;;  %1501 = vmatprep.subr.bf16.mxu0 %v1781_v36 }
  0xd6   : > { %v604_v25 = vsel %vm593_vm4, %v2082_v59, %v603_v50  ;;  %v596_v48 = vsel %vm593_vm4, %v2069_v49, %v595_v4  ;;  %v2269_v0 = vpop.permute.xlu1 %578  ;;  %v2271_v6 = vpop.permute.xlu0 %568  ;;  %1502 = vmatpush1.bf16.msra.mxu0 %v1780_v33 }
  0xd7   : > { %v590_v22 = vrot.slane %v2269_v0, 4  ;;  %v585_v61 = vrot.slane %v2271_v6, 4  ;;  %v1770_v34 = vcombine.high %v596_v48, %v604_v25  ;;  %v1769_v42 = vcombine.low %v596_v48, %v604_v25 }
  0xd9   : > { %v605_v51 = vsel %vm243_vm1, %v589_v40, %v590_v22  ;;  %v597_v59 = vsel %vm243_vm1, %v584_v41, %v585_v61  ;;  %1462 = vmatprep.subr.bf16.mxu1 %v1770_v34 }
  0xda   : > { %v606_v49 = vsel %vm593_vm4, %v577_v21, %v605_v51  ;;  %v598_v32 = vsel %vm593_vm4, %v567_v37, %v597_v59  ;;  %v490_v23 = vpop.permute.xlu1 %489  ;;  %v480_v33 = vpop.permute.xlu0 %479  ;;  %1463 = vmatpush1.bf16.msra.mxu1 %v1769_v42 }
  0xdb   : > { %v502_v36 = vrot.slane %v490_v23, 4  ;;  %v497_v50 = vrot.slane %v480_v33, 4  ;;  %v1771_v4 = vcombine.low %v598_v32, %v606_v49  ;;  %v1772_v25 = vcombine.high %v598_v32, %v606_v49 }
  0xdd   : > { %v516_v40 = vsel %vm243_vm1, %v501_v35, %v502_v36  ;;  %v508_v41 = vsel %vm243_vm1, %v496_v11, %v497_v50  ;;  %1503 = vmatprep.subr.bf16.mxu0 %v1772_v25 }
  0xde   : > { %v517_v21 = vsel %vm506_vm5, %v2104_v31, %v516_v40  ;;  %v509_v37 = vsel %vm506_vm5, %v2093_v9, %v508_v41  ;;  %v2293_v48 = vpop.permute.xlu1 %491  ;;  %v2295_v34 = vpop.permute.xlu0 %481  ;;  %1504 = vmatpush1.bf16.msra.mxu0 %v1771_v4 }
  0xdf   : > { %v503_v42 = vrot.slane %v2293_v48, 4  ;;  %v498_v35 = vrot.slane %v2295_v34, 4  ;;  %v1761_v51 = vcombine.high %v509_v37, %v517_v21  ;;  %v1760_v59 = vcombine.low %v509_v37, %v517_v21 }
  0xe1   : > { %v518_v11 = vsel %vm243_vm1, %v502_v36, %v503_v42  ;;  %v510_v31 = vsel %vm243_vm1, %v497_v50, %v498_v35  ;;  %1464 = vmatprep.subr.bf16.mxu1 %v1761_v51 }
  0xe2   : > { %v519_v9 = vsel %vm506_vm5, %v490_v23, %v518_v11  ;;  %v511_v49 = vsel %vm506_vm5, %v480_v33, %v510_v31  ;;  %v403_v32 = vpop.permute.xlu1 %402  ;;  %v393_v4 = vpop.permute.xlu0 %392  ;;  %1465 = vmatpush1.bf16.msra.mxu1 %v1760_v59 }
  0xe3   : > { %v415_v25 = vrot.slane %v403_v32, 4  ;;  %v410_v40 = vrot.slane %v393_v4, 4  ;;  %v1762_v41 = vcombine.low %v511_v49, %v519_v9  ;;  %v1763_v21 = vcombine.high %v511_v49, %v519_v9 }
  0xe5   : > { %v429_v36 = vsel %vm243_vm1, %v414_v20, %v415_v25  ;;  %v421_v50 = vsel %vm243_vm1, %v409_v52, %v410_v40  ;;  %1505 = vmatprep.subr.bf16.mxu0 %v1763_v21 }
  0xe6   : > { %v430_v23 = vsel %vm419_vm6, %v2140_v8, %v429_v36  ;;  %v422_v33 = vsel %vm419_vm6, %v2115_v45, %v421_v50  ;;  %v2317_v37 = vpop.permute.xlu1 %404  ;;  %v2319_v51 = vpop.permute.xlu0 %394  ;;  %1506 = vmatpush1.bf16.msra.mxu0 %v1762_v41 }
  0xe7   : > { %v416_v59 = vrot.slane %v2317_v37, 4  ;;  %v411_v20 = vrot.slane %v2319_v51, 4  ;;  %v1752_v11 = vcombine.high %v422_v33, %v430_v23  ;;  %v1751_v31 = vcombine.low %v422_v33, %v430_v23 }
  0xe9   : > { %v431_v52 = vsel %vm243_vm1, %v415_v25, %v416_v59  ;;  %v423_v8 = vsel %vm243_vm1, %v410_v40, %v411_v20  ;;  %1466 = vmatprep.subr.bf16.mxu1 %v1752_v11 }
  0xea   : > { %v432_v45 = vsel %vm419_vm6, %v403_v32, %v431_v52  ;;  %v424_v9 = vsel %vm419_vm6, %v393_v4, %v423_v8  ;;  %v316_v49 = vpop.permute.xlu1 %315  ;;  %v306_v41 = vpop.permute.xlu0 %305  ;;  %1467 = vmatpush1.bf16.msra.mxu1 %v1751_v31 }
  0xeb   : > { %v328_v21 = vrot.slane %v316_v49, 4  ;;  %v323_v36 = vrot.slane %v306_v41, 4  ;;  %v1753_v50 = vcombine.low %v424_v9, %v432_v45  ;;  %v1754_v23 = vcombine.high %v424_v9, %v432_v45 }
  0xed   : > { %v342_v25 = vsel %vm243_vm1, %v327_v39, %v328_v21  ;;  %v334_v40 = vsel %vm243_vm1, %v322_v30, %v323_v36  ;;  %1507 = vmatprep.subr.bf16.mxu0 %v1754_v23 }
  0xee   : > { %v343_v32 = vsel %vm332_vm8, %v2160_v43, %v342_v25  ;;  %v335_v4 = vsel %vm332_vm8, %v2149_v28, %v334_v40  ;;  %v2341_v33 = vpop.permute.xlu1 %317  ;;  %v2343_v11 = vpop.permute.xlu0 %307  ;;  %1508 = vmatpush1.bf16.msra.mxu0 %v1753_v50 }
  0xef   : > { %v329_v31 = vrot.slane %v2341_v33, 4  ;;  %v324_v39 = vrot.slane %v2343_v11, 4  ;;  %v1743_v52 = vcombine.high %v335_v4, %v343_v32  ;;  %v1742_v8 = vcombine.low %v335_v4, %v343_v32 }
  0xf1   : > { %v344_v30 = vsel %vm243_vm1, %v328_v21, %v329_v31  ;;  %v336_v43 = vsel %vm243_vm1, %v323_v36, %v324_v39  ;;  %1468 = vmatprep.subr.bf16.mxu1 %v1743_v52 }
  0xf2   : > { %v345_v28 = vsel %vm332_vm8, %v316_v49, %v344_v30  ;;  %v337_v45 = vsel %vm332_vm8, %v306_v41, %v336_v43  ;;  %v228_v9 = vpop.permute.xlu1 %227  ;;  %v218_v50 = vpop.permute.xlu0 %217  ;;  %1469 = vmatpush1.bf16.msra.mxu1 %v1742_v8 }
  0xf3   : > { %v240_v23 = vrot.slane %v228_v9, 4  ;;  %v235_v25 = vrot.slane %v218_v50, 4  ;;  %v1744_v40 = vcombine.low %v337_v45, %v345_v28  ;;  %v1745_v32 = vcombine.high %v337_v45, %v345_v28 }
  0xf5   : > { %v255_v21 = vsel %vm243_vm1, %v239_v29, %v240_v23  ;;  %v247_v36 = vsel %vm243_vm1, %v234_v60, %v235_v25  ;;  %1509 = vmatprep.subr.bf16.mxu0 %v1745_v32 }
  0xf6   : > { %v256_v49 = vsel %vm245_vm9, %v2177_v24, %v255_v21  ;;  %v248_v41 = vsel %vm245_vm9, %v2170_v54, %v247_v36  ;;  %v2365_v4 = vpop.permute.xlu1 %229  ;;  %v2367_v52 = vpop.permute.xlu0 %219  ;;  %1510 = vmatpush1.bf16.msra.mxu0 %v1744_v40 }
  0xf7   : > { %v241_v8 = vrot.slane %v2365_v4, 4  ;;  %v236_v29 = vrot.slane %v2367_v52, 4  ;;  %v1734_v30 = vcombine.high %v248_v41, %v256_v49  ;;  %v1733_v43 = vcombine.low %v248_v41, %v256_v49 }
  0xf9   : > { %v257_v60 = vsel %vm243_vm1, %v240_v23, %v241_v8  ;;  %v249_v24 = vsel %vm243_vm1, %v235_v25, %v236_v29  ;;  %1470 = vmatprep.subr.bf16.mxu1 %v1734_v30 }
  0xfa   : > { %v258_v54 = vsel %vm245_vm9, %v228_v9, %v257_v60  ;;  %v250_v28 = vsel %vm245_vm9, %v218_v50, %v249_v24  ;;  %v842_v45 = vpop.permute.xlu1 %841  ;;  %v832_v40 = vpop.permute.xlu0 %831  ;;  %1471 = vmatpush1.bf16.msra.mxu1 %v1733_v43 }
  0xfb   : > { %v854_v32 = vrot.slane %v842_v45, 4  ;;  %v849_v21 = vrot.slane %v832_v40, 4  ;;  %1472 = vmatprep.subr.bf16.mxu1 %v1725_v14  ;;  %v1735_v36 = vcombine.low %v250_v28, %v258_v54  ;;  %v1736_v23 = vcombine.high %v250_v28, %v258_v54 }
  0xfd   : > { %v869_v25 = vsel %vm243_vm1, %v853_v3, %v854_v32  ;;  %v860_v9 = vsel %vm243_vm1, %v848_v47, %v849_v21  ;;  %1511 = vmatprep.subr.bf16.mxu0 %v1736_v23 }
  0xfe   : > { %v870_v50 = vsel %vm858_vm10, %v2191_v62, %v869_v25  ;;  %v861_v49 = vsel %vm858_vm10, %v2184_v38, %v860_v9  ;;  %v2392_v41 = vpop.permute.xlu1 %843  ;;  %v2394_v14 = vpop.permute.xlu0 %833  ;;  %1473 = vmatpush1.bf16.msra.mxu1 %v1724_v15  ;;  %1512 = vmatpush1.bf16.msra.mxu0 %v1735_v36 }
  0xff   : > { %v855_v3 = vrot.slane %v2392_v41, 4  ;;  %v850_v47 = vrot.slane %v2394_v14, 4  ;;  %v1797_v30 = vcombine.high %v861_v49, %v870_v50  ;;  %1513 = vmatprep.subr.bf16.mxu0 %v1727_v18  ;;  %v1796_v62 = vcombine.low %v861_v49, %v870_v50 }
 0x101   : > { %v871_v38 = vsel %vm243_vm1, %v854_v32, %v855_v3  ;;  %v862_v12 = vsel %vm243_vm1, %v849_v21, %v850_v47  ;;  %1488 = vmatprep.subr.bf16.mxu1 %v1797_v30 }
 0x102   : > { %v872_v13 = vsel %vm858_vm10, %v842_v45, %v871_v38  ;;  %v863_v15 = vsel %vm858_vm10, %v832_v40, %v862_v12  ;;  %v757_v43 = vpop.permute.xlu1 %756  ;;  %v747_v60 = vpop.permute.xlu0 %746  ;;  %1489 = vmatpush2.bf16.msra.mxu1 %v1796_v62  ;;  %1514 = vmatpush1.bf16.msra.mxu0 %v1726_v19 }
 0x103   : > { %v767_v18 = vrot.slane %v757_v43, 4  ;;  %v762_v24 = vrot.slane %v747_v60, 4  ;;  %v1798_v54 = vcombine.low %v863_v15, %v872_v13  ;;  %v1799_v28 = vcombine.high %v863_v15, %v872_v13 }
 0x105   : > { %v784_v32 = vsel %vm243_vm1, %v766_v26, %v767_v18  ;;  %v786_v21 = vsel %vm769_vm2, %v757_v43, %v767_v18  ;;  %v775_v45 = vsel %vm243_vm1, %v761_v27, %v762_v24  ;;  %v777_v40 = vsel %vm769_vm2, %v747_v60, %v762_v24  ;;  %1491 = vmatmul.mubr.bf16.vlgmr.msra.gmra.mxu1 %v2212_v53 }
 0x106   : > { %v785_v16 = vsel %vm769_vm2, %v2218_v5, %v784_v32  ;;  %806 = vst.msk [vmem:[#allocation2 + $0x23c] sm:$0xf] %vm186_vm7, %v786_v21  ;;  %v776_v17 = vsel %vm769_vm2, %v2220_v55, %v775_v45  ;;  %801 = vst.msk [vmem:[#allocation2 + $0x218] sm:$0xf] %vm186_vm7, %v777_v40  ;;  %v668_v19 = vpop.permute.xlu1 %667  ;;  %v658_v26 = vpop.permute.xlu0 %657  ;;  %1529 = vmatprep.subr.bf16.mxu0 %v1799_v28  ;;  %1806 = vmatprep.mubr.msk.bf16.mxu1 %vm1413_vm0, %v1965_v7 }
 0x107   : > { %v678_v27 = vrot.slane %v668_v19, 4  ;;  %v673_v36 = vrot.slane %v658_v26, 4  ;;  %1530 = vmatpush2.bf16.msra.mxu0 %v1798_v54  ;;  %v1791_v23 = vcombine.low %v776_v17, %v785_v16  ;;  %v1792_v25 = vcombine.high %v776_v17, %v785_v16 }
 0x108   : > { %1581 = vmatprep.subr.bf16.mxu0 %v1864_v46 }
 0x109   : > { %v695_v5 = vsel %vm243_vm1, %v677_v10, %v678_v27  ;;  %v697_v55 = vsel %vm680_vm3, %v668_v19, %v678_v27  ;;  %v686_v9 = vsel %vm243_vm1, %v672_v44, %v673_v36  ;;  %v688_v50 = vsel %vm680_vm3, %v658_v26, %v673_v36  ;;  %1540 = vmatprep.subr.bf16.mxu1 %v1792_v25 }
 0x10a   : > { %v696_v49 = vsel %vm680_vm3, %v2245_v1, %v695_v5  ;;  %717 = vst.msk [vmem:[#allocation2 + $0x1f4] sm:$0xf] %vm186_vm7, %v697_v55  ;;  %v687_v30 = vsel %vm680_vm3, %v2247_v63, %v686_v9  ;;  %712 = vst.msk [vmem:[#allocation2 + $0x1d0] sm:$0xf] %vm186_vm7, %v688_v50  ;;  %v581_v10 = vpop.permute.xlu1 %580  ;;  %v571_v62 = vpop.permute.xlu0 %570  ;;  %1532 = vmatmul.mubr.bf16.vlgmr.msra.gmra.mxu0 %v2212_v53  ;;  %1541 = vmatpush1.bf16.msra.mxu1 %v1791_v23 }
 0x10b   : > { %v591_v38 = vrot.slane %v581_v10, 4  ;;  %628 = vst.msk [vmem:[#allocation2 + $0x1ac] sm:$0xf] %vm186_vm7, %v581_v10  ;;  %v586_v44 = vrot.slane %v571_v62, 4  ;;  %623 = vst.msk [vmem:[#allocation2 + $0x188] sm:$0xf] %vm186_vm7, %v571_v62  ;;  %v1782_v12 = vcombine.low %v687_v30, %v696_v49  ;;  %v1783_v1 = vcombine.high %v687_v30, %v696_v49  ;;  %1807 = vmatprep.mubr.msk.bf16.mxu0 %vm1413_vm0, %v1965_v7 }
 0x10d   : > { %v607_v63 = vsel %vm243_vm1, %v590_v22, %v591_v38  ;;  %v599_v13 = vsel %vm243_vm1, %v585_v61, %v586_v44  ;;  %v1837_v15 = vld [vmem:[#allocation2 + $0x218] ss:$36 sps:$4 sm:$0xff]   ;;  %1542 = vmatprep.subr.bf16.mxu1 %v1783_v1 }
 0x10e   : > { %v608_v43 = vsel %vm593_vm4, %v2269_v0, %v607_v63  ;;  %v600_v60 = vsel %vm593_vm4, %v2271_v6, %v599_v13  ;;  %v494_v18 = vpop.permute.xlu1 %493  ;;  %v484_v24 = vpop.permute.xlu0 %483  ;;  %1543 = vmatpush1.bf16.msra.mxu1 %v1782_v12  ;;  %1582 = vmatpush1.bf16.msra.mxu0 %v1837_v15  ;;  %vm1656_vm4 = vcmask 523264  }
 0x10f   : > { %v504_v7 = vrot.slane %v494_v18, 4  ;;  %541 = vst.msk [vmem:[#allocation2 + $0x164] sm:$0xf] %vm186_vm7, %v494_v18  ;;  %v499_v54 = vrot.slane %v484_v24, 4  ;;  %536 = vst.msk [vmem:[#allocation2 + $0x140] sm:$0xf] %vm186_vm7, %v484_v24  ;;  %v1773_v22 = vcombine.low %v600_v60, %v608_v43  ;;  %v1774_v61 = vcombine.high %v600_v60, %v608_v43  ;;  %1583 = vmatprep.subr.bf16.mxu0 %v1864_v46 }
 0x111   : > { %v520_v0 = vsel %vm243_vm1, %v503_v42, %v504_v7  ;;  %v512_v6 = vsel %vm243_vm1, %v498_v35, %v499_v54  ;;  %v1838_v28 = vld [vmem:[#allocation2 + $0x1d0] ss:$36 sps:$4 sm:$0xff]   ;;  %1544 = vmatprep.subr.bf16.mxu1 %v1774_v61 }
 0x112   : > { %v521_v32 = vsel %vm506_vm5, %v2293_v48, %v520_v0  ;;  %v513_v21 = vsel %vm506_vm5, %v2295_v34, %v512_v6  ;;  %v407_v45 = vpop.permute.xlu1 %406  ;;  %v397_v40 = vpop.permute.xlu0 %396  ;;  %1545 = vmatpush1.bf16.msra.mxu1 %v1773_v22  ;;  %1584 = vmatpush1.bf16.msra.mxu0 %v1838_v28  ;;  %v1839_v42 = vld [vmem:[#allocation2 + $0x188] ss:$36 sps:$4 sm:$0xff]  }
 0x113   : > { %v417_v16 = vrot.slane %v407_v45, 4  ;;  %454 = vst.msk [vmem:[#allocation2 + $0x11c] sm:$0xf] %vm186_vm7, %v407_v45  ;;  %v412_v17 = vrot.slane %v397_v40, 4  ;;  %449 = vst.msk [vmem:[#allocation2 + $0xf8] sm:$0xf] %vm186_vm7, %v397_v40  ;;  %v1764_v35 = vcombine.low %v513_v21, %v521_v32  ;;  %v1765_v19 = vcombine.high %v513_v21, %v521_v32  ;;  %1585 = vmatprep.subr.bf16.mxu0 %v1864_v46 }
 0x115   : > { %v433_v48 = vsel %vm243_vm1, %v416_v59, %v417_v16  ;;  %v425_v34 = vsel %vm243_vm1, %v411_v20, %v412_v17  ;;  %1546 = vmatprep.subr.bf16.mxu1 %v1765_v19 }
 0x116   : > { %v434_v26 = vsel %vm419_vm6, %v2317_v37, %v433_v48  ;;  %v426_v27 = vsel %vm419_vm6, %v2319_v51, %v425_v34  ;;  %v320_v36 = vpop.permute.xlu1 %319  ;;  %v310_v23 = vpop.permute.xlu0 %309  ;;  %1547 = vmatpush1.bf16.msra.mxu1 %v1764_v35  ;;  %1586 = vmatpush1.bf16.msra.mxu0 %v1839_v42  ;;  %v1840_v59 = vld [vmem:[#allocation2 + $0x140] ss:$36 sps:$4 sm:$0xff]  }
 0x117   : > { %v330_v25 = vrot.slane %v320_v36, 4  ;;  %367 = vst.msk [vmem:[#allocation2 + $0xd4] sm:$0xf] %vm186_vm7, %v320_v36  ;;  %v325_v5 = vrot.slane %v310_v23, 4  ;;  %362 = vst.msk [vmem:[#allocation2 + $0xb0] sm:$0xf] %vm186_vm7, %v310_v23  ;;  %v1755_v55 = vcombine.low %v426_v27, %v434_v26  ;;  %v1756_v20 = vcombine.high %v426_v27, %v434_v26  ;;  %1587 = vmatprep.subr.bf16.mxu0 %v1864_v46 }
 0x119   : > { %v346_v37 = vsel %vm243_vm1, %v329_v31, %v330_v25  ;;  %v338_v51 = vsel %vm243_vm1, %v324_v39, %v325_v5  ;;  %1548 = vmatprep.subr.bf16.mxu1 %v1756_v20 }
 0x11a   : > { %v347_v9 = vsel %vm332_vm8, %v2341_v33, %v346_v37  ;;  %v339_v50 = vsel %vm332_vm8, %v2343_v11, %v338_v51  ;;  %v232_v49 = vpop.permute.xlu1 %231  ;;  %v222_v30 = vpop.permute.xlu0 %221  ;;  %1549 = vmatpush1.bf16.msra.mxu1 %v1755_v55  ;;  %1588 = vmatpush1.bf16.msra.mxu0 %v1840_v59  ;;  %v1841_v31 = vld [vmem:[#allocation2 + $0xf8] ss:$36 sps:$4 sm:$0xff]  }
 0x11b   : > { %v242_v10 = vrot.slane %v232_v49, 4  ;;  %280 = vst.msk [vmem:[#allocation2 + $0x8c] sm:$0xf] %vm186_vm7, %v232_v49  ;;  %v237_v62 = vrot.slane %v222_v30, 4  ;;  %275 = vst.msk [vmem:[#allocation2 + $0x68] sm:$0xf] %vm186_vm7, %v222_v30  ;;  %v1746_v38 = vcombine.low %v339_v50, %v347_v9  ;;  %v1747_v39 = vcombine.high %v339_v50, %v347_v9  ;;  %1589 = vmatprep.subr.bf16.mxu0 %v1864_v46 }
 0x11d   : > { %v259_v33 = vsel %vm243_vm1, %v241_v8, %v242_v10  ;;  %v251_v11 = vsel %vm243_vm1, %v236_v29, %v237_v62  ;;  %1550 = vmatprep.subr.bf16.mxu1 %v1747_v39 }
 0x11e   : > { %v260_v44 = vsel %vm245_vm9, %v2365_v4, %v259_v33  ;;  %v252_v12 = vsel %vm245_vm9, %v2367_v52, %v251_v11  ;;  %v846_v1 = vpop.permute.xlu1 %845  ;;  %v836_v63 = vpop.permute.xlu0 %835  ;;  %1551 = vmatpush1.bf16.msra.mxu1 %v1746_v38  ;;  %1590 = vmatpush1.bf16.msra.mxu0 %v1841_v31  ;;  %v1842_v43 = vld [vmem:[#allocation2 + $0xb0] ss:$36 sps:$4 sm:$0xff]  }
 0x11f   : > { %v856_v13 = vrot.slane %v846_v1, 4  ;;  %v851_v15 = vrot.slane %v836_v63, 4  ;;  %v1737_v60 = vcombine.low %v252_v12, %v260_v44  ;;  %v1738_v8 = vcombine.high %v252_v12, %v260_v44  ;;  %1591 = vmatprep.subr.bf16.mxu0 %v1864_v46 }
 0x121   : > { %v873_v29 = vsel %vm243_vm1, %v855_v3, %v856_v13  ;;  %v875_v4 = vsel %vm858_vm10, %v846_v1, %v856_v13  ;;  %v864_v52 = vsel %vm243_vm1, %v850_v47, %v851_v15  ;;  %v866_v18 = vsel %vm858_vm10, %v836_v63, %v851_v15  ;;  %1552 = vmatprep.subr.bf16.mxu1 %v1738_v8 }
 0x122   : > { %v874_v24 = vsel %vm858_vm10, %v2392_v41, %v873_v29  ;;  %895 = vst.msk [vmem:[#allocation2 + $0x284] sm:$0xf] %vm186_vm7, %v875_v4  ;;  %v865_v7 = vsel %vm858_vm10, %v2394_v14, %v864_v52  ;;  %890 = vst.msk [vmem:[#allocation2 + $0x260] sm:$0xf] %vm186_vm7, %v866_v18  ;;  %1553 = vmatpush1.bf16.msra.mxu1 %v1737_v60  ;;  %1592 = vmatpush1.bf16.msra.mxu0 %v1842_v43  ;;  %v1843_v3 = vld [vmem:[#allocation2 + $0x68] ss:$36 sps:$4 sm:$0xff]  }
 0x123   : > { %1554 = vmatprep.subr.bf16.mxu1 %v1729_v58  ;;  %1593 = vmatprep.subr.bf16.mxu0 %v1864_v46  ;;  %v1801_v47 = vcombine.high %v865_v7, %v874_v24  ;;  %v1846_v41 = vld [vmem:[#allocation2 + $0x20] ss:$36 sps:$4 sm:$0xff]   ;;  %v1800_v14 = vcombine.low %v865_v7, %v874_v24 }
 0x126   : > { %1555 = vmatpush1.bf16.msra.mxu1 %v1728_v2  ;;  %1594 = vmatpush1.bf16.msra.mxu0 %v1843_v3 }
 0x127   : > { %1570 = vmatprep.subr.bf16.mxu1 %v1801_v47  ;;  %1595 = vmatprep.subr.bf16.mxu0 %v1864_v46 }
 0x129   : > { %v1847_v54 = vld [vmem:[#allocation2 + $0x260] ss:$36 sps:$4 sm:$0xff]  }
 0x12a   : > { %1571 = vmatpush2.bf16.msra.mxu1 %v1800_v14  ;;  %1596 = vmatpush1.bf16.msra.mxu0 %v1846_v41 }
 0x12b   : > { %1611 = vmatprep.subr.bf16.mxu0 %v1864_v46  ;;  %v991_v58 = vpop.permute.xlu0 %990 }
 0x12d   : > { %1573 = vmatmul.mubr.bf16.vlgmr.msra.gmra.mxu1 %v2212_v53 }
 0x12e   : > { %1612 = vmatpush2.bf16.msra.mxu0 %v1847_v54 }
 0x131   : > { %1614 = vmatmul.mubr.bf16.vlgmr.msra.gmra.mxu0 %v2212_v53 }
 0x189   : > { %v1451_v56 = vpop.f32.mrf.mxu0 }
 0x18a   : > { %v1452_v57 = vadd.f32 %v1451_v56, %v991_v58 }
 0x18b   : > { %v1453_v2 = vpop.f32.mrf.mxu0 }
 0x18c   : > { %v1454_v22 = vadd.f32 %v1453_v2, %v991_v58  ;;  %vm1621_vm11 = vcmp.gt.f32.partialorder %v1452_v57, 0.0  ;;  %v1630_v46 = vmul.f32 0.2, %v1452_v57 }
 0x18d   : > { %v1455_v61 = vpop.f32.mrf.mxu0 }
 0x18e   : > { %vm1622_vm12 = vcmp.gt.f32.partialorder %v1454_v22, 0.0  ;;  %v1631_v0 = vmul.f32 0.2, %v1454_v22  ;;  %v1639_v6 = vsel %vm1621_vm11, %v1452_v57, %v1630_v46 }
 0x18f   : > { %1648 = vst [vmem:[%s2544_s6] sm:$0xff] %v1639_v6  ;;  %v1456_v53 = vpop.f32.mrf.mxu0 }
 0x190   : > { %v1640_v28 = vsel %vm1622_vm12, %v1454_v22, %v1631_v0 }
 0x191   : > { %1649 = vst [vmem:[%s2544_s6 + $0x8] sm:$0xff] %v1640_v28 }
 0x1c5   : > { %v1492_v32 = vpop.f32.mrf.mxu1 }
 0x1c6   : > { %v1493_v21 = vadd.f32 %v1492_v32, %v991_v58 }
 0x1c7   : > { %v1494_v45 = vpop.f32.mrf.mxu1 }
 0x1c8   : > { %vm1623_vm13 = vcmp.gt.f32.partialorder %v1493_v21, 0.0  ;;  %v1632_v40 = vmul.f32 0.2, %v1493_v21  ;;  %v1495_v16 = vadd.f32 %v1494_v45, %v991_v58 }
 0x1c9   : > { %v1496_v17 = vpop.f32.mrf.mxu1 }
 0x1ca   : > { %v1641_v42 = vsel %vm1623_vm13, %v1493_v21, %v1632_v40  ;;  %vm1624_vm14 = vcmp.gt.f32.partialorder %v1495_v16, 0.0  ;;  %v1633_v35 = vmul.f32 0.2, %v1495_v16  ;;  %v1533_v19 = vpop.f32.mrf.mxu0 }
 0x1cb   : > { %1650 = vst [vmem:[%s2544_s6 + $0x10] sm:$0xff] %v1641_v42  ;;  %v1534_v48 = vadd.f32 %v1533_v19, %v991_v58  ;;  %v1497_v34 = vpop.f32.mrf.mxu1 }
 0x1cc   : > { %v1642_v26 = vsel %vm1624_vm14, %v1495_v16, %v1633_v35  ;;  %v1535_v27 = vpop.f32.mrf.mxu0 }
 0x1cd   : > { %1651 = vst [vmem:[%s2544_s6 + $0x18] sm:$0xff] %v1642_v26  ;;  %vm1625_vm15 = vcmp.gt.f32.partialorder %v1534_v48, 0.0  ;;  %v1634_v36 = vmul.f32 0.2, %v1534_v48  ;;  %v1536_v23 = vadd.f32 %v1535_v27, %v991_v58 }
 0x1ce   : > { %v1537_v25 = vpop.f32.mrf.mxu0 }
 0x1cf   : > { %v1643_v5 = vsel %vm1625_vm15, %v1534_v48, %v1634_v36  ;;  %vm1626_vm0 = vcmp.gt.f32.partialorder %v1536_v23, 0.0  ;;  %v1635_v59 = vmul.f32 0.2, %v1536_v23 }
 0x1d0   : > { %1652 = vst [vmem:[%s2544_s6 + $0x20] sm:$0xff] %v1643_v5  ;;  %v1538_v55 = vpop.f32.mrf.mxu0 }
 0x1d1   : > { %v1644_v20 = vsel %vm1626_vm0, %v1536_v23, %v1635_v59 }
 0x1d2   : > { %1653 = vst [vmem:[%s2544_s6 + $0x28] sm:$0xff] %v1644_v20 }
 0x1ed   : > { %v1574_v37 = vpop.f32.mrf.mxu1 }
 0x1ee   : > { %v1575_v51 = vadd.f32 %v1574_v37, %v991_v58 }
 0x1ef   : > { %v1576_v9 = vpop.f32.mrf.mxu1 }
 0x1f0   : > { %vm1627_vm1 = vcmp.gt.f32.partialorder %v1575_v51, 0.0  ;;  %v1636_v50 = vmul.f32 0.2, %v1575_v51  ;;  %v1577_v49 = vadd.f32 %v1576_v9, %v991_v58 }
 0x1f1   : > { %v1578_v30 = vpop.f32.mrf.mxu1  ;;  %v1615_v62 = vpop.f32.mrf.mxu0 }
 0x1f2   : > { %v1645_v10 = vsel %vm1627_vm1, %v1575_v51, %v1636_v50  ;;  %vm1628_vm2 = vcmp.gt.f32.partialorder %v1577_v49, 0.0  ;;  %v1637_v31 = vmul.f32 0.2, %v1577_v49  ;;  %v1616_v38 = vadd.f32 %v1615_v62, %v991_v58 }
 0x1f3   : > { %1654 = vst [vmem:[%s2544_s6 + $0x30] sm:$0xff] %v1645_v10  ;;  %v1579_v39 = vpop.f32.mrf.mxu1  ;;  %v1617_v11 = vpop.f32.mrf.mxu0 }
 0x1f4   : > { %v1646_v33 = vsel %vm1628_vm2, %v1577_v49, %v1637_v31  ;;  %vm1629_vm3 = vcmp.gt.f32.partialorder %v1616_v38, 0.0  ;;  %v1638_v44 = vmul.f32 0.2, %v1616_v38 }
 0x1f5   : > { %1655 = vst [vmem:[%s2544_s6 + $0x38] sm:$0xff] %v1646_v33  ;;  %v1618_v12 = vpop.f32.mrf.mxu0 }
 0x1f6   : > { %v1647_v1 = vsel %vm1629_vm3, %v1616_v38, %v1638_v44 }
 0x1f7   : > { %1657 = vst.msk [vmem:[%s2544_s6 + $0x40] sm:$0xff] %vm1656_vm4, %v1647_v1  ;;  %v1619_v63 = vpop.f32.mrf.mxu0 }
 0x1f8 PF: > { %s13_s12 = sadd.s32 1, %s1854_s12  }
 0x1f9   : > { %p10_p4 = scmp.ge.s32.totalorder %s13_s12, 4  }
 0x1fb   :  { %12 = sbr.rel (!%p10_p4) target bundleno = 1 (0x1), region = 62 }

// kernel: loss_forward.31
= control target key start
LH: loop header
LB: loop body
LE: loop exit
PB: predicated region body
PF: predicated region fallthrough
CT: control target
= control target key end

     0   :  { %s1974_s12 = smov 0   ;;  %s2664_s0 = inlined_call_operand.vmem [shape: bf16[2,16,1158], index: 0, kind: input, shape index: {}]   ;;  %s2665_s1 = inlined_call_operand.vmem [shape: bf16[16,144], index: 1, kind: input, shape index: {}]   ;;  %s2666_s2 = inlined_call_operand.vmem [shape: f32[16,1], index: 2, kind: input, shape index: {}]   ;;  %s2667_s3 = inlined_call_operand.vmem [shape: bf16[2,16,1088], index: 3, kind: output, shape index: {}]  }
   0x1 LB: > { %s1779_s13 = sadd.s32 4294967295, %s1943_s12   ;;  %p1783_p0 = scmp.ge.s32.totalorder %s1943_s12, 1  ;;  %s1943_s12 = sphi %s1974_s12, %s13_s12  }
   0x2   : > { %p137_p1 = scmp.lt.s32.totalorder %s1943_s12, 3 }
   0x4   : > { %p138_p2 = pnand %p1783_p0, %p137_p1 }
   0x5   : > { %p161_p3 = scmp.lt.s32.totalorder (!%p138_p2), %s1779_s13, 1  ;;  %s1945_s18 = smov (!%p138_p2), 59  }
   0x6   : > { %141 = sbr.rel (%p138_p2) target bundleno = 509 (0x1fd), region = 32  ;;  %s1946_s19 = smov (!%p138_p2), 60  }
   0x7   : > { %s1947_s20 = smov (!%p138_p2), 92   ;;  %s1948_s21 = smov (!%p138_p2), 93  }
   0x8   : > { %s1949_s22 = smov (!%p138_p2), 94   ;;  %s1950_s23 = smov (!%p138_p2), 126  }
   0x9   : > { %s1951_s24 = smov (!%p138_p2), 127   ;;  %s1952_s25 = smov (!%p138_p2), 58  }
   0xb   : > { %s2669_s13 = smov (!%p161_p3, %s1779_s13), 1  ;;  %v2050_v6 = vld [vmem:[%s2665_s1 + $0x4] ss:$8 sps:$4 sm:$0xff]   ;;  %vm1423_vm0 = vcmask 130048   ;;  %vm243_vm1 = vcmask 1043456   ;;  %vm769_vm2 = vcmask 482304  }
   0xc   : > { %s1896_s14 = smul.u32 80, %s2669_s13  ;;  %1869 = vmatprep.mubr.msk.bf16.mxu0 %vm1423_vm0, %v2050_v6  ;;  %1870 = vmatprep.mubr.msk.bf16.mxu1 %vm1423_vm0, %v2050_v6  ;;  %vm680_vm3 = vcmask 490496   ;;  %v1953_v45 = vmov 0   ;;  %vm593_vm4 = vcmask 752640   ;;  %vm506_vm5 = vcmask 760832  }
   0xd   : > { %1916 = vset.pattern.permute.xlu1 %v1953_v45  ;;  %1915 = vset.pattern.permute.xlu0 %v1953_v45  ;;  %vm419_vm6 = vcmask 769024   ;;  %vm186_vm7 = vcmask 519168   ;;  %vm332_vm8 = vcmask 1031168   ;;  %vm245_vm9 = vcmask 1039360   ;;  %s1897_s9 = smul.u32 72, %s2669_s13 }
   0xe   : > { %s1988_s17 = scalar_lea.vmem %s2664_s0, %s1896_s14  ;;  %vm858_vm10 = vcmask 474112  }
   0xf   : > { %v1991_v0 = vld [vmem:[%s1988_s17 + $0x28] sm:$0xff]  ;;  %v1994_v1 = vld [vmem:[%s1988_s17] sm:$0xff]  ;;  %v724_v2 = vld [vmem:[%s1988_s17 + $0x30] sm:$0xff]  ;;  %s2639_s14 = scalar_lea.vmem %s2667_s3, %s1897_s9 }
  0x10   : > { %748 = vrot.lane.b32.xlu1 %v1991_v0, %s1945_s18  ;;  %738 = vrot.lane.b32.xlu0 %v1994_v1, %s1945_s18  ;;  %v719_v3 = vld [vmem:[%s1988_s17 + $0x8] sm:$0xff]  ;;  %v1789_v4 = vcombine.high %v1994_v1, %v1991_v0  ;;  %v1788_v5 = vcombine.low %v1994_v1, %v1991_v0  ;;  %v725_v7 = vld [vmem:[%s1988_s17 + $0x38] sm:$0xff] }
  0x11   : > { %v720_v8 = vld [vmem:[%s1988_s17 + $0x10] sm:$0xff]  ;;  %v726_v9 = vld [vmem:[%s1988_s17 + $0x40] sm:$0xff]  ;;  %v721_v10 = vld [vmem:[%s1988_s17 + $0x18] sm:$0xff] }
  0x12   : > { %v2086_v11 = vld [vmem:[%s1988_s17 + $0x8] sm:$0xff]  ;;  %v2089_v12 = vld [vmem:[%s1988_s17 + $0x30] sm:$0xff]  ;;  %v2101_v16 = vld [vmem:[%s1988_s17 + $0x38] sm:$0xff] }
  0x13   : > { %v1791_v13 = vcombine.high %v2086_v11, %v2089_v12  ;;  %v1790_v14 = vcombine.low %v2086_v11, %v2089_v12  ;;  %v2098_v15 = vld [vmem:[%s1988_s17 + $0x10] sm:$0xff]  ;;  %v2136_v38 = vld [vmem:[%s1988_s17 + $0x48] sm:$0xff]  ;;  %v2139_v39 = vld [vmem:[%s1988_s17 + $0x20] sm:$0xff] }
  0x14   : > { %750 = vrot.lane.b32.xlu1 %v724_v2, %s1945_s18  ;;  %740 = vrot.lane.b32.xlu0 %v719_v3, %s1945_s18  ;;  %v1793_v17 = vcombine.high %v2098_v15, %v2101_v16  ;;  %v1792_v18 = vcombine.low %v2098_v15, %v2101_v16  ;;  %v551_v55 = vld [vmem:[%s1988_s17 + $0x48] sm:$0xf]  ;;  %v546_v56 = vld [vmem:[%s1988_s17 + $0x20] sm:$0xf] }
  0x15   : > { %v464_v63 = vld [vmem:[%s1988_s17 + $0x48] sm:$0xf] }
  0x18   : > { %651 = vrot.lane.b32.xlu1 %v719_v3, %s1946_s19  ;;  %649 = vrot.lane.b32.xlu0 %v1994_v1, %s1946_s19 }
  0x1c   : > { %661 = vrot.lane.b32.xlu1 %v724_v2, %s1946_s19  ;;  %659 = vrot.lane.b32.xlu0 %v1991_v0, %s1946_s19 }
  0x20   : > { %564 = vrot.lane.b32.xlu1 %v719_v3, %s1947_s20  ;;  %562 = vrot.lane.b32.xlu0 %v1994_v1, %s1947_s20 }
  0x24   : > { %574 = vrot.lane.b32.xlu1 %v724_v2, %s1947_s20  ;;  %572 = vrot.lane.b32.xlu0 %v1991_v0, %s1947_s20 }
  0x28   : > { %477 = vrot.lane.b32.xlu1 %v719_v3, %s1948_s21  ;;  %475 = vrot.lane.b32.xlu0 %v1994_v1, %s1948_s21 }
  0x2c   : > { %487 = vrot.lane.b32.xlu1 %v724_v2, %s1948_s21  ;;  %485 = vrot.lane.b32.xlu0 %v1991_v0, %s1948_s21 }
  0x30   : > { %390 = vrot.lane.b32.xlu1 %v719_v3, %s1949_s22  ;;  %388 = vrot.lane.b32.xlu0 %v1994_v1, %s1949_s22 }
  0x34   : > { %400 = vrot.lane.b32.xlu1 %v724_v2, %s1949_s22  ;;  %398 = vrot.lane.b32.xlu0 %v1991_v0, %s1949_s22 }
  0x38   : > { %303 = vrot.lane.b32.xlu1 %v719_v3, %s1950_s23  ;;  %301 = vrot.lane.b32.xlu0 %v1994_v1, %s1950_s23 }
  0x3c   : > { %313 = vrot.lane.b32.xlu1 %v724_v2, %s1950_s23  ;;  %311 = vrot.lane.b32.xlu0 %v1991_v0, %s1950_s23 }
  0x40   : > { %215 = vrot.lane.b32.xlu1 %v719_v3, %s1951_s24  ;;  %213 = vrot.lane.b32.xlu0 %v1994_v1, %s1951_s24 }
  0x44   : > { %225 = vrot.lane.b32.xlu1 %v724_v2, %s1951_s24  ;;  %223 = vrot.lane.b32.xlu0 %v1991_v0, %s1951_s24 }
  0x48   : > { %829 = vrot.lane.b32.xlu1 %v719_v3, %s1952_s25  ;;  %827 = vrot.lane.b32.xlu0 %v1994_v1, %s1952_s25 }
  0x4c   : > { %839 = vrot.lane.b32.xlu1 %v724_v2, %s1952_s25  ;;  %837 = vrot.lane.b32.xlu0 %v1991_v0, %s1952_s25  ;;  %v459_v2 = vld [vmem:[%s1988_s17 + $0x20] sm:$0xf] }
  0x50   : > { %752 = vrot.lane.b32.xlu1 %v725_v7, %s1945_s18  ;;  %742 = vrot.lane.b32.xlu0 %v720_v8, %s1945_s18 }
  0x54   : > { %754 = vrot.lane.b32.xlu1 %v726_v9, %s1945_s18  ;;  %744 = vrot.lane.b32.xlu0 %v721_v10, %s1945_s18 }
  0x58   : > { %663 = vrot.lane.b32.xlu1 %v725_v7, %s1946_s19  ;;  %653 = vrot.lane.b32.xlu0 %v720_v8, %s1946_s19 }
  0x5c   : > { %665 = vrot.lane.b32.xlu1 %v726_v9, %s1946_s19  ;;  %655 = vrot.lane.b32.xlu0 %v721_v10, %s1946_s19 }
  0x60   : > { %576 = vrot.lane.b32.xlu1 %v725_v7, %s1947_s20  ;;  %566 = vrot.lane.b32.xlu0 %v720_v8, %s1947_s20 }
  0x64   : > { %578 = vrot.lane.b32.xlu1 %v726_v9, %s1947_s20  ;;  %568 = vrot.lane.b32.xlu0 %v721_v10, %s1947_s20 }
  0x68   : > { %489 = vrot.lane.b32.xlu1 %v725_v7, %s1948_s21  ;;  %479 = vrot.lane.b32.xlu0 %v720_v8, %s1948_s21 }
  0x6c   : > { %491 = vrot.lane.b32.xlu1 %v726_v9, %s1948_s21  ;;  %481 = vrot.lane.b32.xlu0 %v721_v10, %s1948_s21 }
  0x70   : > { %402 = vrot.lane.b32.xlu1 %v725_v7, %s1949_s22  ;;  %392 = vrot.lane.b32.xlu0 %v720_v8, %s1949_s22 }
  0x74   : > { %404 = vrot.lane.b32.xlu1 %v726_v9, %s1949_s22  ;;  %394 = vrot.lane.b32.xlu0 %v721_v10, %s1949_s22 }
  0x78   : > { %315 = vrot.lane.b32.xlu1 %v725_v7, %s1950_s23  ;;  %305 = vrot.lane.b32.xlu0 %v720_v8, %s1950_s23 }
  0x7c   : > { %317 = vrot.lane.b32.xlu1 %v726_v9, %s1950_s23  ;;  %307 = vrot.lane.b32.xlu0 %v721_v10, %s1950_s23 }
  0x80   : > { %227 = vrot.lane.b32.xlu1 %v725_v7, %s1951_s24  ;;  %217 = vrot.lane.b32.xlu0 %v720_v8, %s1951_s24 }
  0x82   : > { %v749_v19 = vpop.permute.xlu1 %748  ;;  %v739_v20 = vpop.permute.xlu0 %738 }
  0x83   : > { %v763_v23 = vrot.slane %v749_v19, 4  ;;  %v758_v24 = vrot.slane %v739_v20, 4 }
  0x84   : > { %229 = vrot.lane.b32.xlu1 %v726_v9, %s1951_s24  ;;  %219 = vrot.lane.b32.xlu0 %v721_v10, %s1951_s24 }
  0x86   : > { %v2111_v21 = vpop.permute.xlu1 %750  ;;  %v2113_v22 = vpop.permute.xlu0 %740 }
  0x87   : > { %v764_v25 = vrot.slane %v2111_v21, 4  ;;  %v759_v26 = vrot.slane %v2113_v22, 4 }
  0x88   : > { %841 = vrot.lane.b32.xlu1 %v725_v7, %s1952_s25  ;;  %831 = vrot.lane.b32.xlu0 %v720_v8, %s1952_s25 }
  0x89   : > { %v778_v27 = vsel %vm243_vm1, %v763_v23, %v764_v25  ;;  %v768_v28 = vsel %vm243_vm1, %v758_v24, %v759_v26  ;;  %v377_v24 = vld [vmem:[%s1988_s17 + $0x48] sm:$0xf] }
  0x8a   : > { %v779_v29 = vsel %vm769_vm2, %v749_v19, %v778_v27  ;;  %v770_v30 = vsel %vm769_vm2, %v739_v20, %v768_v28  ;;  %v2127_v31 = vpop.permute.xlu1 %651  ;;  %v650_v32 = vpop.permute.xlu0 %649  ;;  %v372_v27 = vld [vmem:[%s1988_s17 + $0x20] sm:$0xf] }
  0x8b   : > { %v670_v33 = vrot.slane %v2127_v31, 4  ;;  %v669_v34 = vrot.slane %v650_v32, 4  ;;  %v1852_v35 = vcombine.high %v770_v30, %v779_v29  ;;  %v1851_v36 = vcombine.low %v770_v30, %v779_v29 }
  0x8c   : > { %843 = vrot.lane.b32.xlu1 %v726_v9, %s1952_s25  ;;  %833 = vrot.lane.b32.xlu0 %v721_v10, %s1952_s25 }
  0x8d   : > { %v679_v37 = vsel %vm243_vm1, %v669_v34, %v670_v33  ;;  %1427 = vmatprep.subr.bf16.mxu0 %v1852_v35 }
  0x8e   : > { %v681_v40 = vsel %vm680_vm3, %v650_v32, %v679_v37  ;;  %v2142_v41 = vpop.permute.xlu1 %661  ;;  %v660_v42 = vpop.permute.xlu0 %659  ;;  %1428 = vmatpush1.bf16.msra.mxu0 %v1851_v36  ;;  %v290_v36 = vld [vmem:[%s1988_s17 + $0x48] sm:$0xf]  ;;  %v285_v37 = vld [vmem:[%s1988_s17 + $0x20] sm:$0xf] }
  0x8f   : > { %v675_v43 = vrot.slane %v2142_v41, 4  ;;  %v674_v44 = vrot.slane %v660_v42, 4 }
  0x90   : > { %756 = vrot.lane.b32.xlu1 %v2136_v38, %s1945_s18  ;;  %746 = vrot.lane.b32.xlu0 %v2139_v39, %s1945_s18 }
  0x91   : > { %v689_v46 = vsel %vm243_vm1, %v674_v44, %v675_v43 }
  0x92   : > { %v690_v47 = vsel %vm680_vm3, %v660_v42, %v689_v46  ;;  %v2155_v48 = vpop.permute.xlu1 %564  ;;  %v563_v49 = vpop.permute.xlu0 %562  ;;  %v176_v46 = vld [vmem:[%s1988_s17 + $0x20] sm:$0xf] }
  0x93   : > { %v583_v50 = vrot.slane %v2155_v48, 4  ;;  %v582_v51 = vrot.slane %v563_v49, 4  ;;  %v1843_v52 = vcombine.high %v681_v40, %v690_v47  ;;  %v1842_v53 = vcombine.low %v681_v40, %v690_v47  ;;  %v181_v47 = vld [vmem:[%s1988_s17 + $0x48] sm:$0xf]  ;;  %187 = vst.msk [vmem:[#allocation2 + $0x20] sm:$0xf] %vm186_vm7, %v176_v46 }
  0x94   : > { %667 = vrot.lane.b32.xlu1 %v2136_v38, %s1946_s19  ;;  %657 = vrot.lane.b32.xlu0 %v2139_v39, %s1946_s19  ;;  %192 = vst.msk [vmem:[#allocation2 + $0x44] sm:$0xf] %vm186_vm7, %v181_v47 }
  0x95   : > { %v592_v54 = vsel %vm243_vm1, %v582_v51, %v583_v50  ;;  %1429 = vmatprep.subr.bf16.mxu0 %v1843_v52 }
  0x96   : > { %v594_v57 = vsel %vm593_vm4, %v563_v49, %v592_v54  ;;  %v2168_v58 = vpop.permute.xlu1 %574  ;;  %v573_v59 = vpop.permute.xlu0 %572  ;;  %1430 = vmatpush1.bf16.msra.mxu0 %v1842_v53  ;;  %v2207_v54 = vld [vmem:[%s1988_s17 + $0x18] sm:$0xff] }
  0x97   : > { %v588_v60 = vrot.slane %v2168_v58, 4  ;;  %v587_v61 = vrot.slane %v573_v59, 4 }
  0x98   : > { %580 = vrot.lane.b32.xlu1 %v551_v55, %s1947_s20  ;;  %570 = vrot.lane.b32.xlu0 %v546_v56, %s1947_s20  ;;  %v2210_v55 = vld [vmem:[%s1988_s17 + $0x40] sm:$0xff] }
  0x99   : > { %v601_v62 = vsel %vm243_vm1, %v587_v61, %v588_v60  ;;  %v1795_v56 = vcombine.high %v2207_v54, %v2210_v55  ;;  %v197_v61 = vld [vmem:[%s1988_s17 + $0x20] sm:$0xf] }
  0x9a   : > { %v602_v3 = vsel %vm593_vm4, %v573_v59, %v601_v62  ;;  %v2179_v7 = vpop.permute.xlu1 %477  ;;  %v476_v8 = vpop.permute.xlu0 %475  ;;  %v202_v59 = vld [vmem:[%s1988_s17 + $0x48] sm:$0xf]  ;;  %v1794_v62 = vcombine.low %v2207_v54, %v2210_v55 }
  0x9b   : > { %v496_v9 = vrot.slane %v2179_v7, 4  ;;  %v495_v10 = vrot.slane %v476_v8, 4  ;;  %v1834_v19 = vcombine.high %v594_v57, %v602_v3  ;;  %v1833_v20 = vcombine.low %v594_v57, %v602_v3 }
  0x9c   : > { %493 = vrot.lane.b32.xlu1 %v464_v63, %s1948_s21  ;;  %483 = vrot.lane.b32.xlu0 %v459_v2, %s1948_s21 }
  0x9d   : > { %v505_v23 = vsel %vm243_vm1, %v495_v10, %v496_v9  ;;  %1431 = vmatprep.subr.bf16.mxu0 %v1834_v19 }
  0x9e   : > { %v507_v28 = vsel %vm506_vm5, %v476_v8, %v505_v23  ;;  %v2190_v29 = vpop.permute.xlu1 %487  ;;  %v486_v30 = vpop.permute.xlu0 %485  ;;  %1432 = vmatpush1.bf16.msra.mxu0 %v1833_v20 }
  0x9f   : > { %v501_v32 = vrot.slane %v2190_v29, 4  ;;  %v500_v34 = vrot.slane %v486_v30, 4 }
  0xa0   : > { %406 = vrot.lane.b32.xlu1 %v377_v24, %s1949_s22  ;;  %396 = vrot.lane.b32.xlu0 %v372_v27, %s1949_s22 }
  0xa1   : > { %v514_v35 = vsel %vm243_vm1, %v500_v34, %v501_v32 }
  0xa2   : > { %v515_v40 = vsel %vm506_vm5, %v486_v30, %v514_v35  ;;  %v2201_v42 = vpop.permute.xlu1 %390  ;;  %v389_v44 = vpop.permute.xlu0 %388 }
  0xa3   : > { %v409_v49 = vrot.slane %v2201_v42, 4  ;;  %v408_v51 = vrot.slane %v389_v44, 4  ;;  %v1825_v52 = vcombine.high %v507_v28, %v515_v40  ;;  %v1824_v53 = vcombine.low %v507_v28, %v515_v40 }
  0xa4   : > { %319 = vrot.lane.b32.xlu1 %v290_v36, %s1950_s23  ;;  %309 = vrot.lane.b32.xlu0 %v285_v37, %s1950_s23 }
  0xa5   : > { %v418_v57 = vsel %vm243_vm1, %v408_v51, %v409_v49  ;;  %1433 = vmatprep.subr.bf16.mxu0 %v1825_v52 }
  0xa6   : > { %v420_v63 = vsel %vm419_vm6, %v389_v44, %v418_v57  ;;  %v2226_v2 = vpop.permute.xlu1 %400  ;;  %v399_v3 = vpop.permute.xlu0 %398  ;;  %1434 = vmatpush1.bf16.msra.mxu0 %v1824_v53 }
  0xa7   : > { %v414_v8 = vrot.slane %v2226_v2, 4  ;;  %v413_v10 = vrot.slane %v399_v3, 4 }
  0xa8   : > { %231 = vrot.lane.b32.xlu1 %v202_v59, %s1951_s24  ;;  %221 = vrot.lane.b32.xlu0 %v197_v61, %s1951_s24 }
  0xa9   : > { %v427_v19 = vsel %vm243_vm1, %v413_v10, %v414_v8 }
  0xaa   : > { %v428_v20 = vsel %vm419_vm6, %v399_v3, %v427_v19  ;;  %v2235_v23 = vpop.permute.xlu1 %303  ;;  %v302_v24 = vpop.permute.xlu0 %301 }
  0xab   : > { %v322_v27 = vrot.slane %v2235_v23, 4  ;;  %v321_v28 = vrot.slane %v302_v24, 4  ;;  %v1816_v30 = vcombine.high %v420_v63, %v428_v20  ;;  %v1815_v34 = vcombine.low %v420_v63, %v428_v20 }
  0xac   : > { %845 = vrot.lane.b32.xlu1 %v2136_v38, %s1952_s25  ;;  %835 = vrot.lane.b32.xlu0 %v2139_v39, %s1952_s25  ;;  %v989_v38 = vld [vmem:[%s2666_s2 + $0x8] sm:$0xff]  ;;  %v988_v39 = vld [vmem:[%s2666_s2] sm:$0xff] }
  0xad   : > { %v331_v35 = vsel %vm243_vm1, %v321_v28, %v322_v27  ;;  %1435 = vmatprep.subr.bf16.mxu0 %v1816_v30 }
  0xae   : > { %v333_v36 = vsel %vm332_vm8, %v302_v24, %v331_v35  ;;  %v2246_v37 = vpop.permute.xlu1 %313  ;;  %v312_v40 = vpop.permute.xlu0 %311  ;;  %1436 = vmatpush1.bf16.msra.mxu0 %v1815_v34 }
  0xaf   : > { %v327_v44 = vrot.slane %v2246_v37, 4  ;;  %v326_v46 = vrot.slane %v312_v40, 4 }
  0xb0   : > { %997 = vperm.xlu1 %1916, %v989_v38   ;;  %992 = vperm.xlu0 %1915, %v988_v39  }
  0xb1   : > { %v340_v47 = vsel %vm243_vm1, %v326_v46, %v327_v44 }
  0xb2   : > { %v341_v51 = vsel %vm332_vm8, %v312_v40, %v340_v47  ;;  %v2259_v52 = vpop.permute.xlu1 %215  ;;  %v214_v53 = vpop.permute.xlu0 %213 }
  0xb3   : > { %v234_v57 = vrot.slane %v2259_v52, 4  ;;  %v233_v59 = vrot.slane %v214_v53, 4  ;;  %v1807_v61 = vcombine.high %v333_v36, %v341_v51  ;;  %v1806_v63 = vcombine.low %v333_v36, %v341_v51 }
  0xb5   : > { %v244_v3 = vsel %vm243_vm1, %v233_v59, %v234_v57  ;;  %1437 = vmatprep.subr.bf16.mxu0 %v1807_v61 }
  0xb6   : > { %v246_v10 = vsel %vm245_vm9, %v214_v53, %v244_v3  ;;  %v2266_v19 = vpop.permute.xlu1 %225  ;;  %v224_v20 = vpop.permute.xlu0 %223  ;;  %1438 = vmatpush1.bf16.msra.mxu0 %v1806_v63 }
  0xb7   : > { %v239_v24 = vrot.slane %v2266_v19, 4  ;;  %v238_v28 = vrot.slane %v224_v20, 4 }
  0xb9   : > { %v253_v30 = vsel %vm243_vm1, %v238_v28, %v239_v24 }
  0xba   : > { %v254_v34 = vsel %vm245_vm9, %v224_v20, %v253_v30  ;;  %v2273_v35 = vpop.permute.xlu1 %829  ;;  %v828_v36 = vpop.permute.xlu0 %827 }
  0xbb   : > { %v848_v40 = vrot.slane %v2273_v35, 4  ;;  %v847_v46 = vrot.slane %v828_v36, 4  ;;  %v1798_v38 = vcombine.high %v246_v10, %v254_v34  ;;  %v1797_v39 = vcombine.low %v246_v10, %v254_v34 }
  0xbd   : > { %v857_v47 = vsel %vm243_vm1, %v847_v46, %v848_v40  ;;  %1439 = vmatprep.subr.bf16.mxu0 %v1798_v38 }
  0xbe   : > { %v859_v51 = vsel %vm858_vm10, %v828_v36, %v857_v47  ;;  %v2280_v53 = vpop.permute.xlu1 %839  ;;  %v838_v59 = vpop.permute.xlu0 %837  ;;  %1440 = vmatpush1.bf16.msra.mxu0 %v1797_v39  ;;  %v2302_v39 = vld [vmem:[%s2665_s1] ss:$8 sps:$4 sm:$0xff]  }
  0xbf   : > { %v853_v61 = vrot.slane %v2280_v53, 4  ;;  %v852_v63 = vrot.slane %v838_v59, 4  ;;  %1441 = vmatprep.subr.bf16.mxu0 %v1789_v4 }
  0xc1   : > { %v867_v3 = vsel %vm243_vm1, %v852_v63, %v853_v61 }
  0xc2   : > { %v868_v10 = vsel %vm858_vm10, %v838_v59, %v867_v3  ;;  %v753_v20 = vpop.permute.xlu1 %752  ;;  %v743_v28 = vpop.permute.xlu0 %742  ;;  %1442 = vmatpush1.bf16.msra.mxu0 %v1788_v5 }
  0xc3   : > { %v765_v30 = vrot.slane %v753_v20, 4  ;;  %v760_v34 = vrot.slane %v743_v28, 4  ;;  %v1861_v36 = vcombine.high %v859_v51, %v868_v10  ;;  %v1860_v46 = vcombine.low %v859_v51, %v868_v10 }
  0xc5   : > { %v780_v4 = vsel %vm243_vm1, %v764_v25, %v765_v30  ;;  %v771_v38 = vsel %vm243_vm1, %v759_v26, %v760_v34  ;;  %1457 = vmatprep.subr.bf16.mxu0 %v1861_v36 }
  0xc6   : > { %v781_v0 = vsel %vm769_vm2, %v2111_v21, %v780_v4  ;;  %v772_v1 = vsel %vm769_vm2, %v2113_v22, %v771_v38  ;;  %v2308_v5 = vpop.permute.xlu1 %754  ;;  %v2310_v47 = vpop.permute.xlu0 %744  ;;  %1458 = vmatpush2.bf16.msra.mxu0 %v1860_v46 }
  0xc7   : > { %v766_v25 = vrot.slane %v2308_v5, 4  ;;  %v761_v26 = vrot.slane %v2310_v47, 4  ;;  %v1854_v51 = vcombine.high %v772_v1, %v781_v0  ;;  %v1853_v59 = vcombine.low %v772_v1, %v781_v0 }
  0xc9   : > { %v782_v63 = vsel %vm243_vm1, %v765_v30, %v766_v25  ;;  %v773_v21 = vsel %vm243_vm1, %v760_v34, %v761_v26  ;;  %1470 = vmatprep.subr.bf16.mxu1 %v1854_v51  ;;  %1460 = vmatmul.mubr.bf16.vlgmr.msra.gmra.mxu0 %v2302_v39 }
  0xca   : > { %v783_v22 = vsel %vm769_vm2, %v753_v20, %v782_v63  ;;  %v774_v3 = vsel %vm769_vm2, %v743_v28, %v773_v21  ;;  %v664_v10 = vpop.permute.xlu1 %663  ;;  %v654_v36 = vpop.permute.xlu0 %653  ;;  %1471 = vmatpush1.bf16.msra.mxu1 %v1853_v59  ;;  %1871 = vmatprep.mubr.msk.bf16.mxu0 %vm1423_vm0, %v2050_v6 }
  0xcb   : > { %v676_v46 = vrot.slane %v664_v10, 4  ;;  %v671_v4 = vrot.slane %v654_v36, 4  ;;  %v1855_v30 = vcombine.low %v774_v3, %v783_v22  ;;  %v1856_v38 = vcombine.high %v774_v3, %v783_v22 }
  0xcd   : > { %v691_v34 = vsel %vm243_vm1, %v675_v43, %v676_v46  ;;  %v682_v20 = vsel %vm243_vm1, %v670_v33, %v671_v4  ;;  %1513 = vmatprep.subr.bf16.mxu0 %v1856_v38 }
  0xce   : > { %v692_v28 = vsel %vm680_vm3, %v2142_v41, %v691_v34  ;;  %v683_v0 = vsel %vm680_vm3, %v2127_v31, %v682_v20  ;;  %v2335_v1 = vpop.permute.xlu1 %665  ;;  %v2337_v51 = vpop.permute.xlu0 %655  ;;  %1514 = vmatpush1.bf16.msra.mxu0 %v1855_v30 }
  0xcf   : > { %v677_v59 = vrot.slane %v2335_v1, 4  ;;  %v672_v43 = vrot.slane %v2337_v51, 4  ;;  %v1845_v63 = vcombine.high %v683_v0, %v692_v28  ;;  %v1844_v21 = vcombine.low %v683_v0, %v692_v28 }
  0xd1   : > { %v693_v33 = vsel %vm243_vm1, %v676_v46, %v677_v59  ;;  %v684_v41 = vsel %vm243_vm1, %v671_v4, %v672_v43  ;;  %1472 = vmatprep.subr.bf16.mxu1 %v1845_v63 }
  0xd2   : > { %v694_v31 = vsel %vm680_vm3, %v664_v10, %v693_v33  ;;  %v685_v22 = vsel %vm680_vm3, %v654_v36, %v684_v41  ;;  %v577_v3 = vpop.permute.xlu1 %576  ;;  %v567_v30 = vpop.permute.xlu0 %566  ;;  %1473 = vmatpush1.bf16.msra.mxu1 %v1844_v21 }
  0xd3   : > { %v589_v38 = vrot.slane %v577_v3, 4  ;;  %v584_v34 = vrot.slane %v567_v30, 4  ;;  %v1846_v20 = vcombine.low %v685_v22, %v694_v31  ;;  %v1847_v28 = vcombine.high %v685_v22, %v694_v31 }
  0xd5   : > { %v603_v46 = vsel %vm243_vm1, %v588_v60, %v589_v38  ;;  %v595_v4 = vsel %vm243_vm1, %v583_v50, %v584_v34  ;;  %1515 = vmatprep.subr.bf16.mxu0 %v1847_v28 }
  0xd6   : > { %v604_v10 = vsel %vm593_vm4, %v2168_v58, %v603_v46  ;;  %v596_v36 = vsel %vm593_vm4, %v2155_v48, %v595_v4  ;;  %v2359_v0 = vpop.permute.xlu1 %578  ;;  %v2361_v63 = vpop.permute.xlu0 %568  ;;  %1516 = vmatpush1.bf16.msra.mxu0 %v1846_v20 }
  0xd7   : > { %v590_v21 = vrot.slane %v2359_v0, 4  ;;  %v585_v60 = vrot.slane %v2361_v63, 4  ;;  %v1836_v33 = vcombine.high %v596_v36, %v604_v10  ;;  %v1835_v41 = vcombine.low %v596_v36, %v604_v10 }
  0xd9   : > { %v605_v50 = vsel %vm243_vm1, %v589_v38, %v590_v21  ;;  %v597_v58 = vsel %vm243_vm1, %v584_v34, %v585_v60  ;;  %1474 = vmatprep.subr.bf16.mxu1 %v1836_v33 }
  0xda   : > { %v606_v48 = vsel %vm593_vm4, %v577_v3, %v605_v50  ;;  %v598_v31 = vsel %vm593_vm4, %v567_v30, %v597_v58  ;;  %v490_v22 = vpop.permute.xlu1 %489  ;;  %v480_v20 = vpop.permute.xlu0 %479  ;;  %1475 = vmatpush1.bf16.msra.mxu1 %v1835_v41 }
  0xdb   : > { %v502_v28 = vrot.slane %v490_v22, 4  ;;  %v497_v46 = vrot.slane %v480_v20, 4  ;;  %v1837_v4 = vcombine.low %v598_v31, %v606_v48  ;;  %v1838_v10 = vcombine.high %v598_v31, %v606_v48 }
  0xdd   : > { %v516_v38 = vsel %vm243_vm1, %v501_v32, %v502_v28  ;;  %v508_v34 = vsel %vm243_vm1, %v496_v9, %v497_v46  ;;  %1517 = vmatprep.subr.bf16.mxu0 %v1838_v10 }
  0xde   : > { %v517_v3 = vsel %vm506_vm5, %v2190_v29, %v516_v38  ;;  %v509_v30 = vsel %vm506_vm5, %v2179_v7, %v508_v34  ;;  %v2383_v36 = vpop.permute.xlu1 %491  ;;  %v2385_v33 = vpop.permute.xlu0 %481  ;;  %1518 = vmatpush1.bf16.msra.mxu0 %v1837_v4 }
  0xdf   : > { %v503_v41 = vrot.slane %v2383_v36, 4  ;;  %v498_v32 = vrot.slane %v2385_v33, 4  ;;  %v1827_v50 = vcombine.high %v509_v30, %v517_v3  ;;  %v1826_v58 = vcombine.low %v509_v30, %v517_v3 }
  0xe1   : > { %v518_v9 = vsel %vm243_vm1, %v502_v28, %v503_v41  ;;  %v510_v29 = vsel %vm243_vm1, %v497_v46, %v498_v32  ;;  %1476 = vmatprep.subr.bf16.mxu1 %v1827_v50 }
  0xe2   : > { %v519_v7 = vsel %vm506_vm5, %v490_v22, %v518_v9  ;;  %v511_v48 = vsel %vm506_vm5, %v480_v20, %v510_v29  ;;  %v403_v31 = vpop.permute.xlu1 %402  ;;  %v393_v4 = vpop.permute.xlu0 %392  ;;  %1477 = vmatpush1.bf16.msra.mxu1 %v1826_v58 }
  0xe3   : > { %v415_v10 = vrot.slane %v403_v31, 4  ;;  %v410_v38 = vrot.slane %v393_v4, 4  ;;  %v1828_v34 = vcombine.low %v511_v48, %v519_v7  ;;  %v1829_v3 = vcombine.high %v511_v48, %v519_v7 }
  0xe5   : > { %v429_v28 = vsel %vm243_vm1, %v414_v8, %v415_v10  ;;  %v421_v46 = vsel %vm243_vm1, %v409_v49, %v410_v38  ;;  %1519 = vmatprep.subr.bf16.mxu0 %v1829_v3 }
  0xe6   : > { %v430_v22 = vsel %vm419_vm6, %v2226_v2, %v429_v28  ;;  %v422_v20 = vsel %vm419_vm6, %v2201_v42, %v421_v46  ;;  %v2407_v30 = vpop.permute.xlu1 %404  ;;  %v2409_v50 = vpop.permute.xlu0 %394  ;;  %1520 = vmatpush1.bf16.msra.mxu0 %v1828_v34 }
  0xe7   : > { %v416_v58 = vrot.slane %v2407_v30, 4  ;;  %v411_v8 = vrot.slane %v2409_v50, 4  ;;  %v1818_v9 = vcombine.high %v422_v20, %v430_v22  ;;  %v1817_v29 = vcombine.low %v422_v20, %v430_v22 }
  0xe9   : > { %v431_v49 = vsel %vm243_vm1, %v415_v10, %v416_v58  ;;  %v423_v2 = vsel %vm243_vm1, %v410_v38, %v411_v8  ;;  %1478 = vmatprep.subr.bf16.mxu1 %v1818_v9 }
  0xea   : > { %v432_v42 = vsel %vm419_vm6, %v403_v31, %v431_v49  ;;  %v424_v7 = vsel %vm419_vm6, %v393_v4, %v423_v2  ;;  %v316_v48 = vpop.permute.xlu1 %315  ;;  %v306_v34 = vpop.permute.xlu0 %305  ;;  %1479 = vmatpush1.bf16.msra.mxu1 %v1817_v29 }
  0xeb   : > { %v328_v3 = vrot.slane %v316_v48, 4  ;;  %v323_v28 = vrot.slane %v306_v34, 4  ;;  %v1819_v46 = vcombine.low %v424_v7, %v432_v42  ;;  %v1820_v22 = vcombine.high %v424_v7, %v432_v42 }
  0xed   : > { %v342_v10 = vsel %vm243_vm1, %v327_v44, %v328_v3  ;;  %v334_v38 = vsel %vm243_vm1, %v322_v27, %v323_v28  ;;  %1521 = vmatprep.subr.bf16.mxu0 %v1820_v22 }
  0xee   : > { %v343_v31 = vsel %vm332_vm8, %v2246_v37, %v342_v10  ;;  %v335_v4 = vsel %vm332_vm8, %v2235_v23, %v334_v38  ;;  %v2431_v20 = vpop.permute.xlu1 %317  ;;  %v2433_v9 = vpop.permute.xlu0 %307  ;;  %1522 = vmatpush1.bf16.msra.mxu0 %v1819_v46 }
  0xef   : > { %v329_v29 = vrot.slane %v2431_v20, 4  ;;  %v324_v44 = vrot.slane %v2433_v9, 4  ;;  %v1809_v49 = vcombine.high %v335_v4, %v343_v31  ;;  %v1808_v2 = vcombine.low %v335_v4, %v343_v31 }
  0xf1   : > { %v344_v27 = vsel %vm243_vm1, %v328_v3, %v329_v29  ;;  %v336_v37 = vsel %vm243_vm1, %v323_v28, %v324_v44  ;;  %1480 = vmatprep.subr.bf16.mxu1 %v1809_v49 }
  0xf2   : > { %v345_v23 = vsel %vm332_vm8, %v316_v48, %v344_v27  ;;  %v337_v42 = vsel %vm332_vm8, %v306_v34, %v336_v37  ;;  %v228_v7 = vpop.permute.xlu1 %227  ;;  %v218_v46 = vpop.permute.xlu0 %217  ;;  %1481 = vmatpush1.bf16.msra.mxu1 %v1808_v2 }
  0xf3   : > { %v240_v22 = vrot.slane %v228_v7, 4  ;;  %v235_v10 = vrot.slane %v218_v46, 4  ;;  %v1810_v38 = vcombine.low %v337_v42, %v345_v23  ;;  %v1811_v31 = vcombine.high %v337_v42, %v345_v23 }
  0xf5   : > { %v255_v3 = vsel %vm243_vm1, %v239_v24, %v240_v22  ;;  %v247_v28 = vsel %vm243_vm1, %v234_v57, %v235_v10  ;;  %1523 = vmatprep.subr.bf16.mxu0 %v1811_v31 }
  0xf6   : > { %v256_v48 = vsel %vm245_vm9, %v2266_v19, %v255_v3  ;;  %v248_v34 = vsel %vm245_vm9, %v2259_v52, %v247_v28  ;;  %v2455_v4 = vpop.permute.xlu1 %229  ;;  %v2457_v49 = vpop.permute.xlu0 %219  ;;  %1524 = vmatpush1.bf16.msra.mxu0 %v1810_v38 }
  0xf7   : > { %v241_v2 = vrot.slane %v2455_v4, 4  ;;  %v236_v24 = vrot.slane %v2457_v49, 4  ;;  %v1800_v27 = vcombine.high %v248_v34, %v256_v48  ;;  %v1799_v37 = vcombine.low %v248_v34, %v256_v48 }
  0xf9   : > { %v257_v57 = vsel %vm243_vm1, %v240_v22, %v241_v2  ;;  %v249_v19 = vsel %vm243_vm1, %v235_v10, %v236_v24  ;;  %1482 = vmatprep.subr.bf16.mxu1 %v1800_v27 }
  0xfa   : > { %v258_v52 = vsel %vm245_vm9, %v228_v7, %v257_v57  ;;  %v250_v23 = vsel %vm245_vm9, %v218_v46, %v249_v19  ;;  %v842_v42 = vpop.permute.xlu1 %841  ;;  %v832_v38 = vpop.permute.xlu0 %831  ;;  %1483 = vmatpush1.bf16.msra.mxu1 %v1799_v37 }
  0xfb   : > { %v854_v31 = vrot.slane %v842_v42, 4  ;;  %v849_v3 = vrot.slane %v832_v38, 4  ;;  %1484 = vmatprep.subr.bf16.mxu1 %v1791_v13  ;;  %v1801_v28 = vcombine.low %v250_v23, %v258_v52  ;;  %v1802_v22 = vcombine.high %v250_v23, %v258_v52 }
  0xfd   : > { %v869_v10 = vsel %vm243_vm1, %v853_v61, %v854_v31  ;;  %v860_v7 = vsel %vm243_vm1, %v848_v40, %v849_v3  ;;  %1525 = vmatprep.subr.bf16.mxu0 %v1802_v22 }
  0xfe   : > { %v870_v46 = vsel %vm858_vm10, %v2280_v53, %v869_v10  ;;  %v861_v48 = vsel %vm858_vm10, %v2273_v35, %v860_v7  ;;  %v2482_v34 = vpop.permute.xlu1 %843  ;;  %v2484_v13 = vpop.permute.xlu0 %833  ;;  %1485 = vmatpush1.bf16.msra.mxu1 %v1790_v14  ;;  %1526 = vmatpush1.bf16.msra.mxu0 %v1801_v28 }
  0xff   : > { %v855_v61 = vrot.slane %v2482_v34, 4  ;;  %v850_v40 = vrot.slane %v2484_v13, 4  ;;  %v1863_v27 = vcombine.high %v861_v48, %v870_v46  ;;  %1527 = vmatprep.subr.bf16.mxu0 %v1793_v17  ;;  %v1862_v53 = vcombine.low %v861_v48, %v870_v46 }
 0x101   : > { %v871_v35 = vsel %vm243_vm1, %v854_v31, %v855_v61  ;;  %v862_v11 = vsel %vm243_vm1, %v849_v3, %v850_v40  ;;  %1500 = vmatprep.subr.bf16.mxu1 %v1863_v27 }
 0x102   : > { %v872_v12 = vsel %vm858_vm10, %v842_v42, %v871_v35  ;;  %v863_v14 = vsel %vm858_vm10, %v832_v38, %v862_v11  ;;  %v757_v37 = vpop.permute.xlu1 %756  ;;  %v747_v57 = vpop.permute.xlu0 %746  ;;  %1501 = vmatpush2.bf16.msra.mxu1 %v1862_v53  ;;  %1528 = vmatpush1.bf16.msra.mxu0 %v1792_v18  ;;  %v1936_v11 = vld [vmem:[%s2665_s1 + $0x4] ss:$8 sps:$4 sm:$0xff]  }
 0x103   : > { %v767_v17 = vrot.slane %v757_v37, 4  ;;  %v762_v19 = vrot.slane %v747_v57, 4  ;;  %v1864_v52 = vcombine.low %v863_v14, %v872_v12  ;;  %v1865_v23 = vcombine.high %v863_v14, %v872_v12 }
 0x105   : > { %v784_v31 = vsel %vm243_vm1, %v766_v25, %v767_v17  ;;  %v786_v3 = vsel %vm769_vm2, %v757_v37, %v767_v17  ;;  %v775_v42 = vsel %vm243_vm1, %v761_v26, %v762_v19  ;;  %v777_v38 = vsel %vm769_vm2, %v747_v57, %v762_v19  ;;  %1503 = vmatmul.mubr.bf16.vlgmr.msra.gmra.mxu1 %v2302_v39 }
 0x106   : > { %v785_v15 = vsel %vm769_vm2, %v2308_v5, %v784_v31  ;;  %806 = vst.msk [vmem:[#allocation2 + $0x23c] sm:$0xf] %vm186_vm7, %v786_v3  ;;  %v776_v16 = vsel %vm769_vm2, %v2310_v47, %v775_v42  ;;  %801 = vst.msk [vmem:[#allocation2 + $0x218] sm:$0xf] %vm186_vm7, %v777_v38  ;;  %v668_v18 = vpop.permute.xlu1 %667  ;;  %v658_v25 = vpop.permute.xlu0 %657  ;;  %1543 = vmatprep.subr.bf16.mxu0 %v1865_v23  ;;  %1872 = vmatprep.mubr.msk.bf16.mxu1 %vm1423_vm0, %v2050_v6 }
 0x107   : > { %v678_v26 = vrot.slane %v668_v18, 4  ;;  %v673_v28 = vrot.slane %v658_v25, 4  ;;  %1544 = vmatpush2.bf16.msra.mxu0 %v1864_v52  ;;  %v1857_v22 = vcombine.low %v776_v16, %v785_v15  ;;  %v1858_v10 = vcombine.high %v776_v16, %v785_v15 }
 0x108   : > { %1599 = vmatprep.subr.bf16.mxu0 %v1953_v45 }
 0x109   : > { %v695_v5 = vsel %vm243_vm1, %v677_v59, %v678_v26  ;;  %v697_v47 = vsel %vm680_vm3, %v668_v18, %v678_v26  ;;  %v686_v7 = vsel %vm243_vm1, %v672_v43, %v673_v28  ;;  %v688_v46 = vsel %vm680_vm3, %v658_v25, %v673_v28  ;;  %1556 = vmatprep.subr.bf16.mxu1 %v1858_v10 }
 0x10a   : > { %v696_v6 = vsel %vm680_vm3, %v2335_v1, %v695_v5  ;;  %717 = vst.msk [vmem:[#allocation2 + $0x1f4] sm:$0xf] %vm186_vm7, %v697_v47  ;;  %v687_v48 = vsel %vm680_vm3, %v2337_v51, %v686_v7  ;;  %712 = vst.msk [vmem:[#allocation2 + $0x1d0] sm:$0xf] %vm186_vm7, %v688_v46  ;;  %v581_v59 = vpop.permute.xlu1 %580  ;;  %v571_v27 = vpop.permute.xlu0 %570  ;;  %1546 = vmatmul.mubr.bf16.vlgmr.msra.gmra.mxu0 %v2302_v39  ;;  %1557 = vmatpush1.bf16.msra.mxu1 %v1857_v22 }
 0x10b   : > { %v591_v53 = vrot.slane %v581_v59, 4  ;;  %628 = vst.msk [vmem:[#allocation2 + $0x1ac] sm:$0xf] %vm186_vm7, %v581_v59  ;;  %v586_v43 = vrot.slane %v571_v27, 4  ;;  %623 = vst.msk [vmem:[#allocation2 + $0x188] sm:$0xf] %vm186_vm7, %v571_v27  ;;  %v1848_v35 = vcombine.low %v687_v48, %v696_v6  ;;  %v1849_v1 = vcombine.high %v687_v48, %v696_v6  ;;  %1873 = vmatprep.mubr.msk.bf16.mxu0 %vm1423_vm0, %v1936_v11 }
 0x10d   : > { %v607_v51 = vsel %vm243_vm1, %v590_v21, %v591_v53  ;;  %v599_v12 = vsel %vm243_vm1, %v585_v60, %v586_v43  ;;  %v1925_v14 = vld [vmem:[#allocation2 + $0x218] ss:$36 sps:$4 sm:$0xff]   ;;  %1558 = vmatprep.subr.bf16.mxu1 %v1849_v1 }
 0x10e   : > { %v608_v37 = vsel %vm593_vm4, %v2359_v0, %v607_v51  ;;  %v600_v57 = vsel %vm593_vm4, %v2361_v63, %v599_v12  ;;  %v494_v17 = vpop.permute.xlu1 %493  ;;  %v484_v19 = vpop.permute.xlu0 %483  ;;  %1559 = vmatpush1.bf16.msra.mxu1 %v1848_v35  ;;  %1600 = vmatpush1.bf16.msra.mxu0 %v1925_v14 }
 0x10f   : > { %v504_v52 = vrot.slane %v494_v17, 4  ;;  %541 = vst.msk [vmem:[#allocation2 + $0x164] sm:$0xf] %vm186_vm7, %v494_v17  ;;  %v499_v23 = vrot.slane %v484_v19, 4  ;;  %536 = vst.msk [vmem:[#allocation2 + $0x140] sm:$0xf] %vm186_vm7, %v484_v19  ;;  %v1839_v21 = vcombine.low %v600_v57, %v608_v37  ;;  %v1840_v60 = vcombine.high %v600_v57, %v608_v37  ;;  %1601 = vmatprep.subr.bf16.mxu0 %v1953_v45 }
 0x111   : > { %v520_v0 = vsel %vm243_vm1, %v503_v41, %v504_v52  ;;  %v512_v63 = vsel %vm243_vm1, %v498_v32, %v499_v23  ;;  %v1926_v31 = vld [vmem:[#allocation2 + $0x1d0] ss:$36 sps:$4 sm:$0xff]   ;;  %1560 = vmatprep.subr.bf16.mxu1 %v1840_v60 }
 0x112   : > { %v521_v3 = vsel %vm506_vm5, %v2383_v36, %v520_v0  ;;  %v513_v42 = vsel %vm506_vm5, %v2385_v33, %v512_v63  ;;  %v407_v38 = vpop.permute.xlu1 %406  ;;  %v397_v15 = vpop.permute.xlu0 %396  ;;  %1561 = vmatpush1.bf16.msra.mxu1 %v1839_v21  ;;  %1602 = vmatpush1.bf16.msra.mxu0 %v1926_v31  ;;  %v1927_v41 = vld [vmem:[#allocation2 + $0x188] ss:$36 sps:$4 sm:$0xff]  }
 0x113   : > { %v417_v16 = vrot.slane %v407_v38, 4  ;;  %454 = vst.msk [vmem:[#allocation2 + $0x11c] sm:$0xf] %vm186_vm7, %v407_v38  ;;  %v412_v18 = vrot.slane %v397_v15, 4  ;;  %449 = vst.msk [vmem:[#allocation2 + $0xf8] sm:$0xf] %vm186_vm7, %v397_v15  ;;  %v1830_v32 = vcombine.low %v513_v42, %v521_v3  ;;  %v1831_v25 = vcombine.high %v513_v42, %v521_v3  ;;  %1603 = vmatprep.subr.bf16.mxu0 %v1953_v45 }
 0x115   : > { %v433_v36 = vsel %vm243_vm1, %v416_v58, %v417_v16  ;;  %v425_v33 = vsel %vm243_vm1, %v411_v8, %v412_v18  ;;  %1562 = vmatprep.subr.bf16.mxu1 %v1831_v25 }
 0x116   : > { %v434_v26 = vsel %vm419_vm6, %v2407_v30, %v433_v36  ;;  %v426_v28 = vsel %vm419_vm6, %v2409_v50, %v425_v33  ;;  %v320_v22 = vpop.permute.xlu1 %319  ;;  %v310_v10 = vpop.permute.xlu0 %309  ;;  %1563 = vmatpush1.bf16.msra.mxu1 %v1830_v32  ;;  %1604 = vmatpush1.bf16.msra.mxu0 %v1927_v41  ;;  %v1928_v58 = vld [vmem:[#allocation2 + $0x140] ss:$36 sps:$4 sm:$0xff]  }
 0x117   : > { %v330_v5 = vrot.slane %v320_v22, 4  ;;  %367 = vst.msk [vmem:[#allocation2 + $0xd4] sm:$0xf] %vm186_vm7, %v320_v22  ;;  %v325_v47 = vrot.slane %v310_v10, 4  ;;  %362 = vst.msk [vmem:[#allocation2 + $0xb0] sm:$0xf] %vm186_vm7, %v310_v10  ;;  %v1821_v7 = vcombine.low %v426_v28, %v434_v26  ;;  %v1822_v8 = vcombine.high %v426_v28, %v434_v26  ;;  %1605 = vmatprep.subr.bf16.mxu0 %v1953_v45 }
 0x119   : > { %v346_v30 = vsel %vm243_vm1, %v329_v29, %v330_v5  ;;  %v338_v50 = vsel %vm243_vm1, %v324_v44, %v325_v47  ;;  %1564 = vmatprep.subr.bf16.mxu1 %v1822_v8 }
 0x11a   : > { %v347_v46 = vsel %vm332_vm8, %v2431_v20, %v346_v30  ;;  %v339_v6 = vsel %vm332_vm8, %v2433_v9, %v338_v50  ;;  %v232_v48 = vpop.permute.xlu1 %231  ;;  %v222_v59 = vpop.permute.xlu0 %221  ;;  %1565 = vmatpush1.bf16.msra.mxu1 %v1821_v7  ;;  %1606 = vmatpush1.bf16.msra.mxu0 %v1928_v58  ;;  %v1929_v29 = vld [vmem:[#allocation2 + $0xf8] ss:$36 sps:$4 sm:$0xff]  }
 0x11b   : > { %v242_v27 = vrot.slane %v232_v48, 4  ;;  %280 = vst.msk [vmem:[#allocation2 + $0x8c] sm:$0xf] %vm186_vm7, %v232_v48  ;;  %v237_v53 = vrot.slane %v222_v59, 4  ;;  %275 = vst.msk [vmem:[#allocation2 + $0x68] sm:$0xf] %vm186_vm7, %v222_v59  ;;  %v1812_v43 = vcombine.low %v339_v6, %v347_v46  ;;  %v1813_v44 = vcombine.high %v339_v6, %v347_v46  ;;  %1607 = vmatprep.subr.bf16.mxu0 %v1953_v45 }
 0x11d   : > { %v259_v20 = vsel %vm243_vm1, %v241_v2, %v242_v27  ;;  %v251_v9 = vsel %vm243_vm1, %v236_v24, %v237_v53  ;;  %1566 = vmatprep.subr.bf16.mxu1 %v1813_v44 }
 0x11e   : > { %v260_v35 = vsel %vm245_vm9, %v2455_v4, %v259_v20  ;;  %v252_v1 = vsel %vm245_vm9, %v2457_v49, %v251_v9  ;;  %v846_v11 = vpop.permute.xlu1 %845  ;;  %v836_v51 = vpop.permute.xlu0 %835  ;;  %1567 = vmatpush1.bf16.msra.mxu1 %v1812_v43  ;;  %1608 = vmatpush1.bf16.msra.mxu0 %v1929_v29  ;;  %v1930_v37 = vld [vmem:[#allocation2 + $0xb0] ss:$36 sps:$4 sm:$0xff]  }
 0x11f   : > { %v856_v12 = vrot.slane %v846_v11, 4  ;;  %v851_v14 = vrot.slane %v836_v51, 4  ;;  %v1803_v57 = vcombine.low %v252_v1, %v260_v35  ;;  %v1804_v2 = vcombine.high %v252_v1, %v260_v35  ;;  %1609 = vmatprep.subr.bf16.mxu0 %v1953_v45 }
 0x121   : > { %v873_v24 = vsel %vm243_vm1, %v855_v61, %v856_v12  ;;  %v875_v4 = vsel %vm858_vm10, %v846_v11, %v856_v12  ;;  %v864_v49 = vsel %vm243_vm1, %v850_v40, %v851_v14  ;;  %v866_v17 = vsel %vm858_vm10, %v836_v51, %v851_v14  ;;  %1568 = vmatprep.subr.bf16.mxu1 %v1804_v2 }
 0x122   : > { %v874_v19 = vsel %vm858_vm10, %v2482_v34, %v873_v24  ;;  %895 = vst.msk [vmem:[#allocation2 + $0x284] sm:$0xf] %vm186_vm7, %v875_v4  ;;  %v865_v52 = vsel %vm858_vm10, %v2484_v13, %v864_v49  ;;  %890 = vst.msk [vmem:[#allocation2 + $0x260] sm:$0xf] %vm186_vm7, %v866_v17  ;;  %1569 = vmatpush1.bf16.msra.mxu1 %v1803_v57  ;;  %1610 = vmatpush1.bf16.msra.mxu0 %v1930_v37  ;;  %v1931_v61 = vld [vmem:[#allocation2 + $0x68] ss:$36 sps:$4 sm:$0xff]  }
 0x123   : > { %1570 = vmatprep.subr.bf16.mxu1 %v1795_v56  ;;  %1611 = vmatprep.subr.bf16.mxu0 %v1953_v45  ;;  %v1867_v40 = vcombine.high %v865_v52, %v874_v19  ;;  %v1934_v34 = vld [vmem:[#allocation2 + $0x20] ss:$36 sps:$4 sm:$0xff]   ;;  %v1866_v13 = vcombine.low %v865_v52, %v874_v19 }
 0x126   : > { %1571 = vmatpush1.bf16.msra.mxu1 %v1794_v62  ;;  %1612 = vmatpush1.bf16.msra.mxu0 %v1931_v61 }
 0x127   : > { %1586 = vmatprep.subr.bf16.mxu1 %v1867_v40  ;;  %1613 = vmatprep.subr.bf16.mxu0 %v1953_v45 }
 0x129   : > { %v1935_v23 = vld [vmem:[#allocation2 + $0x260] ss:$36 sps:$4 sm:$0xff]  }
 0x12a   : > { %1587 = vmatpush2.bf16.msra.mxu1 %v1866_v13  ;;  %1614 = vmatpush1.bf16.msra.mxu0 %v1934_v34 }
 0x12b   : > { %1629 = vmatprep.subr.bf16.mxu0 %v1953_v45  ;;  %v993_v56 = vpop.permute.xlu0 %992  ;;  %v2632_v21 = vpop.permute.xlu1 %997 }
 0x12d   : > { %1589 = vmatmul.mubr.bf16.vlgmr.msra.gmra.mxu1 %v2302_v39 }
 0x12e   : > { %1630 = vmatpush2.bf16.msra.mxu0 %v1935_v23 }
 0x131   : > { %1632 = vmatmul.mubr.bf16.vlgmr.msra.gmra.mxu0 %v2302_v39 }
 0x189   : > { %v1461_v54 = vpop.f32.mrf.mxu0 }
 0x18a   : > { %v1462_v55 = vadd.f32 %v1461_v54, %v993_v56 }
 0x18b   : > { %v1463_v62 = vpop.f32.mrf.mxu0 }
 0x18c   : > { %v1464_v60 = vadd.f32 %v1463_v62, %v993_v56  ;;  %v1640_v0 = vmax.f32 %v1462_v55, 0.0 }
 0x18d   : > { %v1465_v63 = vpop.f32.mrf.mxu0 }
 0x18e   : > { %v1641_v31 = vmax.f32 %v1464_v60, 0.0  ;;  %v1466_v3 = vadd.f32 %v1465_v63, %v2632_v21 }
 0x18f   : > { %v1467_v45 = vpop.f32.mrf.mxu0 }
 0x190   : > { %v1886_v39 = vpack.c.bf16 %v1641_v31, %v1640_v0  ;;  %v1468_v42 = vadd.f32 %v1467_v45, %v2632_v21  ;;  %v1649_v38 = vmax.f32 %v1466_v3, 0.0 }
 0x192   : > { %1714 = vst [vmem:[%s2639_s14] sm:$0xff] %v1886_v39  ;;  %v1650_v15 = vmax.f32 %v1468_v42, 0.0 }
 0x194   : > { %v1891_v16 = vpack.c.bf16 %v1650_v15, %v1649_v38 }
 0x196   : > { %1719 = vst [vmem:[%s2639_s14 + $0x24] sm:$0xff] %v1891_v16 }
 0x1c5   : > { %v1504_v18 = vpop.f32.mrf.mxu1 }
 0x1c6   : > { %v1505_v41 = vadd.f32 %v1504_v18, %v993_v56 }
 0x1c7   : > { %v1506_v32 = vpop.f32.mrf.mxu1 }
 0x1c8   : > { %v1642_v25 = vmax.f32 %v1505_v41, 0.0  ;;  %v1507_v36 = vadd.f32 %v1506_v32, %v993_v56 }
 0x1c9   : > { %v1508_v33 = vpop.f32.mrf.mxu1 }
 0x1ca   : > { %v1643_v26 = vmax.f32 %v1507_v36, 0.0  ;;  %v1509_v28 = vadd.f32 %v1508_v33, %v2632_v21  ;;  %v1547_v22 = vpop.f32.mrf.mxu0 }
 0x1cb   : > { %v1548_v10 = vadd.f32 %v1547_v22, %v993_v56  ;;  %v1510_v5 = vpop.f32.mrf.mxu1 }
 0x1cc   : > { %v1887_v47 = vpack.c.bf16 %v1643_v26, %v1642_v25  ;;  %v1651_v58 = vmax.f32 %v1509_v28, 0.0  ;;  %v1511_v7 = vadd.f32 %v1510_v5, %v2632_v21  ;;  %v1549_v8 = vpop.f32.mrf.mxu0 }
 0x1cd   : > { %v1644_v30 = vmax.f32 %v1548_v10, 0.0  ;;  %v1550_v50 = vadd.f32 %v1549_v8, %v993_v56 }
 0x1ce   : > { %1715 = vst [vmem:[%s2639_s14 + $0x8] sm:$0xff] %v1887_v47  ;;  %v1652_v46 = vmax.f32 %v1511_v7, 0.0  ;;  %v1551_v6 = vpop.f32.mrf.mxu0 }
 0x1cf   : > { %v1645_v48 = vmax.f32 %v1550_v50, 0.0  ;;  %v1552_v59 = vadd.f32 %v1551_v6, %v2632_v21 }
 0x1d0   : > { %v1892_v27 = vpack.c.bf16 %v1652_v46, %v1651_v58  ;;  %v1553_v53 = vpop.f32.mrf.mxu0 }
 0x1d1   : > { %v1888_v29 = vpack.c.bf16 %v1645_v48, %v1644_v30  ;;  %v1653_v43 = vmax.f32 %v1552_v59, 0.0  ;;  %v1554_v44 = vadd.f32 %v1553_v53, %v2632_v21 }
 0x1d2   : > { %1720 = vst [vmem:[%s2639_s14 + $0x2c] sm:$0xff] %v1892_v27 }
 0x1d3   : > { %1716 = vst [vmem:[%s2639_s14 + $0x10] sm:$0xff] %v1888_v29  ;;  %v1654_v20 = vmax.f32 %v1554_v44, 0.0 }
 0x1d5   : > { %v1893_v9 = vpack.c.bf16 %v1654_v20, %v1653_v43 }
 0x1d7   : > { %1721 = vst [vmem:[%s2639_s14 + $0x34] sm:$0xff] %v1893_v9 }
 0x1ed   : > { %v1590_v35 = vpop.f32.mrf.mxu1 }
 0x1ee   : > { %v1591_v1 = vadd.f32 %v1590_v35, %v993_v56 }
 0x1ef   : > { %v1592_v11 = vpop.f32.mrf.mxu1 }
 0x1f0   : > { %v1646_v51 = vmax.f32 %v1591_v1, 0.0  ;;  %v1593_v12 = vadd.f32 %v1592_v11, %v993_v56 }
 0x1f1   : > { %v1594_v14 = vpop.f32.mrf.mxu1  ;;  %v1633_v37 = vpop.f32.mrf.mxu0 }
 0x1f2   : > { %v1647_v57 = vmax.f32 %v1593_v12, 0.0  ;;  %v1595_v2 = vadd.f32 %v1594_v14, %v2632_v21  ;;  %v1634_v24 = vadd.f32 %v1633_v37, %v993_v56 }
 0x1f3   : > { %v1596_v4 = vpop.f32.mrf.mxu1  ;;  %v1635_v17 = vpop.f32.mrf.mxu0 }
 0x1f4   : > { %v1889_v49 = vpack.c.bf16 %v1647_v57, %v1646_v51  ;;  %v1597_v19 = vadd.f32 %v1596_v4, %v2632_v21  ;;  %v1648_v52 = vmax.f32 %v1634_v24, 0.0  ;;  %v1655_v61 = vmax.f32 %v1595_v2, 0.0 }
 0x1f5   : > { %v1636_v40 = vpop.f32.mrf.mxu0 }
 0x1f6   : > { %1717 = vst [vmem:[%s2639_s14 + $0x18] sm:$0xff] %v1889_v49  ;;  %v1656_v34 = vmax.f32 %v1597_v19, 0.0  ;;  %v1890_v13 = vpack.c.bf16 %v1648_v52, %v1648_v52  ;;  %v1637_v23 = vadd.f32 %v1636_v40, %v2632_v21 }
 0x1f7   : > { %v1638_v55 = vpop.f32.mrf.mxu0 }
 0x1f8   : > { %v1894_v54 = vpack.c.bf16 %v1656_v34, %v1655_v61  ;;  %1718 = vst.msk [vmem:[%s2639_s14 + $0x20] sm:$0xf] %vm186_vm7, %v1890_v13  ;;  %v1657_v56 = vmax.f32 %v1637_v23, 0.0 }
 0x1fa   : > { %1722 = vst [vmem:[%s2639_s14 + $0x3c] sm:$0xff] %v1894_v54  ;;  %v1895_v62 = vpack.c.bf16 %v1657_v56, %v1657_v56 }
 0x1fc   : > { %1723 = vst.msk [vmem:[%s2639_s14 + $0x44] sm:$0xf] %vm186_vm7, %v1895_v62 }
 0x1fd PF: > { %s13_s12 = sadd.s32 1, %s1943_s12  }
 0x1fe   : > { %p10_p4 = scmp.ge.s32.totalorder %s13_s12, 4  }
 0x200   :  { %12 = sbr.rel (!%p10_p4) target bundleno = 1 (0x1), region = 62 }

// kernel: loss_forward.25
= control target key start
LH: loop header
LB: loop body
LE: loop exit
PB: predicated region body
PF: predicated region fallthrough
CT: control target
= control target key end

     0   :  { %s1065_s12 = smov 0   ;;  %s1239_s0 = inlined_call_operand.vmem [shape: bf16[2,16,326], index: 0, kind: input, shape index: {}]   ;;  %s1240_s1 = inlined_call_operand.vmem [shape: bf16[32,144], index: 1, kind: input, shape index: {}]   ;;  %s1241_s2 = inlined_call_operand.vmem [shape: f32[32,1], index: 2, kind: input, shape index: {}]   ;;  %s1242_s3 = inlined_call_operand.vmem [shape: bf16[2,32,288], index: 3, kind: output, shape index: {}]  }
   0x1 LB: > { %s932_s13 = sadd.s32 4294967295, %s1034_s12   ;;  %p936_p0 = scmp.ge.s32.totalorder %s1034_s12, 1  ;;  %s1034_s12 = sphi %s1065_s12, %s13_s12  }
   0x2   : > { %p137_p1 = scmp.lt.s32.totalorder %s1034_s12, 3 }
   0x4   : > { %p138_p2 = pnand %p936_p0, %p137_p1 }
   0x5   : > { %p161_p3 = scmp.lt.s32.totalorder (!%p138_p2), %s932_s13, 1  ;;  %s1037_s18 = smov (!%p138_p2), 91  }
   0x6   : > { %141 = sbr.rel (%p138_p2) target bundleno = 420 (0x1a4), region = 32  ;;  %s1038_s19 = smov (!%p138_p2), 92  }
   0x7   : > { %s1039_s20 = smov (!%p138_p2), 108   ;;  %s1040_s21 = smov (!%p138_p2), 109  }
   0x8   : > { %s1041_s22 = smov (!%p138_p2), 110   ;;  %s1042_s23 = smov (!%p138_p2), 126  }
   0x9   : > { %s1043_s24 = smov (!%p138_p2), 127   ;;  %s1044_s27 = smov (!%p138_p2), 90  }
   0xb   : > { %s1244_s13 = smov (!%p161_p3, %s932_s13), 1  ;;  %v1036_v2 = vmov 0   ;;  %vm177_vm0 = vcmask 257024   ;;  %v1024_v22 = vld [vmem:[%s1240_s1 + $0x4] ss:$8 sps:$4 sm:$0xff]   ;;  %vm672_vm1 = vcmask 130048  }
   0xc   : > { %s992_s14 = smul.u32 24, %s1244_s13  ;;  %732 = vmatprep.subr.bf16.mxu1 %v1036_v2  ;;  %1012 = vset.pattern.permute.xlu1 %v1036_v2  ;;  %v487_v24 = vld [vmem:[%s1241_s2 + $0x8] sm:$0xff]  ;;  %v486_v25 = vld [vmem:[%s1241_s2] sm:$0xff]  ;;  %v488_v26 = vld [vmem:[%s1241_s2 + $0x10] sm:$0xff]  ;;  %vm201_vm2 = vcmask 1043456   ;;  %vm401_vm3 = vcmask 744448  }
   0xd   : > { %1011 = vset.pattern.permute.xlu0 %v1036_v2  ;;  %972 = vmatprep.mubr.msk.bf16.mxu1 %vm672_vm1, %v1024_v22  ;;  %v489_v27 = vld [vmem:[%s1241_s2 + $0x18] sm:$0xff]  ;;  %vm368_vm4 = vcmask 752640   ;;  %vm335_vm5 = vcmask 883712   ;;  %vm302_vm6 = vcmask 891904   ;;  %vm269_vm7 = vcmask 900096  }
   0xe   : > { %s1079_s17 = scalar_lea.vmem %s1239_s0, %s992_s14  ;;  %970 = vmatprep.mubr.msk.bf16.mxu0 %vm672_vm1, %v1024_v22  ;;  %vm236_vm8 = vcmask 1031168   ;;  %vm203_vm9 = vcmask 1039360   ;;  %vm434_vm10 = vcmask 736256  }
   0xf   : > { %v1082_v0 = vld [vmem:[%s1079_s17 + $0xc] sm:$0xff]  ;;  %v1085_v1 = vld [vmem:[%s1079_s17] sm:$0xff]  ;;  %v383_v3 = vld [vmem:[%s1079_s17 + $0x14] sm:$0xf] }
  0x10   : > { %392 = vrot.lane.b32.xlu1 %v1082_v0, %s1037_s18  ;;  %388 = vrot.lane.b32.xlu0 %v1085_v1, %s1037_s18  ;;  %v381_v4 = vld [vmem:[%s1079_s17 + $0x8] sm:$0xf]  ;;  %v350_v6 = vld [vmem:[%s1079_s17 + $0x14] sm:$0xf]  ;;  %v944_v18 = vcombine.high %v1085_v1, %v1082_v0  ;;  %v943_v19 = vcombine.low %v1085_v1, %v1082_v0 }
  0x11   : > { %v348_v5 = vld [vmem:[%s1079_s17 + $0x8] sm:$0xf]  ;;  %v317_v8 = vld [vmem:[%s1079_s17 + $0x14] sm:$0xf] }
  0x12   : > { %v315_v7 = vld [vmem:[%s1079_s17 + $0x8] sm:$0xf]  ;;  %v284_v10 = vld [vmem:[%s1079_s17 + $0x14] sm:$0xf] }
  0x13   : > { %v282_v9 = vld [vmem:[%s1079_s17 + $0x8] sm:$0xf]  ;;  %v251_v12 = vld [vmem:[%s1079_s17 + $0x14] sm:$0xf] }
  0x14   : > { %394 = vrot.lane.b32.xlu1 %v383_v3, %s1037_s18  ;;  %390 = vrot.lane.b32.xlu0 %v381_v4, %s1037_s18  ;;  %v249_v11 = vld [vmem:[%s1079_s17 + $0x8] sm:$0xf]  ;;  %v218_v14 = vld [vmem:[%s1079_s17 + $0x14] sm:$0xf] }
  0x15   : > { %v216_v13 = vld [vmem:[%s1079_s17 + $0x8] sm:$0xf]  ;;  %v175_v16 = vld [vmem:[%s1079_s17 + $0x14] sm:$0xf] }
  0x16   : > { %v173_v15 = vld [vmem:[%s1079_s17 + $0x8] sm:$0xf]  ;;  %180 = vst.msk [vmem:[#allocation2 + $0x14] sm:$0xf] %vm177_vm0, %v175_v16  ;;  %v184_v20 = vld [vmem:[%s1079_s17 + $0x14] sm:$0xf] }
  0x17   : > { %178 = vst.msk [vmem:[#allocation2 + $0x8] sm:$0xf] %vm177_vm0, %v173_v15  ;;  %v182_v17 = vld [vmem:[%s1079_s17 + $0x8] sm:$0xf]  ;;  %v416_v23 = vld [vmem:[%s1079_s17 + $0x14] sm:$0xf] }
  0x18   : > { %357 = vrot.lane.b32.xlu1 %v348_v5, %s1038_s19  ;;  %355 = vrot.lane.b32.xlu0 %v1085_v1, %s1038_s19  ;;  %v414_v21 = vld [vmem:[%s1079_s17 + $0x8] sm:$0xf]  ;;  %s993_s17 = smul.u32 48, %s1244_s13 }
  0x1c   : > { %361 = vrot.lane.b32.xlu1 %v350_v6, %s1038_s19  ;;  %359 = vrot.lane.b32.xlu0 %v1082_v0, %s1038_s19  ;;  %s1222_s19 = scalar_lea.vmem %s1242_s3, %s993_s17 }
  0x20   : > { %324 = vrot.lane.b32.xlu1 %v315_v7, %s1039_s20  ;;  %322 = vrot.lane.b32.xlu0 %v1085_v1, %s1039_s20 }
  0x24   : > { %328 = vrot.lane.b32.xlu1 %v317_v8, %s1039_s20  ;;  %326 = vrot.lane.b32.xlu0 %v1082_v0, %s1039_s20 }
  0x28   : > { %291 = vrot.lane.b32.xlu1 %v282_v9, %s1040_s21  ;;  %289 = vrot.lane.b32.xlu0 %v1085_v1, %s1040_s21 }
  0x2c   : > { %295 = vrot.lane.b32.xlu1 %v284_v10, %s1040_s21  ;;  %293 = vrot.lane.b32.xlu0 %v1082_v0, %s1040_s21 }
  0x30   : > { %258 = vrot.lane.b32.xlu1 %v249_v11, %s1041_s22  ;;  %256 = vrot.lane.b32.xlu0 %v1085_v1, %s1041_s22 }
  0x34   : > { %262 = vrot.lane.b32.xlu1 %v251_v12, %s1041_s22  ;;  %260 = vrot.lane.b32.xlu0 %v1082_v0, %s1041_s22 }
  0x38   : > { %225 = vrot.lane.b32.xlu1 %v216_v13, %s1042_s23  ;;  %223 = vrot.lane.b32.xlu0 %v1085_v1, %s1042_s23 }
  0x3c   : > { %229 = vrot.lane.b32.xlu1 %v218_v14, %s1042_s23  ;;  %227 = vrot.lane.b32.xlu0 %v1082_v0, %s1042_s23 }
  0x40   : > { %191 = vrot.lane.b32.xlu1 %v182_v17, %s1043_s24  ;;  %189 = vrot.lane.b32.xlu0 %v1085_v1, %s1043_s24 }
  0x44   : > { %195 = vrot.lane.b32.xlu1 %v184_v20, %s1043_s24  ;;  %193 = vrot.lane.b32.xlu0 %v1082_v0, %s1043_s24 }
  0x48   : > { %423 = vrot.lane.b32.xlu1 %v414_v21, %s1044_s27  ;;  %421 = vrot.lane.b32.xlu0 %v1085_v1, %s1044_s27 }
  0x4c   : > { %427 = vrot.lane.b32.xlu1 %v416_v23, %s1044_s27  ;;  %425 = vrot.lane.b32.xlu0 %v1082_v0, %s1044_s27  ;;  %v1027_v0 = vld [vmem:[%s1240_s1 + $0x10] ss:$8 sps:$4 sm:$0xff]  }
  0x50   : > { %497 = vperm.xlu1 %1012, %v487_v24   ;;  %492 = vperm.xlu0 %1011, %v486_v25  }
  0x54   : > { %502 = vperm.xlu1 %1012, %v488_v26   ;;  %507 = vperm.xlu0 %1011, %v489_v27  }
  0x82   : > { %v393_v28 = vpop.permute.xlu1 %392  ;;  %v389_v29 = vpop.permute.xlu0 %388 }
  0x83   : > { %v398_v32 = vrot.slane %v393_v28, 4  ;;  %v396_v33 = vrot.slane %v389_v29, 4 }
  0x86   : > { %v395_v30 = vpop.permute.xlu1 %394  ;;  %v391_v31 = vpop.permute.xlu0 %390 }
  0x87   : > { %v399_v34 = vrot.slane %v395_v30, 4  ;;  %412 = vst.msk [vmem:[#allocation2 + $0xbc] sm:$0xf] %vm177_vm0, %v395_v30  ;;  %v397_v35 = vrot.slane %v391_v31, 4  ;;  %410 = vst.msk [vmem:[#allocation2 + $0xb0] sm:$0xf] %vm177_vm0, %v391_v31 }
  0x89   : > { %v403_v36 = vsel %vm201_vm2, %v398_v32, %v399_v34  ;;  %v400_v37 = vsel %vm201_vm2, %v396_v33, %v397_v35 }
  0x8a   : > { %v404_v38 = vsel %vm401_vm3, %v393_v28, %v403_v36  ;;  %v402_v39 = vsel %vm401_vm3, %v389_v29, %v400_v37  ;;  %v358_v40 = vpop.permute.xlu1 %357  ;;  %v356_v41 = vpop.permute.xlu0 %355 }
  0x8b   : > { %v364_v42 = vrot.slane %v358_v40, 4  ;;  %377 = vst.msk [vmem:[#allocation2 + $0x98] sm:$0xf] %vm177_vm0, %v358_v40  ;;  %v363_v43 = vrot.slane %v356_v41, 4  ;;  %v965_v44 = vcombine.high %v402_v39, %v404_v38  ;;  %v964_v45 = vcombine.low %v402_v39, %v404_v38 }
  0x8d   : > { %v367_v46 = vsel %vm201_vm2, %v363_v43, %v364_v42  ;;  %679 = vmatprep.subr.bf16.mxu0 %v965_v44 }
  0x8e   : > { %v369_v47 = vsel %vm368_vm4, %v356_v41, %v367_v46  ;;  %v362_v48 = vpop.permute.xlu1 %361  ;;  %v360_v49 = vpop.permute.xlu0 %359  ;;  %v1013_v50 = vld [vmem:[#allocation2 + $0xb0] ss:$12 sps:$4 sm:$0xff]   ;;  %680 = vmatpush1.bf16.msra.mxu0 %v964_v45 }
  0x8f   : > { %v366_v51 = vrot.slane %v362_v48, 4  ;;  %379 = vst.msk [vmem:[#allocation2 + $0xa4] sm:$0xf] %vm177_vm0, %v362_v48  ;;  %v365_v52 = vrot.slane %v360_v49, 4  ;;  %733 = vmatpush1.bf16.msra.mxu1 %v1013_v50 }
  0x90   : > { %734 = vmatprep.subr.bf16.mxu1 %v1036_v2 }
  0x91   : > { %v370_v53 = vsel %vm201_vm2, %v365_v52, %v366_v51 }
  0x92   : > { %v371_v54 = vsel %vm368_vm4, %v360_v49, %v370_v53  ;;  %v325_v55 = vpop.permute.xlu1 %324  ;;  %v323_v56 = vpop.permute.xlu0 %322 }
  0x93   : > { %v331_v57 = vrot.slane %v325_v55, 4  ;;  %344 = vst.msk [vmem:[#allocation2 + $0x80] sm:$0xf] %vm177_vm0, %v325_v55  ;;  %v330_v58 = vrot.slane %v323_v56, 4  ;;  %v962_v59 = vcombine.high %v369_v47, %v371_v54  ;;  %v961_v60 = vcombine.low %v369_v47, %v371_v54 }
  0x95   : > { %v334_v61 = vsel %vm201_vm2, %v330_v58, %v331_v57  ;;  %681 = vmatprep.subr.bf16.mxu0 %v962_v59 }
  0x96   : > { %v336_v62 = vsel %vm335_vm5, %v323_v56, %v334_v61  ;;  %v329_v63 = vpop.permute.xlu1 %328  ;;  %v327_v3 = vpop.permute.xlu0 %326  ;;  %v1014_v4 = vld [vmem:[#allocation2 + $0x98] ss:$12 sps:$4 sm:$0xff]   ;;  %682 = vmatpush1.bf16.msra.mxu0 %v961_v60 }
  0x97   : > { %v333_v5 = vrot.slane %v329_v63, 4  ;;  %346 = vst.msk [vmem:[#allocation2 + $0x8c] sm:$0xf] %vm177_vm0, %v329_v63  ;;  %v332_v6 = vrot.slane %v327_v3, 4  ;;  %735 = vmatpush1.bf16.msra.mxu1 %v1014_v4 }
  0x98   : > { %736 = vmatprep.subr.bf16.mxu1 %v1036_v2 }
  0x99   : > { %v337_v7 = vsel %vm201_vm2, %v332_v6, %v333_v5 }
  0x9a   : > { %v338_v8 = vsel %vm335_vm5, %v327_v3, %v337_v7  ;;  %v292_v9 = vpop.permute.xlu1 %291  ;;  %v290_v10 = vpop.permute.xlu0 %289 }
  0x9b   : > { %v298_v11 = vrot.slane %v292_v9, 4  ;;  %311 = vst.msk [vmem:[#allocation2 + $0x68] sm:$0xf] %vm177_vm0, %v292_v9  ;;  %v297_v12 = vrot.slane %v290_v10, 4  ;;  %v959_v13 = vcombine.high %v336_v62, %v338_v8  ;;  %v958_v14 = vcombine.low %v336_v62, %v338_v8 }
  0x9d   : > { %v301_v15 = vsel %vm201_vm2, %v297_v12, %v298_v11  ;;  %683 = vmatprep.subr.bf16.mxu0 %v959_v13 }
  0x9e   : > { %v303_v16 = vsel %vm302_vm6, %v290_v10, %v301_v15  ;;  %v296_v17 = vpop.permute.xlu1 %295  ;;  %v294_v20 = vpop.permute.xlu0 %293  ;;  %v1015_v21 = vld [vmem:[#allocation2 + $0x80] ss:$12 sps:$4 sm:$0xff]   ;;  %684 = vmatpush1.bf16.msra.mxu0 %v958_v14 }
  0x9f   : > { %v300_v22 = vrot.slane %v296_v17, 4  ;;  %313 = vst.msk [vmem:[#allocation2 + $0x74] sm:$0xf] %vm177_vm0, %v296_v17  ;;  %v299_v23 = vrot.slane %v294_v20, 4  ;;  %737 = vmatpush1.bf16.msra.mxu1 %v1015_v21 }
  0xa0   : > { %738 = vmatprep.subr.bf16.mxu1 %v1036_v2 }
  0xa1   : > { %v304_v24 = vsel %vm201_vm2, %v299_v23, %v300_v22 }
  0xa2   : > { %v305_v25 = vsel %vm302_vm6, %v294_v20, %v304_v24  ;;  %v259_v26 = vpop.permute.xlu1 %258  ;;  %v257_v27 = vpop.permute.xlu0 %256 }
  0xa3   : > { %v265_v28 = vrot.slane %v259_v26, 4  ;;  %278 = vst.msk [vmem:[#allocation2 + $0x50] sm:$0xf] %vm177_vm0, %v259_v26  ;;  %v264_v29 = vrot.slane %v257_v27, 4  ;;  %v956_v30 = vcombine.high %v303_v16, %v305_v25  ;;  %v955_v31 = vcombine.low %v303_v16, %v305_v25  ;;  %v1020_v25 = vld [vmem:[#allocation2 + $0x8] ss:$12 sps:$4 sm:$0xff]  }
  0xa5   : > { %v268_v32 = vsel %vm201_vm2, %v264_v29, %v265_v28  ;;  %685 = vmatprep.subr.bf16.mxu0 %v956_v30 }
  0xa6   : > { %v270_v33 = vsel %vm269_vm7, %v257_v27, %v268_v32  ;;  %v263_v34 = vpop.permute.xlu1 %262  ;;  %v261_v35 = vpop.permute.xlu0 %260  ;;  %v1016_v36 = vld [vmem:[#allocation2 + $0x68] ss:$12 sps:$4 sm:$0xff]   ;;  %686 = vmatpush1.bf16.msra.mxu0 %v955_v31 }
  0xa7   : > { %v267_v37 = vrot.slane %v263_v34, 4  ;;  %280 = vst.msk [vmem:[#allocation2 + $0x5c] sm:$0xf] %vm177_vm0, %v263_v34  ;;  %v266_v38 = vrot.slane %v261_v35, 4  ;;  %739 = vmatpush1.bf16.msra.mxu1 %v1016_v36  ;;  %v1025_v31 = vld [vmem:[%s1240_s1 + $0x14] ss:$8 sps:$4 sm:$0xff]  }
  0xa8   : > { %740 = vmatprep.subr.bf16.mxu1 %v1036_v2 }
  0xa9   : > { %v271_v39 = vsel %vm201_vm2, %v266_v38, %v267_v37 }
  0xaa   : > { %v272_v40 = vsel %vm269_vm7, %v261_v35, %v271_v39  ;;  %v226_v41 = vpop.permute.xlu1 %225  ;;  %v224_v42 = vpop.permute.xlu0 %223 }
  0xab   : > { %v232_v43 = vrot.slane %v226_v41, 4  ;;  %245 = vst.msk [vmem:[#allocation2 + $0x38] sm:$0xf] %vm177_vm0, %v226_v41  ;;  %v231_v44 = vrot.slane %v224_v42, 4  ;;  %v953_v45 = vcombine.high %v270_v33, %v272_v40  ;;  %v952_v46 = vcombine.low %v270_v33, %v272_v40 }
  0xad   : > { %v235_v47 = vsel %vm201_vm2, %v231_v44, %v232_v43  ;;  %687 = vmatprep.subr.bf16.mxu0 %v953_v45 }
  0xae   : > { %v237_v48 = vsel %vm236_vm8, %v224_v42, %v235_v47  ;;  %v230_v49 = vpop.permute.xlu1 %229  ;;  %v228_v50 = vpop.permute.xlu0 %227  ;;  %v1017_v51 = vld [vmem:[#allocation2 + $0x50] ss:$12 sps:$4 sm:$0xff]   ;;  %688 = vmatpush1.bf16.msra.mxu0 %v952_v46 }
  0xaf   : > { %v234_v52 = vrot.slane %v230_v49, 4  ;;  %247 = vst.msk [vmem:[#allocation2 + $0x44] sm:$0xf] %vm177_vm0, %v230_v49  ;;  %v233_v53 = vrot.slane %v228_v50, 4  ;;  %741 = vmatpush1.bf16.msra.mxu1 %v1017_v51 }
  0xb0   : > { %742 = vmatprep.subr.bf16.mxu1 %v1036_v2 }
  0xb1   : > { %v238_v54 = vsel %vm201_vm2, %v233_v53, %v234_v52 }
  0xb2   : > { %v239_v55 = vsel %vm236_vm8, %v228_v50, %v238_v54  ;;  %v192_v56 = vpop.permute.xlu1 %191  ;;  %v190_v57 = vpop.permute.xlu0 %189 }
  0xb3   : > { %v198_v58 = vrot.slane %v192_v56, 4  ;;  %212 = vst.msk [vmem:[#allocation2 + $0x20] sm:$0xf] %vm177_vm0, %v192_v56  ;;  %v197_v59 = vrot.slane %v190_v57, 4  ;;  %v950_v60 = vcombine.high %v237_v48, %v239_v55  ;;  %v949_v61 = vcombine.low %v237_v48, %v239_v55 }
  0xb5   : > { %v202_v62 = vsel %vm201_vm2, %v197_v59, %v198_v58  ;;  %689 = vmatprep.subr.bf16.mxu0 %v950_v60 }
  0xb6   : > { %v204_v63 = vsel %vm203_vm9, %v190_v57, %v202_v62  ;;  %v196_v3 = vpop.permute.xlu1 %195  ;;  %v194_v4 = vpop.permute.xlu0 %193  ;;  %v1018_v5 = vld [vmem:[#allocation2 + $0x38] ss:$12 sps:$4 sm:$0xff]   ;;  %690 = vmatpush1.bf16.msra.mxu0 %v949_v61 }
  0xb7   : > { %v200_v6 = vrot.slane %v196_v3, 4  ;;  %214 = vst.msk [vmem:[#allocation2 + $0x2c] sm:$0xf] %vm177_vm0, %v196_v3  ;;  %v199_v7 = vrot.slane %v194_v4, 4  ;;  %743 = vmatpush1.bf16.msra.mxu1 %v1018_v5 }
  0xb8   : > { %744 = vmatprep.subr.bf16.mxu1 %v1036_v2 }
  0xb9   : > { %v205_v8 = vsel %vm201_vm2, %v199_v7, %v200_v6 }
  0xba   : > { %v206_v9 = vsel %vm203_vm9, %v194_v4, %v205_v8  ;;  %v424_v10 = vpop.permute.xlu1 %423  ;;  %v422_v11 = vpop.permute.xlu0 %421 }
  0xbb   : > { %v430_v12 = vrot.slane %v424_v10, 4  ;;  %443 = vst.msk [vmem:[#allocation2 + $0xc8] sm:$0xf] %vm177_vm0, %v424_v10  ;;  %v429_v13 = vrot.slane %v422_v11, 4  ;;  %v947_v14 = vcombine.high %v204_v63, %v206_v9  ;;  %v946_v15 = vcombine.low %v204_v63, %v206_v9 }
  0xbd   : > { %v433_v16 = vsel %vm201_vm2, %v429_v13, %v430_v12  ;;  %691 = vmatprep.subr.bf16.mxu0 %v947_v14 }
  0xbe   : > { %v435_v17 = vsel %vm434_vm10, %v422_v11, %v433_v16  ;;  %v428_v20 = vpop.permute.xlu1 %427  ;;  %v426_v21 = vpop.permute.xlu0 %425  ;;  %v1019_v22 = vld [vmem:[#allocation2 + $0x20] ss:$12 sps:$4 sm:$0xff]   ;;  %692 = vmatpush1.bf16.msra.mxu0 %v946_v15 }
  0xbf   : > { %v432_v23 = vrot.slane %v428_v20, 4  ;;  %445 = vst.msk [vmem:[#allocation2 + $0xd4] sm:$0xf] %vm177_vm0, %v428_v20  ;;  %v431_v24 = vrot.slane %v426_v21, 4  ;;  %693 = vmatprep.subr.bf16.mxu0 %v944_v18  ;;  %745 = vmatpush1.bf16.msra.mxu1 %v1019_v22  ;;  %v1022_v18 = vld [vmem:[%s1240_s1] ss:$8 sps:$4 sm:$0xff]  }
  0xc0   : > { %746 = vmatprep.subr.bf16.mxu1 %v1036_v2 }
  0xc1   : > { %v436_v26 = vsel %vm201_vm2, %v431_v24, %v432_v23 }
  0xc2   : > { %v437_v27 = vsel %vm434_vm10, %v426_v21, %v436_v26  ;;  %694 = vmatpush1.bf16.msra.mxu0 %v943_v19 }
  0xc3   : > { %v968_v28 = vcombine.high %v435_v17, %v437_v27  ;;  %v967_v29 = vcombine.low %v435_v17, %v437_v27  ;;  %747 = vmatpush1.bf16.msra.mxu1 %v1020_v25 }
  0xc4   : > { %762 = vmatprep.subr.bf16.mxu1 %v1036_v2 }
  0xc5   : > { %709 = vmatprep.subr.bf16.mxu0 %v968_v28 }
  0xc6   : > { %v1021_v30 = vld [vmem:[#allocation2 + $0xc8] ss:$12 sps:$4 sm:$0xff]   ;;  %710 = vmatpush2.bf16.msra.mxu0 %v967_v29 }
  0xc7   : > { %763 = vmatpush2.bf16.msra.mxu1 %v1021_v30 }
  0xc9   : > { %712 = vmatmul.mubr.bf16.vlgmr.msra.gmra.mxu0 %v1022_v18 }
  0xca   : > { %971 = vmatprep.mubr.msk.bf16.mxu0 %vm672_vm1, %v1025_v31  ;;  %765 = vmatmul.mubr.bf16.vlgmr.msra.gmra.mxu1 %v1022_v18 }
  0xcb   : > { %973 = vmatprep.mubr.msk.bf16.mxu1 %vm672_vm1, %v1025_v31  ;;  %v493_v1 = vpop.permute.xlu0 %492  ;;  %v498_v19 = vpop.permute.xlu1 %497 }
  0xcf   : > { %v503_v51 = vpop.permute.xlu1 %502  ;;  %v508_v21 = vpop.permute.xlu0 %507 }
  0xd1   : > { %722 = vmatmul.mubr.bf16.gmra.mxu0 %v1027_v0 }
  0xd2   : > { %773 = vmatmul.mubr.bf16.gmra.mxu1 %v1027_v0 }
 0x189   : > { %v713_v2 = vpop.f32.mrf.mxu0 }
 0x18a   : > { %v714_v32 = vadd.f32 %v713_v2, %v493_v1  ;;  %v766_v33 = vpop.f32.mrf.mxu1 }
 0x18b   : > { %v715_v34 = vpop.f32.mrf.mxu0  ;;  %v767_v35 = vadd.f32 %v766_v33, %v493_v1 }
 0x18c   : > { %v793_v36 = vmin.f32 %v714_v32, 0.0  ;;  %v716_v37 = vadd.f32 %v715_v34, %v493_v1  ;;  %v768_v38 = vpop.f32.mrf.mxu1  ;;  %v781_v42 = vmax.f32 %v714_v32, 0.0 }
 0x18d   : > { %v717_v39 = vpop.f32.mrf.mxu0  ;;  %v795_v40 = vmin.f32 %v767_v35, 0.0  ;;  %v783_v47 = vmax.f32 %v767_v35, 0.0 }
 0x18e   : > { %v805_v41 = vmul.f32 0.25, %v793_v36  ;;  %v769_v43 = vpop.f32.mrf.mxu1  ;;  %v794_v44 = vmin.f32 %v716_v37, 0.0  ;;  %v718_v45 = vadd.f32 %v717_v39, %v498_v19  ;;  %v782_v53 = vmax.f32 %v716_v37, 0.0 }
 0x18f   : > { %v719_v46 = vpop.f32.mrf.mxu0  ;;  %v807_v48 = vmul.f32 0.25, %v795_v40  ;;  %v770_v49 = vadd.f32 %v769_v43, %v498_v19 }
 0x190   : > { %v720_v50 = vadd.f32 %v719_v46, %v498_v19  ;;  %v817_v52 = vadd.f32 %v805_v41, %v781_v42  ;;  %v806_v54 = vmul.f32 0.25, %v794_v44  ;;  %v771_v55 = vpop.f32.mrf.mxu1  ;;  %v796_v56 = vmin.f32 %v718_v45, 0.0 }
 0x191   : > { %v723_v57 = vpop.f32.mrf.mxu0  ;;  %v819_v58 = vadd.f32 %v807_v48, %v783_v47  ;;  %v786_v59 = vmax.f32 %v770_v49, 0.0  ;;  %v798_v60 = vmin.f32 %v770_v49, 0.0  ;;  %v784_v61 = vmax.f32 %v718_v45, 0.0 }
 0x192   : > { %v818_v62 = vadd.f32 %v806_v54, %v782_v53  ;;  %v808_v63 = vmul.f32 0.25, %v796_v56  ;;  %v774_v3 = vpop.f32.mrf.mxu1  ;;  %v797_v4 = vmin.f32 %v720_v50, 0.0  ;;  %v724_v5 = vadd.f32 %v723_v57, %v503_v51 }
 0x193   : > { %v725_v6 = vpop.f32.mrf.mxu0  ;;  %v985_v7 = vpack.c.bf16 %v819_v58, %v819_v58  ;;  %v810_v8 = vmul.f32 0.25, %v798_v60  ;;  %v775_v9 = vadd.f32 %v774_v3, %v503_v51  ;;  %v785_v13 = vmax.f32 %v720_v50, 0.0 }
 0x194   : > { %v726_v10 = vadd.f32 %v725_v6, %v503_v51  ;;  %v984_v11 = vpack.c.bf16 %v818_v62, %v817_v52  ;;  %v820_v12 = vadd.f32 %v808_v63, %v784_v61  ;;  %v809_v14 = vmul.f32 0.25, %v797_v4  ;;  %v776_v15 = vpop.f32.mrf.mxu1 }
 0x195   : > { %v727_v16 = vpop.f32.mrf.mxu0  ;;  %870 = vst.msk [vmem:[%s1222_s19 + $0x8] sm:$0xf] %vm177_vm0, %v985_v7  ;;  %v822_v17 = vadd.f32 %v810_v8, %v786_v59  ;;  %v801_v20 = vmin.f32 %v775_v9, 0.0  ;;  %v787_v22 = vmax.f32 %v724_v5, 0.0  ;;  %v799_v23 = vmin.f32 %v724_v5, 0.0 }
 0x196   : > { %869 = vst [vmem:[%s1222_s19] sm:$0xff] %v984_v11  ;;  %v821_v24 = vadd.f32 %v809_v14, %v785_v13  ;;  %v789_v25 = vmax.f32 %v775_v9, 0.0  ;;  %v777_v26 = vpop.f32.mrf.mxu1  ;;  %v800_v27 = vmin.f32 %v726_v10, 0.0  ;;  %v728_v28 = vadd.f32 %v727_v16, %v508_v21 }
 0x197   : > { %v987_v29 = vpack.c.bf16 %v822_v17, %v822_v17  ;;  %v813_v18 = vmul.f32 0.25, %v801_v20  ;;  %v811_v30 = vmul.f32 0.25, %v799_v23  ;;  %v778_v31 = vadd.f32 %v777_v26, %v508_v21  ;;  %v729_v0 = vpop.f32.mrf.mxu0 }
 0x198   : > { %v986_v1 = vpack.c.bf16 %v821_v24, %v820_v12  ;;  %v788_v2 = vmax.f32 %v726_v10, 0.0  ;;  %v812_v19 = vmul.f32 0.25, %v800_v27  ;;  %v779_v32 = vpop.f32.mrf.mxu1  ;;  %v802_v33 = vmin.f32 %v728_v28, 0.0 }
 0x199   : > { %872 = vst.msk [vmem:[%s1222_s19 + $0x14] sm:$0xf] %vm177_vm0, %v987_v29  ;;  %v825_v34 = vadd.f32 %v813_v18, %v789_v25  ;;  %v804_v35 = vmin.f32 %v778_v31, 0.0  ;;  %v823_v36 = vadd.f32 %v811_v30, %v787_v22  ;;  %v730_v38 = vadd.f32 %v729_v0, %v508_v21 }
 0x19a   : > { %871 = vst [vmem:[%s1222_s19 + $0xc] sm:$0xff] %v986_v1  ;;  %v824_v37 = vadd.f32 %v812_v19, %v788_v2  ;;  %v792_v40 = vmax.f32 %v778_v31, 0.0  ;;  %v814_v43 = vmul.f32 0.25, %v802_v33  ;;  %v790_v46 = vmax.f32 %v728_v28, 0.0 }
 0x19b   : > { %v989_v39 = vpack.c.bf16 %v825_v34, %v825_v34  ;;  %v816_v41 = vmul.f32 0.25, %v804_v35  ;;  %v803_v44 = vmin.f32 %v730_v38, 0.0  ;;  %v791_v47 = vmax.f32 %v730_v38, 0.0 }
 0x19c   : > { %v988_v42 = vpack.c.bf16 %v824_v37, %v823_v36  ;;  %v826_v50 = vadd.f32 %v814_v43, %v790_v46 }
 0x19d   : > { %874 = vst.msk [vmem:[%s1222_s19 + $0x20] sm:$0xf] %vm177_vm0, %v989_v39  ;;  %v828_v45 = vadd.f32 %v816_v41, %v792_v40  ;;  %v815_v48 = vmul.f32 0.25, %v803_v44 }
 0x19e   : > { %873 = vst [vmem:[%s1222_s19 + $0x18] sm:$0xff] %v988_v42 }
 0x19f   : > { %v991_v49 = vpack.c.bf16 %v828_v45, %v828_v45  ;;  %v827_v51 = vadd.f32 %v815_v48, %v791_v47 }
 0x1a1   : > { %876 = vst.msk [vmem:[%s1222_s19 + $0x2c] sm:$0xf] %vm177_vm0, %v991_v49  ;;  %v990_v52 = vpack.c.bf16 %v827_v51, %v826_v50 }
 0x1a3   : > { %875 = vst [vmem:[%s1222_s19 + $0x24] sm:$0xff] %v990_v52 }
 0x1a4 PF: > { %s13_s12 = sadd.s32 1, %s1034_s12  }
 0x1a5   : > { %p10_p4 = scmp.ge.s32.totalorder %s13_s12, 4  }
 0x1a7   :  { %12 = sbr.rel (!%p10_p4) target bundleno = 1 (0x1), region = 62 }

// kernel: loss_forward.30
= control target key start
LH: loop header
LB: loop body
LE: loop exit
PB: predicated region body
PF: predicated region fallthrough
CT: control target
= control target key end

     0   :  { %v47_v0 = vlaneseq  ;;  %v1099_v3 = vmov 1983009808   ;;  %vm959_vm0 = vcmask 1041408   ;;  %vm1092_vm1 = vcmask 1024   ;;  %s1747_s1 = inlined_call_operand.vmem [shape: f32[1,8192], index: 1, kind: input, shape index: {}]   ;;  %s1748_s0 = inlined_call_operand.vmem [shape: f32[2,8192], index: 0, kind: input, shape index: {}]   ;;  %s1749_s2 = inlined_call_operand.<no memory space> [shape: f32[1,1], index: 2, kind: input, shape index: {}]   ;;  %s1750_s3 = inlined_call_operand.vmem [shape: f32[2,1], index: 3, kind: output, shape index: {}]  }
   0x1   :  { %v1123_v2 = vld [vmem:[%s1747_s1 + $0x20] sm:$0xff]  ;;  %v306_v4 = vunpack.c.l.s4 %v1099_v3  ;;  %v1136_v9 = vld [vmem:[%s1747_s1 + $0x28] sm:$0xff]  ;;  %v1157_v18 = vld [vmem:[%s1747_s1 + $0x30] sm:$0xff] }
   0x2   :  { %v48_v1 = vshrl.u32 %v47_v0, 7  ;;  %v1178_v27 = vld [vmem:[%s1747_s1 + $0x38] sm:$0xff]  ;;  %v1223_v49 = vld [vmem:[%s1747_s1] sm:$0xff]  ;;  %v1228_v50 = vld [vmem:[%s1747_s1 + $0x8] sm:$0xff] }
   0x3   :  { %v307_v48 = vunpack.c.0.s8 %v306_v4  ;;  %v1239_v54 = vld [vmem:[%s1747_s1 + $0x10] sm:$0xff] }
   0x4   :  { %v1125_v5 = vsub.s32 0, %v48_v1  ;;  %v1127_v6 = vsub.s32 1, %v48_v1  ;;  %v1129_v7 = vsub.s32 2, %v48_v1  ;;  %v1131_v8 = vsub.s32 3, %v48_v1 }
   0x5   :  { %v1138_v10 = vsub.s32 4, %v48_v1  ;;  %v1140_v11 = vsub.s32 5, %v48_v1  ;;  %v1142_v12 = vsub.s32 6, %v48_v1  ;;  %v1144_v13 = vsub.s32 7, %v48_v1 }
   0x6   :  { %1764 = vst [vmem:[#allocation3_spill] sm:$0xff] %v1127_v6  ;;  %1765 = vst [vmem:[#allocation4_spill] sm:$0xff] %v1129_v7  ;;  %v178_v14 = vrot.slane %v1123_v2, %v1125_v5  ;;  %v182_v15 = vrot.slane %v1123_v2, %v1127_v6  ;;  %v186_v16 = vrot.slane %v1123_v2, %v1129_v7 }
   0x7   :  { %1766 = vst [vmem:[#allocation5_spill] sm:$0xff] %v1138_v10  ;;  %1767 = vst [vmem:[#allocation6_spill] sm:$0xff] %v1140_v11  ;;  %v190_v17 = vrot.slane %v1123_v2, %v1131_v8  ;;  %v194_v19 = vrot.slane %v1123_v2, %v1138_v10  ;;  %v198_v20 = vrot.slane %v1123_v2, %v1140_v11 }
   0x8   :  { %1768 = vst [vmem:[#allocation7_spill] sm:$0xff] %v1142_v12  ;;  %1769 = vst [vmem:[#allocation8_spill] sm:$0xff] %v1144_v13  ;;  %v202_v21 = vrot.slane %v1123_v2, %v1142_v12  ;;  %v206_v22 = vrot.slane %v1123_v2, %v1144_v13  ;;  %v210_v23 = vrot.slane %v1136_v9, %v1125_v5 }
   0x9   :  { %v214_v24 = vrot.slane %v1136_v9, %v1127_v6  ;;  %v218_v25 = vrot.slane %v1136_v9, %v1129_v7  ;;  %v222_v26 = vrot.slane %v1136_v9, %v1131_v8  ;;  %v226_v28 = vrot.slane %v1136_v9, %v1138_v10 }
   0xa   :  { %v230_v29 = vrot.slane %v1136_v9, %v1140_v11  ;;  %v234_v30 = vrot.slane %v1136_v9, %v1142_v12  ;;  %v238_v31 = vrot.slane %v1136_v9, %v1144_v13  ;;  %v242_v32 = vrot.slane %v1157_v18, %v1125_v5 }
   0xb   :  { %v246_v33 = vrot.slane %v1157_v18, %v1127_v6  ;;  %v250_v34 = vrot.slane %v1157_v18, %v1129_v7  ;;  %v254_v35 = vrot.slane %v1157_v18, %v1131_v8  ;;  %v258_v36 = vrot.slane %v1157_v18, %v1138_v10 }
   0xc   :  { %v262_v37 = vrot.slane %v1157_v18, %v1140_v11  ;;  %v266_v38 = vrot.slane %v1157_v18, %v1142_v12  ;;  %v270_v39 = vrot.slane %v1157_v18, %v1144_v13  ;;  %v274_v40 = vrot.slane %v1178_v27, %v1125_v5 }
   0xd   :  { %v278_v41 = vrot.slane %v1178_v27, %v1127_v6  ;;  %v282_v42 = vrot.slane %v1178_v27, %v1129_v7  ;;  %v286_v43 = vrot.slane %v1178_v27, %v1131_v8  ;;  %v290_v44 = vrot.slane %v1178_v27, %v1138_v10 }
   0xe   :  { %v294_v45 = vrot.slane %v1178_v27, %v1140_v11  ;;  %v298_v46 = vrot.slane %v1178_v27, %v1142_v12  ;;  %v302_v47 = vrot.slane %v1178_v27, %v1144_v13  ;;  %v50_v51 = vrot.slane %v1223_v49, %v1125_v5 }
   0xf   :  { %v54_v52 = vrot.slane %v1223_v49, %v1127_v6  ;;  %v1234_v53 = vsub.s32 %v307_v48, %v48_v1  ;;  %v58_v55 = vrot.slane %v1223_v49, %v1129_v7  ;;  %v62_v56 = vrot.slane %v1223_v49, %v1131_v8 }
  0x10   :  { %v66_v57 = vrot.slane %v1223_v49, %v1138_v10  ;;  %v70_v58 = vrot.slane %v1223_v49, %v1140_v11  ;;  %v74_v59 = vrot.slane %v1223_v49, %v1142_v12  ;;  %v78_v60 = vrot.slane %v1223_v49, %v1144_v13 }
  0x11   :  { %v86_v62 = vrot.slane %v1228_v50, %v1127_v6  ;;  %v90_v63 = vrot.slane %v1228_v50, %v1129_v7  ;;  %v94_v0 = vrot.slane %v1228_v50, %v1131_v8  ;;  %v98_v1 = vrot.slane %v1228_v50, %v1138_v10 }
  0x12   :  { %v102_v2 = vrot.slane %v1228_v50, %v1140_v11  ;;  %v110_v4 = vrot.slane %v1228_v50, %v1144_v13  ;;  %v439_v18 = vcombine.low %v178_v14, %v182_v15  ;;  %v440_v61 = vcombine.low %v186_v16, %v190_v17 }
  0x13   :  { %v1277_v11 = vcombine.low %v50_v51, %v54_v52  ;;  %v456_v10 = vcombine.low %v194_v19, %v198_v20  ;;  %v457_v13 = vcombine.low %v202_v21, %v206_v22  ;;  %v1280_v12 = vcombine.low %v58_v55, %v62_v56 }
  0x14   :  { %v447_v3 = vrot.slane %v439_v18, %v1234_v53  ;;  %v454_v14 = vrot.slane %v440_v61, %v1234_v53  ;;  %v473_v15 = vcombine.low %v210_v23, %v214_v24  ;;  %v474_v9 = vcombine.low %v218_v25, %v222_v26  ;;  %v1771_v61 = vld [vmem:[#allocation7_spill] sm:$0xff] }
  0x15   :  { %v464_v27 = vrot.slane %v456_v10, %v1234_v53  ;;  %v471_v48 = vrot.slane %v457_v13, %v1234_v53  ;;  %v490_v7 = vcombine.low %v226_v28, %v230_v29  ;;  %v491_v6 = vcombine.low %v234_v30, %v238_v31 }
  0x16   :  { %v455_v49 = vcombine.low %v447_v3, %v454_v14  ;;  %v481_v16 = vrot.slane %v473_v15, %v1234_v53  ;;  %v488_v17 = vrot.slane %v474_v9, %v1234_v53  ;;  %v507_v51 = vcombine.low %v242_v32, %v246_v33 }
  0x17   :  { %v472_v19 = vcombine.low %v464_v27, %v471_v48  ;;  %v498_v20 = vrot.slane %v490_v7, %v1234_v53  ;;  %v505_v21 = vrot.slane %v491_v6, %v1234_v53  ;;  %v508_v22 = vcombine.low %v250_v34, %v254_v35  ;;  %v23_v6 = vld [vmem:[%s1748_s0 + $0x40] sm:$0xff]  ;;  %v24_v7 = vld [vmem:[%s1748_s0 + $0x48] sm:$0xff] }
  0x18   :  { %v489_v23 = vcombine.low %v481_v16, %v488_v17  ;;  %v515_v24 = vrot.slane %v507_v51, %v1234_v53  ;;  %v524_v10 = vcombine.low %v258_v36, %v262_v37  ;;  %v525_v25 = vcombine.low %v266_v38, %v270_v39  ;;  %v25_v38 = vld [vmem:[%s1748_s0 + $0x50] sm:$0xff]  ;;  %v26_v39 = vld [vmem:[%s1748_s0 + $0x58] sm:$0xff]  ;;  %v1777_v17 = vld [vmem:[#allocation4_spill] sm:$0xff] }
  0x19   :  { %v506_v13 = vcombine.low %v498_v20, %v505_v21  ;;  %v522_v26 = vrot.slane %v508_v22, %v1234_v53  ;;  %v541_v28 = vcombine.low %v274_v40, %v278_v41  ;;  %v542_v29 = vcombine.low %v282_v42, %v286_v43  ;;  %v27_v40 = vld [vmem:[%s1748_s0 + $0x60] sm:$0xff]  ;;  %v1358_v22 = vld [vmem:[%s1747_s1 + $0x18] sm:$0xff] }
  0x1a   :  { %v532_v30 = vrot.slane %v524_v10, %v1234_v53  ;;  %v539_v31 = vrot.slane %v525_v25, %v1234_v53  ;;  %v558_v32 = vcombine.low %v290_v44, %v294_v45  ;;  %v559_v33 = vcombine.low %v298_v46, %v302_v47  ;;  %v28_v45 = vld [vmem:[%s1748_s0 + $0x68] sm:$0xff]  ;;  %v29_v46 = vld [vmem:[%s1748_s0 + $0x70] sm:$0xff]  ;;  %v30_v47 = vld [vmem:[%s1748_s0 + $0x78] sm:$0xff] }
  0x1b   :  { %v320_v34 = vcombine.low %v66_v57, %v70_v58  ;;  %v523_v35 = vcombine.low %v515_v24, %v522_v26  ;;  %v549_v36 = vrot.slane %v541_v28, %v1234_v53  ;;  %v556_v37 = vrot.slane %v542_v29, %v1234_v53  ;;  %v15_v25 = vld [vmem:[%s1748_s0] sm:$0xff]  ;;  %v1780_v28 = vld [vmem:[#allocation6_spill] sm:$0xff] }
  0x1c   :  { %v321_v41 = vcombine.low %v74_v59, %v78_v60  ;;  %v540_v42 = vcombine.low %v532_v30, %v539_v31  ;;  %v566_v43 = vrot.slane %v558_v32, %v1234_v53  ;;  %v573_v44 = vrot.slane %v559_v33, %v1234_v53  ;;  %v16_v31 = vld [vmem:[%s1748_s0 + $0x8] sm:$0xff] }
  0x1d   :  { %v1770_v52 = vrot.slane %v1228_v50, %v1125_v5  ;;  %v338_v56 = vcombine.low %v90_v63, %v94_v0  ;;  %v354_v57 = vcombine.low %v98_v1, %v102_v2  ;;  %v557_v58 = vcombine.low %v549_v36, %v556_v37  ;;  %v1781_v33 = vld [vmem:[#allocation8_spill] sm:$0xff]  ;;  %v17_v37 = vld [vmem:[%s1748_s0 + $0x10] sm:$0xff] }
  0x1e   :  { %v311_v59 = vrot.slane %v1277_v11, %v1234_v53  ;;  %v318_v60 = vrot.slane %v1280_v12, %v1234_v53  ;;  %v1772_v3 = vrot.slane %v1228_v50, %v1771_v61  ;;  %v574_v18 = vcombine.low %v566_v43, %v573_v44  ;;  %v1773_v50 = vld [vmem:[#allocation3_spill] sm:$0xff] }
  0x1f   :  { %v337_v55 = vcombine.low %v1770_v52, %v86_v62  ;;  %v599_v27 = vmul.f32 %v455_v49, %v23_v6  ;;  %v600_v48 = vmul.f32 %v472_v19, %v24_v7  ;;  %v601_v14 = vmul.f32 %v489_v23, %v25_v38 }
  0x20   :  { %v355_v9 = vcombine.low %v1772_v3, %v110_v4  ;;  %v602_v15 = vmul.f32 %v506_v13, %v26_v39  ;;  %v1331_v16 = vmul.f32 %v523_v35, %v27_v40  ;;  %v1333_v62 = vmul.f32 %v540_v42, %v28_v45  ;;  %v1779_v13 = vld [vmem:[#allocation5_spill] sm:$0xff] }
  0x21   :  { %v1335_v63 = vmul.f32 %v557_v58, %v29_v46  ;;  %v1337_v0 = vmul.f32 %v574_v18, %v30_v47  ;;  %v328_v11 = vrot.slane %v320_v34, %v1234_v53  ;;  %v335_v12 = vrot.slane %v321_v41, %v1234_v53  ;;  %v18_v41 = vld [vmem:[%s1748_s0 + $0x18] sm:$0xff] }
  0x22   :  { %v1774_v1 = vrot.slane %v1239_v54, %v1773_v50  ;;  %v1775_v2 = vrot.slane %v1239_v54, %v1125_v5  ;;  %v1776_v49 = vrot.slane %v1239_v54, %v1131_v8  ;;  %v1778_v51 = vrot.slane %v1239_v54, %v1777_v17 }
  0x23   :  { %v345_v20 = vrot.slane %v337_v55, %v1234_v53  ;;  %v352_v21 = vrot.slane %v338_v56, %v1234_v53  ;;  %v319_v23 = vcombine.low %v311_v59, %v318_v60  ;;  %v362_v24 = vrot.slane %v354_v57, %v1234_v53 }
  0x24   :  { %v371_v4 = vcombine.low %v1775_v2, %v1774_v1  ;;  %v372_v19 = vcombine.low %v1778_v51, %v1776_v49  ;;  %v369_v10 = vrot.slane %v355_v9, %v1234_v53  ;;  %v130_v26 = vrot.slane %v1239_v54, %v1779_v13 }
  0x25   :  { %v134_v29 = vrot.slane %v1239_v54, %v1780_v28  ;;  %v336_v30 = vcombine.low %v328_v11, %v335_v12  ;;  %v138_v32 = vrot.slane %v1239_v54, %v1771_v61  ;;  %v142_v6 = vrot.slane %v1239_v54, %v1781_v33 }
  0x26   :  { %v379_v7 = vrot.slane %v371_v4, %v1234_v53  ;;  %v386_v34 = vrot.slane %v372_v19, %v1234_v53  ;;  %v353_v36 = vcombine.low %v345_v20, %v352_v21  ;;  %v370_v40 = vcombine.low %v362_v24, %v369_v10 }
  0x27   :  { %v591_v54 = vmul.f32 %v319_v23, %v15_v25  ;;  %v1392_v43 = vcombine.low %v130_v26, %v134_v29  ;;  %v592_v44 = vmul.f32 %v336_v30, %v16_v31  ;;  %v759_v45 = vcombine.high %v599_v27, %v599_v27  ;;  %v19_v29 = vld [vmem:[%s1748_s0 + $0x20] sm:$0xff] }
  0x28   :  { %v387_v46 = vcombine.low %v379_v7, %v386_v34  ;;  %v1394_v47 = vcombine.low %v138_v32, %v142_v6  ;;  %v1397_v55 = vrot.slane %v599_v27, %v1234_v53  ;;  %v593_v56 = vmul.f32 %v353_v36, %v17_v37 }
  0x29   :  { %v623_v52 = vcombine.high %v591_v54, %v591_v54  ;;  %v1400_v57 = vrot.slane %v759_v45, %v1234_v53  ;;  %v776_v58 = vcombine.high %v600_v48, %v600_v48  ;;  %v1403_v59 = vrot.slane %v600_v48, %v1234_v53 }
  0x2a   :  { %1782 = vst [vmem:[#allocation7_spill] sm:$0xff] %v1397_v55  ;;  %v594_v60 = vmul.f32 %v370_v40, %v18_v41  ;;  %v630_v3 = vrot.slane %v591_v54, %v1234_v53  ;;  %v793_v9 = vcombine.high %v601_v14, %v601_v14  ;;  %v1407_v18 = vrot.slane %v601_v14, %v1234_v53 }
  0x2b   :  { %v640_v11 = vcombine.high %v592_v44, %v592_v44  ;;  %v647_v12 = vrot.slane %v592_v44, %v1234_v53  ;;  %v1411_v27 = vrot.slane %v776_v58, %v1234_v53  ;;  %v810_v1 = vcombine.high %v602_v15, %v602_v15 }
  0x2c   :  { %v637_v2 = vrot.slane %v623_v52, %v1234_v53  ;;  %v1415_v4 = vrot.slane %v793_v9, %v1234_v53  ;;  %v1418_v48 = vrot.slane %v602_v15, %v1234_v53  ;;  %v827_v49 = vcombine.high %v1331_v16, %v1331_v16 }
  0x2d   :  { %v657_v14 = vcombine.high %v593_v56, %v593_v56  ;;  %v1423_v51 = vrot.slane %v810_v1, %v1234_v53  ;;  %v1427_v19 = vrot.slane %v1331_v16, %v1234_v53  ;;  %v844_v20 = vcombine.high %v1333_v62, %v1333_v62 }
  0x2e   :  { %v638_v21 = vcombine.high %v630_v3, %v630_v3  ;;  %v664_v23 = vrot.slane %v593_v56, %v1234_v53  ;;  %v1433_v15 = vrot.slane %v827_v49, %v1234_v53  ;;  %v1437_v24 = vrot.slane %v1333_v62, %v1234_v53 }
  0x2f   :  { %v674_v10 = vcombine.high %v594_v60, %v594_v60  ;;  %v1440_v25 = vrot.slane %v594_v60, %v1234_v53  ;;  %v1443_v16 = vrot.slane %v844_v20, %v1234_v53  ;;  %v861_v26 = vcombine.high %v1335_v63, %v1335_v63 }
  0x30   :  { %v639_v30 = vcombine.high %v637_v2, %v637_v2  ;;  %v654_v31 = vrot.slane %v640_v11, %v1234_v53  ;;  %v1453_v62 = vrot.slane %v1335_v63, %v1234_v53  ;;  %v878_v32 = vcombine.high %v1337_v0, %v1337_v0 }
  0x31   :  { %v671_v6 = vrot.slane %v657_v14, %v1234_v53  ;;  %v1459_v7 = vrot.slane %v861_v26, %v1234_v53  ;;  %v1463_v34 = vrot.slane %v1337_v0, %v1234_v53  ;;  %v960_v36 = vsel %vm959_vm0, %v630_v3, 0.0 }
  0x32   :  { %v1469_v63 = vrot.slane %v878_v32, %v1234_v53  ;;  %v961_v40 = vsel %vm959_vm0, %v638_v21, 0.0  ;;  %v963_v54 = vsel %vm959_vm0, %v637_v2, 0.0  ;;  %v1475_v44 = vmul.f32 %v387_v46, %v19_v29 }
  0x33   :  { %v655_v45 = vcombine.high %v647_v12, %v647_v12  ;;  %v962_v0 = vadd.f32 %v961_v40, %v960_v36  ;;  %v672_v52 = vcombine.high %v664_v23, %v664_v23  ;;  %v1478_v56 = vrot.slane %v674_v10, %v1234_v53 }
  0x34   :  { %v965_v60 = vsel %vm959_vm0, %v639_v30, 0.0  ;;  %v656_v3 = vcombine.high %v654_v31, %v654_v31  ;;  %v673_v9 = vcombine.high %v671_v6, %v671_v6  ;;  %v774_v11 = vcombine.high %v1397_v55, %v1397_v55 }
  0x35   :  { %v964_v1 = vadd.f32 %v963_v54, %v962_v0  ;;  %v775_v46 = vcombine.high %v1400_v57, %v1400_v57  ;;  %v791_v2 = vcombine.high %v1403_v59, %v1403_v59  ;;  %v808_v49 = vcombine.high %v1407_v18, %v1407_v18 }
  0x36   :  { %v967_v14 = vsel %vm959_vm0, %v647_v12, 0.0  ;;  %v792_v20 = vcombine.high %v1411_v27, %v1411_v27  ;;  %v809_v21 = vcombine.high %v1415_v4, %v1415_v4  ;;  %v825_v10 = vcombine.high %v1418_v48, %v1418_v48 }
  0x37   :  { %v966_v26 = vadd.f32 %v965_v60, %v964_v1  ;;  %v826_v29 = vcombine.high %v1423_v51, %v1423_v51  ;;  %v842_v30 = vcombine.high %v1427_v19, %v1427_v19  ;;  %v843_v32 = vcombine.high %v1433_v15, %v1433_v15 }
  0x38   :  { %v969_v12 = vsel %vm959_vm0, %v655_v45, 0.0  ;;  %v859_v36 = vcombine.high %v1437_v24, %v1437_v24  ;;  %v860_v40 = vcombine.high %v1443_v16, %v1443_v16  ;;  %v876_v54 = vcombine.high %v1453_v62, %v1453_v62 }
  0x39   :  { %v968_v0 = vadd.f32 %v967_v14, %v966_v26  ;;  %v877_v60 = vcombine.high %v1459_v7, %v1459_v7  ;;  %v893_v1 = vcombine.high %v1463_v34, %v1463_v34  ;;  %v894_v58 = vcombine.high %v1469_v63, %v1469_v63 }
  0x3a   :  { %v971_v45 = vsel %vm959_vm0, %v654_v31, 0.0  ;;  %v973_v42 = vsel %vm959_vm0, %v656_v3, 0.0  ;;  %v975_v35 = vsel %vm959_vm0, %v664_v23, 0.0  ;;  %v977_v38 = vsel %vm959_vm0, %v672_v52, 0.0 }
  0x3b   :  { %v970_v39 = vadd.f32 %v969_v12, %v968_v0  ;;  %v979_v14 = vsel %vm959_vm0, %v671_v6, 0.0  ;;  %v981_v26 = vsel %vm959_vm0, %v673_v9, 0.0  ;;  %v1524_v37 = vsel %vm959_vm0, %v774_v11, 0.0 }
  0x3c   :  { %v1528_v41 = vsel %vm959_vm0, %v1400_v57, 0.0  ;;  %v1531_v31 = vsel %vm959_vm0, %v775_v46, 0.0  ;;  %v1535_v23 = vsel %vm959_vm0, %v1403_v59, 0.0  ;;  %v1538_v52 = vsel %vm959_vm0, %v791_v2, 0.0 }
  0x3d   :  { %v972_v55 = vadd.f32 %v971_v45, %v970_v39  ;;  %v1542_v6 = vsel %vm959_vm0, %v1411_v27, 0.0  ;;  %v1545_v3 = vsel %vm959_vm0, %v792_v20, 0.0  ;;  %v1549_v39 = vsel %vm959_vm0, %v1407_v18, 0.0 }
  0x3e   :  { %v1552_v57 = vsel %vm959_vm0, %v808_v49, 0.0  ;;  %v1556_v59 = vsel %vm959_vm0, %v1415_v4, 0.0  ;;  %v1559_v11 = vsel %vm959_vm0, %v809_v21, 0.0  ;;  %v1563_v27 = vsel %vm959_vm0, %v1418_v48, 0.0 }
  0x3f   :  { %v974_v9 = vadd.f32 %v973_v42, %v972_v55  ;;  %v1566_v46 = vsel %vm959_vm0, %v825_v10, 0.0  ;;  %v1570_v18 = vsel %vm959_vm0, %v1423_v51, 0.0  ;;  %v1573_v42 = vsel %vm959_vm0, %v826_v29, 0.0 }
  0x40   :  { %v1577_v55 = vsel %vm959_vm0, %v1427_v19, 0.0  ;;  %v1580_v2 = vsel %vm959_vm0, %v842_v30, 0.0  ;;  %v1584_v48 = vsel %vm959_vm0, %v1433_v15, 0.0  ;;  %v1587_v49 = vsel %vm959_vm0, %v843_v32, 0.0 }
  0x41   :  { %v976_v4 = vadd.f32 %v975_v35, %v974_v9  ;;  %v1591_v51 = vsel %vm959_vm0, %v1437_v24, 0.0  ;;  %v1594_v20 = vsel %vm959_vm0, %v859_v36, 0.0  ;;  %v1598_v35 = vsel %vm959_vm0, %v1443_v16, 0.0 }
  0x42   :  { %v1601_v19 = vsel %vm959_vm0, %v860_v40, 0.0  ;;  %v1605_v15 = vsel %vm959_vm0, %v1453_v62, 0.0  ;;  %v1608_v10 = vsel %vm959_vm0, %v876_v54, 0.0  ;;  %v1612_v24 = vsel %vm959_vm0, %v1459_v7, 0.0 }
  0x43   :  { %v978_v21 = vadd.f32 %v977_v38, %v976_v4  ;;  %v1615_v29 = vsel %vm959_vm0, %v877_v60, 0.0  ;;  %v1619_v16 = vsel %vm959_vm0, %v1463_v34, 0.0  ;;  %v1622_v38 = vsel %vm959_vm0, %v893_v1, 0.0 }
  0x44   :  { %v1626_v62 = vsel %vm959_vm0, %v1469_v63, 0.0  ;;  %v1629_v32 = vsel %vm959_vm0, %v894_v58, 0.0  ;;  %v983_v7 = vsel %vm959_vm0, %v1440_v25, 0.0  ;;  %v1783_v12 = vrot.slane %v1394_v47, %v1234_v53 }
  0x45   :  { %v980_v30 = vadd.f32 %v979_v14, %v978_v21  ;;  %v1784_v34 = vrot.slane %v1392_v43, %v1234_v53  ;;  %v1785_v40 = vrot.slane %v1358_v22, %v1773_v50  ;;  %v1786_v63 = vrot.slane %v1358_v22, %v1125_v5 }
  0x46   :  { %v1787_v58 = vrot.slane %v1358_v22, %v1131_v8  ;;  %v1788_v0 = vrot.slane %v1358_v22, %v1777_v17  ;;  %v690_v47 = vcombine.high %v1478_v56, %v1478_v56  ;;  %v691_v43 = vcombine.high %v1475_v44, %v1475_v44  ;;  %v20_v8 = vld [vmem:[%s1748_s0 + $0x28] sm:$0xff] }
  0x47   :  { %v404_v36 = vcombine.low %v1784_v34, %v1783_v12  ;;  %v405_v54 = vcombine.low %v1786_v63, %v1785_v40  ;;  %v982_v1 = vadd.f32 %v981_v26, %v980_v30  ;;  %v698_v50 = vrot.slane %v1475_v44, %v1234_v53 }
  0x48   :  { %v406_v60 = vcombine.low %v1788_v0, %v1787_v58  ;;  %v1789_v5 = vcombine.high %v1440_v25, %v1440_v25  ;;  %v162_v14 = vrot.slane %v1358_v22, %v1779_v13  ;;  %v166_v26 = vrot.slane %v1358_v22, %v1780_v28 }
  0x49   :  { %v984_v17 = vadd.f32 %v983_v7, %v982_v1  ;;  %v170_v9 = vrot.slane %v1358_v22, %v1771_v61  ;;  %v987_v44 = vsel %vm959_vm0, %v1478_v56, 0.0  ;;  %v174_v25 = vrot.slane %v1358_v22, %v1781_v33 }
  0x4a   :  { %v985_v45 = vsel %vm959_vm0, %v1789_v5, 0.0  ;;  %v413_v4 = vrot.slane %v405_v54, %v1234_v53  ;;  %v420_v21 = vrot.slane %v406_v60, %v1234_v53  ;;  %v596_v7 = vmul.f32 %v404_v36, %v20_v8  ;;  %v21_v36 = vld [vmem:[%s1748_s0 + $0x30] sm:$0xff] }
  0x4b   :  { %v986_v30 = vadd.f32 %v985_v45, %v984_v17  ;;  %v705_v13 = vrot.slane %v691_v43, %v1234_v53  ;;  %v706_v12 = vcombine.high %v698_v50, %v698_v50  ;;  %v989_v28 = vsel %vm959_vm0, %v690_v47, 0.0 }
  0x4c   :  { %v991_v61 = vsel %vm959_vm0, %v698_v50, 0.0  ;;  %v421_v40 = vcombine.low %v413_v4, %v420_v21  ;;  %v422_v63 = vcombine.low %v162_v14, %v166_v26  ;;  %v423_v56 = vcombine.low %v170_v9, %v174_v25 }
  0x4d   :  { %v988_v34 = vadd.f32 %v987_v44, %v986_v30  ;;  %v707_v0 = vcombine.high %v705_v13, %v705_v13  ;;  %v708_v22 = vcombine.high %v596_v7, %v596_v7  ;;  %v715_v33 = vrot.slane %v596_v7, %v1234_v53  ;;  %v22_v7 = vld [vmem:[%s1748_s0 + $0x38] sm:$0xff] }
  0x4e   :  { %v993_v54 = vsel %vm959_vm0, %v706_v12, 0.0  ;;  %v995_v1 = vsel %vm959_vm0, %v705_v13, 0.0  ;;  %v430_v47 = vrot.slane %v422_v63, %v1234_v53  ;;  %v437_v43 = vrot.slane %v423_v56, %v1234_v53 }
  0x4f   :  { %v990_v58 = vadd.f32 %v989_v28, %v988_v34  ;;  %v597_v5 = vmul.f32 %v421_v40, %v21_v36  ;;  %v722_v45 = vrot.slane %v708_v22, %v1234_v53  ;;  %v723_v8 = vcombine.high %v715_v33, %v715_v33 }
  0x50   :  { %v997_v17 = vsel %vm959_vm0, %v707_v0, 0.0  ;;  %v999_v26 = vsel %vm959_vm0, %v715_v33, 0.0  ;;  %v438_v9 = vcombine.low %v430_v47, %v437_v43 }
  0x51   :  { %v992_v60 = vadd.f32 %v991_v61, %v990_v58  ;;  %v724_v25 = vcombine.high %v722_v45, %v722_v45  ;;  %v725_v4 = vcombine.high %v597_v5, %v597_v5  ;;  %v732_v21 = vrot.slane %v597_v5, %v1234_v53 }
  0x52   :  { %v1001_v30 = vsel %vm959_vm0, %v723_v8, 0.0  ;;  %v1003_v12 = vsel %vm959_vm0, %v722_v45, 0.0  ;;  %v598_v34 = vmul.f32 %v438_v9, %v22_v7 }
  0x53   :  { %v994_v50 = vadd.f32 %v993_v54, %v992_v60  ;;  %v739_v61 = vrot.slane %v725_v4, %v1234_v53  ;;  %v740_v40 = vcombine.high %v732_v21, %v732_v21  ;;  %v1005_v63 = vsel %vm959_vm0, %v724_v25, 0.0 }
  0x54   :  { %v1007_v58 = vsel %vm959_vm0, %v732_v21, 0.0  ;;  %v742_v33 = vcombine.high %v598_v34, %v598_v34  ;;  %v749_v54 = vrot.slane %v598_v34, %v1234_v53 }
  0x55   :  { %v996_v14 = vadd.f32 %v995_v1, %v994_v50  ;;  %v741_v22 = vcombine.high %v739_v61, %v739_v61  ;;  %v1009_v36 = vsel %vm959_vm0, %v740_v40, 0.0  ;;  %v1011_v1 = vsel %vm959_vm0, %v739_v61, 0.0 }
  0x56   :  { %v756_v43 = vrot.slane %v742_v33, %v1234_v53  ;;  %v757_v50 = vcombine.high %v749_v54, %v749_v54  ;;  %v1015_v8 = vsel %vm959_vm0, %v749_v54, 0.0 }
  0x57   :  { %v998_v44 = vadd.f32 %v997_v17, %v996_v14  ;;  %v1013_v5 = vsel %vm959_vm0, %v741_v22, 0.0 }
  0x58   :  { %v758_v14 = vcombine.high %v756_v43, %v756_v43 }
  0x59   :  { %v1000_v13 = vadd.f32 %v999_v26, %v998_v44  ;;  %v1017_v26 = vsel %vm959_vm0, %v757_v50, 0.0  ;;  %v1019_v44 = vsel %vm959_vm0, %v756_v43, 0.0 }
  0x5a   :  { %v1021_v4 = vsel %vm959_vm0, %v758_v14, 0.0 }
  0x5b   :  { %v1002_v28 = vadd.f32 %v1001_v30, %v1000_v13  ;;  %v1790_v30 = vld [vmem:[#allocation7_spill] sm:$0xff] }
  0x5c   :  { %v1023_v53 = vsel %vm959_vm0, %v1790_v30, 0.0 }
  0x5d   :  { %v1004_v56 = vadd.f32 %v1003_v12, %v1002_v28 }
  0x5f   :  { %v1006_v0 = vadd.f32 %v1005_v63, %v1004_v56 }
  0x61   :  { %v1008_v60 = vadd.f32 %v1007_v58, %v1006_v0 }
  0x63   :  { %v1010_v47 = vadd.f32 %v1009_v36, %v1008_v60 }
  0x65   :  { %v1012_v45 = vadd.f32 %v1011_v1, %v1010_v47 }
  0x67   :  { %v1014_v17 = vadd.f32 %v1013_v5, %v1012_v45 }
  0x69   :  { %v1016_v9 = vadd.f32 %v1015_v8, %v1014_v17 }
  0x6b   :  { %v1018_v25 = vadd.f32 %v1017_v26, %v1016_v9 }
  0x6d   :  { %v1020_v21 = vadd.f32 %v1019_v44, %v1018_v25 }
  0x6f   :  { %v1022_v7 = vadd.f32 %v1021_v4, %v1020_v21 }
  0x71   :  { %v1024_v13 = vadd.f32 %v1023_v53, %v1022_v7 }
  0x73   :  { %v1026_v12 = vadd.f32 %v1524_v37, %v1024_v13 }
  0x75   :  { %v1028_v28 = vadd.f32 %v1528_v41, %v1026_v12 }
  0x77   :  { %v1030_v34 = vadd.f32 %v1531_v31, %v1028_v28 }
  0x79   :  { %v1032_v61 = vadd.f32 %v1535_v23, %v1030_v34 }
  0x7b   :  { %v1034_v40 = vadd.f32 %v1538_v52, %v1032_v61 }
  0x7d   :  { %v1036_v63 = vadd.f32 %v1542_v6, %v1034_v40 }
  0x7f   :  { %v1038_v56 = vadd.f32 %v1545_v3, %v1036_v63 }
  0x81   :  { %v1040_v58 = vadd.f32 %v1549_v39, %v1038_v56 }
  0x83   :  { %v1042_v0 = vadd.f32 %v1552_v57, %v1040_v58 }
  0x85   :  { %v1044_v22 = vadd.f32 %v1556_v59, %v1042_v0 }
  0x87   :  { %v1046_v37 = vadd.f32 %v1559_v11, %v1044_v22 }
  0x89   :  { %v1048_v41 = vadd.f32 %v1563_v27, %v1046_v37 }
  0x8b   :  { %v1050_v31 = vadd.f32 %v1566_v46, %v1048_v41 }
  0x8d   :  { %v1052_v23 = vadd.f32 %v1570_v18, %v1050_v31 }
  0x8f   :  { %v1054_v52 = vadd.f32 %v1573_v42, %v1052_v23 }
  0x91   :  { %v1056_v6 = vadd.f32 %v1577_v55, %v1054_v52 }
  0x93   :  { %v1058_v3 = vadd.f32 %v1580_v2, %v1056_v6 }
  0x95   :  { %v1060_v39 = vadd.f32 %v1584_v48, %v1058_v3 }
  0x97   :  { %v1062_v57 = vadd.f32 %v1587_v49, %v1060_v39 }
  0x99   :  { %v1064_v59 = vadd.f32 %v1591_v51, %v1062_v57 }
  0x9b   :  { %v1066_v11 = vadd.f32 %v1594_v20, %v1064_v59 }
  0x9d   :  { %v1068_v27 = vadd.f32 %v1598_v35, %v1066_v11  ;;  %v1090_v35 = vstv %s1749_s2 }
  0x9f   :  { %v1070_v46 = vadd.f32 %v1601_v19, %v1068_v27 }
  0xa1   :  { %v1072_v18 = vadd.f32 %v1605_v15, %v1070_v46 }
  0xa3   :  { %v1074_v42 = vadd.f32 %v1608_v10, %v1072_v18 }
  0xa5   :  { %v1076_v55 = vadd.f32 %v1612_v24, %v1074_v42 }
  0xa7   :  { %v1078_v2 = vadd.f32 %v1615_v29, %v1076_v55 }
  0xa9   :  { %v1080_v48 = vadd.f32 %v1619_v16, %v1078_v2 }
  0xab   :  { %v1082_v49 = vadd.f32 %v1622_v38, %v1080_v48 }
  0xad   :  { %v1084_v51 = vadd.f32 %v1626_v62, %v1082_v49 }
  0xaf   :  { %v1086_v20 = vadd.f32 %v1629_v32, %v1084_v51 }
  0xb1   :  { %1087 = vadd.xlane.f32.xlu0 %v1086_v20 }
 0x13a   :  { %v1088_v19 = vpop.xlane.xlu0 %1087 }
 0x13b   :  { %v1091_v15 = vadd.f32 %v1090_v35, %v1088_v19 }
 0x13d   :  { %1093 = vst.msk [vmem:[%s1750_s3] sm:$0x3] %vm1092_vm1, %v1091_v15 }

// kernel: loss_forward.32
= control target key start
LH: loop header
LB: loop body
LE: loop exit
PB: predicated region body
PF: predicated region fallthrough
CT: control target
= control target key end

     0   :  { %s1907_s12 = smov 0   ;;  %s2603_s0 = inlined_call_operand.vmem [shape: bf16[2,16,1158], index: 0, kind: input, shape index: {}]   ;;  %s2604_s1 = inlined_call_operand.vmem [shape: bf16[16,144], index: 1, kind: input, shape index: {}]   ;;  %s2605_s2 = inlined_call_operand.vmem [shape: f32[16,1], index: 2, kind: input, shape index: {}]   ;;  %s2606_s3 = inlined_call_operand.vmem [shape: f32[2,16,1088], index: 3, kind: output, shape index: {}]  }
   0x1 LB: > { %s1732_s13 = sadd.s32 4294967295, %s1876_s12   ;;  %p1736_p0 = scmp.ge.s32.totalorder %s1876_s12, 1  ;;  %s1876_s12 = sphi %s1907_s12, %s13_s12  }
   0x2   : > { %p137_p1 = scmp.lt.s32.totalorder %s1876_s12, 3 }
   0x4   : > { %p138_p2 = pnand %p1736_p0, %p137_p1 }
   0x5   : > { %p161_p3 = scmp.lt.s32.totalorder (!%p138_p2), %s1732_s13, 1  ;;  %s1878_s18 = smov (!%p138_p2), 59  }
   0x6   : > { %141 = sbr.rel (%p138_p2) target bundleno = 507 (0x1fb), region = 32  ;;  %s1879_s19 = smov (!%p138_p2), 60  }
   0x7   : > { %s1880_s20 = smov (!%p138_p2), 92   ;;  %s1881_s21 = smov (!%p138_p2), 93  }
   0x8   : > { %s1882_s22 = smov (!%p138_p2), 94   ;;  %s1883_s23 = smov (!%p138_p2), 126  }
   0x9   : > { %s1884_s24 = smov (!%p138_p2), 127   ;;  %s1885_s25 = smov (!%p138_p2), 58  }
   0xb   : > { %s2608_s13 = smov (!%p161_p3, %s1732_s13), 1  ;;  %v1983_v6 = vld [vmem:[%s2604_s1 + $0x4] ss:$8 sps:$4 sm:$0xff]   ;;  %vm1423_vm0 = vcmask 130048   ;;  %vm243_vm1 = vcmask 1043456   ;;  %vm769_vm2 = vcmask 482304  }
   0xc   : > { %s1829_s14 = smul.u32 80, %s2608_s13  ;;  %1822 = vmatprep.mubr.msk.bf16.mxu0 %vm1423_vm0, %v1983_v6  ;;  %1823 = vmatprep.mubr.msk.bf16.mxu1 %vm1423_vm0, %v1983_v6  ;;  %vm680_vm3 = vcmask 490496   ;;  %v1886_v45 = vmov 0   ;;  %vm593_vm4 = vcmask 752640   ;;  %vm506_vm5 = vcmask 760832  }
   0xd   : > { %1849 = vset.pattern.permute.xlu1 %v1886_v45  ;;  %1848 = vset.pattern.permute.xlu0 %v1886_v45  ;;  %vm419_vm6 = vcmask 769024   ;;  %vm186_vm7 = vcmask 519168   ;;  %vm332_vm8 = vcmask 1031168   ;;  %vm245_vm9 = vcmask 1039360   ;;  %s1830_s9 = smul.u32 144, %s2608_s13 }
   0xe   : > { %s1921_s17 = scalar_lea.vmem %s2603_s0, %s1829_s14  ;;  %vm858_vm10 = vcmask 474112   ;;  %vm1666_vm11 = vcmask 523264  }
   0xf   : > { %v1924_v0 = vld [vmem:[%s1921_s17 + $0x28] sm:$0xff]  ;;  %v1927_v1 = vld [vmem:[%s1921_s17] sm:$0xff]  ;;  %v724_v2 = vld [vmem:[%s1921_s17 + $0x30] sm:$0xff]  ;;  %s2569_s14 = scalar_lea.vmem %s2606_s3, %s1830_s9 }
  0x10   : > { %748 = vrot.lane.b32.xlu1 %v1924_v0, %s1878_s18  ;;  %738 = vrot.lane.b32.xlu0 %v1927_v1, %s1878_s18  ;;  %v719_v3 = vld [vmem:[%s1921_s17 + $0x8] sm:$0xff]  ;;  %v1742_v4 = vcombine.high %v1927_v1, %v1924_v0  ;;  %v1741_v5 = vcombine.low %v1927_v1, %v1924_v0  ;;  %v725_v7 = vld [vmem:[%s1921_s17 + $0x38] sm:$0xff] }
  0x11   : > { %v720_v8 = vld [vmem:[%s1921_s17 + $0x10] sm:$0xff]  ;;  %v726_v9 = vld [vmem:[%s1921_s17 + $0x40] sm:$0xff]  ;;  %v721_v10 = vld [vmem:[%s1921_s17 + $0x18] sm:$0xff] }
  0x12   : > { %v2019_v11 = vld [vmem:[%s1921_s17 + $0x8] sm:$0xff]  ;;  %v2022_v12 = vld [vmem:[%s1921_s17 + $0x30] sm:$0xff]  ;;  %v2034_v16 = vld [vmem:[%s1921_s17 + $0x38] sm:$0xff] }
  0x13   : > { %v1744_v13 = vcombine.high %v2019_v11, %v2022_v12  ;;  %v1743_v14 = vcombine.low %v2019_v11, %v2022_v12  ;;  %v2031_v15 = vld [vmem:[%s1921_s17 + $0x10] sm:$0xff]  ;;  %v2069_v38 = vld [vmem:[%s1921_s17 + $0x48] sm:$0xff]  ;;  %v2072_v39 = vld [vmem:[%s1921_s17 + $0x20] sm:$0xff] }
  0x14   : > { %750 = vrot.lane.b32.xlu1 %v724_v2, %s1878_s18  ;;  %740 = vrot.lane.b32.xlu0 %v719_v3, %s1878_s18  ;;  %v1746_v17 = vcombine.high %v2031_v15, %v2034_v16  ;;  %v1745_v18 = vcombine.low %v2031_v15, %v2034_v16  ;;  %v551_v55 = vld [vmem:[%s1921_s17 + $0x48] sm:$0xf]  ;;  %v546_v56 = vld [vmem:[%s1921_s17 + $0x20] sm:$0xf] }
  0x15   : > { %v464_v63 = vld [vmem:[%s1921_s17 + $0x48] sm:$0xf] }
  0x18   : > { %651 = vrot.lane.b32.xlu1 %v719_v3, %s1879_s19  ;;  %649 = vrot.lane.b32.xlu0 %v1927_v1, %s1879_s19 }
  0x1c   : > { %661 = vrot.lane.b32.xlu1 %v724_v2, %s1879_s19  ;;  %659 = vrot.lane.b32.xlu0 %v1924_v0, %s1879_s19 }
  0x20   : > { %564 = vrot.lane.b32.xlu1 %v719_v3, %s1880_s20  ;;  %562 = vrot.lane.b32.xlu0 %v1927_v1, %s1880_s20 }
  0x24   : > { %574 = vrot.lane.b32.xlu1 %v724_v2, %s1880_s20  ;;  %572 = vrot.lane.b32.xlu0 %v1924_v0, %s1880_s20 }
  0x28   : > { %477 = vrot.lane.b32.xlu1 %v719_v3, %s1881_s21  ;;  %475 = vrot.lane.b32.xlu0 %v1927_v1, %s1881_s21 }
  0x2c   : > { %487 = vrot.lane.b32.xlu1 %v724_v2, %s1881_s21  ;;  %485 = vrot.lane.b32.xlu0 %v1924_v0, %s1881_s21 }
  0x30   : > { %390 = vrot.lane.b32.xlu1 %v719_v3, %s1882_s22  ;;  %388 = vrot.lane.b32.xlu0 %v1927_v1, %s1882_s22 }
  0x34   : > { %400 = vrot.lane.b32.xlu1 %v724_v2, %s1882_s22  ;;  %398 = vrot.lane.b32.xlu0 %v1924_v0, %s1882_s22 }
  0x38   : > { %303 = vrot.lane.b32.xlu1 %v719_v3, %s1883_s23  ;;  %301 = vrot.lane.b32.xlu0 %v1927_v1, %s1883_s23 }
  0x3c   : > { %313 = vrot.lane.b32.xlu1 %v724_v2, %s1883_s23  ;;  %311 = vrot.lane.b32.xlu0 %v1924_v0, %s1883_s23 }
  0x40   : > { %215 = vrot.lane.b32.xlu1 %v719_v3, %s1884_s24  ;;  %213 = vrot.lane.b32.xlu0 %v1927_v1, %s1884_s24 }
  0x44   : > { %225 = vrot.lane.b32.xlu1 %v724_v2, %s1884_s24  ;;  %223 = vrot.lane.b32.xlu0 %v1924_v0, %s1884_s24 }
  0x48   : > { %829 = vrot.lane.b32.xlu1 %v719_v3, %s1885_s25  ;;  %827 = vrot.lane.b32.xlu0 %v1927_v1, %s1885_s25 }
  0x4c   : > { %839 = vrot.lane.b32.xlu1 %v724_v2, %s1885_s25  ;;  %837 = vrot.lane.b32.xlu0 %v1924_v0, %s1885_s25  ;;  %v459_v2 = vld [vmem:[%s1921_s17 + $0x20] sm:$0xf] }
  0x50   : > { %752 = vrot.lane.b32.xlu1 %v725_v7, %s1878_s18  ;;  %742 = vrot.lane.b32.xlu0 %v720_v8, %s1878_s18 }
  0x54   : > { %754 = vrot.lane.b32.xlu1 %v726_v9, %s1878_s18  ;;  %744 = vrot.lane.b32.xlu0 %v721_v10, %s1878_s18 }
  0x58   : > { %663 = vrot.lane.b32.xlu1 %v725_v7, %s1879_s19  ;;  %653 = vrot.lane.b32.xlu0 %v720_v8, %s1879_s19 }
  0x5c   : > { %665 = vrot.lane.b32.xlu1 %v726_v9, %s1879_s19  ;;  %655 = vrot.lane.b32.xlu0 %v721_v10, %s1879_s19 }
  0x60   : > { %576 = vrot.lane.b32.xlu1 %v725_v7, %s1880_s20  ;;  %566 = vrot.lane.b32.xlu0 %v720_v8, %s1880_s20 }
  0x64   : > { %578 = vrot.lane.b32.xlu1 %v726_v9, %s1880_s20  ;;  %568 = vrot.lane.b32.xlu0 %v721_v10, %s1880_s20 }
  0x68   : > { %489 = vrot.lane.b32.xlu1 %v725_v7, %s1881_s21  ;;  %479 = vrot.lane.b32.xlu0 %v720_v8, %s1881_s21 }
  0x6c   : > { %491 = vrot.lane.b32.xlu1 %v726_v9, %s1881_s21  ;;  %481 = vrot.lane.b32.xlu0 %v721_v10, %s1881_s21 }
  0x70   : > { %402 = vrot.lane.b32.xlu1 %v725_v7, %s1882_s22  ;;  %392 = vrot.lane.b32.xlu0 %v720_v8, %s1882_s22 }
  0x74   : > { %404 = vrot.lane.b32.xlu1 %v726_v9, %s1882_s22  ;;  %394 = vrot.lane.b32.xlu0 %v721_v10, %s1882_s22 }
  0x78   : > { %315 = vrot.lane.b32.xlu1 %v725_v7, %s1883_s23  ;;  %305 = vrot.lane.b32.xlu0 %v720_v8, %s1883_s23 }
  0x7c   : > { %317 = vrot.lane.b32.xlu1 %v726_v9, %s1883_s23  ;;  %307 = vrot.lane.b32.xlu0 %v721_v10, %s1883_s23 }
  0x80   : > { %227 = vrot.lane.b32.xlu1 %v725_v7, %s1884_s24  ;;  %217 = vrot.lane.b32.xlu0 %v720_v8, %s1884_s24 }
  0x82   : > { %v749_v19 = vpop.permute.xlu1 %748  ;;  %v739_v20 = vpop.permute.xlu0 %738 }
  0x83   : > { %v763_v23 = vrot.slane %v749_v19, 4  ;;  %v758_v24 = vrot.slane %v739_v20, 4 }
  0x84   : > { %229 = vrot.lane.b32.xlu1 %v726_v9, %s1884_s24  ;;  %219 = vrot.lane.b32.xlu0 %v721_v10, %s1884_s24 }
  0x86   : > { %v2044_v21 = vpop.permute.xlu1 %750  ;;  %v2046_v22 = vpop.permute.xlu0 %740 }
  0x87   : > { %v764_v25 = vrot.slane %v2044_v21, 4  ;;  %v759_v26 = vrot.slane %v2046_v22, 4 }
  0x88   : > { %841 = vrot.lane.b32.xlu1 %v725_v7, %s1885_s25  ;;  %831 = vrot.lane.b32.xlu0 %v720_v8, %s1885_s25 }
  0x89   : > { %v778_v27 = vsel %vm243_vm1, %v763_v23, %v764_v25  ;;  %v768_v28 = vsel %vm243_vm1, %v758_v24, %v759_v26  ;;  %v377_v24 = vld [vmem:[%s1921_s17 + $0x48] sm:$0xf] }
  0x8a   : > { %v779_v29 = vsel %vm769_vm2, %v749_v19, %v778_v27  ;;  %v770_v30 = vsel %vm769_vm2, %v739_v20, %v768_v28  ;;  %v2060_v31 = vpop.permute.xlu1 %651  ;;  %v650_v32 = vpop.permute.xlu0 %649  ;;  %v372_v27 = vld [vmem:[%s1921_s17 + $0x20] sm:$0xf] }
  0x8b   : > { %v670_v33 = vrot.slane %v2060_v31, 4  ;;  %v669_v34 = vrot.slane %v650_v32, 4  ;;  %v1805_v35 = vcombine.high %v770_v30, %v779_v29  ;;  %v1804_v36 = vcombine.low %v770_v30, %v779_v29 }
  0x8c   : > { %843 = vrot.lane.b32.xlu1 %v726_v9, %s1885_s25  ;;  %833 = vrot.lane.b32.xlu0 %v721_v10, %s1885_s25 }
  0x8d   : > { %v679_v37 = vsel %vm243_vm1, %v669_v34, %v670_v33  ;;  %1427 = vmatprep.subr.bf16.mxu0 %v1805_v35 }
  0x8e   : > { %v681_v40 = vsel %vm680_vm3, %v650_v32, %v679_v37  ;;  %v2075_v41 = vpop.permute.xlu1 %661  ;;  %v660_v42 = vpop.permute.xlu0 %659  ;;  %1428 = vmatpush1.bf16.msra.mxu0 %v1804_v36  ;;  %v290_v36 = vld [vmem:[%s1921_s17 + $0x48] sm:$0xf]  ;;  %v285_v37 = vld [vmem:[%s1921_s17 + $0x20] sm:$0xf] }
  0x8f   : > { %v675_v43 = vrot.slane %v2075_v41, 4  ;;  %v674_v44 = vrot.slane %v660_v42, 4 }
  0x90   : > { %756 = vrot.lane.b32.xlu1 %v2069_v38, %s1878_s18  ;;  %746 = vrot.lane.b32.xlu0 %v2072_v39, %s1878_s18 }
  0x91   : > { %v689_v46 = vsel %vm243_vm1, %v674_v44, %v675_v43 }
  0x92   : > { %v690_v47 = vsel %vm680_vm3, %v660_v42, %v689_v46  ;;  %v2088_v48 = vpop.permute.xlu1 %564  ;;  %v563_v49 = vpop.permute.xlu0 %562  ;;  %v176_v46 = vld [vmem:[%s1921_s17 + $0x20] sm:$0xf] }
  0x93   : > { %v583_v50 = vrot.slane %v2088_v48, 4  ;;  %v582_v51 = vrot.slane %v563_v49, 4  ;;  %v1796_v52 = vcombine.high %v681_v40, %v690_v47  ;;  %v1795_v53 = vcombine.low %v681_v40, %v690_v47  ;;  %v181_v47 = vld [vmem:[%s1921_s17 + $0x48] sm:$0xf]  ;;  %187 = vst.msk [vmem:[#allocation2 + $0x20] sm:$0xf] %vm186_vm7, %v176_v46 }
  0x94   : > { %667 = vrot.lane.b32.xlu1 %v2069_v38, %s1879_s19  ;;  %657 = vrot.lane.b32.xlu0 %v2072_v39, %s1879_s19  ;;  %192 = vst.msk [vmem:[#allocation2 + $0x44] sm:$0xf] %vm186_vm7, %v181_v47 }
  0x95   : > { %v592_v54 = vsel %vm243_vm1, %v582_v51, %v583_v50  ;;  %1429 = vmatprep.subr.bf16.mxu0 %v1796_v52 }
  0x96   : > { %v594_v57 = vsel %vm593_vm4, %v563_v49, %v592_v54  ;;  %v2101_v58 = vpop.permute.xlu1 %574  ;;  %v573_v59 = vpop.permute.xlu0 %572  ;;  %1430 = vmatpush1.bf16.msra.mxu0 %v1795_v53  ;;  %v2140_v54 = vld [vmem:[%s1921_s17 + $0x18] sm:$0xff] }
  0x97   : > { %v588_v60 = vrot.slane %v2101_v58, 4  ;;  %v587_v61 = vrot.slane %v573_v59, 4 }
  0x98   : > { %580 = vrot.lane.b32.xlu1 %v551_v55, %s1880_s20  ;;  %570 = vrot.lane.b32.xlu0 %v546_v56, %s1880_s20  ;;  %v2143_v55 = vld [vmem:[%s1921_s17 + $0x40] sm:$0xff] }
  0x99   : > { %v601_v62 = vsel %vm243_vm1, %v587_v61, %v588_v60  ;;  %v1748_v56 = vcombine.high %v2140_v54, %v2143_v55  ;;  %v197_v61 = vld [vmem:[%s1921_s17 + $0x20] sm:$0xf] }
  0x9a   : > { %v602_v3 = vsel %vm593_vm4, %v573_v59, %v601_v62  ;;  %v2112_v7 = vpop.permute.xlu1 %477  ;;  %v476_v8 = vpop.permute.xlu0 %475  ;;  %v202_v59 = vld [vmem:[%s1921_s17 + $0x48] sm:$0xf]  ;;  %v1747_v62 = vcombine.low %v2140_v54, %v2143_v55 }
  0x9b   : > { %v496_v9 = vrot.slane %v2112_v7, 4  ;;  %v495_v10 = vrot.slane %v476_v8, 4  ;;  %v1787_v19 = vcombine.high %v594_v57, %v602_v3  ;;  %v1786_v20 = vcombine.low %v594_v57, %v602_v3 }
  0x9c   : > { %493 = vrot.lane.b32.xlu1 %v464_v63, %s1881_s21  ;;  %483 = vrot.lane.b32.xlu0 %v459_v2, %s1881_s21 }
  0x9d   : > { %v505_v23 = vsel %vm243_vm1, %v495_v10, %v496_v9  ;;  %1431 = vmatprep.subr.bf16.mxu0 %v1787_v19 }
  0x9e   : > { %v507_v28 = vsel %vm506_vm5, %v476_v8, %v505_v23  ;;  %v2123_v29 = vpop.permute.xlu1 %487  ;;  %v486_v30 = vpop.permute.xlu0 %485  ;;  %1432 = vmatpush1.bf16.msra.mxu0 %v1786_v20 }
  0x9f   : > { %v501_v32 = vrot.slane %v2123_v29, 4  ;;  %v500_v34 = vrot.slane %v486_v30, 4 }
  0xa0   : > { %406 = vrot.lane.b32.xlu1 %v377_v24, %s1882_s22  ;;  %396 = vrot.lane.b32.xlu0 %v372_v27, %s1882_s22 }
  0xa1   : > { %v514_v35 = vsel %vm243_vm1, %v500_v34, %v501_v32 }
  0xa2   : > { %v515_v40 = vsel %vm506_vm5, %v486_v30, %v514_v35  ;;  %v2134_v42 = vpop.permute.xlu1 %390  ;;  %v389_v44 = vpop.permute.xlu0 %388 }
  0xa3   : > { %v409_v49 = vrot.slane %v2134_v42, 4  ;;  %v408_v51 = vrot.slane %v389_v44, 4  ;;  %v1778_v52 = vcombine.high %v507_v28, %v515_v40  ;;  %v1777_v53 = vcombine.low %v507_v28, %v515_v40 }
  0xa4   : > { %319 = vrot.lane.b32.xlu1 %v290_v36, %s1883_s23  ;;  %309 = vrot.lane.b32.xlu0 %v285_v37, %s1883_s23 }
  0xa5   : > { %v418_v57 = vsel %vm243_vm1, %v408_v51, %v409_v49  ;;  %1433 = vmatprep.subr.bf16.mxu0 %v1778_v52 }
  0xa6   : > { %v420_v63 = vsel %vm419_vm6, %v389_v44, %v418_v57  ;;  %v2159_v2 = vpop.permute.xlu1 %400  ;;  %v399_v3 = vpop.permute.xlu0 %398  ;;  %1434 = vmatpush1.bf16.msra.mxu0 %v1777_v53 }
  0xa7   : > { %v414_v8 = vrot.slane %v2159_v2, 4  ;;  %v413_v10 = vrot.slane %v399_v3, 4 }
  0xa8   : > { %231 = vrot.lane.b32.xlu1 %v202_v59, %s1884_s24  ;;  %221 = vrot.lane.b32.xlu0 %v197_v61, %s1884_s24 }
  0xa9   : > { %v427_v19 = vsel %vm243_vm1, %v413_v10, %v414_v8 }
  0xaa   : > { %v428_v20 = vsel %vm419_vm6, %v399_v3, %v427_v19  ;;  %v2168_v23 = vpop.permute.xlu1 %303  ;;  %v302_v24 = vpop.permute.xlu0 %301 }
  0xab   : > { %v322_v27 = vrot.slane %v2168_v23, 4  ;;  %v321_v28 = vrot.slane %v302_v24, 4  ;;  %v1769_v30 = vcombine.high %v420_v63, %v428_v20  ;;  %v1768_v34 = vcombine.low %v420_v63, %v428_v20 }
  0xac   : > { %845 = vrot.lane.b32.xlu1 %v2069_v38, %s1885_s25  ;;  %835 = vrot.lane.b32.xlu0 %v2072_v39, %s1885_s25  ;;  %v989_v38 = vld [vmem:[%s2605_s2 + $0x8] sm:$0xff]  ;;  %v988_v39 = vld [vmem:[%s2605_s2] sm:$0xff] }
  0xad   : > { %v331_v35 = vsel %vm243_vm1, %v321_v28, %v322_v27  ;;  %1435 = vmatprep.subr.bf16.mxu0 %v1769_v30 }
  0xae   : > { %v333_v36 = vsel %vm332_vm8, %v302_v24, %v331_v35  ;;  %v2179_v37 = vpop.permute.xlu1 %313  ;;  %v312_v40 = vpop.permute.xlu0 %311  ;;  %1436 = vmatpush1.bf16.msra.mxu0 %v1768_v34 }
  0xaf   : > { %v327_v44 = vrot.slane %v2179_v37, 4  ;;  %v326_v46 = vrot.slane %v312_v40, 4 }
  0xb0   : > { %997 = vperm.xlu1 %1849, %v989_v38   ;;  %992 = vperm.xlu0 %1848, %v988_v39  }
  0xb1   : > { %v340_v47 = vsel %vm243_vm1, %v326_v46, %v327_v44 }
  0xb2   : > { %v341_v51 = vsel %vm332_vm8, %v312_v40, %v340_v47  ;;  %v2192_v52 = vpop.permute.xlu1 %215  ;;  %v214_v53 = vpop.permute.xlu0 %213 }
  0xb3   : > { %v234_v57 = vrot.slane %v2192_v52, 4  ;;  %v233_v59 = vrot.slane %v214_v53, 4  ;;  %v1760_v61 = vcombine.high %v333_v36, %v341_v51  ;;  %v1759_v63 = vcombine.low %v333_v36, %v341_v51 }
  0xb5   : > { %v244_v3 = vsel %vm243_vm1, %v233_v59, %v234_v57  ;;  %1437 = vmatprep.subr.bf16.mxu0 %v1760_v61 }
  0xb6   : > { %v246_v10 = vsel %vm245_vm9, %v214_v53, %v244_v3  ;;  %v2199_v19 = vpop.permute.xlu1 %225  ;;  %v224_v20 = vpop.permute.xlu0 %223  ;;  %1438 = vmatpush1.bf16.msra.mxu0 %v1759_v63 }
  0xb7   : > { %v239_v24 = vrot.slane %v2199_v19, 4  ;;  %v238_v28 = vrot.slane %v224_v20, 4 }
  0xb9   : > { %v253_v30 = vsel %vm243_vm1, %v238_v28, %v239_v24 }
  0xba   : > { %v254_v34 = vsel %vm245_vm9, %v224_v20, %v253_v30  ;;  %v2206_v35 = vpop.permute.xlu1 %829  ;;  %v828_v36 = vpop.permute.xlu0 %827 }
  0xbb   : > { %v848_v40 = vrot.slane %v2206_v35, 4  ;;  %v847_v46 = vrot.slane %v828_v36, 4  ;;  %v1751_v38 = vcombine.high %v246_v10, %v254_v34  ;;  %v1750_v39 = vcombine.low %v246_v10, %v254_v34 }
  0xbd   : > { %v857_v47 = vsel %vm243_vm1, %v847_v46, %v848_v40  ;;  %1439 = vmatprep.subr.bf16.mxu0 %v1751_v38 }
  0xbe   : > { %v859_v51 = vsel %vm858_vm10, %v828_v36, %v857_v47  ;;  %v2213_v53 = vpop.permute.xlu1 %839  ;;  %v838_v59 = vpop.permute.xlu0 %837  ;;  %1440 = vmatpush1.bf16.msra.mxu0 %v1750_v39  ;;  %v2235_v39 = vld [vmem:[%s2604_s1] ss:$8 sps:$4 sm:$0xff]  }
  0xbf   : > { %v853_v61 = vrot.slane %v2213_v53, 4  ;;  %v852_v63 = vrot.slane %v838_v59, 4  ;;  %1441 = vmatprep.subr.bf16.mxu0 %v1742_v4 }
  0xc1   : > { %v867_v3 = vsel %vm243_vm1, %v852_v63, %v853_v61 }
  0xc2   : > { %v868_v10 = vsel %vm858_vm10, %v838_v59, %v867_v3  ;;  %v753_v20 = vpop.permute.xlu1 %752  ;;  %v743_v28 = vpop.permute.xlu0 %742  ;;  %1442 = vmatpush1.bf16.msra.mxu0 %v1741_v5 }
  0xc3   : > { %v765_v30 = vrot.slane %v753_v20, 4  ;;  %v760_v34 = vrot.slane %v743_v28, 4  ;;  %v1814_v36 = vcombine.high %v859_v51, %v868_v10  ;;  %v1813_v46 = vcombine.low %v859_v51, %v868_v10 }
  0xc5   : > { %v780_v4 = vsel %vm243_vm1, %v764_v25, %v765_v30  ;;  %v771_v38 = vsel %vm243_vm1, %v759_v26, %v760_v34  ;;  %1457 = vmatprep.subr.bf16.mxu0 %v1814_v36 }
  0xc6   : > { %v781_v0 = vsel %vm769_vm2, %v2044_v21, %v780_v4  ;;  %v772_v1 = vsel %vm769_vm2, %v2046_v22, %v771_v38  ;;  %v2241_v5 = vpop.permute.xlu1 %754  ;;  %v2243_v47 = vpop.permute.xlu0 %744  ;;  %1458 = vmatpush2.bf16.msra.mxu0 %v1813_v46 }
  0xc7   : > { %v766_v25 = vrot.slane %v2241_v5, 4  ;;  %v761_v26 = vrot.slane %v2243_v47, 4  ;;  %v1807_v51 = vcombine.high %v772_v1, %v781_v0  ;;  %v1806_v59 = vcombine.low %v772_v1, %v781_v0 }
  0xc9   : > { %v782_v63 = vsel %vm243_vm1, %v765_v30, %v766_v25  ;;  %v773_v21 = vsel %vm243_vm1, %v760_v34, %v761_v26  ;;  %1470 = vmatprep.subr.bf16.mxu1 %v1807_v51  ;;  %1460 = vmatmul.mubr.bf16.vlgmr.msra.gmra.mxu0 %v2235_v39 }
  0xca   : > { %v783_v22 = vsel %vm769_vm2, %v753_v20, %v782_v63  ;;  %v774_v3 = vsel %vm769_vm2, %v743_v28, %v773_v21  ;;  %v664_v10 = vpop.permute.xlu1 %663  ;;  %v654_v36 = vpop.permute.xlu0 %653  ;;  %1471 = vmatpush1.bf16.msra.mxu1 %v1806_v59  ;;  %1824 = vmatprep.mubr.msk.bf16.mxu0 %vm1423_vm0, %v1983_v6 }
  0xcb   : > { %v676_v46 = vrot.slane %v664_v10, 4  ;;  %v671_v4 = vrot.slane %v654_v36, 4  ;;  %v1808_v30 = vcombine.low %v774_v3, %v783_v22  ;;  %v1809_v38 = vcombine.high %v774_v3, %v783_v22 }
  0xcd   : > { %v691_v34 = vsel %vm243_vm1, %v675_v43, %v676_v46  ;;  %v682_v20 = vsel %vm243_vm1, %v670_v33, %v671_v4  ;;  %1513 = vmatprep.subr.bf16.mxu0 %v1809_v38 }
  0xce   : > { %v692_v28 = vsel %vm680_vm3, %v2075_v41, %v691_v34  ;;  %v683_v0 = vsel %vm680_vm3, %v2060_v31, %v682_v20  ;;  %v2268_v1 = vpop.permute.xlu1 %665  ;;  %v2270_v51 = vpop.permute.xlu0 %655  ;;  %1514 = vmatpush1.bf16.msra.mxu0 %v1808_v30 }
  0xcf   : > { %v677_v59 = vrot.slane %v2268_v1, 4  ;;  %v672_v43 = vrot.slane %v2270_v51, 4  ;;  %v1798_v63 = vcombine.high %v683_v0, %v692_v28  ;;  %v1797_v21 = vcombine.low %v683_v0, %v692_v28 }
  0xd1   : > { %v693_v33 = vsel %vm243_vm1, %v676_v46, %v677_v59  ;;  %v684_v41 = vsel %vm243_vm1, %v671_v4, %v672_v43  ;;  %1472 = vmatprep.subr.bf16.mxu1 %v1798_v63 }
  0xd2   : > { %v694_v31 = vsel %vm680_vm3, %v664_v10, %v693_v33  ;;  %v685_v22 = vsel %vm680_vm3, %v654_v36, %v684_v41  ;;  %v577_v3 = vpop.permute.xlu1 %576  ;;  %v567_v30 = vpop.permute.xlu0 %566  ;;  %1473 = vmatpush1.bf16.msra.mxu1 %v1797_v21 }
  0xd3   : > { %v589_v38 = vrot.slane %v577_v3, 4  ;;  %v584_v34 = vrot.slane %v567_v30, 4  ;;  %v1799_v20 = vcombine.low %v685_v22, %v694_v31  ;;  %v1800_v28 = vcombine.high %v685_v22, %v694_v31 }
  0xd5   : > { %v603_v46 = vsel %vm243_vm1, %v588_v60, %v589_v38  ;;  %v595_v4 = vsel %vm243_vm1, %v583_v50, %v584_v34  ;;  %1515 = vmatprep.subr.bf16.mxu0 %v1800_v28 }
  0xd6   : > { %v604_v10 = vsel %vm593_vm4, %v2101_v58, %v603_v46  ;;  %v596_v36 = vsel %vm593_vm4, %v2088_v48, %v595_v4  ;;  %v2292_v0 = vpop.permute.xlu1 %578  ;;  %v2294_v63 = vpop.permute.xlu0 %568  ;;  %1516 = vmatpush1.bf16.msra.mxu0 %v1799_v20 }
  0xd7   : > { %v590_v21 = vrot.slane %v2292_v0, 4  ;;  %v585_v60 = vrot.slane %v2294_v63, 4  ;;  %v1789_v33 = vcombine.high %v596_v36, %v604_v10  ;;  %v1788_v41 = vcombine.low %v596_v36, %v604_v10 }
  0xd9   : > { %v605_v50 = vsel %vm243_vm1, %v589_v38, %v590_v21  ;;  %v597_v58 = vsel %vm243_vm1, %v584_v34, %v585_v60  ;;  %1474 = vmatprep.subr.bf16.mxu1 %v1789_v33 }
  0xda   : > { %v606_v48 = vsel %vm593_vm4, %v577_v3, %v605_v50  ;;  %v598_v31 = vsel %vm593_vm4, %v567_v30, %v597_v58  ;;  %v490_v22 = vpop.permute.xlu1 %489  ;;  %v480_v20 = vpop.permute.xlu0 %479  ;;  %1475 = vmatpush1.bf16.msra.mxu1 %v1788_v41 }
  0xdb   : > { %v502_v28 = vrot.slane %v490_v22, 4  ;;  %v497_v46 = vrot.slane %v480_v20, 4  ;;  %v1790_v4 = vcombine.low %v598_v31, %v606_v48  ;;  %v1791_v10 = vcombine.high %v598_v31, %v606_v48 }
  0xdd   : > { %v516_v38 = vsel %vm243_vm1, %v501_v32, %v502_v28  ;;  %v508_v34 = vsel %vm243_vm1, %v496_v9, %v497_v46  ;;  %1517 = vmatprep.subr.bf16.mxu0 %v1791_v10 }
  0xde   : > { %v517_v3 = vsel %vm506_vm5, %v2123_v29, %v516_v38  ;;  %v509_v30 = vsel %vm506_vm5, %v2112_v7, %v508_v34  ;;  %v2316_v36 = vpop.permute.xlu1 %491  ;;  %v2318_v33 = vpop.permute.xlu0 %481  ;;  %1518 = vmatpush1.bf16.msra.mxu0 %v1790_v4 }
  0xdf   : > { %v503_v41 = vrot.slane %v2316_v36, 4  ;;  %v498_v32 = vrot.slane %v2318_v33, 4  ;;  %v1780_v50 = vcombine.high %v509_v30, %v517_v3  ;;  %v1779_v58 = vcombine.low %v509_v30, %v517_v3 }
  0xe1   : > { %v518_v9 = vsel %vm243_vm1, %v502_v28, %v503_v41  ;;  %v510_v29 = vsel %vm243_vm1, %v497_v46, %v498_v32  ;;  %1476 = vmatprep.subr.bf16.mxu1 %v1780_v50 }
  0xe2   : > { %v519_v7 = vsel %vm506_vm5, %v490_v22, %v518_v9  ;;  %v511_v48 = vsel %vm506_vm5, %v480_v20, %v510_v29  ;;  %v403_v31 = vpop.permute.xlu1 %402  ;;  %v393_v4 = vpop.permute.xlu0 %392  ;;  %1477 = vmatpush1.bf16.msra.mxu1 %v1779_v58 }
  0xe3   : > { %v415_v10 = vrot.slane %v403_v31, 4  ;;  %v410_v38 = vrot.slane %v393_v4, 4  ;;  %v1781_v34 = vcombine.low %v511_v48, %v519_v7  ;;  %v1782_v3 = vcombine.high %v511_v48, %v519_v7 }
  0xe5   : > { %v429_v28 = vsel %vm243_vm1, %v414_v8, %v415_v10  ;;  %v421_v46 = vsel %vm243_vm1, %v409_v49, %v410_v38  ;;  %1519 = vmatprep.subr.bf16.mxu0 %v1782_v3 }
  0xe6   : > { %v430_v22 = vsel %vm419_vm6, %v2159_v2, %v429_v28  ;;  %v422_v20 = vsel %vm419_vm6, %v2134_v42, %v421_v46  ;;  %v2340_v30 = vpop.permute.xlu1 %404  ;;  %v2342_v50 = vpop.permute.xlu0 %394  ;;  %1520 = vmatpush1.bf16.msra.mxu0 %v1781_v34 }
  0xe7   : > { %v416_v58 = vrot.slane %v2340_v30, 4  ;;  %v411_v8 = vrot.slane %v2342_v50, 4  ;;  %v1771_v9 = vcombine.high %v422_v20, %v430_v22  ;;  %v1770_v29 = vcombine.low %v422_v20, %v430_v22 }
  0xe9   : > { %v431_v49 = vsel %vm243_vm1, %v415_v10, %v416_v58  ;;  %v423_v2 = vsel %vm243_vm1, %v410_v38, %v411_v8  ;;  %1478 = vmatprep.subr.bf16.mxu1 %v1771_v9 }
  0xea   : > { %v432_v42 = vsel %vm419_vm6, %v403_v31, %v431_v49  ;;  %v424_v7 = vsel %vm419_vm6, %v393_v4, %v423_v2  ;;  %v316_v48 = vpop.permute.xlu1 %315  ;;  %v306_v34 = vpop.permute.xlu0 %305  ;;  %1479 = vmatpush1.bf16.msra.mxu1 %v1770_v29 }
  0xeb   : > { %v328_v3 = vrot.slane %v316_v48, 4  ;;  %v323_v28 = vrot.slane %v306_v34, 4  ;;  %v1772_v46 = vcombine.low %v424_v7, %v432_v42  ;;  %v1773_v22 = vcombine.high %v424_v7, %v432_v42 }
  0xed   : > { %v342_v10 = vsel %vm243_vm1, %v327_v44, %v328_v3  ;;  %v334_v38 = vsel %vm243_vm1, %v322_v27, %v323_v28  ;;  %1521 = vmatprep.subr.bf16.mxu0 %v1773_v22 }
  0xee   : > { %v343_v31 = vsel %vm332_vm8, %v2179_v37, %v342_v10  ;;  %v335_v4 = vsel %vm332_vm8, %v2168_v23, %v334_v38  ;;  %v2364_v20 = vpop.permute.xlu1 %317  ;;  %v2366_v9 = vpop.permute.xlu0 %307  ;;  %1522 = vmatpush1.bf16.msra.mxu0 %v1772_v46 }
  0xef   : > { %v329_v29 = vrot.slane %v2364_v20, 4  ;;  %v324_v44 = vrot.slane %v2366_v9, 4  ;;  %v1762_v49 = vcombine.high %v335_v4, %v343_v31  ;;  %v1761_v2 = vcombine.low %v335_v4, %v343_v31 }
  0xf1   : > { %v344_v27 = vsel %vm243_vm1, %v328_v3, %v329_v29  ;;  %v336_v37 = vsel %vm243_vm1, %v323_v28, %v324_v44  ;;  %1480 = vmatprep.subr.bf16.mxu1 %v1762_v49 }
  0xf2   : > { %v345_v23 = vsel %vm332_vm8, %v316_v48, %v344_v27  ;;  %v337_v42 = vsel %vm332_vm8, %v306_v34, %v336_v37  ;;  %v228_v7 = vpop.permute.xlu1 %227  ;;  %v218_v46 = vpop.permute.xlu0 %217  ;;  %1481 = vmatpush1.bf16.msra.mxu1 %v1761_v2 }
  0xf3   : > { %v240_v22 = vrot.slane %v228_v7, 4  ;;  %v235_v10 = vrot.slane %v218_v46, 4  ;;  %v1763_v38 = vcombine.low %v337_v42, %v345_v23  ;;  %v1764_v31 = vcombine.high %v337_v42, %v345_v23 }
  0xf5   : > { %v255_v3 = vsel %vm243_vm1, %v239_v24, %v240_v22  ;;  %v247_v28 = vsel %vm243_vm1, %v234_v57, %v235_v10  ;;  %1523 = vmatprep.subr.bf16.mxu0 %v1764_v31 }
  0xf6   : > { %v256_v48 = vsel %vm245_vm9, %v2199_v19, %v255_v3  ;;  %v248_v34 = vsel %vm245_vm9, %v2192_v52, %v247_v28  ;;  %v2388_v4 = vpop.permute.xlu1 %229  ;;  %v2390_v49 = vpop.permute.xlu0 %219  ;;  %1524 = vmatpush1.bf16.msra.mxu0 %v1763_v38 }
  0xf7   : > { %v241_v2 = vrot.slane %v2388_v4, 4  ;;  %v236_v24 = vrot.slane %v2390_v49, 4  ;;  %v1753_v27 = vcombine.high %v248_v34, %v256_v48  ;;  %v1752_v37 = vcombine.low %v248_v34, %v256_v48 }
  0xf9   : > { %v257_v57 = vsel %vm243_vm1, %v240_v22, %v241_v2  ;;  %v249_v19 = vsel %vm243_vm1, %v235_v10, %v236_v24  ;;  %1482 = vmatprep.subr.bf16.mxu1 %v1753_v27 }
  0xfa   : > { %v258_v52 = vsel %vm245_vm9, %v228_v7, %v257_v57  ;;  %v250_v23 = vsel %vm245_vm9, %v218_v46, %v249_v19  ;;  %v842_v42 = vpop.permute.xlu1 %841  ;;  %v832_v38 = vpop.permute.xlu0 %831  ;;  %1483 = vmatpush1.bf16.msra.mxu1 %v1752_v37 }
  0xfb   : > { %v854_v31 = vrot.slane %v842_v42, 4  ;;  %v849_v3 = vrot.slane %v832_v38, 4  ;;  %1484 = vmatprep.subr.bf16.mxu1 %v1744_v13  ;;  %v1754_v28 = vcombine.low %v250_v23, %v258_v52  ;;  %v1755_v22 = vcombine.high %v250_v23, %v258_v52 }
  0xfd   : > { %v869_v10 = vsel %vm243_vm1, %v853_v61, %v854_v31  ;;  %v860_v7 = vsel %vm243_vm1, %v848_v40, %v849_v3  ;;  %1525 = vmatprep.subr.bf16.mxu0 %v1755_v22 }
  0xfe   : > { %v870_v46 = vsel %vm858_vm10, %v2213_v53, %v869_v10  ;;  %v861_v48 = vsel %vm858_vm10, %v2206_v35, %v860_v7  ;;  %v2415_v34 = vpop.permute.xlu1 %843  ;;  %v2417_v13 = vpop.permute.xlu0 %833  ;;  %1485 = vmatpush1.bf16.msra.mxu1 %v1743_v14  ;;  %1526 = vmatpush1.bf16.msra.mxu0 %v1754_v28 }
  0xff   : > { %v855_v61 = vrot.slane %v2415_v34, 4  ;;  %v850_v40 = vrot.slane %v2417_v13, 4  ;;  %v1816_v27 = vcombine.high %v861_v48, %v870_v46  ;;  %1527 = vmatprep.subr.bf16.mxu0 %v1746_v17  ;;  %v1815_v53 = vcombine.low %v861_v48, %v870_v46 }
 0x101   : > { %v871_v35 = vsel %vm243_vm1, %v854_v31, %v855_v61  ;;  %v862_v11 = vsel %vm243_vm1, %v849_v3, %v850_v40  ;;  %1500 = vmatprep.subr.bf16.mxu1 %v1816_v27 }
 0x102   : > { %v872_v12 = vsel %vm858_vm10, %v842_v42, %v871_v35  ;;  %v863_v14 = vsel %vm858_vm10, %v832_v38, %v862_v11  ;;  %v757_v37 = vpop.permute.xlu1 %756  ;;  %v747_v57 = vpop.permute.xlu0 %746  ;;  %1501 = vmatpush2.bf16.msra.mxu1 %v1815_v53  ;;  %1528 = vmatpush1.bf16.msra.mxu0 %v1745_v18  ;;  %v1869_v11 = vld [vmem:[%s2604_s1 + $0x4] ss:$8 sps:$4 sm:$0xff]  }
 0x103   : > { %v767_v17 = vrot.slane %v757_v37, 4  ;;  %v762_v19 = vrot.slane %v747_v57, 4  ;;  %v1817_v52 = vcombine.low %v863_v14, %v872_v12  ;;  %v1818_v23 = vcombine.high %v863_v14, %v872_v12 }
 0x105   : > { %v784_v31 = vsel %vm243_vm1, %v766_v25, %v767_v17  ;;  %v786_v3 = vsel %vm769_vm2, %v757_v37, %v767_v17  ;;  %v775_v42 = vsel %vm243_vm1, %v761_v26, %v762_v19  ;;  %v777_v38 = vsel %vm769_vm2, %v747_v57, %v762_v19  ;;  %1503 = vmatmul.mubr.bf16.vlgmr.msra.gmra.mxu1 %v2235_v39 }
 0x106   : > { %v785_v15 = vsel %vm769_vm2, %v2241_v5, %v784_v31  ;;  %806 = vst.msk [vmem:[#allocation2 + $0x23c] sm:$0xf] %vm186_vm7, %v786_v3  ;;  %v776_v16 = vsel %vm769_vm2, %v2243_v47, %v775_v42  ;;  %801 = vst.msk [vmem:[#allocation2 + $0x218] sm:$0xf] %vm186_vm7, %v777_v38  ;;  %v668_v18 = vpop.permute.xlu1 %667  ;;  %v658_v25 = vpop.permute.xlu0 %657  ;;  %1543 = vmatprep.subr.bf16.mxu0 %v1818_v23  ;;  %1825 = vmatprep.mubr.msk.bf16.mxu1 %vm1423_vm0, %v1983_v6 }
 0x107   : > { %v678_v26 = vrot.slane %v668_v18, 4  ;;  %v673_v28 = vrot.slane %v658_v25, 4  ;;  %1544 = vmatpush2.bf16.msra.mxu0 %v1817_v52  ;;  %v1810_v22 = vcombine.low %v776_v16, %v785_v15  ;;  %v1811_v10 = vcombine.high %v776_v16, %v785_v15 }
 0x108   : > { %1599 = vmatprep.subr.bf16.mxu0 %v1886_v45 }
 0x109   : > { %v695_v5 = vsel %vm243_vm1, %v677_v59, %v678_v26  ;;  %v697_v47 = vsel %vm680_vm3, %v668_v18, %v678_v26  ;;  %v686_v7 = vsel %vm243_vm1, %v672_v43, %v673_v28  ;;  %v688_v46 = vsel %vm680_vm3, %v658_v25, %v673_v28  ;;  %1556 = vmatprep.subr.bf16.mxu1 %v1811_v10 }
 0x10a   : > { %v696_v6 = vsel %vm680_vm3, %v2268_v1, %v695_v5  ;;  %717 = vst.msk [vmem:[#allocation2 + $0x1f4] sm:$0xf] %vm186_vm7, %v697_v47  ;;  %v687_v48 = vsel %vm680_vm3, %v2270_v51, %v686_v7  ;;  %712 = vst.msk [vmem:[#allocation2 + $0x1d0] sm:$0xf] %vm186_vm7, %v688_v46  ;;  %v581_v59 = vpop.permute.xlu1 %580  ;;  %v571_v27 = vpop.permute.xlu0 %570  ;;  %1546 = vmatmul.mubr.bf16.vlgmr.msra.gmra.mxu0 %v2235_v39  ;;  %1557 = vmatpush1.bf16.msra.mxu1 %v1810_v22 }
 0x10b   : > { %v591_v53 = vrot.slane %v581_v59, 4  ;;  %628 = vst.msk [vmem:[#allocation2 + $0x1ac] sm:$0xf] %vm186_vm7, %v581_v59  ;;  %v586_v43 = vrot.slane %v571_v27, 4  ;;  %623 = vst.msk [vmem:[#allocation2 + $0x188] sm:$0xf] %vm186_vm7, %v571_v27  ;;  %v1801_v35 = vcombine.low %v687_v48, %v696_v6  ;;  %v1802_v1 = vcombine.high %v687_v48, %v696_v6  ;;  %1826 = vmatprep.mubr.msk.bf16.mxu0 %vm1423_vm0, %v1869_v11 }
 0x10d   : > { %v607_v51 = vsel %vm243_vm1, %v590_v21, %v591_v53  ;;  %v599_v12 = vsel %vm243_vm1, %v585_v60, %v586_v43  ;;  %v1858_v14 = vld [vmem:[#allocation2 + $0x218] ss:$36 sps:$4 sm:$0xff]   ;;  %1558 = vmatprep.subr.bf16.mxu1 %v1802_v1 }
 0x10e   : > { %v608_v37 = vsel %vm593_vm4, %v2292_v0, %v607_v51  ;;  %v600_v57 = vsel %vm593_vm4, %v2294_v63, %v599_v12  ;;  %v494_v17 = vpop.permute.xlu1 %493  ;;  %v484_v19 = vpop.permute.xlu0 %483  ;;  %1559 = vmatpush1.bf16.msra.mxu1 %v1801_v35  ;;  %1600 = vmatpush1.bf16.msra.mxu0 %v1858_v14 }
 0x10f   : > { %v504_v52 = vrot.slane %v494_v17, 4  ;;  %541 = vst.msk [vmem:[#allocation2 + $0x164] sm:$0xf] %vm186_vm7, %v494_v17  ;;  %v499_v23 = vrot.slane %v484_v19, 4  ;;  %536 = vst.msk [vmem:[#allocation2 + $0x140] sm:$0xf] %vm186_vm7, %v484_v19  ;;  %v1792_v21 = vcombine.low %v600_v57, %v608_v37  ;;  %v1793_v60 = vcombine.high %v600_v57, %v608_v37  ;;  %1601 = vmatprep.subr.bf16.mxu0 %v1886_v45 }
 0x111   : > { %v520_v0 = vsel %vm243_vm1, %v503_v41, %v504_v52  ;;  %v512_v63 = vsel %vm243_vm1, %v498_v32, %v499_v23  ;;  %v1859_v31 = vld [vmem:[#allocation2 + $0x1d0] ss:$36 sps:$4 sm:$0xff]   ;;  %1560 = vmatprep.subr.bf16.mxu1 %v1793_v60 }
 0x112   : > { %v521_v3 = vsel %vm506_vm5, %v2316_v36, %v520_v0  ;;  %v513_v42 = vsel %vm506_vm5, %v2318_v33, %v512_v63  ;;  %v407_v38 = vpop.permute.xlu1 %406  ;;  %v397_v15 = vpop.permute.xlu0 %396  ;;  %1561 = vmatpush1.bf16.msra.mxu1 %v1792_v21  ;;  %1602 = vmatpush1.bf16.msra.mxu0 %v1859_v31  ;;  %v1860_v41 = vld [vmem:[#allocation2 + $0x188] ss:$36 sps:$4 sm:$0xff]  }
 0x113   : > { %v417_v16 = vrot.slane %v407_v38, 4  ;;  %454 = vst.msk [vmem:[#allocation2 + $0x11c] sm:$0xf] %vm186_vm7, %v407_v38  ;;  %v412_v18 = vrot.slane %v397_v15, 4  ;;  %449 = vst.msk [vmem:[#allocation2 + $0xf8] sm:$0xf] %vm186_vm7, %v397_v15  ;;  %v1783_v32 = vcombine.low %v513_v42, %v521_v3  ;;  %v1784_v25 = vcombine.high %v513_v42, %v521_v3  ;;  %1603 = vmatprep.subr.bf16.mxu0 %v1886_v45 }
 0x115   : > { %v433_v36 = vsel %vm243_vm1, %v416_v58, %v417_v16  ;;  %v425_v33 = vsel %vm243_vm1, %v411_v8, %v412_v18  ;;  %1562 = vmatprep.subr.bf16.mxu1 %v1784_v25 }
 0x116   : > { %v434_v26 = vsel %vm419_vm6, %v2340_v30, %v433_v36  ;;  %v426_v28 = vsel %vm419_vm6, %v2342_v50, %v425_v33  ;;  %v320_v22 = vpop.permute.xlu1 %319  ;;  %v310_v10 = vpop.permute.xlu0 %309  ;;  %1563 = vmatpush1.bf16.msra.mxu1 %v1783_v32  ;;  %1604 = vmatpush1.bf16.msra.mxu0 %v1860_v41  ;;  %v1861_v58 = vld [vmem:[#allocation2 + $0x140] ss:$36 sps:$4 sm:$0xff]  }
 0x117   : > { %v330_v5 = vrot.slane %v320_v22, 4  ;;  %367 = vst.msk [vmem:[#allocation2 + $0xd4] sm:$0xf] %vm186_vm7, %v320_v22  ;;  %v325_v47 = vrot.slane %v310_v10, 4  ;;  %362 = vst.msk [vmem:[#allocation2 + $0xb0] sm:$0xf] %vm186_vm7, %v310_v10  ;;  %v1774_v7 = vcombine.low %v426_v28, %v434_v26  ;;  %v1775_v8 = vcombine.high %v426_v28, %v434_v26  ;;  %1605 = vmatprep.subr.bf16.mxu0 %v1886_v45 }
 0x119   : > { %v346_v30 = vsel %vm243_vm1, %v329_v29, %v330_v5  ;;  %v338_v50 = vsel %vm243_vm1, %v324_v44, %v325_v47  ;;  %1564 = vmatprep.subr.bf16.mxu1 %v1775_v8 }
 0x11a   : > { %v347_v46 = vsel %vm332_vm8, %v2364_v20, %v346_v30  ;;  %v339_v6 = vsel %vm332_vm8, %v2366_v9, %v338_v50  ;;  %v232_v48 = vpop.permute.xlu1 %231  ;;  %v222_v59 = vpop.permute.xlu0 %221  ;;  %1565 = vmatpush1.bf16.msra.mxu1 %v1774_v7  ;;  %1606 = vmatpush1.bf16.msra.mxu0 %v1861_v58  ;;  %v1862_v29 = vld [vmem:[#allocation2 + $0xf8] ss:$36 sps:$4 sm:$0xff]  }
 0x11b   : > { %v242_v27 = vrot.slane %v232_v48, 4  ;;  %280 = vst.msk [vmem:[#allocation2 + $0x8c] sm:$0xf] %vm186_vm7, %v232_v48  ;;  %v237_v53 = vrot.slane %v222_v59, 4  ;;  %275 = vst.msk [vmem:[#allocation2 + $0x68] sm:$0xf] %vm186_vm7, %v222_v59  ;;  %v1765_v43 = vcombine.low %v339_v6, %v347_v46  ;;  %v1766_v44 = vcombine.high %v339_v6, %v347_v46  ;;  %1607 = vmatprep.subr.bf16.mxu0 %v1886_v45 }
 0x11d   : > { %v259_v20 = vsel %vm243_vm1, %v241_v2, %v242_v27  ;;  %v251_v9 = vsel %vm243_vm1, %v236_v24, %v237_v53  ;;  %1566 = vmatprep.subr.bf16.mxu1 %v1766_v44 }
 0x11e   : > { %v260_v35 = vsel %vm245_vm9, %v2388_v4, %v259_v20  ;;  %v252_v1 = vsel %vm245_vm9, %v2390_v49, %v251_v9  ;;  %v846_v11 = vpop.permute.xlu1 %845  ;;  %v836_v51 = vpop.permute.xlu0 %835  ;;  %1567 = vmatpush1.bf16.msra.mxu1 %v1765_v43  ;;  %1608 = vmatpush1.bf16.msra.mxu0 %v1862_v29  ;;  %v1863_v37 = vld [vmem:[#allocation2 + $0xb0] ss:$36 sps:$4 sm:$0xff]  }
 0x11f   : > { %v856_v12 = vrot.slane %v846_v11, 4  ;;  %v851_v14 = vrot.slane %v836_v51, 4  ;;  %v1756_v57 = vcombine.low %v252_v1, %v260_v35  ;;  %v1757_v2 = vcombine.high %v252_v1, %v260_v35  ;;  %1609 = vmatprep.subr.bf16.mxu0 %v1886_v45 }
 0x121   : > { %v873_v24 = vsel %vm243_vm1, %v855_v61, %v856_v12  ;;  %v875_v4 = vsel %vm858_vm10, %v846_v11, %v856_v12  ;;  %v864_v49 = vsel %vm243_vm1, %v850_v40, %v851_v14  ;;  %v866_v17 = vsel %vm858_vm10, %v836_v51, %v851_v14  ;;  %1568 = vmatprep.subr.bf16.mxu1 %v1757_v2 }
 0x122   : > { %v874_v19 = vsel %vm858_vm10, %v2415_v34, %v873_v24  ;;  %895 = vst.msk [vmem:[#allocation2 + $0x284] sm:$0xf] %vm186_vm7, %v875_v4  ;;  %v865_v52 = vsel %vm858_vm10, %v2417_v13, %v864_v49  ;;  %890 = vst.msk [vmem:[#allocation2 + $0x260] sm:$0xf] %vm186_vm7, %v866_v17  ;;  %1569 = vmatpush1.bf16.msra.mxu1 %v1756_v57  ;;  %1610 = vmatpush1.bf16.msra.mxu0 %v1863_v37  ;;  %v1864_v61 = vld [vmem:[#allocation2 + $0x68] ss:$36 sps:$4 sm:$0xff]  }
 0x123   : > { %1570 = vmatprep.subr.bf16.mxu1 %v1748_v56  ;;  %1611 = vmatprep.subr.bf16.mxu0 %v1886_v45  ;;  %v1820_v40 = vcombine.high %v865_v52, %v874_v19  ;;  %v1867_v34 = vld [vmem:[#allocation2 + $0x20] ss:$36 sps:$4 sm:$0xff]   ;;  %v1819_v13 = vcombine.low %v865_v52, %v874_v19 }
 0x126   : > { %1571 = vmatpush1.bf16.msra.mxu1 %v1747_v62  ;;  %1612 = vmatpush1.bf16.msra.mxu0 %v1864_v61 }
 0x127   : > { %1586 = vmatprep.subr.bf16.mxu1 %v1820_v40  ;;  %1613 = vmatprep.subr.bf16.mxu0 %v1886_v45 }
 0x129   : > { %v1868_v23 = vld [vmem:[#allocation2 + $0x260] ss:$36 sps:$4 sm:$0xff]  }
 0x12a   : > { %1587 = vmatpush2.bf16.msra.mxu1 %v1819_v13  ;;  %1614 = vmatpush1.bf16.msra.mxu0 %v1867_v34 }
 0x12b   : > { %1629 = vmatprep.subr.bf16.mxu0 %v1886_v45  ;;  %v993_v56 = vpop.permute.xlu0 %992  ;;  %v2571_v45 = vpop.permute.xlu1 %997 }
 0x12d   : > { %1589 = vmatmul.mubr.bf16.vlgmr.msra.gmra.mxu1 %v2235_v39 }
 0x12e   : > { %1630 = vmatpush2.bf16.msra.mxu0 %v1868_v23 }
 0x131   : > { %1632 = vmatmul.mubr.bf16.vlgmr.msra.gmra.mxu0 %v2235_v39 }
 0x189   : > { %v1461_v54 = vpop.f32.mrf.mxu0 }
 0x18a   : > { %v1462_v55 = vadd.f32 %v1461_v54, %v993_v56 }
 0x18b   : > { %v1463_v62 = vpop.f32.mrf.mxu0 }
 0x18c   : > { %v1464_v21 = vadd.f32 %v1463_v62, %v993_v56  ;;  %v1640_v60 = vmax.f32 %v1462_v55, 0.0 }
 0x18d   : > { %v1465_v0 = vpop.f32.mrf.mxu0 }
 0x18e   : > { %v1466_v39 = vadd.f32 %v1465_v0, %v2571_v45  ;;  %v1641_v63 = vmax.f32 %v1464_v21, 0.0  ;;  %1658 = vst [vmem:[%s2569_s14] sm:$0xff] %v1640_v60 }
 0x18f   : > { %v1467_v31 = vpop.f32.mrf.mxu0 }
 0x190   : > { %v1649_v3 = vmax.f32 %v1466_v39, 0.0  ;;  %1659 = vst [vmem:[%s2569_s14 + $0x8] sm:$0xff] %v1641_v63  ;;  %v1468_v42 = vadd.f32 %v1467_v31, %v2571_v45 }
 0x192   : > { %1668 = vst [vmem:[%s2569_s14 + $0x48] sm:$0xff] %v1649_v3  ;;  %v1650_v38 = vmax.f32 %v1468_v42, 0.0 }
 0x194   : > { %1669 = vst [vmem:[%s2569_s14 + $0x50] sm:$0xff] %v1650_v38 }
 0x1c5   : > { %v1504_v15 = vpop.f32.mrf.mxu1 }
 0x1c6   : > { %v1505_v16 = vadd.f32 %v1504_v15, %v993_v56 }
 0x1c7   : > { %v1506_v18 = vpop.f32.mrf.mxu1 }
 0x1c8   : > { %v1642_v41 = vmax.f32 %v1505_v16, 0.0  ;;  %v1507_v32 = vadd.f32 %v1506_v18, %v993_v56 }
 0x1c9   : > { %v1508_v25 = vpop.f32.mrf.mxu1 }
 0x1ca   : > { %1660 = vst [vmem:[%s2569_s14 + $0x10] sm:$0xff] %v1642_v41  ;;  %v1643_v36 = vmax.f32 %v1507_v32, 0.0  ;;  %v1509_v33 = vadd.f32 %v1508_v25, %v2571_v45  ;;  %v1547_v26 = vpop.f32.mrf.mxu0 }
 0x1cb   : > { %v1548_v28 = vadd.f32 %v1547_v26, %v993_v56  ;;  %v1510_v22 = vpop.f32.mrf.mxu1 }
 0x1cc   : > { %1661 = vst [vmem:[%s2569_s14 + $0x18] sm:$0xff] %v1643_v36  ;;  %v1651_v10 = vmax.f32 %v1509_v33, 0.0  ;;  %v1511_v5 = vadd.f32 %v1510_v22, %v2571_v45  ;;  %v1549_v47 = vpop.f32.mrf.mxu0 }
 0x1cd   : > { %v1644_v58 = vmax.f32 %v1548_v28, 0.0  ;;  %v1550_v7 = vadd.f32 %v1549_v47, %v993_v56 }
 0x1ce   : > { %1670 = vst [vmem:[%s2569_s14 + $0x58] sm:$0xff] %v1651_v10  ;;  %v1652_v8 = vmax.f32 %v1511_v5, 0.0  ;;  %v1551_v30 = vpop.f32.mrf.mxu0 }
 0x1cf   : > { %1662 = vst [vmem:[%s2569_s14 + $0x20] sm:$0xff] %v1644_v58  ;;  %v1645_v50 = vmax.f32 %v1550_v7, 0.0  ;;  %v1552_v46 = vadd.f32 %v1551_v30, %v2571_v45 }
 0x1d0   : > { %1671 = vst [vmem:[%s2569_s14 + $0x60] sm:$0xff] %v1652_v8  ;;  %v1553_v6 = vpop.f32.mrf.mxu0 }
 0x1d1   : > { %1663 = vst [vmem:[%s2569_s14 + $0x28] sm:$0xff] %v1645_v50  ;;  %v1653_v48 = vmax.f32 %v1552_v46, 0.0  ;;  %v1554_v59 = vadd.f32 %v1553_v6, %v2571_v45 }
 0x1d3   : > { %1672 = vst [vmem:[%s2569_s14 + $0x68] sm:$0xff] %v1653_v48  ;;  %v1654_v27 = vmax.f32 %v1554_v59, 0.0 }
 0x1d5   : > { %1673 = vst [vmem:[%s2569_s14 + $0x70] sm:$0xff] %v1654_v27 }
 0x1ed   : > { %v1590_v53 = vpop.f32.mrf.mxu1 }
 0x1ee   : > { %v1591_v29 = vadd.f32 %v1590_v53, %v993_v56 }
 0x1ef   : > { %v1592_v43 = vpop.f32.mrf.mxu1 }
 0x1f0   : > { %v1646_v44 = vmax.f32 %v1591_v29, 0.0  ;;  %v1593_v20 = vadd.f32 %v1592_v43, %v993_v56 }
 0x1f1   : > { %v1594_v9 = vpop.f32.mrf.mxu1  ;;  %v1633_v35 = vpop.f32.mrf.mxu0 }
 0x1f2   : > { %1664 = vst [vmem:[%s2569_s14 + $0x30] sm:$0xff] %v1646_v44  ;;  %v1647_v1 = vmax.f32 %v1593_v20, 0.0  ;;  %v1595_v11 = vadd.f32 %v1594_v9, %v2571_v45  ;;  %v1634_v51 = vadd.f32 %v1633_v35, %v993_v56 }
 0x1f3   : > { %v1596_v12 = vpop.f32.mrf.mxu1  ;;  %v1635_v14 = vpop.f32.mrf.mxu0 }
 0x1f4   : > { %1665 = vst [vmem:[%s2569_s14 + $0x38] sm:$0xff] %v1647_v1  ;;  %v1655_v37 = vmax.f32 %v1595_v11, 0.0  ;;  %v1597_v57 = vadd.f32 %v1596_v12, %v2571_v45  ;;  %v1648_v2 = vmax.f32 %v1634_v51, 0.0 }
 0x1f5   : > { %v1636_v24 = vpop.f32.mrf.mxu0 }
 0x1f6   : > { %1674 = vst [vmem:[%s2569_s14 + $0x78] sm:$0xff] %v1655_v37  ;;  %v1656_v4 = vmax.f32 %v1597_v57, 0.0  ;;  %1667 = vst.msk [vmem:[%s2569_s14 + $0x40] sm:$0xff] %vm1666_vm11, %v1648_v2  ;;  %v1637_v49 = vadd.f32 %v1636_v24, %v2571_v45 }
 0x1f7   : > { %v1638_v17 = vpop.f32.mrf.mxu0 }
 0x1f8   : > { %1675 = vst [vmem:[%s2569_s14 + $0x80] sm:$0xff] %v1656_v4  ;;  %v1657_v19 = vmax.f32 %v1637_v49, 0.0 }
 0x1fa   : > { %1676 = vst.msk [vmem:[%s2569_s14 + $0x88] sm:$0xff] %vm1666_vm11, %v1657_v19 }
 0x1fb PF: > { %s13_s12 = sadd.s32 1, %s1876_s12  }
 0x1fc   : > { %p10_p4 = scmp.ge.s32.totalorder %s13_s12, 4  }
 0x1fe   :  { %12 = sbr.rel (!%p10_p4) target bundleno = 1 (0x1), region = 62 }

// kernel: loss_forward.26
= control target key start
LH: loop header
LB: loop body
LE: loop exit
PB: predicated region body
PF: predicated region fallthrough
CT: control target
= control target key end

     0   :  { %s1899_s12 = smov 0   ;;  %s2589_s0 = inlined_call_operand.vmem [shape: bf16[2,16,1158], index: 0, kind: input, shape index: {}]   ;;  %s2590_s1 = inlined_call_operand.vmem [shape: bf16[3,144], index: 1, kind: input, shape index: {}]   ;;  %s2591_s2 = inlined_call_operand.vmem [shape: f32[3,1], index: 2, kind: input, shape index: {}]   ;;  %s2592_s3 = inlined_call_operand.vmem [shape: f32[2,3,1088], index: 3, kind: output, shape index: {}]  }
   0x1 LB: > { %s1711_s13 = sadd.s32 4294967295, %s1868_s12   ;;  %p1715_p0 = scmp.ge.s32.totalorder %s1868_s12, 1  ;;  %s1868_s12 = sphi %s1899_s12, %s13_s12  }
   0x2   : > { %p137_p1 = scmp.lt.s32.totalorder %s1868_s12, 3 }
   0x4   : > { %p138_p2 = pnand %p1715_p0, %p137_p1 }
   0x5   : > { %p161_p3 = scmp.lt.s32.totalorder (!%p138_p2), %s1711_s13, 1  ;;  %s1870_s18 = smov (!%p138_p2), 59  }
   0x6   : > { %141 = sbr.rel (%p138_p2) target bundleno = 515 (0x203), region = 32  ;;  %s1871_s19 = smov (!%p138_p2), 60  }
   0x7   : > { %s1872_s20 = smov (!%p138_p2), 92   ;;  %s1873_s21 = smov (!%p138_p2), 93  }
   0x8   : > { %s1874_s22 = smov (!%p138_p2), 94   ;;  %s1875_s23 = smov (!%p138_p2), 126  }
   0x9   : > { %s1876_s24 = smov (!%p138_p2), 127   ;;  %s1877_s25 = smov (!%p138_p2), 58  }
   0xb   : > { %s2594_s13 = smov (!%p161_p3, %s1711_s13), 1  ;;  %v1979_v8 = vld.sshfl [vmem:[%s2590_s1] sm:$0x33 pattern:$0x76325410]  ;;  %vm1417_vm0 = vcmask 130048  }
   0xc   : > { %s1807_s14 = smul.u32 80, %s2594_s13  ;;  %v1983_v9 = vcombine.high %v1979_v8, %v1979_v8  ;;  %vm243_vm1 = vcmask 1043456   ;;  %vm769_vm2 = vcmask 482304   ;;  %vm680_vm3 = vcmask 490496  }
   0xd   : > { %v1878_v41 = vmov 0   ;;  %vm593_vm4 = vcmask 752640   ;;  %vm506_vm5 = vcmask 760832   ;;  %vm186_vm6 = vcmask 519168   ;;  %s1808_s5 = smul.u32 36, %s2594_s13 }
   0xe   : > { %s1913_s17 = scalar_lea.vmem %s2589_s0, %s1807_s14  ;;  %1800 = vmatprep.mubr.msk.bf16.mxu0 %vm1417_vm0, %v1983_v9  ;;  %1801 = vmatprep.mubr.msk.bf16.mxu1 %vm1417_vm0, %v1983_v9  ;;  %vm419_vm7 = vcmask 769024   ;;  %vm332_vm8 = vcmask 1031168   ;;  %vm245_vm9 = vcmask 1039360   ;;  %vm858_vm10 = vcmask 474112  }
   0xf   : > { %v1916_v0 = vld [vmem:[%s1913_s17 + $0x28] sm:$0xff]  ;;  %v1919_v1 = vld [vmem:[%s1913_s17] sm:$0xff]  ;;  %v724_v2 = vld [vmem:[%s1913_s17 + $0x30] sm:$0xff]  ;;  %1826 = vset.pattern.permute.xlu0 %v1878_v41  ;;  %s2579_s8 = scalar_lea.vmem %s2592_s3, %s1808_s5  ;;  %vm1654_vm11 = vcmask 518144  }
  0x10   : > { %748 = vrot.lane.b32.xlu1 %v1916_v0, %s1870_s18  ;;  %738 = vrot.lane.b32.xlu0 %v1919_v1, %s1870_s18  ;;  %v719_v3 = vld [vmem:[%s1913_s17 + $0x8] sm:$0xff]  ;;  %v1720_v4 = vcombine.high %v1919_v1, %v1916_v0  ;;  %v1719_v5 = vcombine.low %v1919_v1, %v1916_v0  ;;  %v725_v6 = vld [vmem:[%s1913_s17 + $0x38] sm:$0xff] }
  0x11   : > { %v720_v7 = vld [vmem:[%s1913_s17 + $0x10] sm:$0xff]  ;;  %v1995_v10 = vld [vmem:[%s1913_s17 + $0x40] sm:$0xff]  ;;  %v1998_v11 = vld [vmem:[%s1913_s17 + $0x18] sm:$0xff] }
  0x12   : > { %v2029_v12 = vld [vmem:[%s1913_s17 + $0x8] sm:$0xff]  ;;  %v2032_v13 = vld [vmem:[%s1913_s17 + $0x30] sm:$0xff]  ;;  %v2048_v19 = vld [vmem:[%s1913_s17 + $0x38] sm:$0xff] }
  0x13   : > { %v1722_v14 = vcombine.high %v2029_v12, %v2032_v13  ;;  %v1721_v15 = vcombine.low %v2029_v12, %v2032_v13  ;;  %v2045_v18 = vld [vmem:[%s1913_s17 + $0x10] sm:$0xff]  ;;  %v2073_v30 = vld [vmem:[%s1913_s17 + $0x48] sm:$0xff]  ;;  %v2076_v31 = vld [vmem:[%s1913_s17 + $0x20] sm:$0xff] }
  0x14   : > { %750 = vrot.lane.b32.xlu1 %v724_v2, %s1870_s18  ;;  %740 = vrot.lane.b32.xlu0 %v719_v3, %s1870_s18  ;;  %v1724_v20 = vcombine.high %v2045_v18, %v2048_v19  ;;  %v1723_v21 = vcombine.low %v2045_v18, %v2048_v19  ;;  %v551_v56 = vld [vmem:[%s1913_s17 + $0x48] sm:$0xf]  ;;  %v546_v57 = vld [vmem:[%s1913_s17 + $0x20] sm:$0xf] }
  0x18   : > { %651 = vrot.lane.b32.xlu1 %v719_v3, %s1871_s19  ;;  %649 = vrot.lane.b32.xlu0 %v1919_v1, %s1871_s19 }
  0x1c   : > { %661 = vrot.lane.b32.xlu1 %v724_v2, %s1871_s19  ;;  %659 = vrot.lane.b32.xlu0 %v1916_v0, %s1871_s19 }
  0x20   : > { %564 = vrot.lane.b32.xlu1 %v719_v3, %s1872_s20  ;;  %562 = vrot.lane.b32.xlu0 %v1919_v1, %s1872_s20 }
  0x24   : > { %574 = vrot.lane.b32.xlu1 %v724_v2, %s1872_s20  ;;  %572 = vrot.lane.b32.xlu0 %v1916_v0, %s1872_s20 }
  0x28   : > { %477 = vrot.lane.b32.xlu1 %v719_v3, %s1873_s21  ;;  %475 = vrot.lane.b32.xlu0 %v1919_v1, %s1873_s21 }
  0x2c   : > { %487 = vrot.lane.b32.xlu1 %v724_v2, %s1873_s21  ;;  %485 = vrot.lane.b32.xlu0 %v1916_v0, %s1873_s21 }
  0x30   : > { %390 = vrot.lane.b32.xlu1 %v719_v3, %s1874_s22  ;;  %388 = vrot.lane.b32.xlu0 %v1919_v1, %s1874_s22 }
  0x34   : > { %400 = vrot.lane.b32.xlu1 %v724_v2, %s1874_s22  ;;  %398 = vrot.lane.b32.xlu0 %v1916_v0, %s1874_s22 }
  0x38   : > { %303 = vrot.lane.b32.xlu1 %v719_v3, %s1875_s23  ;;  %301 = vrot.lane.b32.xlu0 %v1919_v1, %s1875_s23 }
  0x3c   : > { %313 = vrot.lane.b32.xlu1 %v724_v2, %s1875_s23  ;;  %311 = vrot.lane.b32.xlu0 %v1916_v0, %s1875_s23 }
  0x40   : > { %215 = vrot.lane.b32.xlu1 %v719_v3, %s1876_s24  ;;  %213 = vrot.lane.b32.xlu0 %v1919_v1, %s1876_s24 }
  0x44   : > { %225 = vrot.lane.b32.xlu1 %v724_v2, %s1876_s24  ;;  %223 = vrot.lane.b32.xlu0 %v1916_v0, %s1876_s24 }
  0x48   : > { %752 = vrot.lane.b32.xlu1 %v725_v6, %s1870_s18  ;;  %742 = vrot.lane.b32.xlu0 %v720_v7, %s1870_s18 }
  0x4c   : > { %829 = vrot.lane.b32.xlu1 %v719_v3, %s1877_s25  ;;  %827 = vrot.lane.b32.xlu0 %v1919_v1, %s1877_s25  ;;  %v459_v3 = vld [vmem:[%s1913_s17 + $0x20] sm:$0xf] }
  0x50   : > { %839 = vrot.lane.b32.xlu1 %v724_v2, %s1877_s25  ;;  %837 = vrot.lane.b32.xlu0 %v1916_v0, %s1877_s25  ;;  %v464_v2 = vld [vmem:[%s1913_s17 + $0x48] sm:$0xf] }
  0x54   : > { %663 = vrot.lane.b32.xlu1 %v725_v6, %s1871_s19  ;;  %653 = vrot.lane.b32.xlu0 %v720_v7, %s1871_s19 }
  0x58   : > { %754 = vrot.lane.b32.xlu1 %v1995_v10, %s1870_s18  ;;  %744 = vrot.lane.b32.xlu0 %v1998_v11, %s1870_s18 }
  0x5c   : > { %576 = vrot.lane.b32.xlu1 %v725_v6, %s1872_s20  ;;  %566 = vrot.lane.b32.xlu0 %v720_v7, %s1872_s20 }
  0x60   : > { %665 = vrot.lane.b32.xlu1 %v1995_v10, %s1871_s19  ;;  %655 = vrot.lane.b32.xlu0 %v1998_v11, %s1871_s19 }
  0x64   : > { %489 = vrot.lane.b32.xlu1 %v725_v6, %s1873_s21  ;;  %479 = vrot.lane.b32.xlu0 %v720_v7, %s1873_s21 }
  0x68   : > { %578 = vrot.lane.b32.xlu1 %v1995_v10, %s1872_s20  ;;  %568 = vrot.lane.b32.xlu0 %v1998_v11, %s1872_s20 }
  0x6c   : > { %402 = vrot.lane.b32.xlu1 %v725_v6, %s1874_s22  ;;  %392 = vrot.lane.b32.xlu0 %v720_v7, %s1874_s22 }
  0x70   : > { %491 = vrot.lane.b32.xlu1 %v1995_v10, %s1873_s21  ;;  %481 = vrot.lane.b32.xlu0 %v1998_v11, %s1873_s21 }
  0x74   : > { %315 = vrot.lane.b32.xlu1 %v725_v6, %s1875_s23  ;;  %305 = vrot.lane.b32.xlu0 %v720_v7, %s1875_s23 }
  0x78   : > { %404 = vrot.lane.b32.xlu1 %v1995_v10, %s1874_s22  ;;  %394 = vrot.lane.b32.xlu0 %v1998_v11, %s1874_s22 }
  0x7c   : > { %227 = vrot.lane.b32.xlu1 %v725_v6, %s1876_s24  ;;  %217 = vrot.lane.b32.xlu0 %v720_v7, %s1876_s24 }
  0x80   : > { %317 = vrot.lane.b32.xlu1 %v1995_v10, %s1875_s23  ;;  %307 = vrot.lane.b32.xlu0 %v1998_v11, %s1875_s23 }
  0x82   : > { %v749_v16 = vpop.permute.xlu1 %748  ;;  %v739_v17 = vpop.permute.xlu0 %738 }
  0x83   : > { %v763_v24 = vrot.slane %v749_v16, 4  ;;  %v758_v25 = vrot.slane %v739_v17, 4 }
  0x84   : > { %229 = vrot.lane.b32.xlu1 %v1995_v10, %s1876_s24  ;;  %219 = vrot.lane.b32.xlu0 %v1998_v11, %s1876_s24 }
  0x86   : > { %v2058_v22 = vpop.permute.xlu1 %750  ;;  %v2060_v23 = vpop.permute.xlu0 %740 }
  0x87   : > { %v764_v26 = vrot.slane %v2058_v22, 4  ;;  %v759_v27 = vrot.slane %v2060_v23, 4 }
  0x88   : > { %841 = vrot.lane.b32.xlu1 %v725_v6, %s1877_s25  ;;  %831 = vrot.lane.b32.xlu0 %v720_v7, %s1877_s25 }
  0x89   : > { %v778_v28 = vsel %vm243_vm1, %v763_v24, %v764_v26  ;;  %v768_v29 = vsel %vm243_vm1, %v758_v25, %v759_v27 }
  0x8a   : > { %v779_v32 = vsel %vm769_vm2, %v749_v16, %v778_v28  ;;  %v770_v33 = vsel %vm769_vm2, %v739_v17, %v768_v29  ;;  %v2080_v34 = vpop.permute.xlu1 %651  ;;  %v650_v35 = vpop.permute.xlu0 %649  ;;  %v377_v28 = vld [vmem:[%s1913_s17 + $0x48] sm:$0xf]  ;;  %v372_v29 = vld [vmem:[%s1913_s17 + $0x20] sm:$0xf] }
  0x8b   : > { %v670_v36 = vrot.slane %v2080_v34, 4  ;;  %v669_v37 = vrot.slane %v650_v35, 4  ;;  %v1783_v38 = vcombine.high %v770_v33, %v779_v32  ;;  %v1782_v39 = vcombine.low %v770_v33, %v779_v32 }
  0x8c   : > { %756 = vrot.lane.b32.xlu1 %v2073_v30, %s1870_s18  ;;  %746 = vrot.lane.b32.xlu0 %v2076_v31, %s1870_s18 }
  0x8d   : > { %v679_v40 = vsel %vm243_vm1, %v669_v37, %v670_v36  ;;  %1421 = vmatprep.subr.bf16.mxu0 %v1783_v38 }
  0x8e   : > { %v681_v42 = vsel %vm680_vm3, %v650_v35, %v679_v40  ;;  %v2092_v43 = vpop.permute.xlu1 %661  ;;  %v660_v44 = vpop.permute.xlu0 %659  ;;  %1422 = vmatpush1.bf16.msra.mxu0 %v1782_v39  ;;  %v290_v39 = vld [vmem:[%s1913_s17 + $0x48] sm:$0xf]  ;;  %v285_v40 = vld [vmem:[%s1913_s17 + $0x20] sm:$0xf] }
  0x8f   : > { %v675_v45 = vrot.slane %v2092_v43, 4  ;;  %v674_v46 = vrot.slane %v660_v44, 4 }
  0x90   : > { %843 = vrot.lane.b32.xlu1 %v1995_v10, %s1877_s25  ;;  %833 = vrot.lane.b32.xlu0 %v1998_v11, %s1877_s25 }
  0x91   : > { %v689_v47 = vsel %vm243_vm1, %v674_v46, %v675_v45  ;;  %v181_v46 = vld [vmem:[%s1913_s17 + $0x48] sm:$0xf] }
  0x92   : > { %v690_v48 = vsel %vm680_vm3, %v660_v44, %v689_v47  ;;  %v2103_v49 = vpop.permute.xlu1 %564  ;;  %v563_v50 = vpop.permute.xlu0 %562  ;;  %v176_v44 = vld [vmem:[%s1913_s17 + $0x20] sm:$0xf]  ;;  %192 = vst.msk [vmem:[#allocation2 + $0x44] sm:$0xf] %vm186_vm6, %v181_v46 }
  0x93   : > { %v583_v51 = vrot.slane %v2103_v49, 4  ;;  %v582_v52 = vrot.slane %v563_v50, 4  ;;  %v1774_v53 = vcombine.high %v681_v42, %v690_v48  ;;  %v1773_v54 = vcombine.low %v681_v42, %v690_v48  ;;  %187 = vst.msk [vmem:[#allocation2 + $0x20] sm:$0xf] %vm186_vm6, %v176_v44 }
  0x94   : > { %667 = vrot.lane.b32.xlu1 %v2073_v30, %s1871_s19  ;;  %657 = vrot.lane.b32.xlu0 %v2076_v31, %s1871_s19 }
  0x95   : > { %v592_v55 = vsel %vm243_vm1, %v582_v52, %v583_v51  ;;  %1423 = vmatprep.subr.bf16.mxu0 %v1774_v53  ;;  %v2154_v52 = vld [vmem:[%s1913_s17 + $0x18] sm:$0xff]  ;;  %v2157_v53 = vld [vmem:[%s1913_s17 + $0x40] sm:$0xff] }
  0x96   : > { %v594_v58 = vsel %vm593_vm4, %v563_v50, %v592_v55  ;;  %v2116_v59 = vpop.permute.xlu1 %574  ;;  %v573_v60 = vpop.permute.xlu0 %572  ;;  %1424 = vmatpush1.bf16.msra.mxu0 %v1773_v54 }
  0x97   : > { %v588_v61 = vrot.slane %v2116_v59, 4  ;;  %v587_v62 = vrot.slane %v573_v60, 4 }
  0x98   : > { %580 = vrot.lane.b32.xlu1 %v551_v56, %s1872_s20  ;;  %570 = vrot.lane.b32.xlu0 %v546_v57, %s1872_s20 }
  0x99   : > { %v601_v63 = vsel %vm243_vm1, %v587_v62, %v588_v61 }
  0x9a   : > { %v602_v6 = vsel %vm593_vm4, %v573_v60, %v601_v63  ;;  %v2127_v7 = vpop.permute.xlu1 %477  ;;  %v476_v10 = vpop.permute.xlu0 %475  ;;  %v1726_v60 = vcombine.high %v2154_v52, %v2157_v53  ;;  %v202_v63 = vld [vmem:[%s1913_s17 + $0x48] sm:$0xf] }
  0x9b   : > { %v496_v11 = vrot.slane %v2127_v7, 4  ;;  %v495_v16 = vrot.slane %v476_v10, 4  ;;  %v1765_v17 = vcombine.high %v594_v58, %v602_v6  ;;  %v1764_v24 = vcombine.low %v594_v58, %v602_v6 }
  0x9c   : > { %493 = vrot.lane.b32.xlu1 %v464_v2, %s1873_s21  ;;  %483 = vrot.lane.b32.xlu0 %v459_v3, %s1873_s21  ;;  %v1725_v58 = vcombine.low %v2154_v52, %v2157_v53  ;;  %v197_v2 = vld [vmem:[%s1913_s17 + $0x20] sm:$0xf] }
  0x9d   : > { %v505_v25 = vsel %vm243_vm1, %v495_v16, %v496_v11  ;;  %1425 = vmatprep.subr.bf16.mxu0 %v1765_v17 }
  0x9e   : > { %v507_v32 = vsel %vm506_vm5, %v476_v10, %v505_v25  ;;  %v2138_v33 = vpop.permute.xlu1 %487  ;;  %v486_v35 = vpop.permute.xlu0 %485  ;;  %1426 = vmatpush1.bf16.msra.mxu0 %v1764_v24 }
  0x9f   : > { %v501_v37 = vrot.slane %v2138_v33, 4  ;;  %v500_v38 = vrot.slane %v486_v35, 4 }
  0xa0   : > { %406 = vrot.lane.b32.xlu1 %v377_v28, %s1874_s22  ;;  %396 = vrot.lane.b32.xlu0 %v372_v29, %s1874_s22 }
  0xa1   : > { %v514_v42 = vsel %vm243_vm1, %v500_v38, %v501_v37 }
  0xa2   : > { %v515_v47 = vsel %vm506_vm5, %v486_v35, %v514_v42  ;;  %v2151_v48 = vpop.permute.xlu1 %390  ;;  %v389_v50 = vpop.permute.xlu0 %388 }
  0xa3   : > { %v409_v54 = vrot.slane %v2151_v48, 4  ;;  %v408_v55 = vrot.slane %v389_v50, 4  ;;  %v1756_v56 = vcombine.high %v507_v32, %v515_v47  ;;  %v1755_v57 = vcombine.low %v507_v32, %v515_v47 }
  0xa4   : > { %319 = vrot.lane.b32.xlu1 %v290_v39, %s1875_s23  ;;  %309 = vrot.lane.b32.xlu0 %v285_v40, %s1875_s23 }
  0xa5   : > { %v418_v62 = vsel %vm243_vm1, %v408_v55, %v409_v54  ;;  %1427 = vmatprep.subr.bf16.mxu0 %v1756_v56 }
  0xa6   : > { %v420_v3 = vsel %vm419_vm7, %v389_v50, %v418_v62  ;;  %v2174_v6 = vpop.permute.xlu1 %400  ;;  %v399_v10 = vpop.permute.xlu0 %398  ;;  %1428 = vmatpush1.bf16.msra.mxu0 %v1755_v57 }
  0xa7   : > { %v414_v16 = vrot.slane %v2174_v6, 4  ;;  %v413_v17 = vrot.slane %v399_v10, 4 }
  0xa8   : > { %231 = vrot.lane.b32.xlu1 %v202_v63, %s1876_s24  ;;  %221 = vrot.lane.b32.xlu0 %v197_v2, %s1876_s24 }
  0xa9   : > { %v427_v24 = vsel %vm243_vm1, %v413_v17, %v414_v16 }
  0xaa   : > { %v428_v25 = vsel %vm419_vm7, %v399_v10, %v427_v24  ;;  %v2183_v28 = vpop.permute.xlu1 %303  ;;  %v302_v29 = vpop.permute.xlu0 %301 }
  0xab   : > { %v322_v32 = vrot.slane %v2183_v28, 4  ;;  %v321_v35 = vrot.slane %v302_v29, 4  ;;  %v1747_v38 = vcombine.high %v420_v3, %v428_v25  ;;  %v1746_v39 = vcombine.low %v420_v3, %v428_v25 }
  0xac   : > { %845 = vrot.lane.b32.xlu1 %v2073_v30, %s1877_s25  ;;  %835 = vrot.lane.b32.xlu0 %v2076_v31, %s1877_s25  ;;  %v987_v30 = vld [vmem:[%s2591_s2] sm:$0x7] }
  0xad   : > { %v331_v40 = vsel %vm243_vm1, %v321_v35, %v322_v32  ;;  %1429 = vmatprep.subr.bf16.mxu0 %v1747_v38 }
  0xae   : > { %v333_v42 = vsel %vm332_vm8, %v302_v29, %v331_v40  ;;  %v2194_v44 = vpop.permute.xlu1 %313  ;;  %v312_v46 = vpop.permute.xlu0 %311  ;;  %1430 = vmatpush1.bf16.msra.mxu0 %v1746_v39 }
  0xaf   : > { %v327_v47 = vrot.slane %v2194_v44, 4  ;;  %v326_v50 = vrot.slane %v312_v46, 4 }
  0xb0   : > { %990 = vperm.xlu0 %1826, %v987_v30  }
  0xb1   : > { %v340_v31 = vsel %vm243_vm1, %v326_v50, %v327_v47 }
  0xb2   : > { %v341_v55 = vsel %vm332_vm8, %v312_v46, %v340_v31  ;;  %v2204_v56 = vpop.permute.xlu1 %215  ;;  %v214_v57 = vpop.permute.xlu0 %213 }
  0xb3   : > { %v234_v62 = vrot.slane %v2204_v56, 4  ;;  %v233_v63 = vrot.slane %v214_v57, 4  ;;  %v1738_v2 = vcombine.high %v333_v42, %v341_v55  ;;  %v1737_v3 = vcombine.low %v333_v42, %v341_v55 }
  0xb5   : > { %v244_v10 = vsel %vm243_vm1, %v233_v63, %v234_v62  ;;  %1431 = vmatprep.subr.bf16.mxu0 %v1738_v2 }
  0xb6   : > { %v246_v17 = vsel %vm245_vm9, %v214_v57, %v244_v10  ;;  %v2211_v24 = vpop.permute.xlu1 %225  ;;  %v224_v25 = vpop.permute.xlu0 %223  ;;  %1432 = vmatpush1.bf16.msra.mxu0 %v1737_v3 }
  0xb7   : > { %v239_v29 = vrot.slane %v2211_v24, 4  ;;  %v238_v35 = vrot.slane %v224_v25, 4 }
  0xb9   : > { %v253_v38 = vsel %vm243_vm1, %v238_v35, %v239_v29 }
  0xba   : > { %v254_v39 = vsel %vm245_vm9, %v224_v25, %v253_v38  ;;  %v753_v40 = vpop.permute.xlu1 %752  ;;  %v743_v42 = vpop.permute.xlu0 %742 }
  0xbb   : > { %v765_v46 = vrot.slane %v753_v40, 4  ;;  %v760_v50 = vrot.slane %v743_v42, 4  ;;  %v1729_v30 = vcombine.high %v246_v17, %v254_v39  ;;  %v1728_v31 = vcombine.low %v246_v17, %v254_v39 }
  0xbd   : > { %v780_v55 = vsel %vm243_vm1, %v764_v26, %v765_v46  ;;  %v771_v57 = vsel %vm243_vm1, %v759_v27, %v760_v50  ;;  %1433 = vmatprep.subr.bf16.mxu0 %v1729_v30 }
  0xbe   : > { %v781_v63 = vsel %vm769_vm2, %v2058_v22, %v780_v55  ;;  %v772_v2 = vsel %vm769_vm2, %v2060_v23, %v771_v57  ;;  %v2228_v3 = vpop.permute.xlu1 %829  ;;  %v828_v10 = vpop.permute.xlu0 %827  ;;  %1434 = vmatpush1.bf16.msra.mxu0 %v1728_v31 }
  0xbf   : > { %v848_v17 = vrot.slane %v2228_v3, 4  ;;  %v847_v25 = vrot.slane %v828_v10, 4  ;;  %v1785_v26 = vcombine.high %v772_v2, %v781_v63  ;;  %v1784_v35 = vcombine.low %v772_v2, %v781_v63  ;;  %1435 = vmatprep.subr.bf16.mxu0 %v1720_v4 }
  0xc1   : > { %v857_v22 = vsel %vm243_vm1, %v847_v25, %v848_v17  ;;  %1462 = vmatprep.subr.bf16.mxu1 %v1785_v26 }
  0xc2   : > { %v859_v23 = vsel %vm858_vm10, %v828_v10, %v857_v22  ;;  %v2238_v27 = vpop.permute.xlu1 %839  ;;  %v838_v38 = vpop.permute.xlu0 %837  ;;  %1463 = vmatpush1.bf16.msra.mxu1 %v1784_v35  ;;  %1436 = vmatpush1.bf16.msra.mxu0 %v1719_v5 }
  0xc3   : > { %v853_v39 = vrot.slane %v2238_v27, 4  ;;  %v852_v30 = vrot.slane %v838_v38, 4 }
  0xc5   : > { %v867_v4 = vsel %vm243_vm1, %v852_v30, %v853_v39 }
  0xc6   : > { %v868_v31 = vsel %vm858_vm10, %v838_v38, %v867_v4  ;;  %v664_v55 = vpop.permute.xlu1 %663  ;;  %v654_v57 = vpop.permute.xlu0 %653 }
  0xc7   : > { %v676_v63 = vrot.slane %v664_v55, 4  ;;  %v671_v2 = vrot.slane %v654_v57, 4  ;;  %v1792_v10 = vcombine.high %v859_v23, %v868_v31  ;;  %v1791_v25 = vcombine.low %v859_v23, %v868_v31 }
  0xc9   : > { %v691_v0 = vsel %vm243_vm1, %v675_v45, %v676_v63  ;;  %v682_v1 = vsel %vm243_vm1, %v670_v36, %v671_v2  ;;  %1451 = vmatprep.subr.bf16.mxu0 %v1792_v10 }
  0xca   : > { %v692_v5 = vsel %vm680_vm3, %v2092_v43, %v691_v0  ;;  %v683_v26 = vsel %vm680_vm3, %v2080_v34, %v682_v1  ;;  %v2258_v35 = vpop.permute.xlu1 %754  ;;  %v2260_v22 = vpop.permute.xlu0 %744  ;;  %1452 = vmatpush2.bf16.msra.mxu0 %v1791_v25 }
  0xcb   : > { %v766_v23 = vrot.slane %v2258_v35, 4  ;;  %v761_v45 = vrot.slane %v2260_v22, 4  ;;  %v1776_v38 = vcombine.high %v683_v26, %v692_v5  ;;  %v1775_v30 = vcombine.low %v683_v26, %v692_v5 }
  0xcd   : > { %v782_v36 = vsel %vm243_vm1, %v765_v46, %v766_v23  ;;  %v773_v43 = vsel %vm243_vm1, %v760_v50, %v761_v45  ;;  %1464 = vmatprep.subr.bf16.mxu1 %v1776_v38  ;;  %1454 = vmatmul.mubr.bf16.vlgmr.msra.gmra.mxu0 %v1979_v8 }
  0xce   : > { %v783_v34 = vsel %vm769_vm2, %v753_v40, %v782_v36  ;;  %v774_v4 = vsel %vm769_vm2, %v743_v42, %v773_v43  ;;  %v577_v31 = vpop.permute.xlu1 %576  ;;  %v567_v10 = vpop.permute.xlu0 %566  ;;  %1465 = vmatpush1.bf16.msra.mxu1 %v1775_v30  ;;  %1802 = vmatprep.mubr.msk.bf16.mxu0 %vm1417_vm0, %v1983_v9 }
  0xcf   : > { %v589_v25 = vrot.slane %v577_v31, 4  ;;  %v584_v0 = vrot.slane %v567_v10, 4  ;;  %v1786_v46 = vcombine.low %v774_v4, %v783_v34  ;;  %v1787_v1 = vcombine.high %v774_v4, %v783_v34 }
  0xd1   : > { %v603_v50 = vsel %vm243_vm1, %v588_v61, %v589_v25  ;;  %v595_v40 = vsel %vm243_vm1, %v583_v51, %v584_v0  ;;  %1503 = vmatprep.subr.bf16.mxu0 %v1787_v1 }
  0xd2   : > { %v604_v42 = vsel %vm593_vm4, %v2116_v59, %v603_v50  ;;  %v596_v5 = vsel %vm593_vm4, %v2103_v49, %v595_v40  ;;  %v2285_v26 = vpop.permute.xlu1 %665  ;;  %v2287_v38 = vpop.permute.xlu0 %655  ;;  %1504 = vmatpush1.bf16.msra.mxu0 %v1786_v46 }
  0xd3   : > { %v677_v30 = vrot.slane %v2285_v26, 4  ;;  %v672_v61 = vrot.slane %v2287_v38, 4  ;;  %v1767_v36 = vcombine.high %v596_v5, %v604_v42  ;;  %v1766_v43 = vcombine.low %v596_v5, %v604_v42 }
  0xd5   : > { %v693_v51 = vsel %vm243_vm1, %v676_v63, %v677_v30  ;;  %v684_v59 = vsel %vm243_vm1, %v671_v2, %v672_v61  ;;  %1466 = vmatprep.subr.bf16.mxu1 %v1767_v36 }
  0xd6   : > { %v694_v49 = vsel %vm680_vm3, %v664_v55, %v693_v51  ;;  %v685_v34 = vsel %vm680_vm3, %v654_v57, %v684_v59  ;;  %v490_v4 = vpop.permute.xlu1 %489  ;;  %v480_v46 = vpop.permute.xlu0 %479  ;;  %1467 = vmatpush1.bf16.msra.mxu1 %v1766_v43 }
  0xd7   : > { %v502_v1 = vrot.slane %v490_v4, 4  ;;  %v497_v50 = vrot.slane %v480_v46, 4  ;;  %v1777_v40 = vcombine.low %v685_v34, %v694_v49  ;;  %v1778_v42 = vcombine.high %v685_v34, %v694_v49 }
  0xd9   : > { %v516_v63 = vsel %vm243_vm1, %v501_v37, %v502_v1  ;;  %v508_v2 = vsel %vm243_vm1, %v496_v11, %v497_v50  ;;  %1505 = vmatprep.subr.bf16.mxu0 %v1778_v42 }
  0xda   : > { %v517_v55 = vsel %vm506_vm5, %v2138_v33, %v516_v63  ;;  %v509_v57 = vsel %vm506_vm5, %v2127_v7, %v508_v2  ;;  %v2309_v5 = vpop.permute.xlu1 %578  ;;  %v2311_v36 = vpop.permute.xlu0 %568  ;;  %1506 = vmatpush1.bf16.msra.mxu0 %v1777_v40 }
  0xdb   : > { %v590_v43 = vrot.slane %v2309_v5, 4  ;;  %v585_v37 = vrot.slane %v2311_v36, 4  ;;  %v1758_v51 = vcombine.high %v509_v57, %v517_v55  ;;  %v1757_v59 = vcombine.low %v509_v57, %v517_v55 }
  0xdd   : > { %v605_v11 = vsel %vm243_vm1, %v589_v25, %v590_v43  ;;  %v597_v33 = vsel %vm243_vm1, %v584_v0, %v585_v37  ;;  %1468 = vmatprep.subr.bf16.mxu1 %v1758_v51 }
  0xde   : > { %v606_v7 = vsel %vm593_vm4, %v577_v31, %v605_v11  ;;  %v598_v49 = vsel %vm593_vm4, %v567_v10, %v597_v33  ;;  %v403_v34 = vpop.permute.xlu1 %402  ;;  %v393_v40 = vpop.permute.xlu0 %392  ;;  %1469 = vmatpush1.bf16.msra.mxu1 %v1757_v59 }
  0xdf   : > { %v415_v42 = vrot.slane %v403_v34, 4  ;;  %v410_v63 = vrot.slane %v393_v40, 4  ;;  %v1768_v2 = vcombine.low %v598_v49, %v606_v7  ;;  %v1769_v55 = vcombine.high %v598_v49, %v606_v7 }
  0xe1   : > { %v429_v25 = vsel %vm243_vm1, %v414_v16, %v415_v42  ;;  %v421_v0 = vsel %vm243_vm1, %v409_v54, %v410_v63  ;;  %1507 = vmatprep.subr.bf16.mxu0 %v1769_v55 }
  0xe2   : > { %v430_v31 = vsel %vm419_vm7, %v2174_v6, %v429_v25  ;;  %v422_v10 = vsel %vm419_vm7, %v2151_v48, %v421_v0  ;;  %v2333_v57 = vpop.permute.xlu1 %491  ;;  %v2335_v51 = vpop.permute.xlu0 %481  ;;  %1508 = vmatpush1.bf16.msra.mxu0 %v1768_v2 }
  0xe3   : > { %v503_v59 = vrot.slane %v2333_v57, 4  ;;  %v498_v16 = vrot.slane %v2335_v51, 4  ;;  %v1749_v11 = vcombine.high %v422_v10, %v430_v31  ;;  %v1748_v33 = vcombine.low %v422_v10, %v430_v31 }
  0xe5   : > { %v518_v54 = vsel %vm243_vm1, %v502_v1, %v503_v59  ;;  %v510_v6 = vsel %vm243_vm1, %v497_v50, %v498_v16  ;;  %1470 = vmatprep.subr.bf16.mxu1 %v1749_v11 }
  0xe6   : > { %v519_v48 = vsel %vm506_vm5, %v490_v4, %v518_v54  ;;  %v511_v7 = vsel %vm506_vm5, %v480_v46, %v510_v6  ;;  %v316_v49 = vpop.permute.xlu1 %315  ;;  %v306_v2 = vpop.permute.xlu0 %305  ;;  %1471 = vmatpush1.bf16.msra.mxu1 %v1748_v33 }
  0xe7   : > { %v328_v55 = vrot.slane %v316_v49, 4  ;;  %v323_v25 = vrot.slane %v306_v2, 4  ;;  %v1759_v0 = vcombine.low %v511_v7, %v519_v48  ;;  %v1760_v31 = vcombine.high %v511_v7, %v519_v48 }
  0xe9   : > { %v342_v1 = vsel %vm243_vm1, %v327_v47, %v328_v55  ;;  %v334_v50 = vsel %vm243_vm1, %v322_v32, %v323_v25  ;;  %1509 = vmatprep.subr.bf16.mxu0 %v1760_v31 }
  0xea   : > { %v343_v4 = vsel %vm332_vm8, %v2194_v44, %v342_v1  ;;  %v335_v46 = vsel %vm332_vm8, %v2183_v28, %v334_v50  ;;  %v2357_v10 = vpop.permute.xlu1 %404  ;;  %v2359_v11 = vpop.permute.xlu0 %394  ;;  %1510 = vmatpush1.bf16.msra.mxu0 %v1759_v0 }
  0xeb   : > { %v416_v33 = vrot.slane %v2357_v10, 4  ;;  %v411_v47 = vrot.slane %v2359_v11, 4  ;;  %v1740_v54 = vcombine.high %v335_v46, %v343_v4  ;;  %v1739_v6 = vcombine.low %v335_v46, %v343_v4 }
  0xed   : > { %v431_v32 = vsel %vm243_vm1, %v415_v42, %v416_v33  ;;  %v423_v44 = vsel %vm243_vm1, %v410_v63, %v411_v47  ;;  %1472 = vmatprep.subr.bf16.mxu1 %v1740_v54 }
  0xee   : > { %v432_v28 = vsel %vm419_vm7, %v403_v34, %v431_v32  ;;  %v424_v48 = vsel %vm419_vm7, %v393_v40, %v423_v44  ;;  %v228_v7 = vpop.permute.xlu1 %227  ;;  %v218_v0 = vpop.permute.xlu0 %217  ;;  %1473 = vmatpush1.bf16.msra.mxu1 %v1739_v6 }
  0xef   : > { %v240_v31 = vrot.slane %v228_v7, 4  ;;  %v235_v1 = vrot.slane %v218_v0, 4  ;;  %v1750_v50 = vcombine.low %v424_v48, %v432_v28  ;;  %v1751_v4 = vcombine.high %v424_v48, %v432_v28 }
  0xf1   : > { %v255_v42 = vsel %vm243_vm1, %v239_v29, %v240_v31  ;;  %v247_v63 = vsel %vm243_vm1, %v234_v62, %v235_v1  ;;  %1511 = vmatprep.subr.bf16.mxu0 %v1751_v4 }
  0xf2   : > { %v256_v34 = vsel %vm245_vm9, %v2211_v24, %v255_v42  ;;  %v248_v40 = vsel %vm245_vm9, %v2204_v56, %v247_v63  ;;  %v2381_v46 = vpop.permute.xlu1 %317  ;;  %v2383_v54 = vpop.permute.xlu0 %307  ;;  %1512 = vmatpush1.bf16.msra.mxu0 %v1750_v50 }
  0xf3   : > { %v329_v6 = vrot.slane %v2381_v46, 4  ;;  %v324_v29 = vrot.slane %v2383_v54, 4  ;;  %v1731_v32 = vcombine.high %v248_v40, %v256_v34  ;;  %v1730_v44 = vcombine.low %v248_v40, %v256_v34 }
  0xf5   : > { %v344_v62 = vsel %vm243_vm1, %v328_v55, %v329_v6  ;;  %v336_v24 = vsel %vm243_vm1, %v323_v25, %v324_v29  ;;  %1474 = vmatprep.subr.bf16.mxu1 %v1731_v32 }
  0xf6   : > { %v345_v56 = vsel %vm332_vm8, %v316_v49, %v344_v62  ;;  %v337_v28 = vsel %vm332_vm8, %v306_v2, %v336_v24  ;;  %v2395_v48 = vpop.permute.xlu1 %229  ;;  %v2397_v50 = vpop.permute.xlu0 %219  ;;  %1475 = vmatpush1.bf16.msra.mxu1 %v1730_v44 }
  0xf7   : > { %v241_v4 = vrot.slane %v2395_v48, 4  ;;  %v236_v42 = vrot.slane %v2397_v50, 4  ;;  %v1741_v63 = vcombine.low %v337_v28, %v345_v56  ;;  %v1742_v55 = vcombine.high %v337_v28, %v345_v56  ;;  %1476 = vmatprep.subr.bf16.mxu1 %v1722_v14 }
  0xf9   : > { %v257_v49 = vsel %vm243_vm1, %v240_v31, %v241_v4  ;;  %v249_v2 = vsel %vm243_vm1, %v235_v1, %v236_v42  ;;  %1513 = vmatprep.subr.bf16.mxu0 %v1742_v55 }
  0xfa   : > { %v258_v25 = vsel %vm245_vm9, %v228_v7, %v257_v49  ;;  %v250_v34 = vsel %vm245_vm9, %v218_v0, %v249_v2  ;;  %v842_v40 = vpop.permute.xlu1 %841  ;;  %v832_v32 = vpop.permute.xlu0 %831  ;;  %1514 = vmatpush1.bf16.msra.mxu0 %v1741_v63  ;;  %1477 = vmatpush1.bf16.msra.mxu1 %v1721_v15 }
  0xfb   : > { %v854_v14 = vrot.slane %v842_v40, 4  ;;  %v849_v44 = vrot.slane %v832_v32, 4  ;;  %v1732_v62 = vcombine.low %v250_v34, %v258_v25  ;;  %v1733_v31 = vcombine.high %v250_v34, %v258_v25 }
  0xfd   : > { %v869_v1 = vsel %vm243_vm1, %v853_v39, %v854_v14  ;;  %v860_v7 = vsel %vm243_vm1, %v848_v17, %v849_v44  ;;  %1515 = vmatprep.subr.bf16.mxu0 %v1733_v31 }
  0xfe   : > { %v870_v0 = vsel %vm858_vm10, %v2238_v27, %v869_v1  ;;  %v861_v12 = vsel %vm858_vm10, %v2228_v3, %v860_v7  ;;  %v757_v13 = vpop.permute.xlu1 %756  ;;  %v747_v15 = vpop.permute.xlu0 %746  ;;  %1516 = vmatpush1.bf16.msra.mxu0 %v1732_v62 }
  0xff   : > { %v767_v24 = vrot.slane %v757_v13, 4  ;;  %v762_v56 = vrot.slane %v747_v15, 4  ;;  %v1794_v28 = vcombine.high %v861_v12, %v870_v0  ;;  %v1793_v63 = vcombine.low %v861_v12, %v870_v0  ;;  %1517 = vmatprep.subr.bf16.mxu0 %v1724_v20 }
 0x101   : > { %v784_v17 = vsel %vm243_vm1, %v766_v23, %v767_v24  ;;  %v786_v27 = vsel %vm769_vm2, %v757_v13, %v767_v24  ;;  %v775_v3 = vsel %vm243_vm1, %v761_v45, %v762_v56  ;;  %v777_v39 = vsel %vm769_vm2, %v747_v15, %v762_v56  ;;  %1492 = vmatprep.subr.bf16.mxu1 %v1794_v28 }
 0x102   : > { %v785_v55 = vsel %vm769_vm2, %v2258_v35, %v784_v17  ;;  %806 = vst.msk [vmem:[#allocation2 + $0x23c] sm:$0xf] %vm186_vm6, %v786_v27  ;;  %v776_v20 = vsel %vm769_vm2, %v2260_v22, %v775_v3  ;;  %801 = vst.msk [vmem:[#allocation2 + $0x218] sm:$0xf] %vm186_vm6, %v777_v39  ;;  %v2442_v23 = vpop.permute.xlu1 %843  ;;  %v2444_v49 = vpop.permute.xlu0 %833  ;;  %1493 = vmatpush2.bf16.msra.mxu1 %v1793_v63  ;;  %1518 = vmatpush1.bf16.msra.mxu0 %v1723_v21 }
 0x103   : > { %v855_v45 = vrot.slane %v2442_v23, 4  ;;  %v850_v35 = vrot.slane %v2444_v49, 4  ;;  %v1788_v2 = vcombine.low %v776_v20, %v785_v55  ;;  %v1789_v25 = vcombine.high %v776_v20, %v785_v55  ;;  %v2488_v63 = vld.sshfl [vmem:[%s2590_s1] sm:$0x33 pattern:$0x76325410] }
 0x105   : > { %v871_v22 = vsel %vm243_vm1, %v854_v14, %v855_v45  ;;  %v862_v34 = vsel %vm243_vm1, %v849_v44, %v850_v35  ;;  %1495 = vmatmul.mubr.bf16.vlgmr.msra.gmra.mxu1 %v1979_v8  ;;  %1544 = vmatprep.subr.bf16.mxu1 %v1789_v25 }
 0x106   : > { %v872_v18 = vsel %vm858_vm10, %v842_v40, %v871_v22  ;;  %v863_v19 = vsel %vm858_vm10, %v832_v32, %v862_v34  ;;  %v668_v21 = vpop.permute.xlu1 %667  ;;  %v658_v62 = vpop.permute.xlu0 %657  ;;  %1545 = vmatpush1.bf16.msra.mxu1 %v1788_v2  ;;  %1803 = vmatprep.mubr.msk.bf16.mxu1 %vm1417_vm0, %v1983_v9 }
 0x107   : > { %v678_v31 = vrot.slane %v668_v21, 4  ;;  %v673_v1 = vrot.slane %v658_v62, 4  ;;  %v1795_v14 = vcombine.low %v863_v19, %v872_v18  ;;  %v1796_v7 = vcombine.high %v863_v19, %v872_v18 }
 0x109   : > { %v695_v44 = vsel %vm243_vm1, %v677_v30, %v678_v31  ;;  %v697_v8 = vsel %vm680_vm3, %v668_v21, %v678_v31  ;;  %v686_v40 = vsel %vm243_vm1, %v672_v61, %v673_v1  ;;  %v688_v32 = vsel %vm680_vm3, %v658_v62, %v673_v1  ;;  %1533 = vmatprep.subr.bf16.mxu0 %v1796_v7 }
 0x10a   : > { %v696_v0 = vsel %vm680_vm3, %v2285_v26, %v695_v44  ;;  %717 = vst.msk [vmem:[#allocation2 + $0x1f4] sm:$0xf] %vm186_vm6, %v697_v8  ;;  %v687_v12 = vsel %vm680_vm3, %v2287_v38, %v686_v40  ;;  %712 = vst.msk [vmem:[#allocation2 + $0x1d0] sm:$0xf] %vm186_vm6, %v688_v32  ;;  %v581_v30 = vpop.permute.xlu1 %580  ;;  %v571_v13 = vpop.permute.xlu0 %570  ;;  %1534 = vmatpush2.bf16.msra.mxu0 %v1795_v14  ;;  %v1832_v26 = vld [vmem:[#allocation2 + $0x218] ss:$36 sps:$4 sm:$0xff]  }
 0x10b   : > { %v591_v15 = vrot.slane %v581_v30, 4  ;;  %628 = vst.msk [vmem:[#allocation2 + $0x1ac] sm:$0xf] %vm186_vm6, %v581_v30  ;;  %v586_v61 = vrot.slane %v571_v13, 4  ;;  %623 = vst.msk [vmem:[#allocation2 + $0x188] sm:$0xf] %vm186_vm6, %v571_v13  ;;  %v1779_v24 = vcombine.low %v687_v12, %v696_v0  ;;  %v1780_v56 = vcombine.high %v687_v12, %v696_v0  ;;  %1585 = vmatprep.subr.bf16.mxu0 %v1878_v41 }
 0x10d   : > { %v607_v38 = vsel %vm243_vm1, %v590_v43, %v591_v15  ;;  %v599_v28 = vsel %vm243_vm1, %v585_v37, %v586_v61  ;;  %1536 = vmatmul.mubr.bf16.vlgmr.msra.gmra.mxu0 %v2488_v63  ;;  %1546 = vmatprep.subr.bf16.mxu1 %v1780_v56 }
 0x10e   : > { %v608_v17 = vsel %vm593_vm4, %v2309_v5, %v607_v38  ;;  %v600_v27 = vsel %vm593_vm4, %v2311_v36, %v599_v28  ;;  %v494_v3 = vpop.permute.xlu1 %493  ;;  %v484_v43 = vpop.permute.xlu0 %483  ;;  %1547 = vmatpush1.bf16.msra.mxu1 %v1779_v24  ;;  %1586 = vmatpush1.bf16.msra.mxu0 %v1832_v26 }
 0x10f   : > { %v504_v39 = vrot.slane %v494_v3, 4  ;;  %541 = vst.msk [vmem:[#allocation2 + $0x164] sm:$0xf] %vm186_vm6, %v494_v3  ;;  %v499_v37 = vrot.slane %v484_v43, 4  ;;  %536 = vst.msk [vmem:[#allocation2 + $0x140] sm:$0xf] %vm186_vm6, %v484_v43  ;;  %v1770_v55 = vcombine.low %v600_v27, %v608_v17  ;;  %v1771_v20 = vcombine.high %v600_v27, %v608_v17  ;;  %1587 = vmatprep.subr.bf16.mxu0 %v1878_v41 }
 0x110   : > { %1804 = vmatprep.mubr.msk.bf16.mxu0 %vm1417_vm0, %v1983_v9 }
 0x111   : > { %v520_v5 = vsel %vm243_vm1, %v503_v59, %v504_v39  ;;  %v512_v36 = vsel %vm243_vm1, %v498_v16, %v499_v37  ;;  %1548 = vmatprep.subr.bf16.mxu1 %v1771_v20  ;;  %v1833_v2 = vld [vmem:[#allocation2 + $0x1d0] ss:$36 sps:$4 sm:$0xff]  }
 0x112   : > { %v521_v25 = vsel %vm506_vm5, %v2333_v57, %v520_v5  ;;  %v513_v22 = vsel %vm506_vm5, %v2335_v51, %v512_v36  ;;  %v407_v34 = vpop.permute.xlu1 %406  ;;  %v397_v18 = vpop.permute.xlu0 %396  ;;  %1549 = vmatpush1.bf16.msra.mxu1 %v1770_v55  ;;  %1588 = vmatpush1.bf16.msra.mxu0 %v1833_v2  ;;  %v1834_v21 = vld [vmem:[#allocation2 + $0x188] ss:$36 sps:$4 sm:$0xff]  }
 0x113   : > { %v417_v9 = vrot.slane %v407_v34, 4  ;;  %454 = vst.msk [vmem:[#allocation2 + $0x11c] sm:$0xf] %vm186_vm6, %v407_v34  ;;  %v412_v19 = vrot.slane %v397_v18, 4  ;;  %449 = vst.msk [vmem:[#allocation2 + $0xf8] sm:$0xf] %vm186_vm6, %v397_v18  ;;  %v1761_v59 = vcombine.low %v513_v22, %v521_v25  ;;  %v1762_v16 = vcombine.high %v513_v22, %v521_v25  ;;  %1589 = vmatprep.subr.bf16.mxu0 %v1878_v41 }
 0x115   : > { %v433_v57 = vsel %vm243_vm1, %v416_v33, %v417_v9  ;;  %v425_v51 = vsel %vm243_vm1, %v411_v47, %v412_v19  ;;  %1550 = vmatprep.subr.bf16.mxu1 %v1762_v16 }
 0x116   : > { %v434_v62 = vsel %vm419_vm7, %v2357_v10, %v433_v57  ;;  %v426_v31 = vsel %vm419_vm7, %v2359_v11, %v425_v51  ;;  %v320_v1 = vpop.permute.xlu1 %319  ;;  %v310_v14 = vpop.permute.xlu0 %309  ;;  %1551 = vmatpush1.bf16.msra.mxu1 %v1761_v59  ;;  %1590 = vmatpush1.bf16.msra.mxu0 %v1834_v21  ;;  %v1835_v8 = vld [vmem:[#allocation2 + $0x140] ss:$36 sps:$4 sm:$0xff]  }
 0x117   : > { %v330_v7 = vrot.slane %v320_v1, 4  ;;  %367 = vst.msk [vmem:[#allocation2 + $0xd4] sm:$0xf] %vm186_vm6, %v320_v1  ;;  %v325_v44 = vrot.slane %v310_v14, 4  ;;  %362 = vst.msk [vmem:[#allocation2 + $0xb0] sm:$0xf] %vm186_vm6, %v310_v14  ;;  %v1752_v33 = vcombine.low %v426_v31, %v434_v62  ;;  %v1753_v47 = vcombine.high %v426_v31, %v434_v62  ;;  %1591 = vmatprep.subr.bf16.mxu0 %v1878_v41 }
 0x119   : > { %v346_v10 = vsel %vm243_vm1, %v329_v6, %v330_v7  ;;  %v338_v11 = vsel %vm243_vm1, %v324_v29, %v325_v44  ;;  %1552 = vmatprep.subr.bf16.mxu1 %v1753_v47 }
 0x11a   : > { %v347_v40 = vsel %vm332_vm8, %v2381_v46, %v346_v10  ;;  %v339_v32 = vsel %vm332_vm8, %v2383_v54, %v338_v11  ;;  %v232_v0 = vpop.permute.xlu1 %231  ;;  %v222_v12 = vpop.permute.xlu0 %221  ;;  %1553 = vmatpush1.bf16.msra.mxu1 %v1752_v33  ;;  %1592 = vmatpush1.bf16.msra.mxu0 %v1835_v8  ;;  %v1836_v15 = vld [vmem:[#allocation2 + $0xf8] ss:$36 sps:$4 sm:$0xff]  }
 0x11b   : > { %v242_v30 = vrot.slane %v232_v0, 4  ;;  %280 = vst.msk [vmem:[#allocation2 + $0x8c] sm:$0xf] %vm186_vm6, %v232_v0  ;;  %v237_v13 = vrot.slane %v222_v12, 4  ;;  %275 = vst.msk [vmem:[#allocation2 + $0x68] sm:$0xf] %vm186_vm6, %v222_v12  ;;  %v1743_v6 = vcombine.low %v339_v32, %v347_v40  ;;  %v1744_v29 = vcombine.high %v339_v32, %v347_v40  ;;  %1593 = vmatprep.subr.bf16.mxu0 %v1878_v41 }
 0x11d   : > { %v259_v46 = vsel %vm243_vm1, %v241_v4, %v242_v30  ;;  %v251_v54 = vsel %vm243_vm1, %v236_v42, %v237_v13  ;;  %1554 = vmatprep.subr.bf16.mxu1 %v1744_v29 }
 0x11e   : > { %v260_v61 = vsel %vm245_vm9, %v2395_v48, %v259_v46  ;;  %v252_v24 = vsel %vm245_vm9, %v2397_v50, %v251_v54  ;;  %v846_v56 = vpop.permute.xlu1 %845  ;;  %v836_v26 = vpop.permute.xlu0 %835  ;;  %1555 = vmatpush1.bf16.msra.mxu1 %v1743_v6  ;;  %1594 = vmatpush1.bf16.msra.mxu0 %v1836_v15  ;;  %v1837_v3 = vld [vmem:[#allocation2 + $0xb0] ss:$36 sps:$4 sm:$0xff]  }
 0x11f   : > { %v856_v38 = vrot.slane %v846_v56, 4  ;;  %v851_v28 = vrot.slane %v836_v26, 4  ;;  %v1734_v17 = vcombine.low %v252_v24, %v260_v61  ;;  %v1735_v4 = vcombine.high %v252_v24, %v260_v61  ;;  %1595 = vmatprep.subr.bf16.mxu0 %v1878_v41 }
 0x121   : > { %v873_v42 = vsel %vm243_vm1, %v855_v45, %v856_v38  ;;  %v875_v27 = vsel %vm858_vm10, %v846_v56, %v856_v38  ;;  %v864_v48 = vsel %vm243_vm1, %v850_v35, %v851_v28  ;;  %v866_v50 = vsel %vm858_vm10, %v836_v26, %v851_v28  ;;  %1556 = vmatprep.subr.bf16.mxu1 %v1735_v4 }
 0x122   : > { %v874_v43 = vsel %vm858_vm10, %v2442_v23, %v873_v42  ;;  %895 = vst.msk [vmem:[#allocation2 + $0x284] sm:$0xf] %vm186_vm6, %v875_v27  ;;  %v865_v39 = vsel %vm858_vm10, %v2444_v49, %v864_v48  ;;  %890 = vst.msk [vmem:[#allocation2 + $0x260] sm:$0xf] %vm186_vm6, %v866_v50  ;;  %1557 = vmatpush1.bf16.msra.mxu1 %v1734_v17  ;;  %1596 = vmatpush1.bf16.msra.mxu0 %v1837_v3  ;;  %v1840_v45 = vld [vmem:[#allocation2 + $0x68] ss:$36 sps:$4 sm:$0xff]  }
 0x123   : > { %1558 = vmatprep.subr.bf16.mxu1 %v1726_v60  ;;  %1597 = vmatprep.subr.bf16.mxu0 %v1878_v41  ;;  %v1798_v35 = vcombine.high %v865_v39, %v874_v43  ;;  %v1841_v23 = vld [vmem:[#allocation2 + $0x20] ss:$36 sps:$4 sm:$0xff]   ;;  %v1797_v49 = vcombine.low %v865_v39, %v874_v43 }
 0x126   : > { %1559 = vmatpush1.bf16.msra.mxu1 %v1725_v58  ;;  %1598 = vmatpush1.bf16.msra.mxu0 %v1840_v45 }
 0x127   : > { %1574 = vmatprep.subr.bf16.mxu1 %v1798_v35  ;;  %1599 = vmatprep.subr.bf16.mxu0 %v1878_v41 }
 0x129   : > { %v1842_v60 = vld [vmem:[#allocation2 + $0x260] ss:$36 sps:$4 sm:$0xff]  }
 0x12a   : > { %1575 = vmatpush2.bf16.msra.mxu1 %v1797_v49  ;;  %1600 = vmatpush1.bf16.msra.mxu0 %v1841_v23 }
 0x12b   : > { %1615 = vmatprep.subr.bf16.mxu0 %v1878_v41  ;;  %v991_v37 = vpop.permute.xlu0 %990 }
 0x12d   : > { %1577 = vmatmul.mubr.bf16.vlgmr.msra.gmra.mxu1 %v2488_v63 }
 0x12e   : > { %1616 = vmatpush2.bf16.msra.mxu0 %v1842_v60 }
 0x131   : > { %1618 = vmatmul.mubr.bf16.vlgmr.msra.gmra.mxu0 %v2488_v63 }
 0x18d   : > { %v1455_v52 = vpop.f32.mrf.mxu0 }
 0x18e   : > { %v1456_v53 = vadd.f32 %v1455_v52, %v991_v37 }
 0x18f   : > { %v1457_v58 = vpop.f32.mrf.mxu0 }
 0x190   : > { %v1458_v55 = vadd.f32 %v1457_v58, %v991_v37  ;;  %1843 = vtanh.f32 %v1456_v53 }
 0x191   : > { %v1459_v20 = vpop.f32.mrf.mxu0 }
 0x192   : > { %1845 = vtanh.f32 %v1458_v55 }
 0x193   : > { %v1460_v5 = vpop.f32.mrf.mxu0 }
 0x19d   : > { %v1844_v36 = vpop.eup %1843 }
 0x19f   : > { %v1846_v2 = vpop.eup %1845 }
 0x1a0   : > { %v1642_v41 = vcombine.low %v1844_v36, %v1846_v2 }
 0x1a2   : > { %1650 = vst [vmem:[%s2579_s8] sm:$0x77] %v1642_v41 }
 0x1c5   : > { %v1496_v63 = vpop.f32.mrf.mxu1 }
 0x1c6   : > { %v1497_v25 = vadd.f32 %v1496_v63, %v991_v37 }
 0x1c7   : > { %v1498_v22 = vpop.f32.mrf.mxu1 }
 0x1c8   : > { %1847 = vtanh.f32 %v1497_v25  ;;  %v1499_v34 = vadd.f32 %v1498_v22, %v991_v37 }
 0x1c9   : > { %v1500_v18 = vpop.f32.mrf.mxu1 }
 0x1ca   : > { %1849 = vtanh.f32 %v1499_v34 }
 0x1cb   : > { %v1501_v9 = vpop.f32.mrf.mxu1 }
 0x1cd   : > { %v1537_v19 = vpop.f32.mrf.mxu0 }
 0x1ce   : > { %v1538_v59 = vadd.f32 %v1537_v19, %v991_v37 }
 0x1cf   : > { %v1539_v16 = vpop.f32.mrf.mxu0 }
 0x1d0   : > { %1851 = vtanh.f32 %v1538_v59  ;;  %v1540_v57 = vadd.f32 %v1539_v16, %v991_v37 }
 0x1d1   : > { %v1541_v51 = vpop.f32.mrf.mxu0 }
 0x1d2   : > { %1853 = vtanh.f32 %v1540_v57 }
 0x1d3   : > { %v1542_v21 = vpop.f32.mrf.mxu0 }
 0x1d5   : > { %v1848_v62 = vpop.eup %1847 }
 0x1d7   : > { %v1850_v31 = vpop.eup %1849 }
 0x1d8   : > { %v1643_v1 = vcombine.low %v1848_v62, %v1850_v31 }
 0x1da   : > { %1651 = vst [vmem:[%s2579_s8 + $0x8] sm:$0x77] %v1643_v1 }
 0x1dd   : > { %v1852_v14 = vpop.eup %1851 }
 0x1df   : > { %v1854_v7 = vpop.eup %1853 }
 0x1e0   : > { %v1644_v44 = vcombine.low %v1852_v14, %v1854_v7 }
 0x1e2   : > { %1652 = vst [vmem:[%s2579_s8 + $0x10] sm:$0x77] %v1644_v44 }
 0x1ed   : > { %v1578_v33 = vpop.f32.mrf.mxu1 }
 0x1ee   : > { %v1579_v47 = vadd.f32 %v1578_v33, %v991_v37 }
 0x1ef   : > { %v1580_v10 = vpop.f32.mrf.mxu1 }
 0x1f0   : > { %1855 = vtanh.f32 %v1579_v47  ;;  %v1581_v11 = vadd.f32 %v1580_v10, %v991_v37 }
 0x1f1   : > { %v1582_v8 = vpop.f32.mrf.mxu1  ;;  %v1619_v40 = vpop.f32.mrf.mxu0 }
 0x1f2   : > { %1857 = vtanh.f32 %v1581_v11  ;;  %v1620_v32 = vadd.f32 %v1619_v40, %v991_v37 }
 0x1f3   : > { %v1583_v0 = vpop.f32.mrf.mxu1  ;;  %v1621_v12 = vpop.f32.mrf.mxu0 }
 0x1f4   : > { %1859 = vtanh.f32 %v1620_v32 }
 0x1f5   : > { %v1622_v30 = vpop.f32.mrf.mxu0 }
 0x1f7   : > { %v1623_v13 = vpop.f32.mrf.mxu0 }
 0x1fd   : > { %v1856_v6 = vpop.eup %1855 }
 0x1ff   : > { %v1858_v29 = vpop.eup %1857 }
 0x200   : > { %v1645_v46 = vcombine.low %v1856_v6, %v1858_v29 }
 0x201   : > { %v1860_v54 = vpop.eup %1859 }
 0x202   : > { %1653 = vst [vmem:[%s2579_s8 + $0x18] sm:$0x77] %v1645_v46  ;;  %1655 = vst.msk [vmem:[%s2579_s8 + $0x20] sm:$0x7] %vm1654_vm11, %v1860_v54 }
 0x203 PF: > { %s13_s12 = sadd.s32 1, %s1868_s12  }
 0x204   : > { %p10_p4 = scmp.ge.s32.totalorder %s13_s12, 4  }
 0x206   :  { %12 = sbr.rel (!%p10_p4) target bundleno = 1 (0x1), region = 62 }

// kernel: loss_forward.35
= control target key start
LH: loop header
LB: loop body
LE: loop exit
PB: predicated region body
PF: predicated region fallthrough
CT: control target
= control target key end

     0   :  { %13 = vsyncpa [#allocation4], 0  ;;  %v398_v3 = vmov 0.0   ;;  %s701_s0 = inlined_call_operand.vmem [shape: f32[48,128], index: 0, kind: input, shape index: {}]   ;;  %s702_s1 = inlined_call_operand.vmem [shape: f32[48,128], index: 1, kind: input, shape index: {}]   ;;  %s703_s2 = inlined_call_operand.vmem [shape: f32[256,128], index: 2, kind: input, shape index: {}]   ;;  %s704_s3 = inlined_call_operand.vmem [shape: f32[256,128], index: 3, kind: input, shape index: {}]   ;;  %s705_s4 = inlined_call_operand.vmem [shape: f32[2,1], index: 4, kind: input, shape index: {}]   ;;  %s706_s5 = inlined_call_operand.vmem [shape: f32[2,1], index: 5, kind: input, shape index: {}]   ;;  %s707_s6 = inlined_call_operand.hbm [shape: f32[1,1], index: 6, kind: output, shape index: {0}]   ;;  %s708_s7 = inlined_call_operand.hbm [shape: f32[1,1], index: 7, kind: output, shape index: {1}]  }
   0x1   :  { %v444_v0 = vld [vmem:[%s705_s4] sm:$0x3]  ;;  %31 = vst [vmem:[#allocation2] sm:$0x3] %v398_v3  ;;  %v33_v6 = vld [vmem:[%s701_s0 + $0x8] sm:$0xff]  ;;  %v34_v7 = vld [vmem:[%s701_s0 + $0x10] sm:$0xff] }
   0x2   :  { %v449_v1 = vld [vmem:[%s706_s5] sm:$0x3]  ;;  %v244_v2 = vand.u32 2147483647, %v444_v0  ;;  %v35_v8 = vld [vmem:[%s701_s0 + $0x18] sm:$0xff]  ;;  %v39_v13 = vld [vmem:[%s702_s1 + $0x8] sm:$0xff] }
   0x3   :  { %v32_v4 = vld [vmem:[%s701_s0] sm:$0xff]  ;;  %v274_v5 = vand.u32 2147483647, %v449_v1  ;;  %v40_v14 = vld [vmem:[%s702_s1 + $0x10] sm:$0xff]  ;;  %v41_v15 = vld [vmem:[%s702_s1 + $0x18] sm:$0xff]  ;;  %v45_v19 = vsub.f32 %v33_v6, %v39_v13 }
   0x4   :  { %v245_v9 = vsub.f32 0.0, %v244_v2  ;;  %v36_v10 = vld [vmem:[%s701_s0 + $0x20] sm:$0xff]  ;;  %v46_v20 = vsub.f32 %v34_v7, %v40_v14  ;;  %v47_v21 = vsub.f32 %v35_v8, %v41_v15  ;;  %v37_v23 = vld [vmem:[%s701_s0 + $0x28] sm:$0xff] }
   0x5   :  { %v38_v11 = vld [vmem:[%s702_s1] sm:$0xff]  ;;  %v275_v12 = vsub.f32 0.0, %v274_v5  ;;  %v43_v24 = vld [vmem:[%s702_s1 + $0x28] sm:$0xff]  ;;  %v148_v27 = vmul.f32 %v45_v19, %v45_v19 }
   0x6   :  { %v44_v16 = vsub.f32 %v32_v4, %v38_v11  ;;  %v246_v17 = vmul.f32 1.442695, %v245_v9  ;;  %v42_v18 = vld [vmem:[%s702_s1 + $0x20] sm:$0xff]  ;;  %v149_v28 = vmul.f32 %v46_v20, %v46_v20  ;;  %v49_v29 = vsub.f32 %v37_v23, %v43_v24 }
   0x7   :  { %v276_v22 = vmul.f32 1.442695, %v275_v12  ;;  %v48_v26 = vsub.f32 %v36_v10, %v42_v18  ;;  %v150_v30 = vmul.f32 %v47_v21, %v47_v21  ;;  %v50_v50 = vld [vmem:[%s703_s2] sm:$0xff] }
   0x8   :  { %v147_v25 = vmul.f32 %v44_v16, %v44_v16  ;;  %370 = vpow2.f32 %v246_v17  ;;  %v152_v34 = vmul.f32 %v49_v29, %v49_v29  ;;  %v146_v49 = vld [vmem:[#allocation2] sm:$0x1] }
   0x9   :  { %372 = vpow2.f32 %v276_v22  ;;  %v151_v32 = vmul.f32 %v48_v26, %v48_v26 }
   0xa   :  { %v153_v31 = vadd.f32 %v148_v27, %v147_v25 }
   0xc   :  { %v154_v33 = vadd.f32 %v153_v31, %v149_v28 }
   0xe   :  { %v155_v35 = vadd.f32 %v154_v33, %v150_v30 }
  0x10   :  { %v156_v36 = vadd.f32 %v155_v35, %v151_v32 }
  0x12   :  { %v157_v37 = vadd.f32 %v156_v36, %v152_v34 }
  0x14   :  { %v158_v38 = vrot.slane %v157_v37, 4 }
  0x15   :  { %v371_v39 = vpop.eup %370 }
  0x16   :  { %v373_v40 = vpop.eup %372  ;;  %v248_v41 = vadd.f32 1.0, %v371_v39  ;;  %v159_v42 = vadd.f32 %v158_v38, %v157_v37  ;;  %v251_v46 = vmul.f32 -0.5, %v371_v39 }
  0x17   :  { %v278_v43 = vadd.f32 1.0, %v373_v40  ;;  %v281_v48 = vmul.f32 -0.5, %v373_v40 }
  0x18   :  { %374 = vlog2.f32 %v248_v41  ;;  %v160_v44 = vrot.slane %v159_v42, 2 }
  0x19   :  { %376 = vlog2.f32 %v278_v43 }
  0x1a   :  { %v161_v45 = vadd.f32 %v160_v44, %v159_v42 }
  0x1c   :  { %v162_v47 = vrot.slane %v161_v45, 1 }
  0x1d   :  { %14 = vsyncpa [#allocation6], 0  ;;  %v51_v52 = vld [vmem:[%s703_s2 + $0x8] sm:$0xff]  ;;  %v82_v53 = vld [vmem:[%s704_s3] sm:$0xff]  ;;  %v242_v55 = vmax.f32 %v444_v0, 0.0  ;;  %v252_v56 = vadd.f32 1.0, %v251_v46 }
  0x1e   :  { %v163_v51 = vadd.f32 %v162_v47, %v161_v45  ;;  %v83_v54 = vld [vmem:[%s704_s3 + $0x8] sm:$0xff]  ;;  %v52_v58 = vld [vmem:[%s703_s2 + $0x10] sm:$0xff]  ;;  %v254_v60 = vand.u32 2147483647, %v371_v39  ;;  %v282_v61 = vadd.f32 1.0, %v281_v48  ;;  %v53_v62 = vld [vmem:[%s703_s2 + $0x18] sm:$0xff]  ;;  %v114_v2 = vsub.f32 %v50_v50, %v82_v53 }
  0x1f   :  { %v84_v59 = vld [vmem:[%s704_s3 + $0x10] sm:$0xff]  ;;  %v85_v63 = vld [vmem:[%s704_s3 + $0x18] sm:$0xff]  ;;  %v115_v3 = vsub.f32 %v51_v52, %v83_v54  ;;  %v271_v4 = vmax.f32 %v449_v1, 0.0  ;;  %v272_v5 = vmul.f32 0.0, %v449_v1  ;;  %v284_v6 = vand.u32 2147483647, %v373_v40 }
  0x20   :  { %v164_v57 = vadd.f32 %v163_v51, %v146_v49  ;;  %v116_v7 = vsub.f32 %v52_v58, %v84_v59  ;;  %v243_v8 = vsub.f32 %v242_v55, %v444_v0  ;;  %v253_v9 = vmul.f32 %v371_v39, %v252_v56  ;;  %v54_v10 = vld [vmem:[%s703_s2 + $0x20] sm:$0xff]  ;;  %v55_v0 = vld [vmem:[%s703_s2 + $0x28] sm:$0xff]  ;;  %v56_v25 = vld [vmem:[%s703_s2 + $0x30] sm:$0xff]  ;;  %s399_s24 = smov [#allocation5]   ;;  %s400_s9 = smov [#allocation3]  }
  0x21   :  { %v86_v11 = vld [vmem:[%s704_s3 + $0x20] sm:$0xff]  ;;  %v117_v12 = vsub.f32 %v53_v62, %v85_v63  ;;  %vm523_vm0 = vcmp.lt.f32.partialorder %v254_v60, 0.0004427343  ;;  %v283_v1 = vmul.f32 %v373_v40, %v282_v61  ;;  %v87_v15 = vld [vmem:[%s704_s3 + $0x28] sm:$0xff]  ;;  %v167_v16 = vmul.f32 %v114_v2, %v114_v2  ;;  %v88_v26 = vld [vmem:[%s704_s3 + $0x30] sm:$0xff] }
  0x22   :  { %165 = vst [vmem:[#allocation2] sm:$0x1] %v164_v57  ;;  %v168_v17 = vmul.f32 %v115_v3, %v115_v3  ;;  %v273_v20 = vsub.f32 %v271_v4, %v272_v5  ;;  %vm285_vm1 = vcmp.lt.f32.partialorder %v284_v6, 0.0004427343  ;;  %vm300_vm2 = vcmask 1040384   ;;  %v57_v35 = vld [vmem:[%s703_s2 + $0x38] sm:$0xff] }
  0x23   :  { %v118_v22 = vsub.f32 %v54_v10, %v86_v11  ;;  %v169_v23 = vmul.f32 %v116_v7, %v116_v7  ;;  %vm258_vm3 = vcmask 1024   ;;  %v119_v27 = vsub.f32 %v55_v0, %v87_v15  ;;  %v89_v36 = vld [vmem:[%s704_s3 + $0x38] sm:$0xff]  ;;  %v58_v41 = vld [vmem:[%s703_s2 + $0x40] sm:$0xff]  ;;  %v59_v47 = vld [vmem:[%s703_s2 + $0x48] sm:$0xff] }
  0x24   :  { %v170_v31 = vmul.f32 %v117_v12, %v117_v12  ;;  %v199_v32 = vadd.f32 %v168_v17, %v167_v16  ;;  %v120_v38 = vsub.f32 %v56_v25, %v88_v26  ;;  %v90_v42 = vld [vmem:[%s704_s3 + $0x40] sm:$0xff]  ;;  %v121_v44 = vsub.f32 %v57_v35, %v89_v36  ;;  %v91_v48 = vld [vmem:[%s704_s3 + $0x48] sm:$0xff]  ;;  %v60_v52 = vld [vmem:[%s703_s2 + $0x50] sm:$0xff] }
  0x25   :  { %v375_v13 = vpop.eup %374  ;;  %v171_v39 = vmul.f32 %v118_v22, %v118_v22  ;;  %v172_v45 = vmul.f32 %v119_v27, %v119_v27  ;;  %v122_v49 = vsub.f32 %v58_v41, %v90_v42  ;;  %v92_v53 = vld [vmem:[%s704_s3 + $0x50] sm:$0xff]  ;;  %v123_v54 = vsub.f32 %v59_v47, %v91_v48  ;;  %v61_v57 = vld [vmem:[%s703_s2 + $0x58] sm:$0xff]  ;;  %v62_v62 = vld [vmem:[%s703_s2 + $0x60] sm:$0xff] }
  0x26   :  { %v377_v18 = vpop.eup %376  ;;  %v250_v19 = vmul.f32 0.6931472, %v375_v13  ;;  %v200_v40 = vadd.f32 %v199_v32, %v169_v23  ;;  %v173_v50 = vmul.f32 %v120_v38, %v120_v38  ;;  %v174_v55 = vmul.f32 %v121_v44, %v121_v44  ;;  %v93_v58 = vld [vmem:[%s704_s3 + $0x58] sm:$0xff]  ;;  %v94_v63 = vld [vmem:[%s704_s3 + $0x60] sm:$0xff]  ;;  %v63_v5 = vld [vmem:[%s703_s2 + $0x68] sm:$0xff] }
  0x27   :  { %v280_v21 = vmul.f32 0.6931472, %v377_v18  ;;  %v124_v59 = vsub.f32 %v60_v52, %v92_v53  ;;  %v175_v60 = vmul.f32 %v122_v49, %v122_v49  ;;  %v125_v2 = vsub.f32 %v61_v57, %v93_v58  ;;  %v95_v6 = vld [vmem:[%s704_s3 + $0x68] sm:$0xff]  ;;  %v64_v10 = vld [vmem:[%s703_s2 + $0x70] sm:$0xff]  ;;  %v97_v0 = vld [vmem:[%s704_s3 + $0x78] sm:$0xff] }
  0x28   :  { %v256_v24 = vsel %vm523_vm0, %v253_v9, %v250_v19  ;;  %v201_v46 = vadd.f32 %v200_v40, %v170_v31  ;;  %v176_v3 = vmul.f32 %v123_v54, %v123_v54  ;;  %v126_v7 = vsub.f32 %v62_v62, %v94_v63  ;;  %v96_v11 = vld [vmem:[%s704_s3 + $0x70] sm:$0xff]  ;;  %v66_v18 = vld [vmem:[%s703_s2 + $0x80] sm:$0xff]  ;;  %v67_v23 = vld [vmem:[%s703_s2 + $0x88] sm:$0xff] }
  0x29   :  { %v257_v28 = vadd.f32 %v256_v24, %v243_v8  ;;  %v286_v29 = vsel %vm285_vm1, %v283_v1, %v280_v21  ;;  %v299_v30 = vld [vmem:[#allocation2] sm:$0x1]  ;;  %v177_v8 = vmul.f32 %v124_v59, %v124_v59  ;;  %v127_v12 = vsub.f32 %v63_v5, %v95_v6  ;;  %v65_v1 = vld [vmem:[%s703_s2 + $0x78] sm:$0xff]  ;;  %v99_v24 = vld [vmem:[%s704_s3 + $0x88] sm:$0xff] }
  0x2a   :  { %v287_v33 = vadd.f32 %v286_v29, %v273_v20  ;;  %v301_v34 = vsel %vm300_vm2, %v299_v30, 0.0  ;;  %v202_v51 = vadd.f32 %v201_v46, %v171_v39  ;;  %v178_v13 = vmul.f32 %v125_v2, %v125_v2  ;;  %v98_v19 = vld [vmem:[%s704_s3 + $0x80] sm:$0xff]  ;;  %v100_v29 = vld [vmem:[%s704_s3 + $0x90] sm:$0xff]  ;;  %v103_v44 = vld [vmem:[%s704_s3 + $0xa8] sm:$0xff] }
  0x2b   :  { %v259_v37 = vsel %vm258_vm3, %v257_v28, 0.0  ;;  %302 = vadd.xlane.f32.xlu1 %v301_v34  ;;  %v128_v15 = vsub.f32 %v64_v10, %v96_v11  ;;  %v179_v16 = vmul.f32 %v126_v7, %v126_v7  ;;  %v129_v20 = vsub.f32 %v65_v1, %v97_v0  ;;  %v68_v28 = vld [vmem:[%s703_s2 + $0x90] sm:$0xff]  ;;  %v101_v34 = vld [vmem:[%s704_s3 + $0x98] sm:$0xff]  ;;  %v70_v38 = vld [vmem:[%s703_s2 + $0xa0] sm:$0xff] }
  0x2c   :  { %260 = vadd.xlane.f32.xlu0 %v259_v37  ;;  %v288_v43 = vsel %vm258_vm3, %v287_v33, 0.0  ;;  %v203_v56 = vadd.f32 %v202_v51, %v172_v45  ;;  %v180_v21 = vmul.f32 %v127_v12, %v127_v12  ;;  %v130_v25 = vsub.f32 %v66_v18, %v98_v19  ;;  %v69_v33 = vld [vmem:[%s703_s2 + $0x98] sm:$0xff]  ;;  %v102_v39 = vld [vmem:[%s704_s3 + $0xa0] sm:$0xff]  ;;  %v72_v48 = vld [vmem:[%s703_s2 + $0xb0] sm:$0xff] }
  0x2d   :  { %v181_v26 = vmul.f32 %v128_v15, %v128_v15  ;;  %v131_v30 = vsub.f32 %v67_v23, %v99_v24  ;;  %v182_v31 = vmul.f32 %v129_v20, %v129_v20  ;;  %v132_v35 = vsub.f32 %v68_v28, %v100_v29  ;;  %v104_v49 = vld [vmem:[%s704_s3 + $0xb0] sm:$0xff]  ;;  %v73_v53 = vld [vmem:[%s703_s2 + $0xb8] sm:$0xff]  ;;  %v74_v58 = vld [vmem:[%s703_s2 + $0xc0] sm:$0xff] }
  0x2e   :  { %v204_v61 = vadd.f32 %v203_v56, %v173_v50  ;;  %v183_v36 = vmul.f32 %v130_v25, %v130_v25  ;;  %v133_v40 = vsub.f32 %v69_v33, %v101_v34  ;;  %v134_v45 = vsub.f32 %v70_v38, %v102_v39  ;;  %v105_v54 = vld [vmem:[%s704_s3 + $0xb8] sm:$0xff]  ;;  %v106_v59 = vld [vmem:[%s704_s3 + $0xc0] sm:$0xff]  ;;  %v75_v63 = vld [vmem:[%s703_s2 + $0xc8] sm:$0xff] }
  0x2f   :  { %v184_v41 = vmul.f32 %v131_v30, %v131_v30  ;;  %v185_v46 = vmul.f32 %v132_v35, %v132_v35  ;;  %v107_v2 = vld [vmem:[%s704_s3 + $0xc8] sm:$0xff]  ;;  %v76_v6 = vld [vmem:[%s703_s2 + $0xd0] sm:$0xff]  ;;  %v77_v11 = vld [vmem:[%s703_s2 + $0xd8] sm:$0xff] }
  0x30   :  { %289 = vadd.xlane.f32.xlu0 %v288_v43  ;;  %v205_v4 = vadd.f32 %v204_v61, %v174_v55  ;;  %v71_v43 = vld [vmem:[%s703_s2 + $0xa8] sm:$0xff]  ;;  %v186_v51 = vmul.f32 %v133_v40, %v133_v40  ;;  %v136_v55 = vsub.f32 %v72_v48, %v104_v49  ;;  %v187_v56 = vmul.f32 %v134_v45, %v134_v45  ;;  %v108_v7 = vld [vmem:[%s704_s3 + $0xd0] sm:$0xff]  ;;  %v109_v12 = vld [vmem:[%s704_s3 + $0xd8] sm:$0xff] }
  0x31   :  { %v135_v50 = vsub.f32 %v71_v43, %v103_v44  ;;  %v78_v0 = vld [vmem:[%s703_s2 + $0xe0] sm:$0xff]  ;;  %v79_v19 = vld [vmem:[%s703_s2 + $0xe8] sm:$0xff]  ;;  %v80_v24 = vld [vmem:[%s703_s2 + $0xf0] sm:$0xff] }
  0x32   :  { %v206_v9 = vadd.f32 %v205_v4, %v175_v60  ;;  %v137_v60 = vsub.f32 %v73_v53, %v105_v54  ;;  %v189_v4 = vmul.f32 %v136_v55, %v136_v55  ;;  %v110_v15 = vld [vmem:[%s704_s3 + $0xe0] sm:$0xff]  ;;  %v111_v20 = vld [vmem:[%s704_s3 + $0xe8] sm:$0xff]  ;;  %v112_v25 = vld [vmem:[%s704_s3 + $0xf0] sm:$0xff] }
  0x33   :  { %v188_v61 = vmul.f32 %v135_v50, %v135_v50  ;;  %v81_v29 = vld [vmem:[%s703_s2 + $0xf8] sm:$0xff]  ;;  %v166_v48 = vld [vmem:[#allocation2 + $0x1] sm:$0x1] }
  0x34   :  { %v207_v14 = vadd.f32 %v206_v9, %v176_v3  ;;  %v138_v3 = vsub.f32 %v74_v58, %v106_v59  ;;  %v190_v9 = vmul.f32 %v137_v60, %v137_v60  ;;  %v113_v30 = vld [vmem:[%s704_s3 + $0xf8] sm:$0xff] }
  0x35   :  { %v145_v34 = vsub.f32 %v81_v29, %v113_v30 }
  0x36   :  { %v208_v17 = vadd.f32 %v207_v14, %v177_v8  ;;  %v139_v8 = vsub.f32 %v75_v63, %v107_v2  ;;  %v191_v14 = vmul.f32 %v138_v3, %v138_v3 }
  0x37   :  { %v198_v39 = vmul.f32 %v145_v34, %v145_v34 }
  0x38   :  { %v209_v22 = vadd.f32 %v208_v17, %v178_v13  ;;  %v140_v13 = vsub.f32 %v76_v6, %v108_v7  ;;  %v192_v17 = vmul.f32 %v139_v8, %v139_v8 }
  0x3a   :  { %v210_v27 = vadd.f32 %v209_v22, %v179_v16  ;;  %v141_v16 = vsub.f32 %v77_v11, %v109_v12  ;;  %v193_v22 = vmul.f32 %v140_v13, %v140_v13 }
  0x3c   :  { %v211_v32 = vadd.f32 %v210_v27, %v180_v21  ;;  %v142_v21 = vsub.f32 %v78_v0, %v110_v15  ;;  %v194_v27 = vmul.f32 %v141_v16, %v141_v16 }
  0x3e   :  { %v212_v37 = vadd.f32 %v211_v32, %v181_v26  ;;  %v143_v26 = vsub.f32 %v79_v19, %v111_v20  ;;  %v195_v32 = vmul.f32 %v142_v21, %v142_v21 }
  0x40   :  { %v213_v42 = vadd.f32 %v212_v37, %v182_v31  ;;  %v144_v31 = vsub.f32 %v80_v24, %v112_v25  ;;  %v196_v35 = vmul.f32 %v143_v26, %v143_v26 }
  0x42   :  { %v214_v47 = vadd.f32 %v213_v42, %v183_v36  ;;  %v197_v37 = vmul.f32 %v144_v31, %v144_v31 }
  0x44   :  { %v215_v52 = vadd.f32 %v214_v47, %v184_v41 }
  0x46   :  { %v216_v57 = vadd.f32 %v215_v52, %v185_v46 }
  0x48   :  { %v217_v62 = vadd.f32 %v216_v57, %v186_v51 }
  0x4a   :  { %v218_v5 = vadd.f32 %v217_v62, %v187_v56 }
  0x4c   :  { %v219_v10 = vadd.f32 %v218_v5, %v188_v61 }
  0x4e   :  { %v220_v1 = vadd.f32 %v219_v10, %v189_v4 }
  0x50   :  { %v221_v18 = vadd.f32 %v220_v1, %v190_v9 }
  0x52   :  { %v222_v23 = vadd.f32 %v221_v18, %v191_v14 }
  0x54   :  { %v223_v28 = vadd.f32 %v222_v23, %v192_v17 }
  0x56   :  { %v224_v33 = vadd.f32 %v223_v28, %v193_v22 }
  0x58   :  { %v225_v36 = vadd.f32 %v224_v33, %v194_v27 }
  0x5a   :  { %v226_v38 = vadd.f32 %v225_v36, %v195_v32 }
  0x5c   :  { %v227_v40 = vadd.f32 %v226_v38, %v196_v35 }
  0x5e   :  { %v228_v41 = vadd.f32 %v227_v40, %v197_v37 }
  0x60   :  { %v229_v42 = vadd.f32 %v228_v41, %v198_v39 }
  0x62   :  { %v230_v43 = vrot.slane %v229_v42, 4 }
  0x64   :  { %v231_v44 = vadd.f32 %v230_v43, %v229_v42 }
  0x66   :  { %v232_v45 = vrot.slane %v231_v44, 2 }
  0x68   :  { %v233_v46 = vadd.f32 %v232_v45, %v231_v44 }
  0x6a   :  { %v234_v47 = vrot.slane %v233_v46, 1 }
  0x6c   :  { %v235_v49 = vadd.f32 %v234_v47, %v233_v46 }
  0x6e   :  { %v236_v50 = vadd.f32 %v235_v49, %v166_v48 }
  0x70   :  { %237 = vst [vmem:[#allocation2 + $0x1] sm:$0x1] %v236_v50 }
  0x77   :  { %v312_v51 = vld [vmem:[#allocation2 + $0x1] sm:$0x1] }
  0x78   :  { %v313_v52 = vsel %vm300_vm2, %v312_v51, 0.0 }
  0x79   :  { %314 = vadd.xlane.f32.xlu1 %v313_v52 }
  0xb4   :  { %v303_v53 = vpop.xlane.xlu1 %302 }
  0xb5   :  { %v261_v54 = vpop.xlane.xlu0 %260  ;;  %v304_v55 = vrot.slane %v303_v53, 4 }
  0xb6   :  { %v262_v56 = vrot.slane %v261_v54, 4 }
  0xb7   :  { %v305_v57 = vadd.f32 %v304_v55, %v303_v53 }
  0xb8   :  { %v263_v58 = vadd.f32 %v262_v56, %v261_v54 }
  0xb9   :  { %v290_v59 = vpop.xlane.xlu0 %289  ;;  %v306_v60 = vrot.slane %v305_v57, 2 }
  0xba   :  { %v264_v61 = vrot.slane %v263_v58, 2  ;;  %v291_v62 = vrot.slane %v290_v59, 4 }
  0xbb   :  { %v307_v63 = vadd.f32 %v306_v60, %v305_v57 }
  0xbc   :  { %v292_v2 = vadd.f32 %v291_v62, %v290_v59  ;;  %v265_v3 = vadd.f32 %v264_v61, %v263_v58 }
  0xbd   :  { %v308_v6 = vrot.slane %v307_v63, 1 }
  0xbe   :  { %v293_v4 = vrot.slane %v292_v2, 2  ;;  %v266_v5 = vrot.slane %v265_v3, 1 }
  0xbf   :  { %v309_v10 = vadd.f32 %v308_v6, %v307_v63 }
  0xc0   :  { %v294_v7 = vadd.f32 %v293_v4, %v292_v2  ;;  %v267_v8 = vadd.f32 %v266_v5, %v265_v3 }
  0xc2   :  { %359 = vpush %v267_v8  ;;  %v295_v9 = vrot.slane %v294_v7, 1 }
  0xc4   :  { %v296_v11 = vadd.f32 %v295_v9, %v294_v7 }
  0xc6   :  { %361 = vpush %v296_v11 }
  0xc7   :  { %363 = vpush %v309_v10 }
  0xf3   :  { %s360_s2 = spop %359 }
  0xf4   :  { %s269_s3 = smul.f32 0.5, %s360_s2 }
  0xf6   :  { %s324_s28 = smul.f32 0.001, %s269_s3 }
  0xf7   :  { %s362_s20 = spop %361 }
  0xf8   :  { %s298_s21 = smul.f32 0.5, %s362_s20  ;;  %s364_s0 = spop %363 }
  0xf9   :  { %s311_s30 = smul.f32 0.00016276042, %s364_s0 }
  0xfa   :  { %s330_s22 = sadd.f32 %s298_s21, %s269_s3 }
  0xfc   :  { %s331_s23 = smul.f32 0.5, %s330_s22 }
  0xfe   :  { %333 = sst [smem:[#allocation5]] %s331_s23 }
  0xff   :  { %349 = dma.smem_to_hbm %s399_s24, 16, %s708_s7, [#allocation6]  }
 0x102   :  { %v315_v12 = vpop.xlane.xlu1 %314 }
 0x103   :  { %v316_v13 = vrot.slane %v315_v12, 4 }
 0x105   :  { %v317_v14 = vadd.f32 %v316_v13, %v315_v12 }
 0x107   :  { %v318_v1 = vrot.slane %v317_v14, 2 }
 0x109   :  { %v319_v0 = vadd.f32 %v318_v1, %v317_v14 }
 0x10b   :  { %v320_v15 = vrot.slane %v319_v0, 1 }
 0x10d   :  { %v321_v16 = vadd.f32 %v320_v15, %v319_v0 }
 0x10f   :  { %365 = vpush %v321_v16 }
 0x140   :  { %s366_s1 = spop %365 }
 0x141   :  { %s323_s27 = smul.f32 3.0517578e-05, %s366_s1 }
 0x143   :  { %s325_s29 = smul.f32 0.006, %s323_s27 }
 0x145   :  { %s326_s8 = sadd.f32 %s325_s29, %s324_s28 }
 0x147   :  { %s327_s4 = sadd.f32 %s326_s8, %s311_s30 }
 0x149   :  { %329 = sst [smem:[#allocation3]] %s327_s4 }
 0x14a   :  { %341 = dma.smem_to_hbm %s400_s9, 16, %s707_s6, [#allocation4]  }
 0x14b   :  { %394 = dma.done.wait [#allocation4], 16  }
 0x14c   :  { %395 = vsyncadd [#allocation4], 4294967280 }
 0x14d   :  { %396 = dma.done.wait [#allocation6], 16  }
 0x14e   :  { %397 = vsyncadd [#allocation6], 4294967280 }
 0x14f   :  { %356 = sfence }
 0x150   :  { %357 = vsyncpa [#allocation4], 1 }
 0x151   :  { %358 = vsyncpa [#allocation6], 1 }

</bundles_post_ra>
